<compile_context>
chip_gen: v7x
topology: tpu7x:2x2x1
jax: 0.10.0
libtpu: 0.0.40
codegen_flags: <defaults>
</compile_context>

<pallas_src>
from functools import partial

import numpy as np
import jax
import jax.numpy as jnp
from jax import lax
from jax.experimental import pallas as pl
from jax.experimental.pallas import tpu as pltpu


# ----------------------------------------------------------------------------
# Fused kernel: upsample -> [x ++ skip] -> conv3x3+BN+ReLU -> conv3x3+BN+ReLU
# ----------------------------------------------------------------------------
def _decoder_block_kernel(*refs, has_skip):
    if has_skip:
        (x_ref, skip_ref, r_ref, ce_ref, w1_ref, b1_ref, w2_ref, b2_ref,
         o_ref, cat_pad, h1_pad, slab1, slab2) = refs
    else:
        (x_ref, r_ref, ce_ref, w1_ref, b1_ref, w2_ref, b2_ref,
         o_ref, cat_pad, h1_pad, slab1, slab2) = refs
        skip_ref = None

    f32 = jnp.float32
    Ccat, Hp, Wp = cat_pad.shape          # channel-major padded conv1 input
    H, W = Hp - 2, Wp - 2
    C1out = h1_pad.shape[0]               # conv1 out channels == conv2 in
    Cin, h, w = x_ref.shape

    # ---- stage 0a: zero only the 1-pixel halo ring of the padded scratches.
    # The interiors are fully overwritten below, so this is correct on every
    # grid step (and under megacore sharding) without a full-buffer memset.
    for buf, c in ((cat_pad, Ccat), (h1_pad, C1out)):
        buf[:, 0:1, :] = jnp.zeros((c, 1, Wp), f32)
        buf[:, Hp - 1:Hp, :] = jnp.zeros((c, 1, Wp), f32)
        buf[:, :, 0:1] = jnp.zeros((c, Hp, 1), f32)
        buf[:, :, Wp - 1:Wp] = jnp.zeros((c, Hp, 1), f32)

    # ---- stage 0b: nearest upsample of x, done on the MXU with static one-hot
    # operators (no HBM materialisation of the 4x tensor, no gathers), written
    # straight into the channel-major padded "virtual concat" buffer.
    xv = x_ref[...].astype(f32)                               # (Cin, h, w)
    xc = jnp.dot(xv.reshape(Cin * h, w), ce_ref[...],
                 preferred_element_type=f32)                  # (Cin*h, W)
    xc = xc.reshape(Cin, h, W)
    r_b = jnp.broadcast_to(r_ref[...].reshape(1, H, h), (Cin, H, h))
    # batched matmul (batch = channel): x_up[c] = R @ xc[c]
    x_up = lax.dot_general(r_b, xc, (((2,), (1,)), ((0,), (0,))),
                           preferred_element_type=f32)        # (Cin, H, W)
    cat_pad[0:Cin, 1:H + 1, 1:W + 1] = x_up
    if has_skip:
        cat_pad[Cin:Ccat, 1:H + 1, 1:W + 1] = skip_ref[...].astype(f32)

    # ---- stage 1: conv1 (3x3, pad 1) + folded BN + ReLU as ONE im2col matmul.
    for t in range(9):
        dy, dx = t // 3, t % 3
        slab1[t * Ccat:(t + 1) * Ccat, :, :] = cat_pad[:, dy:dy + H, dx:dx + W]
    y1 = jnp.dot(w1_ref[...], slab1[...].reshape(9 * Ccat, H * W),
                 preferred_element_type=f32)                  # (C1out, H*W)
    y1 = jnp.maximum(y1 + b1_ref[...], 0.0)
    # conv1 activation never leaves VMEM: re-padded channel-major for conv2.
    h1_pad[:, 1:H + 1, 1:W + 1] = y1.reshape(C1out, H, W)

    # ---- stage 2: conv2 (3x3, pad 1) + folded BN + ReLU as ONE im2col matmul.
    for t in range(9):
        dy, dx = t // 3, t % 3
        slab2[t * C1out:(t + 1) * C1out, :, :] = h1_pad[:, dy:dy + H, dx:dx + W]
    y2 = jnp.dot(w2_ref[...], slab2[...].reshape(9 * C1out, H * W),
                 preferred_element_type=f32)                  # (Cout, H*W)
    y2 = jnp.maximum(y2 + b2_ref[...], 0.0)
    o_ref[...] = y2.astype(o_ref.dtype)                       # lane-dense store


def _fused_decoder_block(x, skip, r_mat, ce_mat, w1m, b1, w2m, b2, H, W):
    """x: (N, Cin, h, w) NCHW; skip: (N, Cskip, H, W) NCHW or None.
    r_mat: (H, h), ce_mat: (w, W) one-hot nearest-upsample operators.
    w1m: (C1out, 9*Ccat), w2m: (Cout, 9*C1out) im2col weights (BN scale folded),
    b1/b2: (C, 1) BN shifts.  Returns channel-major (N, Cout, H*W) float32."""
    N, Cin, h, w = x.shape
    has_skip = skip is not None
    Cskip = skip.shape[1] if has_skip else 0
    Ccat = Cin + Cskip
    C1out = w1m.shape[0]
    Cout = w2m.shape[0]

    kernel = partial(_decoder_block_kernel, has_skip=has_skip)

    in_specs = [pl.BlockSpec((pl.Squeezed(), Cin, h, w), lambda n: (n, 0, 0, 0))]
    inputs = [x]
    if has_skip:
        in_specs.append(pl.BlockSpec((pl.Squeezed(), Cskip, H, W),
                                     lambda n: (n, 0, 0, 0)))
        inputs.append(skip)
    in_specs += [
        pl.BlockSpec((H, h), lambda n: (0, 0)),               # row one-hot
        pl.BlockSpec((w, W), lambda n: (0, 0)),               # col one-hot
        pl.BlockSpec((C1out, 9 * Ccat), lambda n: (0, 0)),    # conv1 im2col W
        pl.BlockSpec((C1out, 1), lambda n: (0, 0)),           # BN1 shift
        pl.BlockSpec((Cout, 9 * C1out), lambda n: (0, 0)),    # conv2 im2col W
        pl.BlockSpec((Cout, 1), lambda n: (0, 0)),            # BN2 shift
    ]
    inputs += [r_mat, ce_mat, w1m, b1, w2m, b2]

    return pl.pallas_call(
        kernel,
        out_shape=jax.ShapeDtypeStruct((N, Cout, H * W), jnp.float32),
        grid_spec=pltpu.PrefetchScalarGridSpec(
            num_scalar_prefetch=0,
            grid=(N,),
            in_specs=in_specs,
            out_specs=pl.BlockSpec((pl.Squeezed(), Cout, H * W),
                                   lambda n: (n, 0, 0)),
            scratch_shapes=[
                pltpu.VMEM((Ccat, H + 2, W + 2), jnp.float32),   # padded concat
                pltpu.VMEM((C1out, H + 2, W + 2), jnp.float32),  # padded conv1 out
                pltpu.VMEM((9 * Ccat, H, W), jnp.float32),       # conv1 im2col slab
                pltpu.VMEM((9 * C1out, H, W), jnp.float32),      # conv2 im2col slab
            ],
        ),
        # TODO(synk): batch is a parallel grid axis (feeds both v7x TCs); on
        # single-TC v5e/v6e fold the batch into one step at these tiny sizes.
        compiler_params=pltpu.CompilerParams(
            dimension_semantics=("parallel",)),
    )(*inputs)


# ----------------------------------------------------------------------------
# Parameter folding + DecoderBlock forward (PyTorch-compatible NCHW interface)
# ----------------------------------------------------------------------------
def _fold_bn_to_im2col(w_hwio, gamma, beta, mean, var, eps=1e-5):
    """Fold BatchNorm(eval) scale into HWIO conv weights and lay them out as a
    (Cout, 9*Cin) im2col matrix (column k = tap*Cin + cin); returns the weight
    matrix and the (Cout, 1) BN shift."""
    scale = gamma / jnp.sqrt(var + eps)
    w = (w_hwio * scale[None, None, None, :]).astype(jnp.float32)
    kh, kw, ci, co = w_hwio.shape
    w_mat = jnp.transpose(w.reshape(kh * kw, ci, co),
                          (2, 0, 1)).reshape(co, kh * kw * ci)
    shift = (beta - mean * scale).astype(jnp.float32).reshape(co, 1)
    return w_mat, shift


def decoder_block_forward(x_nchw, skip_nchw, params, eps=1e-5):
    """x: (N, Cin, h, w); skip: (N, Cskip, H, W) or None; returns (N, Cout, H, W)."""
    N, Cin, h, w = x_nchw.shape
    if skip_nchw is not None:
        H, W = skip_nchw.shape[2], skip_nchw.shape[3]
    else:
        H, W = 2 * h, 2 * w   # F.interpolate(scale_factor=2, mode='nearest')

    # Static one-hot nearest-upsample operators
    # (F.interpolate(mode='nearest', size): src = floor(dst * in/out)).
    rows = (np.arange(H) * h) // H
    cols = (np.arange(W) * w) // W
    r_mat = jnp.asarray((rows[:, None] == np.arange(h)[None, :]).astype(np.float32))
    ce_mat = jnp.asarray((np.arange(w)[:, None] == cols[None, :]).astype(np.float32))

    w1m, b1 = _fold_bn_to_im2col(params["w1"], params["gamma1"], params["beta1"],
                                 params["mean1"], params["var1"], eps)
    w2m, b2 = _fold_bn_to_im2col(params["w2"], params["gamma2"], params["beta2"],
                                 params["mean2"], params["var2"], eps)
    Cout = w2m.shape[0]

    out = _fused_decoder_block(x_nchw, skip_nchw, r_mat, ce_mat,
                               w1m, b1, w2m, b2, H, W)
    # Kernel output is already channel-major (N, Cout, H*W); reshape is free.
    return out.reshape(N, Cout, H, W)


# ----------------------------------------------------------------------------
# Pure-JAX reference for verification
# ----------------------------------------------------------------------------
def _ref_conv_bn_relu_nchw(x, w_hwio, gamma, beta, mean, var, eps=1e-5):
    w_oihw = jnp.transpose(w_hwio, (3, 2, 0, 1))
    y = lax.conv_general_dilated(x, w_oihw, window_strides=(1, 1),
                                 padding=((1, 1), (1, 1)),
                                 dimension_numbers=("NCHW", "OIHW", "NCHW"))
    scale = (gamma / jnp.sqrt(var + eps)).reshape(1, -1, 1, 1)
    shift = (beta - mean * gamma / jnp.sqrt(var + eps)).reshape(1, -1, 1, 1)
    return jnp.maximum(y * scale + shift, 0.0)


def _ref_decoder_block(x, skip, params):
    H, W = skip.shape[2], skip.shape[3]
    h, w = x.shape[2], x.shape[3]
    rows = (jnp.arange(H) * h) // H
    cols = (jnp.arange(W) * w) // W
    x_up = x[:, :, rows, :][:, :, :, cols]
    xc = jnp.concatenate([x_up, skip], axis=1)
    xc = _ref_conv_bn_relu_nchw(xc, params["w1"], params["gamma1"],
                                params["beta1"], params["mean1"], params["var1"])
    xc = _ref_conv_bn_relu_nchw(xc, params["w2"], params["gamma2"],
                                params["beta2"], params["mean2"], params["var2"])
    return xc


# ----------------------------------------------------------------------------
if __name__ == "__main__":
    key = jax.random.PRNGKey(0)
    ks = jax.random.split(key, 12)

    # Small shapes consistent with the module:
    #   in_channels=4, skip_channels=8, out_channels=8
    N, Cin, Cskip, Cout = 2, 4, 8, 8
    h_lo, w_lo = 8, 8          # low-res decoder input
    H, W = 16, 16              # skip (and output) spatial size
    Ccat = Cin + Cskip         # 12

    x = jax.random.normal(ks[0], (N, Cin, h_lo, w_lo), jnp.float32)
    skip = jax.random.normal(ks[1], (N, Cskip, H, W), jnp.float32)

    params = dict(
        # conv1: (Ccat -> Cout), weights in HWIO
        w1=0.1 * jax.random.normal(ks[2], (3, 3, Ccat, Cout), jnp.float32),
        gamma1=1.0 + 0.1 * jax.random.normal(ks[3], (Cout,), jnp.float32),
        beta1=0.1 * jax.random.normal(ks[4], (Cout,), jnp.float32),
        mean1=0.1 * jax.random.normal(ks[5], (Cout,), jnp.float32),
        var1=1.0 + 0.1 * jnp.abs(jax.random.normal(ks[6], (Cout,), jnp.float32)),
        # conv2: (Cout -> Cout)
        w2=0.1 * jax.random.normal(ks[7], (3, 3, Cout, Cout), jnp.float32),
        gamma2=1.0 + 0.1 * jax.random.normal(ks[8], (Cout,), jnp.float32),
        beta2=0.1 * jax.random.normal(ks[9], (Cout,), jnp.float32),
        mean2=0.1 * jax.random.normal(ks[10], (Cout,), jnp.float32),
        var2=1.0 + 0.1 * jnp.abs(jax.random.normal(ks[11], (Cout,), jnp.float32)),
    )

    fwd = jax.jit(decoder_block_forward)
    out = jax.block_until_ready(fwd(x, skip, params))

    ref = jax.block_until_ready(_ref_decoder_block(x, skip, params))
    assert out.shape == (N, Cout, H, W), out.shape
    max_err = float(jnp.max(jnp.abs(out - ref)))
    assert jnp.allclose(out, ref, atol=1e-4, rtol=1e-4), max_err

    print("KERNEL_OK")
</pallas_src>

<mosaic_0001>
module attributes {stable_mosaic.version = 11 : i64} {
  func.func @_decoder_block_kernel(%arg0: i32, %arg1: memref<1x4x8x8xf32, #tpu.memory_space<vmem>>, %arg2: memref<1x8x16x16xf32, #tpu.memory_space<vmem>>, %arg3: memref<16x8xf32, #tpu.memory_space<vmem>>, %arg4: memref<8x16xf32, #tpu.memory_space<vmem>>, %arg5: memref<8x108xf32, #tpu.memory_space<vmem>>, %arg6: memref<8x1xf32, #tpu.memory_space<vmem>>, %arg7: memref<8x72xf32, #tpu.memory_space<vmem>>, %arg8: memref<8x1xf32, #tpu.memory_space<vmem>>, %arg9: memref<1x8x256xf32, #tpu.memory_space<vmem>>, %arg10: memref<12x18x18xf32, #tpu.memory_space<vmem>>, %arg11: memref<8x18x18xf32, #tpu.memory_space<vmem>>, %arg12: memref<108x16x16xf32, #tpu.memory_space<vmem>>, %arg13: memref<72x16x16xf32, #tpu.memory_space<vmem>>) attributes {dimension_semantics = [#tpu.dimension_semantics<parallel>], iteration_bounds = array<i64: 2>, scalar_prefetch = 0 : i64, scratch_operands = 4 : i64, tpu.core_type = #tpu.core_type<tc>, window_params = [{transform_indices = @transform_0, window_bounds = array<i64: 1, 4, 8, 8>}, {transform_indices = @transform_1, window_bounds = array<i64: 1, 8, 16, 16>}, {pipeline_mode = #tpu.pipeline_mode<synchronous>, transform_indices = @transform_2, window_bounds = array<i64: 16, 8>}, {pipeline_mode = #tpu.pipeline_mode<synchronous>, transform_indices = @transform_3, window_bounds = array<i64: 8, 16>}, {pipeline_mode = #tpu.pipeline_mode<synchronous>, transform_indices = @transform_4, window_bounds = array<i64: 8, 108>}, {pipeline_mode = #tpu.pipeline_mode<synchronous>, transform_indices = @transform_5, window_bounds = array<i64: 8, 1>}, {pipeline_mode = #tpu.pipeline_mode<synchronous>, transform_indices = @transform_6, window_bounds = array<i64: 8, 72>}, {pipeline_mode = #tpu.pipeline_mode<synchronous>, transform_indices = @transform_7, window_bounds = array<i64: 8, 1>}, {transform_indices = @transform_8, window_bounds = array<i64: 1, 8, 256>}]} {
    %cst = arith.constant 0.000000e+00 : f32
    %0 = vector.broadcast %cst : f32 to vector<12x1x18xf32>
    %c0 = arith.constant 0 : index
    %c0_0 = arith.constant 0 : index
    %c0_1 = arith.constant 0 : index
    %1 = vector.load %arg10[%c0, %c0_0, %c0_1] : memref<12x18x18xf32, #tpu.memory_space<vmem>>, vector<12x1x18xf32>
    tpu.vector_store %arg10[%c0, %c0_0, %c0_1], %0 {strides = array<i32>} : memref<12x18x18xf32, #tpu.memory_space<vmem>>, vector<12x1x18xf32>,
    %cst_2 = arith.constant 0.000000e+00 : f32
    %2 = vector.broadcast %cst_2 : f32 to vector<12x1x18xf32>
    %c0_3 = arith.constant 0 : index
    %c17 = arith.constant 17 : index
    %c0_4 = arith.constant 0 : index
    %3 = vector.load %arg10[%c0_3, %c17, %c0_4] : memref<12x18x18xf32, #tpu.memory_space<vmem>>, vector<12x1x18xf32>
    tpu.vector_store %arg10[%c0_3, %c17, %c0_4], %2 {strides = array<i32>} : memref<12x18x18xf32, #tpu.memory_space<vmem>>, vector<12x1x18xf32>,
    %cst_5 = arith.constant 0.000000e+00 : f32
    %4 = vector.broadcast %cst_5 : f32 to vector<12x18x1xf32>
    %c0_6 = arith.constant 0 : index
    %c0_7 = arith.constant 0 : index
    %c0_8 = arith.constant 0 : index
    %5 = vector.load %arg10[%c0_6, %c0_7, %c0_8] : memref<12x18x18xf32, #tpu.memory_space<vmem>>, vector<12x18x1xf32>
    tpu.vector_store %arg10[%c0_6, %c0_7, %c0_8], %4 {strides = array<i32>} : memref<12x18x18xf32, #tpu.memory_space<vmem>>, vector<12x18x1xf32>,
    %cst_9 = arith.constant 0.000000e+00 : f32
    %6 = vector.broadcast %cst_9 : f32 to vector<12x18x1xf32>
    %c0_10 = arith.constant 0 : index
    %c0_11 = arith.constant 0 : index
    %c17_12 = arith.constant 17 : index
    %7 = vector.load %arg10[%c0_10, %c0_11, %c17_12] : memref<12x18x18xf32, #tpu.memory_space<vmem>>, vector<12x18x1xf32>
    tpu.vector_store %arg10[%c0_10, %c0_11, %c17_12], %6 {strides = array<i32>} : memref<12x18x18xf32, #tpu.memory_space<vmem>>, vector<12x18x1xf32>,
    %cst_13 = arith.constant 0.000000e+00 : f32
    %8 = vector.broadcast %cst_13 : f32 to vector<8x1x18xf32>
    %c0_14 = arith.constant 0 : index
    %c0_15 = arith.constant 0 : index
    %c0_16 = arith.constant 0 : index
    %9 = vector.load %arg11[%c0_14, %c0_15, %c0_16] : memref<8x18x18xf32, #tpu.memory_space<vmem>>, vector<8x1x18xf32>
    tpu.vector_store %arg11[%c0_14, %c0_15, %c0_16], %8 {strides = array<i32>} : memref<8x18x18xf32, #tpu.memory_space<vmem>>, vector<8x1x18xf32>,
    %cst_17 = arith.constant 0.000000e+00 : f32
    %10 = vector.broadcast %cst_17 : f32 to vector<8x1x18xf32>
    %c0_18 = arith.constant 0 : index
    %c17_19 = arith.constant 17 : index
    %c0_20 = arith.constant 0 : index
    %11 = vector.load %arg11[%c0_18, %c17_19, %c0_20] : memref<8x18x18xf32, #tpu.memory_space<vmem>>, vector<8x1x18xf32>
    tpu.vector_store %arg11[%c0_18, %c17_19, %c0_20], %10 {strides = array<i32>} : memref<8x18x18xf32, #tpu.memory_space<vmem>>, vector<8x1x18xf32>,
    %cst_21 = arith.constant 0.000000e+00 : f32
    %12 = vector.broadcast %cst_21 : f32 to vector<8x18x1xf32>
    %c0_22 = arith.constant 0 : index
    %c0_23 = arith.constant 0 : index
    %c0_24 = arith.constant 0 : index
    %13 = vector.load %arg11[%c0_22, %c0_23, %c0_24] : memref<8x18x18xf32, #tpu.memory_space<vmem>>, vector<8x18x1xf32>
    tpu.vector_store %arg11[%c0_22, %c0_23, %c0_24], %12 {strides = array<i32>} : memref<8x18x18xf32, #tpu.memory_space<vmem>>, vector<8x18x1xf32>,
    %cst_25 = arith.constant 0.000000e+00 : f32
    %14 = vector.broadcast %cst_25 : f32 to vector<8x18x1xf32>
    %c0_26 = arith.constant 0 : index
    %c0_27 = arith.constant 0 : index
    %c17_28 = arith.constant 17 : index
    %15 = vector.load %arg11[%c0_26, %c0_27, %c17_28] : memref<8x18x18xf32, #tpu.memory_space<vmem>>, vector<8x18x1xf32>
    tpu.vector_store %arg11[%c0_26, %c0_27, %c17_28], %14 {strides = array<i32>} : memref<8x18x18xf32, #tpu.memory_space<vmem>>, vector<8x18x1xf32>,
    %c0_29 = arith.constant 0 : index
    %c0_30 = arith.constant 0 : index
    %c0_31 = arith.constant 0 : index
    %c0_32 = arith.constant 0 : index
    %16 = vector.load %arg1[%c0_29, %c0_30, %c0_31, %c0_32] : memref<1x4x8x8xf32, #tpu.memory_space<vmem>>, vector<1x4x8x8xf32>
    %17 = vector.shape_cast %16 : vector<1x4x8x8xf32> to vector<4x8x8xf32>
    %18 = vector.shape_cast %17 : vector<4x8x8xf32> to vector<32x8xf32>
    %c0_33 = arith.constant 0 : index
    %c0_34 = arith.constant 0 : index
    %19 = vector.load %arg4[%c0_33, %c0_34] : memref<8x16xf32, #tpu.memory_space<vmem>>, vector<8x16xf32>
    %cst_35 = arith.constant dense<0.000000e+00> : vector<32x16xf32>
    %20 = tpu.matmul %18, %19, %cst_35 {dimension_numbers = #tpu.dot_dimension_numbers<[1], [0], [0], [1], [0, 0, 1, 1], [], []>} : vector<32x8xf32>, vector<8x16xf32>, vector<32x16xf32> -> vector<32x16xf32>
    %21 = vector.shape_cast %20 : vector<32x16xf32> to vector<4x8x16xf32>
    %c0_36 = arith.constant 0 : index
    %c0_37 = arith.constant 0 : index
    %22 = vector.load %arg3[%c0_36, %c0_37] : memref<16x8xf32, #tpu.memory_space<vmem>>, vector<16x8xf32>
    %23 = vector.shape_cast %22 : vector<16x8xf32> to vector<1x16x8xf32>
    %24 = vector.shape_cast %23 : vector<1x16x8xf32> to vector<1x16x8xf32>
    %25 = vector.broadcast %24 : vector<1x16x8xf32> to vector<4x16x8xf32>
    %cst_38 = arith.constant dense<0.000000e+00> : vector<4x16x16xf32>
    %26 = tpu.matmul %25, %21, %cst_38 {dimension_numbers = #tpu.dot_dimension_numbers<[2], [1], [1], [2], [0, 0, 0, 1, 1, 2], [0], [0]>} : vector<4x16x8xf32>, vector<4x8x16xf32>, vector<4x16x16xf32> -> vector<4x16x16xf32>
    %c0_39 = arith.constant 0 : index
    %c1 = arith.constant 1 : index
    %c1_40 = arith.constant 1 : index
    %27 = vector.load %arg10[%c0_39, %c1, %c1_40] : memref<12x18x18xf32, #tpu.memory_space<vmem>>, vector<4x16x16xf32>
    tpu.vector_store %arg10[%c0_39, %c1, %c1_40], %26 {strides = array<i32>} : memref<12x18x18xf32, #tpu.memory_space<vmem>>, vector<4x16x16xf32>,
    %c0_41 = arith.constant 0 : index
    %c0_42 = arith.constant 0 : index
    %c0_43 = arith.constant 0 : index
    %c0_44 = arith.constant 0 : index
    %28 = vector.load %arg2[%c0_41, %c0_42, %c0_43, %c0_44] : memref<1x8x16x16xf32, #tpu.memory_space<vmem>>, vector<1x8x16x16xf32>
    %29 = vector.shape_cast %28 : vector<1x8x16x16xf32> to vector<8x16x16xf32>
    %c4 = arith.constant 4 : index
    %c1_45 = arith.constant 1 : index
    %c1_46 = arith.constant 1 : index
    %30 = vector.load %arg10[%c4, %c1_45, %c1_46] : memref<12x18x18xf32, #tpu.memory_space<vmem>>, vector<8x16x16xf32>
    tpu.vector_store %arg10[%c4, %c1_45, %c1_46], %29 {strides = array<i32>} : memref<12x18x18xf32, #tpu.memory_space<vmem>>, vector<8x16x16xf32>,
    %c0_47 = arith.constant 0 : index
    %c0_48 = arith.constant 0 : index
    %c0_49 = arith.constant 0 : index
    %31 = vector.load %arg10[%c0_47, %c0_48, %c0_49] : memref<12x18x18xf32, #tpu.memory_space<vmem>>, vector<12x16x16xf32>
    %c0_50 = arith.constant 0 : index
    %c0_51 = arith.constant 0 : index
    %c0_52 = arith.constant 0 : index
    %32 = vector.load %arg12[%c0_50, %c0_51, %c0_52] : memref<108x16x16xf32, #tpu.memory_space<vmem>>, vector<12x16x16xf32>
    tpu.vector_store %arg12[%c0_50, %c0_51, %c0_52], %31 {strides = array<i32>} : memref<108x16x16xf32, #tpu.memory_space<vmem>>, vector<12x16x16xf32>,
    %c0_53 = arith.constant 0 : index
    %c0_54 = arith.constant 0 : index
    %c1_55 = arith.constant 1 : index
    %33 = vector.load %arg10[%c0_53, %c0_54, %c1_55] : memref<12x18x18xf32, #tpu.memory_space<vmem>>, vector<12x16x16xf32>
    %c12 = arith.constant 12 : index
    %c0_56 = arith.constant 0 : index
    %c0_57 = arith.constant 0 : index
    %34 = vector.load %arg12[%c12, %c0_56, %c0_57] : memref<108x16x16xf32, #tpu.memory_space<vmem>>, vector<12x16x16xf32>
    tpu.vector_store %arg12[%c12, %c0_56, %c0_57], %33 {strides = array<i32>} : memref<108x16x16xf32, #tpu.memory_space<vmem>>, vector<12x16x16xf32>,
    %c0_58 = arith.constant 0 : index
    %c0_59 = arith.constant 0 : index
    %c2 = arith.constant 2 : index
    %35 = vector.load %arg10[%c0_58, %c0_59, %c2] : memref<12x18x18xf32, #tpu.memory_space<vmem>>, vector<12x16x16xf32>
    %c24 = arith.constant 24 : index
    %c0_60 = arith.constant 0 : index
    %c0_61 = arith.constant 0 : index
    %36 = vector.load %arg12[%c24, %c0_60, %c0_61] : memref<108x16x16xf32, #tpu.memory_space<vmem>>, vector<12x16x16xf32>
    tpu.vector_store %arg12[%c24, %c0_60, %c0_61], %35 {strides = array<i32>} : memref<108x16x16xf32, #tpu.memory_space<vmem>>, vector<12x16x16xf32>,
    %c0_62 = arith.constant 0 : index
    %c1_63 = arith.constant 1 : index
    %c0_64 = arith.constant 0 : index
    %37 = vector.load %arg10[%c0_62, %c1_63, %c0_64] : memref<12x18x18xf32, #tpu.memory_space<vmem>>, vector<12x16x16xf32>
    %c36 = arith.constant 36 : index
    %c0_65 = arith.constant 0 : index
    %c0_66 = arith.constant 0 : index
    %38 = vector.load %arg12[%c36, %c0_65, %c0_66] : memref<108x16x16xf32, #tpu.memory_space<vmem>>, vector<12x16x16xf32>
    tpu.vector_store %arg12[%c36, %c0_65, %c0_66], %37 {strides = array<i32>} : memref<108x16x16xf32, #tpu.memory_space<vmem>>, vector<12x16x16xf32>,
    %c0_67 = arith.constant 0 : index
    %c1_68 = arith.constant 1 : index
    %c1_69 = arith.constant 1 : index
    %39 = vector.load %arg10[%c0_67, %c1_68, %c1_69] : memref<12x18x18xf32, #tpu.memory_space<vmem>>, vector<12x16x16xf32>
    %c48 = arith.constant 48 : index
    %c0_70 = arith.constant 0 : index
    %c0_71 = arith.constant 0 : index
    %40 = vector.load %arg12[%c48, %c0_70, %c0_71] : memref<108x16x16xf32, #tpu.memory_space<vmem>>, vector<12x16x16xf32>
    tpu.vector_store %arg12[%c48, %c0_70, %c0_71], %39 {strides = array<i32>} : memref<108x16x16xf32, #tpu.memory_space<vmem>>, vector<12x16x16xf32>,
    %c0_72 = arith.constant 0 : index
    %c1_73 = arith.constant 1 : index
    %c2_74 = arith.constant 2 : index
    %41 = vector.load %arg10[%c0_72, %c1_73, %c2_74] : memref<12x18x18xf32, #tpu.memory_space<vmem>>, vector<12x16x16xf32>
    %c60 = arith.constant 60 : index
    %c0_75 = arith.constant 0 : index
    %c0_76 = arith.constant 0 : index
    %42 = vector.load %arg12[%c60, %c0_75, %c0_76] : memref<108x16x16xf32, #tpu.memory_space<vmem>>, vector<12x16x16xf32>
    tpu.vector_store %arg12[%c60, %c0_75, %c0_76], %41 {strides = array<i32>} : memref<108x16x16xf32, #tpu.memory_space<vmem>>, vector<12x16x16xf32>,
    %c0_77 = arith.constant 0 : index
    %c2_78 = arith.constant 2 : index
    %c0_79 = arith.constant 0 : index
    %43 = vector.load %arg10[%c0_77, %c2_78, %c0_79] : memref<12x18x18xf32, #tpu.memory_space<vmem>>, vector<12x16x16xf32>
    %c72 = arith.constant 72 : index
    %c0_80 = arith.constant 0 : index
    %c0_81 = arith.constant 0 : index
    %44 = vector.load %arg12[%c72, %c0_80, %c0_81] : memref<108x16x16xf32, #tpu.memory_space<vmem>>, vector<12x16x16xf32>
    tpu.vector_store %arg12[%c72, %c0_80, %c0_81], %43 {strides = array<i32>} : memref<108x16x16xf32, #tpu.memory_space<vmem>>, vector<12x16x16xf32>,
    %c0_82 = arith.constant 0 : index
    %c2_83 = arith.constant 2 : index
    %c1_84 = arith.constant 1 : index
    %45 = vector.load %arg10[%c0_82, %c2_83, %c1_84] : memref<12x18x18xf32, #tpu.memory_space<vmem>>, vector<12x16x16xf32>
    %c84 = arith.constant 84 : index
    %c0_85 = arith.constant 0 : index
    %c0_86 = arith.constant 0 : index
    %46 = vector.load %arg12[%c84, %c0_85, %c0_86] : memref<108x16x16xf32, #tpu.memory_space<vmem>>, vector<12x16x16xf32>
    tpu.vector_store %arg12[%c84, %c0_85, %c0_86], %45 {strides = array<i32>} : memref<108x16x16xf32, #tpu.memory_space<vmem>>, vector<12x16x16xf32>,
    %c0_87 = arith.constant 0 : index
    %c2_88 = arith.constant 2 : index
    %c2_89 = arith.constant 2 : index
    %47 = vector.load %arg10[%c0_87, %c2_88, %c2_89] : memref<12x18x18xf32, #tpu.memory_space<vmem>>, vector<12x16x16xf32>
    %c96 = arith.constant 96 : index
    %c0_90 = arith.constant 0 : index
    %c0_91 = arith.constant 0 : index
    %48 = vector.load %arg12[%c96, %c0_90, %c0_91] : memref<108x16x16xf32, #tpu.memory_space<vmem>>, vector<12x16x16xf32>
    tpu.vector_store %arg12[%c96, %c0_90, %c0_91], %47 {strides = array<i32>} : memref<108x16x16xf32, #tpu.memory_space<vmem>>, vector<12x16x16xf32>,
    %c0_92 = arith.constant 0 : index
    %c0_93 = arith.constant 0 : index
    %49 = vector.load %arg5[%c0_92, %c0_93] : memref<8x108xf32, #tpu.memory_space<vmem>>, vector<8x108xf32>
    %c0_94 = arith.constant 0 : index
    %c0_95 = arith.constant 0 : index
    %c0_96 = arith.constant 0 : index
    %50 = vector.load %arg12[%c0_94, %c0_95, %c0_96] : memref<108x16x16xf32, #tpu.memory_space<vmem>>, vector<108x16x16xf32>
    %51 = vector.shape_cast %50 : vector<108x16x16xf32> to vector<108x256xf32>
    %cst_97 = arith.constant dense<0.000000e+00> : vector<8x256xf32>
    %52 = tpu.matmul %49, %51, %cst_97 {dimension_numbers = #tpu.dot_dimension_numbers<[1], [0], [0], [1], [0, 0, 1, 1], [], []>} : vector<8x108xf32>, vector<108x256xf32>, vector<8x256xf32> -> vector<8x256xf32>
    %c0_98 = arith.constant 0 : index
    %c0_99 = arith.constant 0 : index
    %53 = vector.load %arg6[%c0_98, %c0_99] : memref<8x1xf32, #tpu.memory_space<vmem>>, vector<8x1xf32>
    %54 = vector.broadcast %53 : vector<8x1xf32> to vector<8x256xf32>
    %55 = arith.addf %52, %54 : vector<8x256xf32>
    %cst_100 = arith.constant 0.000000e+00 : f32
    %56 = vector.broadcast %cst_100 : f32 to vector<8x256xf32>
    %57 = arith.maximumf %55, %56 : vector<8x256xf32>
    %58 = vector.shape_cast %57 : vector<8x256xf32> to vector<8x16x16xf32>
    %c0_101 = arith.constant 0 : index
    %c1_102 = arith.constant 1 : index
    %c1_103 = arith.constant 1 : index
    %59 = vector.load %arg11[%c0_101, %c1_102, %c1_103] : memref<8x18x18xf32, #tpu.memory_space<vmem>>, vector<8x16x16xf32>
    tpu.vector_store %arg11[%c0_101, %c1_102, %c1_103], %58 {strides = array<i32>} : memref<8x18x18xf32, #tpu.memory_space<vmem>>, vector<8x16x16xf32>,
    %c0_104 = arith.constant 0 : index
    %c0_105 = arith.constant 0 : index
    %c0_106 = arith.constant 0 : index
    %60 = vector.load %arg11[%c0_104, %c0_105, %c0_106] : memref<8x18x18xf32, #tpu.memory_space<vmem>>, vector<8x16x16xf32>
    %c0_107 = arith.constant 0 : index
    %c0_108 = arith.constant 0 : index
    %c0_109 = arith.constant 0 : index
    %61 = vector.load %arg13[%c0_107, %c0_108, %c0_109] : memref<72x16x16xf32, #tpu.memory_space<vmem>>, vector<8x16x16xf32>
    tpu.vector_store %arg13[%c0_107, %c0_108, %c0_109], %60 {strides = array<i32>} : memref<72x16x16xf32, #tpu.memory_space<vmem>>, vector<8x16x16xf32>,
    %c0_110 = arith.constant 0 : index
    %c0_111 = arith.constant 0 : index
    %c1_112 = arith.constant 1 : index
    %62 = vector.load %arg11[%c0_110, %c0_111, %c1_112] : memref<8x18x18xf32, #tpu.memory_space<vmem>>, vector<8x16x16xf32>
    %c8 = arith.constant 8 : index
    %c0_113 = arith.constant 0 : index
    %c0_114 = arith.constant 0 : index
    %63 = vector.load %arg13[%c8, %c0_113, %c0_114] : memref<72x16x16xf32, #tpu.memory_space<vmem>>, vector<8x16x16xf32>
    tpu.vector_store %arg13[%c8, %c0_113, %c0_114], %62 {strides = array<i32>} : memref<72x16x16xf32, #tpu.memory_space<vmem>>, vector<8x16x16xf32>,
    %c0_115 = arith.constant 0 : index
    %c0_116 = arith.constant 0 : index
    %c2_117 = arith.constant 2 : index
    %64 = vector.load %arg11[%c0_115, %c0_116, %c2_117] : memref<8x18x18xf32, #tpu.memory_space<vmem>>, vector<8x16x16xf32>
    %c16 = arith.constant 16 : index
    %c0_118 = arith.constant 0 : index
    %c0_119 = arith.constant 0 : index
    %65 = vector.load %arg13[%c16, %c0_118, %c0_119] : memref<72x16x16xf32, #tpu.memory_space<vmem>>, vector<8x16x16xf32>
    tpu.vector_store %arg13[%c16, %c0_118, %c0_119], %64 {strides = array<i32>} : memref<72x16x16xf32, #tpu.memory_space<vmem>>, vector<8x16x16xf32>,
    %c0_120 = arith.constant 0 : index
    %c1_121 = arith.constant 1 : index
    %c0_122 = arith.constant 0 : index
    %66 = vector.load %arg11[%c0_120, %c1_121, %c0_122] : memref<8x18x18xf32, #tpu.memory_space<vmem>>, vector<8x16x16xf32>
    %c24_123 = arith.constant 24 : index
    %c0_124 = arith.constant 0 : index
    %c0_125 = arith.constant 0 : index
    %67 = vector.load %arg13[%c24_123, %c0_124, %c0_125] : memref<72x16x16xf32, #tpu.memory_space<vmem>>, vector<8x16x16xf32>
    tpu.vector_store %arg13[%c24_123, %c0_124, %c0_125], %66 {strides = array<i32>} : memref<72x16x16xf32, #tpu.memory_space<vmem>>, vector<8x16x16xf32>,
    %c0_126 = arith.constant 0 : index
    %c1_127 = arith.constant 1 : index
    %c1_128 = arith.constant 1 : index
    %68 = vector.load %arg11[%c0_126, %c1_127, %c1_128] : memref<8x18x18xf32, #tpu.memory_space<vmem>>, vector<8x16x16xf32>
    %c32 = arith.constant 32 : index
    %c0_129 = arith.constant 0 : index
    %c0_130 = arith.constant 0 : index
    %69 = vector.load %arg13[%c32, %c0_129, %c0_130] : memref<72x16x16xf32, #tpu.memory_space<vmem>>, vector<8x16x16xf32>
    tpu.vector_store %arg13[%c32, %c0_129, %c0_130], %68 {strides = array<i32>} : memref<72x16x16xf32, #tpu.memory_space<vmem>>, vector<8x16x16xf32>,
    %c0_131 = arith.constant 0 : index
    %c1_132 = arith.constant 1 : index
    %c2_133 = arith.constant 2 : index
    %70 = vector.load %arg11[%c0_131, %c1_132, %c2_133] : memref<8x18x18xf32, #tpu.memory_space<vmem>>, vector<8x16x16xf32>
    %c40 = arith.constant 40 : index
    %c0_134 = arith.constant 0 : index
    %c0_135 = arith.constant 0 : index
    %71 = vector.load %arg13[%c40, %c0_134, %c0_135] : memref<72x16x16xf32, #tpu.memory_space<vmem>>, vector<8x16x16xf32>
    tpu.vector_store %arg13[%c40, %c0_134, %c0_135], %70 {strides = array<i32>} : memref<72x16x16xf32, #tpu.memory_space<vmem>>, vector<8x16x16xf32>,
    %c0_136 = arith.constant 0 : index
    %c2_137 = arith.constant 2 : index
    %c0_138 = arith.constant 0 : index
    %72 = vector.load %arg11[%c0_136, %c2_137, %c0_138] : memref<8x18x18xf32, #tpu.memory_space<vmem>>, vector<8x16x16xf32>
    %c48_139 = arith.constant 48 : index
    %c0_140 = arith.constant 0 : index
    %c0_141 = arith.constant 0 : index
    %73 = vector.load %arg13[%c48_139, %c0_140, %c0_141] : memref<72x16x16xf32, #tpu.memory_space<vmem>>, vector<8x16x16xf32>
    tpu.vector_store %arg13[%c48_139, %c0_140, %c0_141], %72 {strides = array<i32>} : memref<72x16x16xf32, #tpu.memory_space<vmem>>, vector<8x16x16xf32>,
    %c0_142 = arith.constant 0 : index
    %c2_143 = arith.constant 2 : index
    %c1_144 = arith.constant 1 : index
    %74 = vector.load %arg11[%c0_142, %c2_143, %c1_144] : memref<8x18x18xf32, #tpu.memory_space<vmem>>, vector<8x16x16xf32>
    %c56 = arith.constant 56 : index
    %c0_145 = arith.constant 0 : index
    %c0_146 = arith.constant 0 : index
    %75 = vector.load %arg13[%c56, %c0_145, %c0_146] : memref<72x16x16xf32, #tpu.memory_space<vmem>>, vector<8x16x16xf32>
    tpu.vector_store %arg13[%c56, %c0_145, %c0_146], %74 {strides = array<i32>} : memref<72x16x16xf32, #tpu.memory_space<vmem>>, vector<8x16x16xf32>,
    %c0_147 = arith.constant 0 : index
    %c2_148 = arith.constant 2 : index
    %c2_149 = arith.constant 2 : index
    %76 = vector.load %arg11[%c0_147, %c2_148, %c2_149] : memref<8x18x18xf32, #tpu.memory_space<vmem>>, vector<8x16x16xf32>
    %c64 = arith.constant 64 : index
    %c0_150 = arith.constant 0 : index
    %c0_151 = arith.constant 0 : index
    %77 = vector.load %arg13[%c64, %c0_150, %c0_151] : memref<72x16x16xf32, #tpu.memory_space<vmem>>, vector<8x16x16xf32>
    tpu.vector_store %arg13[%c64, %c0_150, %c0_151], %76 {strides = array<i32>} : memref<72x16x16xf32, #tpu.memory_space<vmem>>, vector<8x16x16xf32>,
    %c0_152 = arith.constant 0 : index
    %c0_153 = arith.constant 0 : index
    %78 = vector.load %arg7[%c0_152, %c0_153] : memref<8x72xf32, #tpu.memory_space<vmem>>, vector<8x72xf32>
    %c0_154 = arith.constant 0 : index
    %c0_155 = arith.constant 0 : index
    %c0_156 = arith.constant 0 : index
    %79 = vector.load %arg13[%c0_154, %c0_155, %c0_156] : memref<72x16x16xf32, #tpu.memory_space<vmem>>, vector<72x16x16xf32>
    %80 = vector.shape_cast %79 : vector<72x16x16xf32> to vector<72x256xf32>
    %cst_157 = arith.constant dense<0.000000e+00> : vector<8x256xf32>
    %81 = tpu.matmul %78, %80, %cst_157 {dimension_numbers = #tpu.dot_dimension_numbers<[1], [0], [0], [1], [0, 0, 1, 1], [], []>} : vector<8x72xf32>, vector<72x256xf32>, vector<8x256xf32> -> vector<8x256xf32>
    %c0_158 = arith.constant 0 : index
    %c0_159 = arith.constant 0 : index
    %82 = vector.load %arg8[%c0_158, %c0_159] : memref<8x1xf32, #tpu.memory_space<vmem>>, vector<8x1xf32>
    %83 = vector.broadcast %82 : vector<8x1xf32> to vector<8x256xf32>
    %84 = arith.addf %81, %83 : vector<8x256xf32>
    %cst_160 = arith.constant 0.000000e+00 : f32
    %85 = vector.broadcast %cst_160 : f32 to vector<8x256xf32>
    %86 = arith.maximumf %84, %85 : vector<8x256xf32>
    %c0_161 = arith.constant 0 : index
    %c0_162 = arith.constant 0 : index
    %c0_163 = arith.constant 0 : index
    %87 = vector.load %arg9[%c0_161, %c0_162, %c0_163] : memref<1x8x256xf32, #tpu.memory_space<vmem>>, vector<1x8x256xf32>
    %88 = vector.shape_cast %87 : vector<1x8x256xf32> to vector<8x256xf32>
    %89 = vector.shape_cast %86 : vector<8x256xf32> to vector<1x8x256xf32>
    tpu.vector_store %arg9[%c0_161, %c0_162, %c0_163], %89 {strides = array<i32>} : memref<1x8x256xf32, #tpu.memory_space<vmem>>, vector<1x8x256xf32>,
    return
  }
  func.func @transform_0(%arg0: i32) -> (i32, i32, i32, i32) {
    %c0_i32 = arith.constant 0 : i32
    %c0_i32_0 = arith.constant 0 : i32
    %c0_i32_1 = arith.constant 0 : i32
    %c0_i32_2 = arith.constant 0 : i32
    return %arg0, %c0_i32, %c0_i32_0, %c0_i32_1 : i32, i32, i32, i32
  }
  func.func @transform_1(%arg0: i32) -> (i32, i32, i32, i32) {
    %c0_i32 = arith.constant 0 : i32
    %c0_i32_0 = arith.constant 0 : i32
    %c0_i32_1 = arith.constant 0 : i32
    %c0_i32_2 = arith.constant 0 : i32
    return %arg0, %c0_i32, %c0_i32_0, %c0_i32_1 : i32, i32, i32, i32
  }
  func.func @transform_2(%arg0: i32) -> (i32, i32) {
    %c0_i32 = arith.constant 0 : i32
    %c0_i32_0 = arith.constant 0 : i32
    %c0_i32_1 = arith.constant 0 : i32
    return %c0_i32, %c0_i32_0 : i32, i32
  }
  func.func @transform_3(%arg0: i32) -> (i32, i32) {
    %c0_i32 = arith.constant 0 : i32
    %c0_i32_0 = arith.constant 0 : i32
    %c0_i32_1 = arith.constant 0 : i32
    return %c0_i32, %c0_i32_0 : i32, i32
  }
  func.func @transform_4(%arg0: i32) -> (i32, i32) {
    %c0_i32 = arith.constant 0 : i32
    %c0_i32_0 = arith.constant 0 : i32
    %c0_i32_1 = arith.constant 0 : i32
    return %c0_i32, %c0_i32_0 : i32, i32
  }
  func.func @transform_5(%arg0: i32) -> (i32, i32) {
    %c0_i32 = arith.constant 0 : i32
    %c0_i32_0 = arith.constant 0 : i32
    %c0_i32_1 = arith.constant 0 : i32
    return %c0_i32, %c0_i32_0 : i32, i32
  }
  func.func @transform_6(%arg0: i32) -> (i32, i32) {
    %c0_i32 = arith.constant 0 : i32
    %c0_i32_0 = arith.constant 0 : i32
    %c0_i32_1 = arith.constant 0 : i32
    return %c0_i32, %c0_i32_0 : i32, i32
  }
  func.func @transform_7(%arg0: i32) -> (i32, i32) {
    %c0_i32 = arith.constant 0 : i32
    %c0_i32_0 = arith.constant 0 : i32
    %c0_i32_1 = arith.constant 0 : i32
    return %c0_i32, %c0_i32_0 : i32, i32
  }
  func.func @transform_8(%arg0: i32) -> (i32, i32, i32) {
    %c0_i32 = arith.constant 0 : i32
    %c0_i32_0 = arith.constant 0 : i32
    %c0_i32_1 = arith.constant 0 : i32
    return %arg0, %c0_i32, %c0_i32_0 : i32, i32, i32
  }
}

</mosaic_0001>

<bundles_post_ra>
// kernel: decoder_block_forward.1
= control target key start
LH: loop header
LB: loop body
LE: loop exit
PB: predicated region body
PF: predicated region fallthrough
CT: control target
= control target key end

     0   :  { %s12558_s27 = smov 0   ;;  %s19487_s0 = inlined_call_operand.vmem [shape: f32[2,4,8,8], index: 0, kind: input, shape index: {}]   ;;  %s19488_s1 = inlined_call_operand.vmem [shape: f32[2,8,16,16], index: 1, kind: input, shape index: {}]   ;;  %s19489_s2 = inlined_call_operand.vmem [shape: f32[16,8], index: 2, kind: input, shape index: {}]   ;;  %s19490_s3 = inlined_call_operand.vmem [shape: f32[8,16], index: 3, kind: input, shape index: {}]   ;;  %s19491_s4 = inlined_call_operand.vmem [shape: f32[8,108], index: 4, kind: input, shape index: {}]   ;;  %s19492_s5 = inlined_call_operand.vmem [shape: f32[8,1], index: 5, kind: input, shape index: {}]   ;;  %s19493_s6 = inlined_call_operand.vmem [shape: f32[8,72], index: 6, kind: input, shape index: {}]   ;;  %s19494_s7 = inlined_call_operand.vmem [shape: f32[8,1], index: 7, kind: input, shape index: {}]   ;;  %s19495_s8 = inlined_call_operand.vmem [shape: f32[2,8,256], index: 8, kind: output, shape index: {}]  }
   0x1 LB: > { %s11473_s28 = sadd.s32 4294967295, %s12496_s27   ;;  %p11477_p0 = scmp.ge.s32.totalorder %s12496_s27, 1  ;;  %s12496_s27 = sphi %s12558_s27, %s18_s27  }
   0x2   : > { %p272_p1 = scmp.lt.s32.totalorder %s12496_s27, 3 }
   0x4   : > { %p273_p2 = pnand %p11477_p0, %p272_p1 }
   0x6   : > { %276 = sbr.rel (%p273_p2) target bundleno = 2270 (0x8de), region = 52 }
   0xd   : > { %v495_v0 = vld [vmem:[%s19490_s3] sm:$0xff]  ;;  %p12571_p3 = scmp.lt.s32.totalorder %s11473_s28, 1  ;;  %vm326_vm0 = vcmask 139264   ;;  %v19496_v1 = vmov 0.0   ;;  %vm351_vm1 = vcmask 7168   ;;  %vm354_vm2 = vcmask 1024  }
   0xe   : > { %11522 = vmatprep.subr.mxu0 %v495_v0  ;;  %343 = vst.msk [vmem:[#allocation2 + $0x71] sm:$0x1] %vm326_vm0, %v19496_v1  ;;  %vm389_vm3 = vcmask 146568   ;;  %vm392_vm4 = vcmask 140424   ;;  %327 = vst.msk [vmem:[#allocation2] sm:$0x1] %vm326_vm0, %v19496_v1 }
   0xf   : > { %328 = vst.msk [vmem:[#allocation2 + $0x18] sm:$0x1] %vm326_vm0, %v19496_v1  ;;  %329 = vst.msk [vmem:[#allocation2 + $0x30] sm:$0x1] %vm326_vm0, %v19496_v1  ;;  %11523 = vmatpush3.msra.mxu0 %v495_v0  ;;  %s20936_s28 = smov (!%p12571_p3, %s11473_s28), 1  ;;  %vm496_vm5 = vcmask 64512  }
  0x10   : > { %330 = vst.msk [vmem:[#allocation2 + $0x48] sm:$0x1] %vm326_vm0, %v19496_v1  ;;  %331 = vst.msk [vmem:[#allocation2 + $0x60] sm:$0x1] %vm326_vm0, %v19496_v1  ;;  %s11503_s10 = sshll.u32 %s20936_s28, 7  ;;  %s11502_s11 = sshll.u32 %s20936_s28, 5 }
  0x11   : > { %332 = vst.msk [vmem:[#allocation2 + $0x78] sm:$0x1] %vm326_vm0, %v19496_v1  ;;  %333 = vst.msk [vmem:[#allocation2 + $0x90] sm:$0x1] %vm326_vm0, %v19496_v1  ;;  %s12906_s14 = scalar_lea.vmem %s19488_s1, %s11503_s10  ;;  %s315_s17 = scalar_lea.vmem %s19487_s0, %s11502_s11  ;;  %v12951_v22 = vld [vmem:[%s19489_s2] sm:$0xff]  ;;  %vm934_vm6 = vcmask 138248  }
  0x12   : > { %334 = vst.msk [vmem:[#allocation2 + $0xa8] sm:$0x1] %vm326_vm0, %v19496_v1  ;;  %335 = vst.msk [vmem:[#allocation2 + $0xc0] sm:$0x1] %vm326_vm0, %v19496_v1  ;;  %v944_v2 = vld [vmem:[%s12906_s14 + $0x8] sm:$0xff]  ;;  %v943_v3 = vld [vmem:[%s12906_s14] sm:$0xff]  ;;  %11532 = vmatprep.mubr.msk.f32.mxu1 %vm496_vm5, %v12951_v22 }
  0x13   : > { %336 = vst.msk [vmem:[#allocation2 + $0xd8] sm:$0x1] %vm326_vm0, %v19496_v1  ;;  %337 = vst.msk [vmem:[#allocation2 + $0xf0] sm:$0x1] %vm326_vm0, %v19496_v1  ;;  %v491_v4 = vld [vmem:[%s315_s17] sm:$0xff]  ;;  %s12499_s18 = smov 1  }
  0x14   : > { %338 = vst.msk [vmem:[#allocation2 + $0x108] sm:$0x1] %vm326_vm0, %v19496_v1  ;;  %339 = vst.msk [vmem:[#allocation2 + $0x11] sm:$0x1] %vm326_vm0, %v19496_v1  ;;  %977 = vrot.lane.b32.xlu1 %v944_v2, %s12499_s18  ;;  %975 = vrot.lane.b32.xlu0 %v943_v3, %s12499_s18  ;;  %v492_v5 = vld [vmem:[%s315_s17 + $0x8] sm:$0xff]  ;;  %v946_v6 = vld [vmem:[%s12906_s14 + $0x18] sm:$0xff] }
  0x15   : > { %340 = vst.msk [vmem:[#allocation2 + $0x29] sm:$0x1] %vm326_vm0, %v19496_v1  ;;  %341 = vst.msk [vmem:[#allocation2 + $0x41] sm:$0x1] %vm326_vm0, %v19496_v1  ;;  %11524 = vmatprep.mubr.msk.f32.mxu0 %vm496_vm5, %v491_v4  ;;  %v945_v7 = vld [vmem:[%s12906_s14 + $0x10] sm:$0xff]  ;;  %v494_v9 = vld [vmem:[%s315_s17 + $0x18] sm:$0xff] }
  0x16   : > { %342 = vst.msk [vmem:[#allocation2 + $0x59] sm:$0x1] %vm326_vm0, %v19496_v1  ;;  %344 = vst.msk [vmem:[#allocation2 + $0x89] sm:$0x1] %vm326_vm0, %v19496_v1  ;;  %11525 = vmatmul.mubr.msk.f32.vlgmr.msra.gmra.mrb[0].mxu0 %vm496_vm5, %v492_v5  ;;  %v493_v8 = vld [vmem:[%s315_s17 + $0x10] sm:$0xff]  ;;  %v948_v10 = vld [vmem:[%s12906_s14 + $0x28] sm:$0xff] }
  0x17   : > { %345 = vst.msk [vmem:[#allocation2 + $0xa1] sm:$0x1] %vm326_vm0, %v19496_v1  ;;  %346 = vst.msk [vmem:[#allocation2 + $0xb9] sm:$0x1] %vm326_vm0, %v19496_v1  ;;  %11527 = vmatprep.mubr.msk.f32.mxu0 %vm496_vm5, %v493_v8  ;;  %v947_v11 = vld [vmem:[%s12906_s14 + $0x20] sm:$0xff]  ;;  %v950_v12 = vld [vmem:[%s12906_s14 + $0x38] sm:$0xff] }
  0x18   : > { %347 = vst.msk [vmem:[#allocation2 + $0xd1] sm:$0x1] %vm326_vm0, %v19496_v1  ;;  %348 = vst.msk [vmem:[#allocation2 + $0xe9] sm:$0x1] %vm326_vm0, %v19496_v1  ;;  %981 = vrot.lane.b32.xlu1 %v946_v6, %s12499_s18  ;;  %979 = vrot.lane.b32.xlu0 %v945_v7, %s12499_s18  ;;  %v949_v13 = vld [vmem:[%s12906_s14 + $0x30] sm:$0xff]  ;;  %v952_v14 = vld [vmem:[%s12906_s14 + $0x48] sm:$0xff] }
  0x19   : > { %349 = vst.msk [vmem:[#allocation2 + $0x101] sm:$0x1] %vm326_vm0, %v19496_v1  ;;  %350 = vst.msk [vmem:[#allocation2 + $0x119] sm:$0x1] %vm326_vm0, %v19496_v1  ;;  %v951_v15 = vld [vmem:[%s12906_s14 + $0x40] sm:$0xff]  ;;  %v954_v16 = vld [vmem:[%s12906_s14 + $0x58] sm:$0xff] }
  0x1a   : > { %427 = vst.msk [vmem:[#allocation3] sm:$0x1] %vm326_vm0, %v19496_v1  ;;  %428 = vst.msk [vmem:[#allocation3 + $0x18] sm:$0x1] %vm326_vm0, %v19496_v1  ;;  %11528 = vmatmul.mubr.msk.f32.gmra.mrb[2].mxu0 %vm496_vm5, %v494_v9  ;;  %v953_v17 = vld [vmem:[%s12906_s14 + $0x50] sm:$0xff]  ;;  %v956_v18 = vld [vmem:[%s12906_s14 + $0x68] sm:$0xff] }
  0x1b   : > { %429 = vst.msk [vmem:[#allocation3 + $0x30] sm:$0x1] %vm326_vm0, %v19496_v1  ;;  %430 = vst.msk [vmem:[#allocation3 + $0x48] sm:$0x1] %vm326_vm0, %v19496_v1  ;;  %7013 = vmatprep.mubr.f32.mxu0 %v19496_v1  ;;  %v955_v19 = vld [vmem:[%s12906_s14 + $0x60] sm:$0xff]  ;;  %v958_v20 = vld [vmem:[%s12906_s14 + $0x78] sm:$0xff] }
  0x1c   : > { %431 = vst.msk [vmem:[#allocation3 + $0x60] sm:$0x1] %vm326_vm0, %v19496_v1  ;;  %432 = vst.msk [vmem:[#allocation3 + $0x78] sm:$0x1] %vm326_vm0, %v19496_v1  ;;  %985 = vrot.lane.b32.xlu1 %v948_v10, %s12499_s18  ;;  %983 = vrot.lane.b32.xlu0 %v947_v11, %s12499_s18  ;;  %v957_v21 = vld [vmem:[%s12906_s14 + $0x70] sm:$0xff]  ;;  %vm1064_vm7 = vcmask 130048  }
  0x1d   : > { %433 = vst.msk [vmem:[#allocation3 + $0x90] sm:$0x1] %vm326_vm0, %v19496_v1  ;;  %434 = vst.msk [vmem:[#allocation3 + $0xa8] sm:$0x1] %vm326_vm0, %v19496_v1  ;;  %s12500_s21 = smov 127   ;;  %s12502_s22 = smov 126  }
  0x1e   : > { %435 = vst.msk [vmem:[#allocation3 + $0x11] sm:$0x1] %vm326_vm0, %v19496_v1  ;;  %436 = vst.msk [vmem:[#allocation3 + $0x29] sm:$0x1] %vm326_vm0, %v19496_v1  ;;  %s12504_s25 = smov 32   ;;  %s12505_s26 = smov 64  }
  0x1f   : > { %437 = vst.msk [vmem:[#allocation3 + $0x41] sm:$0x1] %vm326_vm0, %v19496_v1  ;;  %438 = vst.msk [vmem:[#allocation3 + $0x59] sm:$0x1] %vm326_vm0, %v19496_v1  ;;  %s12506_s29 = smov 16   ;;  %s12507_s30 = smov 96  }
  0x20   : > { %439 = vst.msk [vmem:[#allocation3 + $0x71] sm:$0x1] %vm326_vm0, %v19496_v1  ;;  %440 = vst.msk [vmem:[#allocation3 + $0x89] sm:$0x1] %vm326_vm0, %v19496_v1  ;;  %989 = vrot.lane.b32.xlu1 %v950_v12, %s12499_s18  ;;  %987 = vrot.lane.b32.xlu0 %v949_v13, %s12499_s18  ;;  %s12508_s9 = smov 48   ;;  %s12509_s10 = smov 80  }
  0x21   : > { %441 = vst.msk [vmem:[#allocation3 + $0xa1] sm:$0x1] %vm326_vm0, %v19496_v1  ;;  %442 = vst.msk [vmem:[#allocation3 + $0xb9] sm:$0x1] %vm326_vm0, %v19496_v1  ;;  %s12510_s11 = smov 112   ;;  %vm6744_vm8 = vcmask 261120  }
  0x22   : > { %366 = vst.msk [vmem:[#allocation2 + $0x68] sm:$0xff] %vm351_vm1, %v19496_v1  ;;  %353 = vst.msk [vmem:[#allocation2 + $0x8] sm:$0xff] %vm351_vm1, %v19496_v1  ;;  %vm6759_vm9 = vcmask 392192   ;;  %vm6774_vm10 = vcmask 523264   ;;  %vm6789_vm11 = vcmask 654336   ;;  %vm6804_vm12 = vcmask 785408  }
  0x23   : > { %367 = vst.msk [vmem:[#allocation2 + $0x70] sm:$0x3] %vm354_vm2, %v19496_v1  ;;  %355 = vst.msk [vmem:[#allocation2 + $0x10] sm:$0x3] %vm354_vm2, %v19496_v1  ;;  %vm6819_vm13 = vcmask 916480   ;;  %vm6942_vm14 = vcmask 1043456  }
  0x24   : > { %357 = vst.msk [vmem:[#allocation2 + $0x20] sm:$0xff] %vm351_vm1, %v19496_v1  ;;  %360 = vst.msk [vmem:[#allocation2 + $0x38] sm:$0xff] %vm351_vm1, %v19496_v1  ;;  %993 = vrot.lane.b32.xlu1 %v952_v14, %s12499_s18  ;;  %991 = vrot.lane.b32.xlu0 %v951_v15, %s12499_s18  ;;  %vm12512_vm15 = vmmov 1   ;;  %s11504_s20 = sshll.u32 %s20936_s28, 4 }
  0x25   : > { %363 = vst.msk [vmem:[#allocation2 + $0x50] sm:$0xff] %vm351_vm1, %v19496_v1  ;;  %369 = vst.msk [vmem:[#allocation2 + $0x80] sm:$0xff] %vm351_vm1, %v19496_v1  ;;  %s325_s23 = scalar_lea.vmem %s19495_s8, %s11504_s20 }
  0x26   : > { %372 = vst.msk [vmem:[#allocation2 + $0x98] sm:$0xff] %vm351_vm1, %v19496_v1  ;;  %375 = vst.msk [vmem:[#allocation2 + $0xb0] sm:$0xff] %vm351_vm1, %v19496_v1 }
  0x27   : > { %378 = vst.msk [vmem:[#allocation2 + $0xc8] sm:$0xff] %vm351_vm1, %v19496_v1  ;;  %381 = vst.msk [vmem:[#allocation2 + $0xe0] sm:$0xff] %vm351_vm1, %v19496_v1 }
  0x28   : > { %384 = vst.msk [vmem:[#allocation2 + $0xf8] sm:$0xff] %vm351_vm1, %v19496_v1  ;;  %387 = vst.msk [vmem:[#allocation2 + $0x110] sm:$0xff] %vm351_vm1, %v19496_v1  ;;  %997 = vrot.lane.b32.xlu1 %v954_v16, %s12499_s18  ;;  %995 = vrot.lane.b32.xlu0 %v953_v17, %s12499_s18 }
  0x29   : > { %444 = vst.msk [vmem:[#allocation3 + $0x8] sm:$0xff] %vm351_vm1, %v19496_v1  ;;  %447 = vst.msk [vmem:[#allocation3 + $0x20] sm:$0xff] %vm351_vm1, %v19496_v1 }
  0x2a   : > { %450 = vst.msk [vmem:[#allocation3 + $0x38] sm:$0xff] %vm351_vm1, %v19496_v1  ;;  %453 = vst.msk [vmem:[#allocation3 + $0x50] sm:$0xff] %vm351_vm1, %v19496_v1 }
  0x2b   : > { %456 = vst.msk [vmem:[#allocation3 + $0x68] sm:$0xff] %vm351_vm1, %v19496_v1  ;;  %459 = vst.msk [vmem:[#allocation3 + $0x80] sm:$0xff] %vm351_vm1, %v19496_v1 }
  0x2c   : > { %462 = vst.msk [vmem:[#allocation3 + $0x98] sm:$0xff] %vm351_vm1, %v19496_v1  ;;  %465 = vst.msk [vmem:[#allocation3 + $0xb0] sm:$0xff] %vm351_vm1, %v19496_v1  ;;  %1001 = vrot.lane.b32.xlu1 %v956_v18, %s12499_s18  ;;  %999 = vrot.lane.b32.xlu0 %v955_v19, %s12499_s18  ;;  %v12501_v18 = vmov 1983009808  }
  0x2d   : > { %365 = vst.msk [vmem:[#allocation2 + $0x60] sm:$0xff] %vm351_vm1, %v19496_v1  ;;  %352 = vst.msk [vmem:[#allocation2] sm:$0xff] %vm351_vm1, %v19496_v1  ;;  %v2277_v19 = vunpack.c.l.s4 %v12501_v18 }
  0x2e   : > { %356 = vst.msk [vmem:[#allocation2 + $0x18] sm:$0xff] %vm351_vm1, %v19496_v1  ;;  %359 = vst.msk [vmem:[#allocation2 + $0x30] sm:$0xff] %vm351_vm1, %v19496_v1 }
  0x2f   : > { %358 = vst.msk [vmem:[#allocation2 + $0x28] sm:$0x3] %vm354_vm2, %v19496_v1  ;;  %361 = vst.msk [vmem:[#allocation2 + $0x40] sm:$0x3] %vm354_vm2, %v19496_v1 }
  0x30   : > { %362 = vst.msk [vmem:[#allocation2 + $0x48] sm:$0xff] %vm351_vm1, %v19496_v1  ;;  %368 = vst.msk [vmem:[#allocation2 + $0x78] sm:$0xff] %vm351_vm1, %v19496_v1  ;;  %1005 = vrot.lane.b32.xlu1 %v958_v20, %s12499_s18  ;;  %1003 = vrot.lane.b32.xlu0 %v957_v21, %s12499_s18  ;;  %v2279_v20 = vlaneseq }
  0x31   : > { %364 = vst.msk [vmem:[#allocation2 + $0x58] sm:$0x3] %vm354_vm2, %v19496_v1  ;;  %370 = vst.msk [vmem:[#allocation2 + $0x88] sm:$0x3] %vm354_vm2, %v19496_v1 }
  0x32   : > { %371 = vst.msk [vmem:[#allocation2 + $0x90] sm:$0xff] %vm351_vm1, %v19496_v1  ;;  %374 = vst.msk [vmem:[#allocation2 + $0xa8] sm:$0xff] %vm351_vm1, %v19496_v1 }
  0x33   : > { %373 = vst.msk [vmem:[#allocation2 + $0xa0] sm:$0x3] %vm354_vm2, %v19496_v1  ;;  %376 = vst.msk [vmem:[#allocation2 + $0xb8] sm:$0x3] %vm354_vm2, %v19496_v1 }
  0x34   : > { %377 = vst.msk [vmem:[#allocation2 + $0xc0] sm:$0xff] %vm351_vm1, %v19496_v1  ;;  %380 = vst.msk [vmem:[#allocation2 + $0xd8] sm:$0xff] %vm351_vm1, %v19496_v1 }
  0x35   : > { %379 = vst.msk [vmem:[#allocation2 + $0xd0] sm:$0x3] %vm354_vm2, %v19496_v1  ;;  %382 = vst.msk [vmem:[#allocation2 + $0xe8] sm:$0x3] %vm354_vm2, %v19496_v1 }
  0x36   : > { %383 = vst.msk [vmem:[#allocation2 + $0xf0] sm:$0xff] %vm351_vm1, %v19496_v1  ;;  %386 = vst.msk [vmem:[#allocation2 + $0x108] sm:$0xff] %vm351_vm1, %v19496_v1 }
  0x37   : > { %385 = vst.msk [vmem:[#allocation2 + $0x100] sm:$0x3] %vm354_vm2, %v19496_v1  ;;  %388 = vst.msk [vmem:[#allocation2 + $0x118] sm:$0x3] %vm354_vm2, %v19496_v1 }
  0x38   : > { %443 = vst.msk [vmem:[#allocation3] sm:$0xff] %vm351_vm1, %v19496_v1  ;;  %446 = vst.msk [vmem:[#allocation3 + $0x18] sm:$0xff] %vm351_vm1, %v19496_v1 }
  0x39   : > { %445 = vst.msk [vmem:[#allocation3 + $0x10] sm:$0x3] %vm354_vm2, %v19496_v1  ;;  %448 = vst.msk [vmem:[#allocation3 + $0x28] sm:$0x3] %vm354_vm2, %v19496_v1 }
  0x3a   : > { %449 = vst.msk [vmem:[#allocation3 + $0x30] sm:$0xff] %vm351_vm1, %v19496_v1  ;;  %452 = vst.msk [vmem:[#allocation3 + $0x48] sm:$0xff] %vm351_vm1, %v19496_v1 }
  0x3b   : > { %451 = vst.msk [vmem:[#allocation3 + $0x40] sm:$0x3] %vm354_vm2, %v19496_v1  ;;  %454 = vst.msk [vmem:[#allocation3 + $0x58] sm:$0x3] %vm354_vm2, %v19496_v1 }
  0x3c   : > { %455 = vst.msk [vmem:[#allocation3 + $0x60] sm:$0xff] %vm351_vm1, %v19496_v1  ;;  %458 = vst.msk [vmem:[#allocation3 + $0x78] sm:$0xff] %vm351_vm1, %v19496_v1 }
  0x3d   : > { %457 = vst.msk [vmem:[#allocation3 + $0x70] sm:$0x3] %vm354_vm2, %v19496_v1  ;;  %460 = vst.msk [vmem:[#allocation3 + $0x88] sm:$0x3] %vm354_vm2, %v19496_v1 }
  0x3e   : > { %461 = vst.msk [vmem:[#allocation3 + $0x90] sm:$0xff] %vm351_vm1, %v19496_v1  ;;  %464 = vst.msk [vmem:[#allocation3 + $0xa8] sm:$0xff] %vm351_vm1, %v19496_v1  ;;  %vm6938_vm1 = vcmask 883712  }
  0x3f   : > { %463 = vst.msk [vmem:[#allocation3 + $0xa0] sm:$0x3] %vm354_vm2, %v19496_v1  ;;  %466 = vst.msk [vmem:[#allocation3 + $0xb8] sm:$0x3] %vm354_vm2, %v19496_v1  ;;  %vm11327_vm2 = vcmask 588800  }
  0x40   : > { %404 = vst.msk [vmem:[#allocation2 + $0x68] sm:$0xff] %vm389_vm3, %v19496_v1  ;;  %403 = vst.msk [vmem:[#allocation2 + $0x60] sm:$0xff] %vm389_vm3, %v19496_v1 }
  0x41   : > { %405 = vst.msk [vmem:[#allocation2 + $0x70] sm:$0x3] %vm392_vm4, %v19496_v1  ;;  %408 = vst.msk [vmem:[#allocation2 + $0x88] sm:$0x3] %vm392_vm4, %v19496_v1 }
  0x42   : > { %391 = vst.msk [vmem:[#allocation2 + $0x8] sm:$0xff] %vm389_vm3, %v19496_v1  ;;  %395 = vst.msk [vmem:[#allocation2 + $0x20] sm:$0xff] %vm389_vm3, %v19496_v1 }
  0x43   : > { %398 = vst.msk [vmem:[#allocation2 + $0x38] sm:$0xff] %vm389_vm3, %v19496_v1  ;;  %401 = vst.msk [vmem:[#allocation2 + $0x50] sm:$0xff] %vm389_vm3, %v19496_v1 }
  0x44   : > { %407 = vst.msk [vmem:[#allocation2 + $0x80] sm:$0xff] %vm389_vm3, %v19496_v1  ;;  %410 = vst.msk [vmem:[#allocation2 + $0x98] sm:$0xff] %vm389_vm3, %v19496_v1 }
  0x45   : > { %413 = vst.msk [vmem:[#allocation2 + $0xb0] sm:$0xff] %vm389_vm3, %v19496_v1  ;;  %416 = vst.msk [vmem:[#allocation2 + $0xc8] sm:$0xff] %vm389_vm3, %v19496_v1 }
  0x46   : > { %419 = vst.msk [vmem:[#allocation2 + $0xe0] sm:$0xff] %vm389_vm3, %v19496_v1  ;;  %422 = vst.msk [vmem:[#allocation2 + $0xf8] sm:$0xff] %vm389_vm3, %v19496_v1 }
  0x47   : > { %425 = vst.msk [vmem:[#allocation2 + $0x110] sm:$0xff] %vm389_vm3, %v19496_v1  ;;  %468 = vst.msk [vmem:[#allocation3 + $0x8] sm:$0xff] %vm389_vm3, %v19496_v1 }
  0x48   : > { %471 = vst.msk [vmem:[#allocation3 + $0x20] sm:$0xff] %vm389_vm3, %v19496_v1  ;;  %474 = vst.msk [vmem:[#allocation3 + $0x38] sm:$0xff] %vm389_vm3, %v19496_v1 }
  0x49   : > { %477 = vst.msk [vmem:[#allocation3 + $0x50] sm:$0xff] %vm389_vm3, %v19496_v1  ;;  %480 = vst.msk [vmem:[#allocation3 + $0x68] sm:$0xff] %vm389_vm3, %v19496_v1 }
  0x4a   : > { %483 = vst.msk [vmem:[#allocation3 + $0x80] sm:$0xff] %vm389_vm3, %v19496_v1  ;;  %486 = vst.msk [vmem:[#allocation3 + $0x98] sm:$0xff] %vm389_vm3, %v19496_v1 }
  0x4b   : > { %489 = vst.msk [vmem:[#allocation3 + $0xb0] sm:$0xff] %vm389_vm3, %v19496_v1  ;;  %390 = vst.msk [vmem:[#allocation2] sm:$0xff] %vm389_vm3, %v19496_v1 }
  0x4c   : > { %393 = vst.msk [vmem:[#allocation2 + $0x10] sm:$0x3] %vm392_vm4, %v19496_v1  ;;  %396 = vst.msk [vmem:[#allocation2 + $0x28] sm:$0x3] %vm392_vm4, %v19496_v1 }
  0x4d   : > { %394 = vst.msk [vmem:[#allocation2 + $0x18] sm:$0xff] %vm389_vm3, %v19496_v1  ;;  %397 = vst.msk [vmem:[#allocation2 + $0x30] sm:$0xff] %vm389_vm3, %v19496_v1 }
  0x4e   : > { %399 = vst.msk [vmem:[#allocation2 + $0x40] sm:$0x3] %vm392_vm4, %v19496_v1  ;;  %402 = vst.msk [vmem:[#allocation2 + $0x58] sm:$0x3] %vm392_vm4, %v19496_v1 }
  0x4f   : > { %400 = vst.msk [vmem:[#allocation2 + $0x48] sm:$0xff] %vm389_vm3, %v19496_v1  ;;  %406 = vst.msk [vmem:[#allocation2 + $0x78] sm:$0xff] %vm389_vm3, %v19496_v1 }
  0x50   : > { %409 = vst.msk [vmem:[#allocation2 + $0x90] sm:$0xff] %vm389_vm3, %v19496_v1  ;;  %412 = vst.msk [vmem:[#allocation2 + $0xa8] sm:$0xff] %vm389_vm3, %v19496_v1 }
  0x51   : > { %411 = vst.msk [vmem:[#allocation2 + $0xa0] sm:$0x3] %vm392_vm4, %v19496_v1  ;;  %414 = vst.msk [vmem:[#allocation2 + $0xb8] sm:$0x3] %vm392_vm4, %v19496_v1 }
  0x52   : > { %415 = vst.msk [vmem:[#allocation2 + $0xc0] sm:$0xff] %vm389_vm3, %v19496_v1  ;;  %418 = vst.msk [vmem:[#allocation2 + $0xd8] sm:$0xff] %vm389_vm3, %v19496_v1 }
  0x53   : > { %417 = vst.msk [vmem:[#allocation2 + $0xd0] sm:$0x3] %vm392_vm4, %v19496_v1  ;;  %420 = vst.msk [vmem:[#allocation2 + $0xe8] sm:$0x3] %vm392_vm4, %v19496_v1 }
  0x54   : > { %421 = vst.msk [vmem:[#allocation2 + $0xf0] sm:$0xff] %vm389_vm3, %v19496_v1  ;;  %424 = vst.msk [vmem:[#allocation2 + $0x108] sm:$0xff] %vm389_vm3, %v19496_v1 }
  0x55   : > { %423 = vst.msk [vmem:[#allocation2 + $0x100] sm:$0x3] %vm392_vm4, %v19496_v1  ;;  %426 = vst.msk [vmem:[#allocation2 + $0x118] sm:$0x3] %vm392_vm4, %v19496_v1 }
  0x56   : > { %467 = vst.msk [vmem:[#allocation3] sm:$0xff] %vm389_vm3, %v19496_v1  ;;  %470 = vst.msk [vmem:[#allocation3 + $0x18] sm:$0xff] %vm389_vm3, %v19496_v1 }
  0x57   : > { %469 = vst.msk [vmem:[#allocation3 + $0x10] sm:$0x3] %vm392_vm4, %v19496_v1  ;;  %472 = vst.msk [vmem:[#allocation3 + $0x28] sm:$0x3] %vm392_vm4, %v19496_v1 }
  0x58   : > { %473 = vst.msk [vmem:[#allocation3 + $0x30] sm:$0xff] %vm389_vm3, %v19496_v1  ;;  %476 = vst.msk [vmem:[#allocation3 + $0x48] sm:$0xff] %vm389_vm3, %v19496_v1 }
  0x59   : > { %475 = vst.msk [vmem:[#allocation3 + $0x40] sm:$0x3] %vm392_vm4, %v19496_v1  ;;  %478 = vst.msk [vmem:[#allocation3 + $0x58] sm:$0x3] %vm392_vm4, %v19496_v1 }
  0x5a   : > { %479 = vst.msk [vmem:[#allocation3 + $0x60] sm:$0xff] %vm389_vm3, %v19496_v1  ;;  %482 = vst.msk [vmem:[#allocation3 + $0x78] sm:$0xff] %vm389_vm3, %v19496_v1 }
  0x5b   : > { %481 = vst.msk [vmem:[#allocation3 + $0x70] sm:$0x3] %vm392_vm4, %v19496_v1  ;;  %484 = vst.msk [vmem:[#allocation3 + $0x88] sm:$0x3] %vm392_vm4, %v19496_v1 }
  0x5c   : > { %485 = vst.msk [vmem:[#allocation3 + $0x90] sm:$0xff] %vm389_vm3, %v19496_v1  ;;  %488 = vst.msk [vmem:[#allocation3 + $0xa8] sm:$0xff] %vm389_vm3, %v19496_v1 }
  0x5d   : > { %487 = vst.msk [vmem:[#allocation3 + $0xa0] sm:$0x3] %vm392_vm4, %v19496_v1  ;;  %490 = vst.msk [vmem:[#allocation3 + $0xb8] sm:$0x3] %vm392_vm4, %v19496_v1 }
  0x5e   : > { %vm16761_vm0 = vmpackc.low %vm6942_vm14, %vm12512_vm15 }
  0x86   : > { %v978_v23 = vpop.permute.xlu1 %977  ;;  %v976_v24 = vpop.permute.xlu0 %975 }
  0x87   : > { %1025 = vst.msk [vmem:[#allocation2 + $0x69] sm:$0xff] %vm934_vm6, %v978_v23  ;;  %1024 = vst.msk [vmem:[#allocation2 + $0x61] sm:$0xff] %vm934_vm6, %v976_v24 }
  0x8a   : > { %v982_v25 = vpop.permute.xlu1 %981  ;;  %v980_v26 = vpop.permute.xlu0 %979 }
  0x8b   : > { %1027 = vst.msk [vmem:[#allocation2 + $0x81] sm:$0xff] %vm934_vm6, %v982_v25  ;;  %1026 = vst.msk [vmem:[#allocation2 + $0x79] sm:$0xff] %vm934_vm6, %v980_v26 }
  0x8e   : > { %v12959_v27 = vld [vmem:[#allocation2 + $0x69] sm:$0xff]  ;;  %v12963_v29 = vld [vmem:[#allocation2 + $0x60] sm:$0xff]  ;;  %v986_v30 = vpop.permute.xlu1 %985  ;;  %v984_v31 = vpop.permute.xlu0 %983 }
  0x8f   : > { %v12961_v28 = vld [vmem:[#allocation2 + $0x6a] sm:$0xff]  ;;  %1413 = vst.msk [vmem:[#allocation4 + $0x288] sm:$0xff] %vm1064_vm7, %v12959_v27  ;;  %1073 = vst.msk [vmem:[#allocation4 + $0x40] sm:$0xff] %vm1064_vm7, %v12963_v29  ;;  %v12973_v33 = vld [vmem:[#allocation2 + $0x61] sm:$0xff]  ;;  %1153 = vrot.lane.b32.xlu0 %v12963_v29, %s12500_s21 }
  0x90   : > { %1752 = vst.msk [vmem:[#allocation4 + $0x4c8] sm:$0xff] %vm1064_vm7, %v12961_v28  ;;  %v12969_v32 = vld [vmem:[#allocation2 + $0x68] sm:$0xff]  ;;  %1412 = vst.msk [vmem:[#allocation4 + $0x280] sm:$0xff] %vm1064_vm7, %v12973_v33 }
  0x91   : > { %v12975_v34 = vld [vmem:[#allocation2 + $0x62] sm:$0xff]  ;;  %1029 = vst.msk [vmem:[#allocation2 + $0x99] sm:$0xff] %vm934_vm6, %v986_v30  ;;  %1028 = vst.msk [vmem:[#allocation2 + $0x91] sm:$0xff] %vm934_vm6, %v984_v31  ;;  %1155 = vrot.lane.b32.xlu1 %v12969_v32, %s12500_s21 }
  0x92   : > { %1074 = vst.msk [vmem:[#allocation4 + $0x48] sm:$0xff] %vm1064_vm7, %v12969_v32  ;;  %1751 = vst.msk [vmem:[#allocation4 + $0x4c0] sm:$0xff] %vm1064_vm7, %v12975_v34  ;;  %v12989_v35 = vld [vmem:[#allocation2 + $0x81] sm:$0xff]  ;;  %v12993_v37 = vld [vmem:[#allocation2 + $0x78] sm:$0xff]  ;;  %v990_v38 = vpop.permute.xlu1 %989  ;;  %v988_v39 = vpop.permute.xlu0 %987 }
  0x93   : > { %v12991_v36 = vld [vmem:[#allocation2 + $0x82] sm:$0xff]  ;;  %1415 = vst.msk [vmem:[#allocation4 + $0x298] sm:$0xff] %vm1064_vm7, %v12989_v35  ;;  %1075 = vst.msk [vmem:[#allocation4 + $0x50] sm:$0xff] %vm1064_vm7, %v12993_v37  ;;  %v13003_v41 = vld [vmem:[#allocation2 + $0x79] sm:$0xff]  ;;  %1157 = vrot.lane.b32.xlu0 %v12993_v37, %s12500_s21 }
  0x94   : > { %1754 = vst.msk [vmem:[#allocation4 + $0x4d8] sm:$0xff] %vm1064_vm7, %v12991_v36  ;;  %v12999_v40 = vld [vmem:[#allocation2 + $0x80] sm:$0xff]  ;;  %1414 = vst.msk [vmem:[#allocation4 + $0x290] sm:$0xff] %vm1064_vm7, %v13003_v41 }
  0x95   : > { %v13005_v42 = vld [vmem:[#allocation2 + $0x7a] sm:$0xff]  ;;  %1031 = vst.msk [vmem:[#allocation2 + $0xb1] sm:$0xff] %vm934_vm6, %v990_v38  ;;  %1030 = vst.msk [vmem:[#allocation2 + $0xa9] sm:$0xff] %vm934_vm6, %v988_v39  ;;  %1159 = vrot.lane.b32.xlu1 %v12999_v40, %s12500_s21 }
  0x96   : > { %1076 = vst.msk [vmem:[#allocation4 + $0x58] sm:$0xff] %vm1064_vm7, %v12999_v40  ;;  %1753 = vst.msk [vmem:[#allocation4 + $0x4d0] sm:$0xff] %vm1064_vm7, %v13005_v42  ;;  %v994_v46 = vpop.permute.xlu1 %993  ;;  %v992_v47 = vpop.permute.xlu0 %991  ;;  %v2139_v25 = vld [vmem:[#allocation4 + $0x288] sm:$0xff] }
  0x97   : > { %1033 = vst.msk [vmem:[#allocation2 + $0xc9] sm:$0xff] %vm934_vm6, %v994_v46  ;;  %1032 = vst.msk [vmem:[#allocation2 + $0xc1] sm:$0xff] %vm934_vm6, %v992_v47  ;;  %v2138_v39 = vld [vmem:[#allocation4 + $0x280] sm:$0xff] }
  0x98   : > { %v13019_v43 = vld [vmem:[#allocation2 + $0x99] sm:$0xff]  ;;  %v13023_v45 = vld [vmem:[#allocation2 + $0x90] sm:$0xff] }
  0x99   : > { %v13021_v44 = vld [vmem:[#allocation2 + $0x9a] sm:$0xff]  ;;  %1417 = vst.msk [vmem:[#allocation4 + $0x2a8] sm:$0xff] %vm1064_vm7, %v13019_v43  ;;  %1077 = vst.msk [vmem:[#allocation4 + $0x60] sm:$0xff] %vm1064_vm7, %v13023_v45  ;;  %v13033_v49 = vld [vmem:[#allocation2 + $0x91] sm:$0xff]  ;;  %1161 = vrot.lane.b32.xlu0 %v13023_v45, %s12500_s21 }
  0x9a   : > { %19980 = vst [vmem:[#allocation6_spill] sm:$0xff] %v13021_v44  ;;  %1756 = vst.msk [vmem:[#allocation4 + $0x4e8] sm:$0xff] %vm1064_vm7, %v13021_v44  ;;  %v13029_v48 = vld [vmem:[#allocation2 + $0x98] sm:$0xff]  ;;  %v998_v54 = vpop.permute.xlu1 %997  ;;  %v996_v55 = vpop.permute.xlu0 %995 }
  0x9b   : > { %v13035_v50 = vld [vmem:[#allocation2 + $0x92] sm:$0xff]  ;;  %1078 = vst.msk [vmem:[#allocation4 + $0x68] sm:$0xff] %vm1064_vm7, %v13029_v48  ;;  %1416 = vst.msk [vmem:[#allocation4 + $0x2a0] sm:$0xff] %vm1064_vm7, %v13033_v49  ;;  %1163 = vrot.lane.b32.xlu1 %v13029_v48, %s12500_s21 }
  0x9c   : > { %1755 = vst.msk [vmem:[#allocation4 + $0x4e0] sm:$0xff] %vm1064_vm7, %v13035_v50  ;;  %v13049_v51 = vld [vmem:[#allocation2 + $0xb1] sm:$0xff]  ;;  %v13053_v53 = vld [vmem:[#allocation2 + $0xa8] sm:$0xff] }
  0x9d   : > { %v13051_v52 = vld [vmem:[#allocation2 + $0xb2] sm:$0xff]  ;;  %1419 = vst.msk [vmem:[#allocation4 + $0x2b8] sm:$0xff] %vm1064_vm7, %v13049_v51  ;;  %1079 = vst.msk [vmem:[#allocation4 + $0x70] sm:$0xff] %vm1064_vm7, %v13053_v53  ;;  %v13063_v57 = vld [vmem:[#allocation2 + $0xa9] sm:$0xff]  ;;  %1165 = vrot.lane.b32.xlu0 %v13053_v53, %s12500_s21 }
  0x9e   : > { %19981 = vst [vmem:[#allocation7_spill] sm:$0xff] %v13051_v52  ;;  %1758 = vst.msk [vmem:[#allocation4 + $0x4f8] sm:$0xff] %vm1064_vm7, %v13051_v52  ;;  %v13059_v56 = vld [vmem:[#allocation2 + $0xb0] sm:$0xff]  ;;  %v13083_v61 = vld [vmem:[#allocation2 + $0xc0] sm:$0xff]  ;;  %v1002_v62 = vpop.permute.xlu1 %1001  ;;  %v1000_v63 = vpop.permute.xlu0 %999 }
  0x9f   : > { %v13065_v58 = vld [vmem:[#allocation2 + $0xaa] sm:$0xff]  ;;  %1035 = vst.msk [vmem:[#allocation2 + $0xe1] sm:$0xff] %vm934_vm6, %v998_v54  ;;  %1034 = vst.msk [vmem:[#allocation2 + $0xd9] sm:$0xff] %vm934_vm6, %v996_v55  ;;  %1167 = vrot.lane.b32.xlu1 %v13059_v56, %s12500_s21  ;;  %v13093_v2 = vld [vmem:[#allocation2 + $0xc1] sm:$0xff]  ;;  %v2278_v55 = vunpack.c.0.s8 %v2277_v19  ;;  %v12503_v19 = vmov 1934713408  }
  0xa0   : > { %19982 = vst [vmem:[#allocation8_spill] sm:$0xff] %v13065_v58  ;;  %1080 = vst.msk [vmem:[#allocation4 + $0x78] sm:$0xff] %vm1064_vm7, %v13059_v56  ;;  %v13079_v59 = vld [vmem:[#allocation2 + $0xc9] sm:$0xff]  ;;  %v2141_v26 = vld [vmem:[#allocation4 + $0x298] sm:$0xff] }
  0xa1   : > { %1418 = vst.msk [vmem:[#allocation4 + $0x2b0] sm:$0xff] %vm1064_vm7, %v13063_v57  ;;  %1757 = vst.msk [vmem:[#allocation4 + $0x4f0] sm:$0xff] %vm1064_vm7, %v13065_v58  ;;  %v13081_v60 = vld [vmem:[#allocation2 + $0xca] sm:$0xff]  ;;  %v13095_v3 = vld [vmem:[#allocation2 + $0xc2] sm:$0xff]  ;;  %1169 = vrot.lane.b32.xlu0 %v13083_v61, %s12500_s21 }
  0xa2   : > { %19983 = vst [vmem:[#allocation9_spill] sm:$0xff] %v13081_v60  ;;  %1421 = vst.msk [vmem:[#allocation4 + $0x2c8] sm:$0xff] %vm1064_vm7, %v13079_v59  ;;  %v13089_v0 = vld [vmem:[#allocation2 + $0xc8] sm:$0xff]  ;;  %v1006_v7 = vpop.permute.xlu1 %1005  ;;  %v1004_v8 = vpop.permute.xlu0 %1003 }
  0xa3   : > { %1760 = vst.msk [vmem:[#allocation4 + $0x508] sm:$0xff] %vm1064_vm7, %v13081_v60  ;;  %1081 = vst.msk [vmem:[#allocation4 + $0x80] sm:$0xff] %vm1064_vm7, %v13083_v61  ;;  %1171 = vrot.lane.b32.xlu1 %v13089_v0, %s12500_s21  ;;  %v2143_v46 = vld [vmem:[#allocation4 + $0x2a8] sm:$0xff] }
  0xa4   : > { %19984 = vst [vmem:[#allocation10_spill] sm:$0xff] %v13095_v3  ;;  %1037 = vst.msk [vmem:[#allocation2 + $0xf9] sm:$0xff] %vm934_vm6, %v1002_v62  ;;  %v2145_v47 = vld [vmem:[#allocation4 + $0x2b8] sm:$0xff]  ;;  %v2280_v62 = vshrl.u32 %v2279_v20, 7  ;;  %v4790_v1 = vcombine.low %v2139_v25, %v2143_v46  ;;  %v2341_v20 = vunpack.c.l.s4 %v12503_v19 }
  0xa5   : > { %1036 = vst.msk [vmem:[#allocation2 + $0xf1] sm:$0xff] %vm934_vm6, %v1000_v63  ;;  %1039 = vst.msk [vmem:[#allocation2 + $0x111] sm:$0xff] %vm934_vm6, %v1006_v7  ;;  %v2140_v63 = vld [vmem:[#allocation4 + $0x290] sm:$0xff]  ;;  %v2142_v7 = vld [vmem:[#allocation4 + $0x2a0] sm:$0xff] }
  0xa6   : > { %1082 = vst.msk [vmem:[#allocation4 + $0x88] sm:$0xff] %vm1064_vm7, %v13089_v0  ;;  %1420 = vst.msk [vmem:[#allocation4 + $0x2c0] sm:$0xff] %vm1064_vm7, %v13093_v2  ;;  %v13109_v4 = vld [vmem:[#allocation2 + $0xe1] sm:$0xff]  ;;  %v13113_v6 = vld [vmem:[#allocation2 + $0xd8] sm:$0xff]  ;;  %v2954_v60 = vcombine.low %v2138_v39, %v2142_v7  ;;  %v2342_v39 = vunpack.c.0.s8 %v2341_v20 }
  0xa7   : > { %1759 = vst.msk [vmem:[#allocation4 + $0x500] sm:$0xff] %vm1064_vm7, %v13095_v3  ;;  %v13111_v5 = vld [vmem:[#allocation2 + $0xe2] sm:$0xff]  ;;  %1423 = vst.msk [vmem:[#allocation4 + $0x2d8] sm:$0xff] %vm1064_vm7, %v13109_v4  ;;  %v13123_v10 = vld [vmem:[#allocation2 + $0xd9] sm:$0xff]  ;;  %1173 = vrot.lane.b32.xlu0 %v13113_v6, %s12500_s21 }
  0xa8   : > { %19985 = vst [vmem:[#allocation11_spill] sm:$0xff] %v13111_v5  ;;  %1762 = vst.msk [vmem:[#allocation4 + $0x518] sm:$0xff] %vm1064_vm7, %v13111_v5  ;;  %v13119_v9 = vld [vmem:[#allocation2 + $0xe0] sm:$0xff] }
  0xa9   : > { %1083 = vst.msk [vmem:[#allocation4 + $0x90] sm:$0xff] %vm1064_vm7, %v13113_v6  ;;  %v13125_v11 = vld [vmem:[#allocation2 + $0xda] sm:$0xff]  ;;  %1084 = vst.msk [vmem:[#allocation4 + $0x98] sm:$0xff] %vm1064_vm7, %v13119_v9  ;;  %1175 = vrot.lane.b32.xlu1 %v13119_v9, %s12500_s21  ;;  %v2147_v54 = vld [vmem:[#allocation4 + $0x2c8] sm:$0xff] }
  0xaa   : > { %19986 = vst [vmem:[#allocation12_spill] sm:$0xff] %v13125_v11  ;;  %1038 = vst.msk [vmem:[#allocation2 + $0x109] sm:$0xff] %vm934_vm6, %v1004_v8  ;;  %v2144_v8 = vld [vmem:[#allocation4 + $0x2b0] sm:$0xff] }
  0xab   : > { %1422 = vst.msk [vmem:[#allocation4 + $0x2d0] sm:$0xff] %vm1064_vm7, %v13123_v10  ;;  %1761 = vst.msk [vmem:[#allocation4 + $0x510] sm:$0xff] %vm1064_vm7, %v13125_v11  ;;  %v13139_v12 = vld [vmem:[#allocation2 + $0xf9] sm:$0xff]  ;;  %v13199_v11 = vsub.s32 %v2278_v55, %v2280_v62  ;;  %v2970_v3 = vcombine.low %v2140_v63, %v2144_v8 }
  0xac   : > { %v13141_v13 = vld [vmem:[#allocation2 + $0xfa] sm:$0xff]  ;;  %v13143_v14 = vld [vmem:[#allocation2 + $0xf0] sm:$0xff]  ;;  %1425 = vst.msk [vmem:[#allocation4 + $0x2e8] sm:$0xff] %vm1064_vm7, %v13139_v12 }
  0xad   : > { %19987 = vst [vmem:[#allocation13_spill] sm:$0xff] %v13141_v13  ;;  %1764 = vst.msk [vmem:[#allocation4 + $0x528] sm:$0xff] %vm1064_vm7, %v13141_v13  ;;  %v13149_v15 = vld [vmem:[#allocation2 + $0xf8] sm:$0xff]  ;;  %1177 = vrot.lane.b32.xlu0 %v13143_v14, %s12500_s21 }
  0xae   : > { %1085 = vst.msk [vmem:[#allocation4 + $0xa0] sm:$0xff] %vm1064_vm7, %v13143_v14  ;;  %v13153_v16 = vld [vmem:[#allocation2 + $0xf1] sm:$0xff]  ;;  %1086 = vst.msk [vmem:[#allocation4 + $0xa8] sm:$0xff] %vm1064_vm7, %v13149_v15  ;;  %1179 = vrot.lane.b32.xlu1 %v13149_v15, %s12500_s21 }
  0xaf   : > { %v13155_v17 = vld [vmem:[#allocation2 + $0xf2] sm:$0xff]  ;;  %1424 = vst.msk [vmem:[#allocation4 + $0x2e0] sm:$0xff] %vm1064_vm7, %v13153_v16  ;;  %19991 = vst [vmem:[#allocation17_spill] sm:$0xff] %v13199_v11 }
  0xb0   : > { %19988 = vst [vmem:[#allocation14_spill] sm:$0xff] %v13155_v17  ;;  %1763 = vst.msk [vmem:[#allocation4 + $0x520] sm:$0xff] %vm1064_vm7, %v13155_v17  ;;  %v13167_v21 = vld [vmem:[#allocation2 + $0x111] sm:$0xff] }
  0xb1   : > { %v13169_v23 = vld [vmem:[#allocation2 + $0x112] sm:$0xff]  ;;  %v13171_v24 = vld [vmem:[#allocation2 + $0x108] sm:$0xff]  ;;  %1427 = vst.msk [vmem:[#allocation4 + $0x2f8] sm:$0xff] %vm1064_vm7, %v13167_v21 }
  0xb2   : > { %19989 = vst [vmem:[#allocation15_spill] sm:$0xff] %v13169_v23  ;;  %1766 = vst.msk [vmem:[#allocation4 + $0x538] sm:$0xff] %vm1064_vm7, %v13169_v23  ;;  %v13177_v30 = vld [vmem:[#allocation2 + $0x110] sm:$0xff]  ;;  %1181 = vrot.lane.b32.xlu0 %v13171_v24, %s12500_s21  ;;  %v4806_v23 = vcombine.low %v2141_v26, %v2145_v47  ;;  %v2149_v5 = vld [vmem:[#allocation4 + $0x2d8] sm:$0xff] }
  0xb3   : > { %1087 = vst.msk [vmem:[#allocation4 + $0xb0] sm:$0xff] %vm1064_vm7, %v13171_v24  ;;  %v13181_v31 = vld [vmem:[#allocation2 + $0x109] sm:$0xff]  ;;  %1088 = vst.msk [vmem:[#allocation4 + $0xb8] sm:$0xff] %vm1064_vm7, %v13177_v30  ;;  %1183 = vrot.lane.b32.xlu1 %v13177_v30, %s12500_s21 }
  0xb4   : > { %v13183_v38 = vld [vmem:[#allocation2 + $0x10a] sm:$0xff]  ;;  %1426 = vst.msk [vmem:[#allocation4 + $0x2f0] sm:$0xff] %vm1064_vm7, %v13181_v31  ;;  %v13207_v25 = vrot.slane %v4806_v23, %v13199_v11 }
  0xb5   : > { %19990 = vst [vmem:[#allocation16_spill] sm:$0xff] %v13183_v38  ;;  %1765 = vst.msk [vmem:[#allocation4 + $0x530] sm:$0xff] %vm1064_vm7, %v13183_v38  ;;  %v2151_v18 = vld [vmem:[#allocation4 + $0x2e8] sm:$0xff]  ;;  %v2146_v38 = vld [vmem:[#allocation4 + $0x2c0] sm:$0xff] }
  0xb6   : > { %1298 = vrot.lane.b32.xlu0 %v12963_v29, %s12502_s22  ;;  %v4822_v13 = vcombine.low %v2147_v54, %v2151_v18  ;;  %v2150_v17 = vld [vmem:[#allocation4 + $0x2e0] sm:$0xff]  ;;  %v2148_v52 = vld [vmem:[#allocation4 + $0x2d0] sm:$0xff]  ;;  %v13204_v29 = vrot.slane %v4790_v1, %v13199_v11  ;;  %v20002_v18 = vld [vmem:[#allocation7_spill] sm:$0xff] }
  0xb7   : > { %1300 = vrot.lane.b32.xlu1 %v12969_v32, %s12502_s22  ;;  %v2986_v44 = vcombine.low %v2146_v38, %v2150_v17  ;;  %v13215_v17 = vrot.slane %v2954_v60, %v13199_v11 }
  0xb8   : > { %v2153_v58 = vld [vmem:[#allocation4 + $0x2f8] sm:$0xff]  ;;  %v13210_v32 = vrot.slane %v4822_v13, %v13199_v11 }
  0xb9   : > { %v4838_v26 = vcombine.low %v2149_v5, %v2153_v58  ;;  %v13224_v23 = vrot.slane %v2986_v44, %v13199_v11 }
  0xba   : > { %1302 = vrot.lane.b32.xlu0 %v12993_v37, %s12502_s22  ;;  %v13218_v37 = vrot.slane %v2970_v3, %v13199_v11 }
  0xbb   : > { %v2152_v46 = vld [vmem:[#allocation4 + $0x2f0] sm:$0xff]  ;;  %1304 = vrot.lane.b32.xlu1 %v12999_v40, %s12502_s22  ;;  %v13221_v38 = vrot.slane %v4838_v26, %v13199_v11  ;;  %v4854_v40 = vcombine.low %v13204_v29, %v13207_v25  ;;  %v20003_v26 = vld [vmem:[#allocation10_spill] sm:$0xff] }
  0xbc   : > { %v3002_v1 = vcombine.low %v2148_v52, %v2152_v46  ;;  %v13237_v52 = vsub.s32 %v2342_v39, %v2280_v62  ;;  %v3018_v44 = vcombine.low %v13215_v17, %v13218_v37  ;;  %v20004_v46 = vld [vmem:[#allocation9_spill] sm:$0xff] }
  0xbd   : > { %v4886_v60 = vcombine.low %v13210_v32, %v13221_v38 }
  0xbe   : > { %v13227_v58 = vrot.slane %v3002_v1, %v13199_v11  ;;  %1306 = vrot.lane.b32.xlu0 %v13023_v45, %s12502_s22  ;;  %19992 = vst [vmem:[#allocation18_spill] sm:$0xff] %v13237_v52  ;;  %v13246_v45 = vrot.slane %v4854_v40, %v13237_v52  ;;  %v20005_v40 = vld [vmem:[#allocation12_spill] sm:$0xff] }
  0xbf   : > { %1308 = vrot.lane.b32.xlu1 %v13029_v48, %s12502_s22  ;;  %v13249_v5 = vrot.slane %v4886_v60, %v13237_v52  ;;  %v13254_v48 = vrot.slane %v3018_v44, %v13237_v52  ;;  %v20006_v60 = vld [vmem:[#allocation11_spill] sm:$0xff] }
  0xc0   : > { %v3050_v3 = vcombine.low %v13224_v23, %v13227_v58  ;;  %19993 = vst [vmem:[#allocation19_spill] sm:$0xff] %v13246_v45  ;;  %v2077_v45 = vld [vmem:[#allocation4 + $0x98] sm:$0xff] }
  0xc1   : > { %19994 = vst [vmem:[#allocation20_spill] sm:$0xff] %v13249_v5  ;;  %19995 = vst [vmem:[#allocation21_spill] sm:$0xff] %v13254_v48 }
  0xc2   : > { %1310 = vrot.lane.b32.xlu0 %v13053_v53, %s12502_s22  ;;  %v13257_v13 = vrot.slane %v3050_v3, %v13237_v52 }
  0xc3   : > { %1312 = vrot.lane.b32.xlu1 %v13059_v56, %s12502_s22  ;;  %v2218_v56 = vld [vmem:[#allocation4 + $0x500] sm:$0xff] }
  0xc4   : > { %19996 = vst [vmem:[#allocation22_spill] sm:$0xff] %v13257_v13 }
  0xc6   : > { %1314 = vrot.lane.b32.xlu0 %v13083_v61, %s12502_s22  ;;  %v2220_v61 = vld [vmem:[#allocation4 + $0x510] sm:$0xff] }
  0xc7   : > { %1316 = vrot.lane.b32.xlu1 %v13089_v0, %s12502_s22  ;;  %v2222_v0 = vld [vmem:[#allocation4 + $0x520] sm:$0xff] }
  0xca   : > { %1318 = vrot.lane.b32.xlu0 %v13113_v6, %s12502_s22  ;;  %v2224_v6 = vld [vmem:[#allocation4 + $0x530] sm:$0xff] }
  0xcb   : > { %1320 = vrot.lane.b32.xlu1 %v13119_v9, %s12502_s22  ;;  %v3635_v9 = vcombine.high %v2218_v56, %v2222_v0  ;;  %v20007_v56 = vld [vmem:[#allocation14_spill] sm:$0xff] }
  0xcd   : > { %v13311_v54 = vrot.slane %v3635_v9, %v13199_v11  ;;  %v20009_v9 = vld [vmem:[#allocation16_spill] sm:$0xff] }
  0xce   : > { %1322 = vrot.lane.b32.xlu0 %v13143_v14, %s12502_s22  ;;  %v3651_v14 = vcombine.high %v2220_v61, %v2224_v6  ;;  %v20008_v61 = vld [vmem:[#allocation13_spill] sm:$0xff] }
  0xcf   : > { %1324 = vrot.lane.b32.xlu1 %v13149_v15, %s12502_s22  ;;  %19997 = vst [vmem:[#allocation23_spill] sm:$0xff] %v13311_v54 }
  0xd0   : > { %v13314_v55 = vrot.slane %v3651_v14, %v13199_v11  ;;  %v20010_v14 = vld [vmem:[#allocation15_spill] sm:$0xff] }
  0xd2   : > { %1326 = vrot.lane.b32.xlu0 %v13171_v24, %s12502_s22  ;;  %19998 = vst [vmem:[#allocation24_spill] sm:$0xff] %v13314_v55 }
  0xd3   : > { %1328 = vrot.lane.b32.xlu1 %v13177_v30, %s12502_s22  ;;  %v595_v30 = vld [vmem:[%s19489_s2 + $0x8] sm:$0xff] }
  0xd6   : > { %1492 = vrot.lane.b32.xlu0 %v12973_v33, %s12500_s21 }
  0xd7   : > { %1494 = vrot.lane.b32.xlu1 %v12959_v27, %s12500_s21 }
  0xda   : > { %1496 = vrot.lane.b32.xlu0 %v13003_v41, %s12500_s21 }
  0xdb   : > { %1498 = vrot.lane.b32.xlu1 %v12989_v35, %s12500_s21 }
  0xde   : > { %1500 = vrot.lane.b32.xlu0 %v13033_v49, %s12500_s21 }
  0xdf   : > { %1502 = vrot.lane.b32.xlu1 %v13019_v43, %s12500_s21 }
  0xe2   : > { %1504 = vrot.lane.b32.xlu0 %v13063_v57, %s12500_s21 }
  0xe3   : > { %1506 = vrot.lane.b32.xlu1 %v13049_v51, %s12500_s21 }
  0xe6   : > { %1508 = vrot.lane.b32.xlu0 %v13093_v2, %s12500_s21 }
  0xe7   : > { %1510 = vrot.lane.b32.xlu1 %v13079_v59, %s12500_s21 }
  0xe9   : > { %v11526_v15 = vpop.f32.mrb[0].mxu0 }
  0xea   : > { %1512 = vrot.lane.b32.xlu0 %v13123_v10, %s12500_s21  ;;  %v575_v24 = vpop.f32.mrb[1].mxu0 }
  0xeb   : > { %1514 = vrot.lane.b32.xlu1 %v13109_v4, %s12500_s21  ;;  %11530 = vmatprep.subr.mxu1 %v575_v24 }
  0xec   : > { %11531 = vmatpush3.msra.mxu1 %v575_v24 }
  0xed   : > { %11533 = vmatmul.mubr.msk.f32.vlgmr.msra.gmra.mrb[0].mxu1 %vm496_vm5, %v595_v30  ;;  %11535 = vmatprep.subr.mxu1 %v11526_v15  ;;  %v11529_v7 = vpop.f32.mrb[2].mxu0 }
  0xee   : > { %1516 = vrot.lane.b32.xlu0 %v13153_v16, %s12500_s21  ;;  %11536 = vmatpush3.msra.mxu1 %v11526_v15  ;;  %v585_v8 = vpop.f32.mrb[3].mxu0 }
  0xef   : > { %1518 = vrot.lane.b32.xlu1 %v13139_v12, %s12500_s21  ;;  %11537 = vmatprep.mubr.msk.f32.mxu1 %vm496_vm5, %v12951_v22 }
  0xf0   : > { %11540 = vmatprep.subr.mxu1 %v585_v8 }
  0xf1   : > { %11538 = vmatmul.mubr.msk.f32.vlgmr.msra.gmra.mrb[2].mxu1 %vm496_vm5, %v595_v30 }
  0xf2   : > { %1520 = vrot.lane.b32.xlu0 %v13181_v31, %s12500_s21  ;;  %11541 = vmatpush3.msra.mxu1 %v585_v8 }
  0xf3   : > { %1522 = vrot.lane.b32.xlu1 %v13167_v21, %s12500_s21  ;;  %11542 = vmatprep.mubr.msk.f32.mxu1 %vm496_vm5, %v12951_v22 }
  0xf4   : > { %11545 = vmatprep.subr.mxu1 %v11529_v7 }
  0xf5   : > { %11543 = vmatmul.mubr.msk.f32.vlgmr.msra.gmra.mrb[4].mxu1 %vm496_vm5, %v595_v30 }
  0xf6   : > { %1637 = vrot.lane.b32.xlu0 %v12973_v33, %s12502_s22  ;;  %11546 = vmatpush3.msra.mxu1 %v11529_v7 }
  0xf7   : > { %1639 = vrot.lane.b32.xlu1 %v12959_v27, %s12502_s22  ;;  %11547 = vmatprep.mubr.msk.f32.mxu1 %vm496_vm5, %v12951_v22  ;;  %v19999_v27 = vmov 0.0  }
  0xf9   : > { %11548 = vmatmul.mubr.msk.f32.vlgmr.msra.gmra.mrb[6].mxu1 %vm496_vm5, %v595_v30 }
  0xfa   : > { %1641 = vrot.lane.b32.xlu0 %v13003_v41, %s12502_s22  ;;  %11395 = vmatprep.mubr.f32.mxu1 %v19999_v27 }
  0xfb   : > { %1643 = vrot.lane.b32.xlu1 %v12989_v35, %s12502_s22 }
  0xfe   : > { %1645 = vrot.lane.b32.xlu0 %v13033_v49, %s12502_s22 }
  0xff   : > { %1647 = vrot.lane.b32.xlu1 %v13019_v43, %s12502_s22 }
 0x101   : > { %v1154_v22 = vpop.permute.xlu0 %1153 }
 0x102   : > { %1649 = vrot.lane.b32.xlu0 %v13063_v57, %s12502_s22  ;;  %1218 = vst.msk [vmem:[#allocation4 + $0x100] sm:$0xff] %vm1064_vm7, %v1154_v22 }
 0x103   : > { %1651 = vrot.lane.b32.xlu1 %v13049_v51, %s12502_s22  ;;  %v1156_v33 = vpop.permute.xlu1 %1155 }
 0x104   : > { %1219 = vst.msk [vmem:[#allocation4 + $0x108] sm:$0xff] %vm1064_vm7, %v1156_v33 }
 0x105   : > { %v1158_v35 = vpop.permute.xlu0 %1157 }
 0x106   : > { %1653 = vrot.lane.b32.xlu0 %v13093_v2, %s12502_s22  ;;  %1220 = vst.msk [vmem:[#allocation4 + $0x110] sm:$0xff] %vm1064_vm7, %v1158_v35 }
 0x107   : > { %1655 = vrot.lane.b32.xlu1 %v13079_v59, %s12502_s22  ;;  %v1160_v41 = vpop.permute.xlu1 %1159 }
 0x108   : > { %1221 = vst.msk [vmem:[#allocation4 + $0x118] sm:$0xff] %vm1064_vm7, %v1160_v41 }
 0x109   : > { %v2090_v35 = vld [vmem:[#allocation4 + $0x100] sm:$0xff] }
 0x10a   : > { %1657 = vrot.lane.b32.xlu0 %v13123_v10, %s12502_s22 }
 0x10b   : > { %1659 = vrot.lane.b32.xlu1 %v13109_v4, %s12502_s22  ;;  %v1162_v43 = vpop.permute.xlu0 %1161 }
 0x10c   : > { %1222 = vst.msk [vmem:[#allocation4 + $0x120] sm:$0xff] %vm1064_vm7, %v1162_v43 }
 0x10d   : > { %v1164_v49 = vpop.permute.xlu1 %1163  ;;  %v2092_v41 = vld [vmem:[#allocation4 + $0x110] sm:$0xff] }
 0x10e   : > { %1661 = vrot.lane.b32.xlu0 %v13153_v16, %s12502_s22  ;;  %1223 = vst.msk [vmem:[#allocation4 + $0x128] sm:$0xff] %vm1064_vm7, %v1164_v49 }
 0x10f   : > { %1663 = vrot.lane.b32.xlu1 %v13139_v12, %s12502_s22  ;;  %v1166_v51 = vpop.permute.xlu0 %1165  ;;  %v20000_v12 = vld [vmem:[#allocation6_spill] sm:$0xff] }
 0x110   : > { %1224 = vst.msk [vmem:[#allocation4 + $0x130] sm:$0xff] %vm1064_vm7, %v1166_v51 }
 0x111   : > { %v1168_v57 = vpop.permute.xlu1 %1167 }
 0x112   : > { %1665 = vrot.lane.b32.xlu0 %v13181_v31, %s12502_s22  ;;  %1225 = vst.msk [vmem:[#allocation4 + $0x138] sm:$0xff] %vm1064_vm7, %v1168_v57  ;;  %v20001_v31 = vld [vmem:[#allocation8_spill] sm:$0xff] }
 0x113   : > { %1667 = vrot.lane.b32.xlu1 %v13167_v21, %s12502_s22  ;;  %v1170_v59 = vpop.permute.xlu0 %1169  ;;  %v2094_v43 = vld [vmem:[#allocation4 + $0x120] sm:$0xff] }
 0x114   : > { %1226 = vst.msk [vmem:[#allocation4 + $0x140] sm:$0xff] %vm1064_vm7, %v1170_v59 }
 0x115   : > { %v1172_v2 = vpop.permute.xlu1 %1171 }
 0x116   : > { %1831 = vrot.lane.b32.xlu0 %v12975_v34, %s12500_s21  ;;  %1227 = vst.msk [vmem:[#allocation4 + $0x148] sm:$0xff] %vm1064_vm7, %v1172_v2 }
 0x117   : > { %1833 = vrot.lane.b32.xlu1 %v12961_v28, %s12500_s21  ;;  %v2096_v49 = vld [vmem:[#allocation4 + $0x130] sm:$0xff] }
 0x119   : > { %v1174_v4 = vpop.permute.xlu0 %1173 }
 0x11a   : > { %1835 = vrot.lane.b32.xlu0 %v13005_v42, %s12500_s21  ;;  %1228 = vst.msk [vmem:[#allocation4 + $0x150] sm:$0xff] %vm1064_vm7, %v1174_v4 }
 0x11b   : > { %1837 = vrot.lane.b32.xlu1 %v12991_v36, %s12500_s21  ;;  %v1176_v10 = vpop.permute.xlu1 %1175  ;;  %v2098_v51 = vld [vmem:[#allocation4 + $0x140] sm:$0xff] }
 0x11c   : > { %1229 = vst.msk [vmem:[#allocation4 + $0x158] sm:$0xff] %vm1064_vm7, %v1176_v10 }
 0x11e   : > { %1839 = vrot.lane.b32.xlu0 %v13035_v50, %s12500_s21 }
 0x11f   : > { %1841 = vrot.lane.b32.xlu1 %v20000_v12, %s12500_s21  ;;  %v1178_v16 = vpop.permute.xlu0 %1177 }
 0x120   : > { %v1180_v21 = vpop.permute.xlu1 %1179  ;;  %1230 = vst.msk [vmem:[#allocation4 + $0x160] sm:$0xff] %vm1064_vm7, %v1178_v16  ;;  %v2562_v16 = vcombine.low %v2092_v41, %v2096_v49 }
 0x121   : > { %1231 = vst.msk [vmem:[#allocation4 + $0x168] sm:$0xff] %vm1064_vm7, %v1180_v21  ;;  %v2100_v59 = vld [vmem:[#allocation4 + $0x150] sm:$0xff] }
 0x122   : > { %1843 = vrot.lane.b32.xlu0 %v20001_v31, %s12500_s21 }
 0x123   : > { %1845 = vrot.lane.b32.xlu1 %v20002_v18, %s12500_s21 }
 0x124   : > { %v1182_v19 = vpop.permute.xlu0 %1181 }
 0x125   : > { %v1184_v20 = vpop.permute.xlu1 %1183  ;;  %1232 = vst.msk [vmem:[#allocation4 + $0x170] sm:$0xff] %vm1064_vm7, %v1182_v19  ;;  %v2091_v19 = vld [vmem:[#allocation4 + $0x108] sm:$0xff] }
 0x126   : > { %1233 = vst.msk [vmem:[#allocation4 + $0x178] sm:$0xff] %vm1064_vm7, %v1184_v20  ;;  %1847 = vrot.lane.b32.xlu0 %v20003_v26, %s12500_s21  ;;  %v2093_v20 = vld [vmem:[#allocation4 + $0x118] sm:$0xff] }
 0x127   : > { %1849 = vrot.lane.b32.xlu1 %v20004_v46, %s12500_s21  ;;  %v2102_v2 = vld [vmem:[#allocation4 + $0x160] sm:$0xff] }
 0x128   : > { %v1299_v39 = vpop.permute.xlu0 %1298  ;;  %v2578_v21 = vcombine.low %v2098_v51, %v2102_v2 }
 0x129   : > { %v1301_v1 = vpop.permute.xlu1 %1300  ;;  %1363 = vst.msk [vmem:[#allocation4 + $0x1c0] sm:$0xff] %vm1064_vm7, %v1299_v39  ;;  %v2097_v39 = vld [vmem:[#allocation4 + $0x138] sm:$0xff] }
 0x12a   : > { %1364 = vst.msk [vmem:[#allocation4 + $0x1c8] sm:$0xff] %vm1064_vm7, %v1301_v1  ;;  %1851 = vrot.lane.b32.xlu0 %v20005_v40, %s12500_s21  ;;  %v2099_v1 = vld [vmem:[#allocation4 + $0x148] sm:$0xff] }
 0x12b   : > { %1853 = vrot.lane.b32.xlu1 %v20006_v60, %s12500_s21 }
 0x12c   : > { %v1303_v44 = vpop.permute.xlu0 %1302  ;;  %v2104_v4 = vld [vmem:[#allocation4 + $0x170] sm:$0xff] }
 0x12d   : > { %v1305_v3 = vpop.permute.xlu1 %1304  ;;  %1365 = vst.msk [vmem:[#allocation4 + $0x1d0] sm:$0xff] %vm1064_vm7, %v1303_v44  ;;  %v2105_v44 = vld [vmem:[#allocation4 + $0x178] sm:$0xff] }
 0x12e   : > { %1366 = vst.msk [vmem:[#allocation4 + $0x1d8] sm:$0xff] %vm1064_vm7, %v1305_v3  ;;  %1855 = vrot.lane.b32.xlu0 %v20007_v56, %s12500_s21 }
 0x12f   : > { %1857 = vrot.lane.b32.xlu1 %v20008_v61, %s12500_s21 }
 0x130   : > { %v1307_v0 = vpop.permute.xlu0 %1306 }
 0x131   : > { %v1309_v6 = vpop.permute.xlu1 %1308  ;;  %1367 = vst.msk [vmem:[#allocation4 + $0x1e0] sm:$0xff] %vm1064_vm7, %v1307_v0 }
 0x132   : > { %1368 = vst.msk [vmem:[#allocation4 + $0x1e8] sm:$0xff] %vm1064_vm7, %v1309_v6  ;;  %1859 = vrot.lane.b32.xlu0 %v20009_v9, %s12500_s21 }
 0x133   : > { %1861 = vrot.lane.b32.xlu1 %v20010_v14, %s12500_s21 }
 0x134   : > { %v1311_v15 = vpop.permute.xlu0 %1310 }
 0x135   : > { %v1313_v24 = vpop.permute.xlu1 %1312  ;;  %1369 = vst.msk [vmem:[#allocation4 + $0x1f0] sm:$0xff] %vm1064_vm7, %v1311_v15 }
 0x136   : > { %1370 = vst.msk [vmem:[#allocation4 + $0x1f8] sm:$0xff] %vm1064_vm7, %v1313_v24  ;;  %1976 = vrot.lane.b32.xlu0 %v12975_v34, %s12502_s22  ;;  %v4398_v24 = vcombine.low %v2093_v20, %v2097_v39 }
 0x137   : > { %1978 = vrot.lane.b32.xlu1 %v12961_v28, %s12502_s22 }
 0x138   : > { %v1315_v30 = vpop.permute.xlu0 %1314 }
 0x139   : > { %v1317_v7 = vpop.permute.xlu1 %1316  ;;  %1371 = vst.msk [vmem:[#allocation4 + $0x200] sm:$0xff] %vm1064_vm7, %v1315_v30 }
 0x13a   : > { %1372 = vst.msk [vmem:[#allocation4 + $0x208] sm:$0xff] %vm1064_vm7, %v1317_v7  ;;  %1980 = vrot.lane.b32.xlu0 %v13005_v42, %s12502_s22 }
 0x13b   : > { %1982 = vrot.lane.b32.xlu1 %v12991_v36, %s12502_s22 }
 0x13c   : > { %v1319_v8 = vpop.permute.xlu0 %1318 }
 0x13d   : > { %v1321_v22 = vpop.permute.xlu1 %1320  ;;  %1373 = vst.msk [vmem:[#allocation4 + $0x210] sm:$0xff] %vm1064_vm7, %v1319_v8 }
 0x13e   : > { %1374 = vst.msk [vmem:[#allocation4 + $0x218] sm:$0xff] %vm1064_vm7, %v1321_v22  ;;  %1984 = vrot.lane.b32.xlu0 %v13035_v50, %s12502_s22 }
 0x13f   : > { %1986 = vrot.lane.b32.xlu1 %v20000_v12, %s12502_s22  ;;  %v2546_v12 = vcombine.low %v2090_v35, %v2094_v43 }
 0x140   : > { %v1323_v28 = vpop.permute.xlu0 %1322 }
 0x141   : > { %v1325_v34 = vpop.permute.xlu1 %1324  ;;  %1375 = vst.msk [vmem:[#allocation4 + $0x220] sm:$0xff] %vm1064_vm7, %v1323_v28  ;;  %v13470_v3 = vrot.slane %v2546_v12, %v13199_v11 }
 0x142   : > { %1376 = vst.msk [vmem:[#allocation4 + $0x228] sm:$0xff] %vm1064_vm7, %v1325_v34  ;;  %1988 = vrot.lane.b32.xlu0 %v20001_v31, %s12502_s22  ;;  %v2594_v31 = vcombine.low %v2100_v59, %v2104_v4 }
 0x143   : > { %1990 = vrot.lane.b32.xlu1 %v20002_v18, %s12502_s22  ;;  %20011 = vst [vmem:[#allocation6_spill] sm:$0xff] %v13470_v3 }
 0x144   : > { %v1327_v36 = vpop.permute.xlu0 %1326  ;;  %v13479_v0 = vrot.slane %v2594_v31, %v13199_v11 }
 0x145   : > { %v1329_v42 = vpop.permute.xlu1 %1328  ;;  %1377 = vst.msk [vmem:[#allocation4 + $0x230] sm:$0xff] %vm1064_vm7, %v1327_v36  ;;  %v13492_v36 = vrot.slane %v4398_v24, %v13199_v11 }
 0x146   : > { %1378 = vst.msk [vmem:[#allocation4 + $0x238] sm:$0xff] %vm1064_vm7, %v1329_v42  ;;  %1992 = vrot.lane.b32.xlu0 %v20003_v26, %s12502_s22  ;;  %20014 = vst [vmem:[#allocation10_spill] sm:$0xff] %v13479_v0 }
 0x147   : > { %1994 = vrot.lane.b32.xlu1 %v20004_v46, %s12502_s22  ;;  %v2095_v46 = vld [vmem:[#allocation4 + $0x128] sm:$0xff]  ;;  %20016 = vst [vmem:[#allocation12_spill] sm:$0xff] %v13492_v36 }
 0x148   : > { %v1493_v50 = vpop.permute.xlu0 %1492  ;;  %v4382_v15 = vcombine.low %v2091_v19, %v2095_v46 }
 0x149   : > { %v1495_v33 = vpop.permute.xlu1 %1494  ;;  %1557 = vst.msk [vmem:[#allocation4 + $0x340] sm:$0xff] %vm1064_vm7, %v1493_v50 }
 0x14a   : > { %1558 = vst.msk [vmem:[#allocation4 + $0x348] sm:$0xff] %vm1064_vm7, %v1495_v33  ;;  %1996 = vrot.lane.b32.xlu0 %v20005_v40, %s12502_s22  ;;  %v2101_v40 = vld [vmem:[#allocation4 + $0x158] sm:$0xff]  ;;  %v13489_v34 = vrot.slane %v4382_v15, %v13199_v11 }
 0x14b   : > { %1998 = vrot.lane.b32.xlu1 %v20006_v60, %s12502_s22  ;;  %v2103_v60 = vld [vmem:[#allocation4 + $0x168] sm:$0xff] }
 0x14c   : > { %v1497_v57 = vpop.permute.xlu0 %1496  ;;  %v4414_v30 = vcombine.low %v2099_v1, %v2103_v60  ;;  %20015 = vst [vmem:[#allocation9_spill] sm:$0xff] %v13489_v34  ;;  %v4446_v2 = vcombine.low %v13489_v34, %v13492_v36  ;;  %v12397_v34 = vld [vmem:[#allocation4 + $0x2b0] sm:$0xff] }
 0x14d   : > { %v1499_v10 = vpop.permute.xlu1 %1498  ;;  %1559 = vst.msk [vmem:[#allocation4 + $0x350] sm:$0xff] %vm1064_vm7, %v1497_v57 }
 0x14e   : > { %1560 = vst.msk [vmem:[#allocation4 + $0x358] sm:$0xff] %vm1064_vm7, %v1499_v10  ;;  %2000 = vrot.lane.b32.xlu0 %v20007_v56, %s12502_s22  ;;  %v13473_v56 = vrot.slane %v2562_v16, %v13199_v11  ;;  %v13495_v42 = vrot.slane %v4414_v30, %v13199_v11  ;;  %v13523_v20 = vrot.slane %v4446_v2, %v13237_v52 }
 0x14f   : > { %2002 = vrot.lane.b32.xlu1 %v20008_v61, %s12502_s22  ;;  %v13476_v61 = vrot.slane %v2578_v21, %v13199_v11 }
 0x150   : > { %v1501_v18 = vpop.permute.xlu0 %1500  ;;  %20012 = vst [vmem:[#allocation8_spill] sm:$0xff] %v13473_v56  ;;  %v2610_v7 = vcombine.low %v13470_v3, %v13473_v56  ;;  %20017 = vst [vmem:[#allocation11_spill] sm:$0xff] %v13495_v42  ;;  %v2162_v33 = vld [vmem:[#allocation4 + $0x340] sm:$0xff] }
 0x151   : > { %v1503_v26 = vpop.permute.xlu1 %1502  ;;  %1561 = vst.msk [vmem:[#allocation4 + $0x360] sm:$0xff] %vm1064_vm7, %v1501_v18  ;;  %20013 = vst [vmem:[#allocation7_spill] sm:$0xff] %v13476_v61  ;;  %v2642_v8 = vcombine.low %v13476_v61, %v13479_v0 }
 0x152   : > { %1562 = vst.msk [vmem:[#allocation4 + $0x368] sm:$0xff] %vm1064_vm7, %v1503_v26  ;;  %2004 = vrot.lane.b32.xlu0 %v20009_v9, %s12502_s22  ;;  %v13502_v41 = vrot.slane %v2610_v7, %v13237_v52  ;;  %20023 = vst [vmem:[#allocation26_spill] sm:$0xff] %v13523_v20 }
 0x153   : > { %2006 = vrot.lane.b32.xlu1 %v20010_v14, %s12502_s22  ;;  %v4430_v14 = vcombine.low %v2101_v40, %v2105_v44  ;;  %v13505_v43 = vrot.slane %v2642_v8, %v13237_v52 }
 0x154   : > { %v1505_v6 = vpop.permute.xlu0 %1504  ;;  %20019 = vst [vmem:[#allocation13_spill] sm:$0xff] %v13502_v41  ;;  %v2164_v49 = vld [vmem:[#allocation4 + $0x350] sm:$0xff] }
 0x155   : > { %v1507_v9 = vpop.permute.xlu1 %1506  ;;  %1563 = vst.msk [vmem:[#allocation4 + $0x370] sm:$0xff] %vm1064_vm7, %v1505_v6  ;;  %v13498_v50 = vrot.slane %v4430_v14, %v13199_v11  ;;  %20020 = vst [vmem:[#allocation16_spill] sm:$0xff] %v13505_v43  ;;  %v13935_v43 = vld [vmem:[#allocation4 + $0x220] sm:$0xff] }
 0x156   : > { %1564 = vst.msk [vmem:[#allocation4 + $0x378] sm:$0xff] %vm1064_vm7, %v1507_v9  ;;  %20076 = vst [vmem:[#allocation78_spill] sm:$0xff] %v13935_v43 }
 0x157   : > { %20018 = vst [vmem:[#allocation14_spill] sm:$0xff] %v13498_v50  ;;  %v4478_v4 = vcombine.low %v13495_v42, %v13498_v50  ;;  %v12396_v50 = vld [vmem:[#allocation4 + $0x290] sm:$0xff] }
 0x158   : > { %v1509_v22 = vpop.permute.xlu0 %1508  ;;  %v2166_v35 = vld [vmem:[#allocation4 + $0x360] sm:$0xff]  ;;  %v2971_v36 = vcombine.high %v12396_v50, %v12397_v34  ;;  %v13892_v50 = vld [vmem:[#allocation4 + $0x208] sm:$0xff] }
 0x159   : > { %v1511_v28 = vpop.permute.xlu1 %1510  ;;  %1565 = vst.msk [vmem:[#allocation4 + $0x380] sm:$0xff] %vm1064_vm7, %v1509_v22  ;;  %v3123_v10 = vcombine.high %v2162_v33, %v2166_v35  ;;  %v13526_v26 = vrot.slane %v4478_v4, %v13237_v52  ;;  %20066 = vst [vmem:[#allocation68_spill] sm:$0xff] %v13892_v50 }
 0x15a   : > { %1566 = vst.msk [vmem:[#allocation4 + $0x388] sm:$0xff] %vm1064_vm7, %v1511_v28 }
 0x15b   : > { %v13514_v16 = vrot.slane %v3123_v10, %v13199_v11  ;;  %20024 = vst [vmem:[#allocation27_spill] sm:$0xff] %v13526_v26  ;;  %v2210_v26 = vld [vmem:[#allocation4 + $0x4c0] sm:$0xff] }
 0x15c   : > { %v1513_v51 = vpop.permute.xlu0 %1512  ;;  %v2168_v57 = vld [vmem:[#allocation4 + $0x370] sm:$0xff] }
 0x15d   : > { %v1515_v59 = vpop.permute.xlu1 %1514  ;;  %1567 = vst.msk [vmem:[#allocation4 + $0x390] sm:$0xff] %vm1064_vm7, %v1513_v51  ;;  %v3139_v12 = vcombine.high %v2164_v49, %v2168_v57  ;;  %20021 = vst [vmem:[#allocation15_spill] sm:$0xff] %v13514_v16 }
 0x15e   : > { %1568 = vst.msk [vmem:[#allocation4 + $0x398] sm:$0xff] %vm1064_vm7, %v1515_v59 }
 0x15f   : > { %v13519_v18 = vrot.slane %v3139_v12, %v13199_v11 }
 0x160   : > { %v1517_v31 = vpop.permute.xlu0 %1516  ;;  %v2170_v44 = vld [vmem:[#allocation4 + $0x380] sm:$0xff] }
 0x161   : > { %20022 = vst [vmem:[#allocation25_spill] sm:$0xff] %v13519_v18  ;;  %v1519_v19 = vpop.permute.xlu1 %1518  ;;  %1569 = vst.msk [vmem:[#allocation4 + $0x3a0] sm:$0xff] %vm1064_vm7, %v1517_v31 }
 0x162   : > { %1570 = vst.msk [vmem:[#allocation4 + $0x3a8] sm:$0xff] %vm1064_vm7, %v1519_v19 }
 0x164   : > { %v1521_v1 = vpop.permute.xlu0 %1520  ;;  %v2172_v30 = vld [vmem:[#allocation4 + $0x390] sm:$0xff] }
 0x165   : > { %v1523_v40 = vpop.permute.xlu1 %1522  ;;  %1571 = vst.msk [vmem:[#allocation4 + $0x3b0] sm:$0xff] %vm1064_vm7, %v1521_v1 }
 0x166   : > { %1572 = vst.msk [vmem:[#allocation4 + $0x3b8] sm:$0xff] %vm1064_vm7, %v1523_v40 }
 0x168   : > { %v1638_v6 = vpop.permute.xlu0 %1637  ;;  %v2174_v9 = vld [vmem:[#allocation4 + $0x3a0] sm:$0xff] }
 0x169   : > { %v1640_v15 = vpop.permute.xlu1 %1639  ;;  %1702 = vst.msk [vmem:[#allocation4 + $0x400] sm:$0xff] %vm1064_vm7, %v1638_v6  ;;  %v3227_v24 = vcombine.high %v2170_v44, %v2174_v9 }
 0x16a   : > { %1703 = vst.msk [vmem:[#allocation4 + $0x408] sm:$0xff] %vm1064_vm7, %v1640_v15 }
 0x16b   : > { %v13541_v22 = vrot.slane %v3227_v24, %v13199_v11 }
 0x16c   : > { %v1642_v14 = vpop.permute.xlu0 %1641  ;;  %v2176_v7 = vld [vmem:[#allocation4 + $0x3b0] sm:$0xff] }
 0x16d   : > { %v1644_v8 = vpop.permute.xlu1 %1643  ;;  %1704 = vst.msk [vmem:[#allocation4 + $0x410] sm:$0xff] %vm1064_vm7, %v1642_v14  ;;  %20025 = vst [vmem:[#allocation28_spill] sm:$0xff] %v13541_v22  ;;  %v3243_v28 = vcombine.high %v2172_v30, %v2176_v7 }
 0x16e   : > { %1705 = vst.msk [vmem:[#allocation4 + $0x418] sm:$0xff] %vm1064_vm7, %v1644_v8 }
 0x16f   : > { %v13545_v33 = vrot.slane %v3243_v28, %v13199_v11 }
 0x170   : > { %v1646_v35 = vpop.permute.xlu0 %1645  ;;  %v2186_v30 = vld [vmem:[#allocation4 + $0x400] sm:$0xff] }
 0x171   : > { %20026 = vst [vmem:[#allocation29_spill] sm:$0xff] %v13545_v33  ;;  %v1648_v49 = vpop.permute.xlu1 %1647  ;;  %1706 = vst.msk [vmem:[#allocation4 + $0x420] sm:$0xff] %vm1064_vm7, %v1646_v35  ;;  %v2187_v44 = vld [vmem:[#allocation4 + $0x408] sm:$0xff] }
 0x172   : > { %1707 = vst.msk [vmem:[#allocation4 + $0x428] sm:$0xff] %vm1064_vm7, %v1648_v49 }
 0x174   : > { %v1650_v59 = vpop.permute.xlu0 %1649  ;;  %v2188_v14 = vld [vmem:[#allocation4 + $0x410] sm:$0xff] }
 0x175   : > { %v1652_v2 = vpop.permute.xlu1 %1651  ;;  %1708 = vst.msk [vmem:[#allocation4 + $0x430] sm:$0xff] %vm1064_vm7, %v1650_v59  ;;  %v2189_v9 = vld [vmem:[#allocation4 + $0x418] sm:$0xff] }
 0x176   : > { %1709 = vst.msk [vmem:[#allocation4 + $0x438] sm:$0xff] %vm1064_vm7, %v1652_v2 }
 0x178   : > { %v1654_v4 = vpop.permute.xlu0 %1653  ;;  %v2190_v28 = vld [vmem:[#allocation4 + $0x420] sm:$0xff] }
 0x179   : > { %v1656_v10 = vpop.permute.xlu1 %1655  ;;  %1710 = vst.msk [vmem:[#allocation4 + $0x440] sm:$0xff] %vm1064_vm7, %v1654_v4  ;;  %v2191_v15 = vld [vmem:[#allocation4 + $0x428] sm:$0xff] }
 0x17a   : > { %1711 = vst.msk [vmem:[#allocation4 + $0x448] sm:$0xff] %vm1064_vm7, %v1656_v10  ;;  %v5198_v59 = vcombine.low %v2187_v44, %v2191_v15 }
 0x17c   : > { %v1658_v12 = vpop.permute.xlu0 %1657  ;;  %v2192_v35 = vld [vmem:[#allocation4 + $0x430] sm:$0xff]  ;;  %v13566_v47 = vrot.slane %v5198_v59, %v13199_v11 }
 0x17d   : > { %v1660_v31 = vpop.permute.xlu1 %1659  ;;  %1712 = vst.msk [vmem:[#allocation4 + $0x450] sm:$0xff] %vm1064_vm7, %v1658_v12  ;;  %v2193_v24 = vld [vmem:[#allocation4 + $0x438] sm:$0xff] }
 0x17e   : > { %1713 = vst.msk [vmem:[#allocation4 + $0x458] sm:$0xff] %vm1064_vm7, %v1660_v31  ;;  %v5214_v2 = vcombine.low %v2189_v9, %v2193_v24  ;;  %20027 = vst [vmem:[#allocation30_spill] sm:$0xff] %v13566_v47 }
 0x180   : > { %v1662_v19 = vpop.permute.xlu0 %1661  ;;  %v2194_v7 = vld [vmem:[#allocation4 + $0x440] sm:$0xff]  ;;  %v13569_v44 = vrot.slane %v5214_v2, %v13199_v11 }
 0x181   : > { %v1664_v1 = vpop.permute.xlu1 %1663  ;;  %1714 = vst.msk [vmem:[#allocation4 + $0x460] sm:$0xff] %vm1064_vm7, %v1662_v19  ;;  %v2195_v8 = vld [vmem:[#allocation4 + $0x448] sm:$0xff] }
 0x182   : > { %1715 = vst.msk [vmem:[#allocation4 + $0x468] sm:$0xff] %vm1064_vm7, %v1664_v1  ;;  %20028 = vst [vmem:[#allocation31_spill] sm:$0xff] %v13569_v44  ;;  %v5262_v2 = vcombine.low %v13566_v47, %v13569_v44  ;;  %v13870_v44 = vld [vmem:[#allocation4 + $0x4f0] sm:$0xff] }
 0x184   : > { %v1666_v40 = vpop.permute.xlu0 %1665  ;;  %v2196_v1 = vld [vmem:[#allocation4 + $0x450] sm:$0xff] }
 0x185   : > { %v1668_v6 = vpop.permute.xlu1 %1667  ;;  %1716 = vst.msk [vmem:[#allocation4 + $0x470] sm:$0xff] %vm1064_vm7, %v1666_v40  ;;  %v3362_v40 = vcombine.low %v2186_v30, %v2190_v28  ;;  %v2197_v60 = vld [vmem:[#allocation4 + $0x458] sm:$0xff] }
 0x186   : > { %1717 = vst.msk [vmem:[#allocation4 + $0x478] sm:$0xff] %vm1064_vm7, %v1668_v6  ;;  %v3378_v6 = vcombine.low %v2188_v14, %v2192_v35 }
 0x187   : > { %v13580_v28 = vrot.slane %v3362_v40, %v13199_v11 }
 0x188   : > { %v1832_v49 = vpop.permute.xlu0 %1831  ;;  %v2198_v4 = vld [vmem:[#allocation4 + $0x460] sm:$0xff]  ;;  %v13583_v35 = vrot.slane %v3378_v6, %v13199_v11 }
 0x189   : > { %v1834_v10 = vpop.permute.xlu1 %1833  ;;  %1896 = vst.msk [vmem:[#allocation4 + $0x580] sm:$0xff] %vm1064_vm7, %v1832_v49  ;;  %v2199_v12 = vld [vmem:[#allocation4 + $0x468] sm:$0xff]  ;;  %v3394_v31 = vcombine.low %v2194_v7, %v2198_v4  ;;  %20031 = vst [vmem:[#allocation34_spill] sm:$0xff] %v13580_v28 }
 0x18a   : > { %1897 = vst.msk [vmem:[#allocation4 + $0x588] sm:$0xff] %vm1064_vm7, %v1834_v10  ;;  %v5230_v19 = vcombine.low %v2195_v8, %v2199_v12  ;;  %20032 = vst [vmem:[#allocation35_spill] sm:$0xff] %v13583_v35  ;;  %v3426_v12 = vcombine.low %v13580_v28, %v13583_v35 }
 0x18b   : > { %v13573_v7 = vrot.slane %v3394_v31, %v13199_v11 }
 0x18c   : > { %v1836_v21 = vpop.permute.xlu0 %1835  ;;  %v2200_v9 = vld [vmem:[#allocation4 + $0x470] sm:$0xff]  ;;  %v13577_v30 = vrot.slane %v5230_v19, %v13199_v11  ;;  %v13602_v19 = vrot.slane %v5262_v2, %v13237_v52 }
 0x18d   : > { %v1838_v15 = vpop.permute.xlu1 %1837  ;;  %1898 = vst.msk [vmem:[#allocation4 + $0x590] sm:$0xff] %vm1064_vm7, %v1836_v21  ;;  %v2201_v24 = vld [vmem:[#allocation4 + $0x478] sm:$0xff]  ;;  %20029 = vst [vmem:[#allocation32_spill] sm:$0xff] %v13573_v7  ;;  %v3410_v8 = vcombine.low %v2196_v1, %v2200_v9  ;;  %v13613_v9 = vrot.slane %v3426_v12, %v13237_v52 }
 0x18e   : > { %1899 = vst.msk [vmem:[#allocation4 + $0x598] sm:$0xff] %vm1064_vm7, %v1838_v15  ;;  %20030 = vst [vmem:[#allocation33_spill] sm:$0xff] %v13577_v30  ;;  %v5246_v14 = vcombine.low %v2197_v60, %v2201_v24 }
 0x18f   : > { %v13586_v49 = vrot.slane %v3410_v8, %v13199_v11  ;;  %20035 = vst [vmem:[#allocation38_spill] sm:$0xff] %v13602_v19  ;;  %20038 = vst [vmem:[#allocation41_spill] sm:$0xff] %v13613_v9 }
 0x190   : > { %v1840_v21 = vpop.permute.xlu0 %1839  ;;  %v13589_v59 = vrot.slane %v5246_v14, %v13199_v11  ;;  %v13619_v14 = vld [vmem:[#allocation4 + $0x580] sm:$0xff] }
 0x191   : > { %20033 = vst [vmem:[#allocation36_spill] sm:$0xff] %v13586_v49  ;;  %v1842_v4 = vpop.permute.xlu1 %1841  ;;  %1900 = vst.msk [vmem:[#allocation4 + $0x5a0] sm:$0xff] %vm1064_vm7, %v1840_v21  ;;  %v3458_v60 = vcombine.low %v13573_v7, %v13586_v49  ;;  %v2235_v39 = vld [vmem:[#allocation4 + $0x588] sm:$0xff] }
 0x192   : > { %20034 = vst [vmem:[#allocation37_spill] sm:$0xff] %v13589_v59  ;;  %1901 = vst.msk [vmem:[#allocation4 + $0x5a8] sm:$0xff] %vm1064_vm7, %v1842_v4  ;;  %v5294_v10 = vcombine.low %v13577_v30, %v13589_v59  ;;  %v2214_v30 = vld [vmem:[#allocation4 + $0x4e0] sm:$0xff] }
 0x193   : > { %v13608_v40 = vrot.slane %v3458_v60, %v13237_v52 }
 0x194   : > { %v1844_v31 = vpop.permute.xlu0 %1843  ;;  %v13605_v1 = vrot.slane %v5294_v10, %v13237_v52  ;;  %v2236_v10 = vld [vmem:[#allocation4 + $0x590] sm:$0xff] }
 0x195   : > { %20037 = vst [vmem:[#allocation40_spill] sm:$0xff] %v13608_v40  ;;  %v1846_v6 = vpop.permute.xlu1 %1845  ;;  %1902 = vst.msk [vmem:[#allocation4 + $0x5b0] sm:$0xff] %vm1064_vm7, %v1844_v31 }
 0x196   : > { %20036 = vst [vmem:[#allocation39_spill] sm:$0xff] %v13605_v1  ;;  %1903 = vst.msk [vmem:[#allocation4 + $0x5b8] sm:$0xff] %vm1064_vm7, %v1846_v6 }
 0x198   : > { %v1848_v15 = vpop.permute.xlu0 %1847  ;;  %v13621_v21 = vld [vmem:[#allocation4 + $0x5a0] sm:$0xff] }
 0x199   : > { %v1850_v2 = vpop.permute.xlu1 %1849  ;;  %1904 = vst.msk [vmem:[#allocation4 + $0x5c0] sm:$0xff] %vm1064_vm7, %v1848_v15  ;;  %v3771_v4 = vcombine.high %v13619_v14, %v13621_v21  ;;  %v2239_v62 = vld [vmem:[#allocation4 + $0x5a8] sm:$0xff]  ;;  %v3770_v35 = vcombine.low %v13619_v14, %v13621_v21 }
 0x19a   : > { %1905 = vst.msk [vmem:[#allocation4 + $0x5c8] sm:$0xff] %vm1064_vm7, %v1850_v2  ;;  %v5606_v16 = vcombine.low %v2235_v39, %v2239_v62 }
 0x19b   : > { %v13630_v8 = vrot.slane %v3771_v4, %v13199_v11  ;;  %v2237_v4 = vld [vmem:[#allocation4 + $0x598] sm:$0xff] }
 0x19c   : > { %v1852_v60 = vpop.permute.xlu0 %1851  ;;  %v2240_v12 = vld [vmem:[#allocation4 + $0x5b0] sm:$0xff] }
 0x19d   : > { %v1854_v31 = vpop.permute.xlu1 %1853  ;;  %1906 = vst.msk [vmem:[#allocation4 + $0x5d0] sm:$0xff] %vm1064_vm7, %v1852_v60  ;;  %v3787_v6 = vcombine.high %v2236_v10, %v2240_v12  ;;  %v3786_v22 = vcombine.low %v2236_v10, %v2240_v12 }
 0x19e   : > { %1907 = vst.msk [vmem:[#allocation4 + $0x5d8] sm:$0xff] %vm1064_vm7, %v1854_v31 }
 0x19f   : > { %v13633_v24 = vrot.slane %v3787_v6, %v13199_v11  ;;  %v2241_v6 = vld [vmem:[#allocation4 + $0x5b8] sm:$0xff]  ;;  %v13653_v62 = vrot.slane %v3786_v22, %v13199_v11 }
 0x1a0   : > { %v1856_v15 = vpop.permute.xlu0 %1855  ;;  %v2242_v46 = vld [vmem:[#allocation4 + $0x5c0] sm:$0xff] }
 0x1a1   : > { %v1858_v53 = vpop.permute.xlu1 %1857  ;;  %1908 = vst.msk [vmem:[#allocation4 + $0x5e0] sm:$0xff] %vm1064_vm7, %v1856_v15  ;;  %v3850_v2 = vcombine.low %v13630_v8, %v13633_v24  ;;  %v2243_v27 = vld [vmem:[#allocation4 + $0x5c8] sm:$0xff]  ;;  %20040 = vst [vmem:[#allocation43_spill] sm:$0xff] %v13653_v62 }
 0x1a2   : > { %1909 = vst.msk [vmem:[#allocation4 + $0x5e8] sm:$0xff] %vm1064_vm7, %v1858_v53  ;;  %v5622_v53 = vcombine.low %v2237_v4, %v2241_v6 }
 0x1a3   : > { %v13686_v10 = vrot.slane %v3850_v2, %v13237_v52 }
 0x1a4   : > { %v1860_v60 = vpop.permute.xlu0 %1859  ;;  %v2244_v40 = vld [vmem:[#allocation4 + $0x5d0] sm:$0xff] }
 0x1a5   : > { %v1862_v31 = vpop.permute.xlu1 %1861  ;;  %1910 = vst.msk [vmem:[#allocation4 + $0x5f0] sm:$0xff] %vm1064_vm7, %v1860_v60  ;;  %v2245_v60 = vld [vmem:[#allocation4 + $0x5d8] sm:$0xff]  ;;  %20047 = vst [vmem:[#allocation50_spill] sm:$0xff] %v13686_v10 }
 0x1a6   : > { %1911 = vst.msk [vmem:[#allocation4 + $0x5f8] sm:$0xff] %vm1064_vm7, %v1862_v31 }
 0x1a8   : > { %v1977_v51 = vpop.permute.xlu0 %1976  ;;  %v2246_v15 = vld [vmem:[#allocation4 + $0x5e0] sm:$0xff] }
 0x1a9   : > { %v1979_v63 = vpop.permute.xlu1 %1978  ;;  %2041 = vst.msk [vmem:[#allocation4 + $0x640] sm:$0xff] %vm1064_vm7, %v1977_v51  ;;  %v2247_v57 = vld [vmem:[#allocation4 + $0x5e8] sm:$0xff]  ;;  %v3803_v33 = vcombine.high %v2242_v46, %v2246_v15  ;;  %v3802_v18 = vcombine.low %v2242_v46, %v2246_v15 }
 0x1aa   : > { %2042 = vst.msk [vmem:[#allocation4 + $0x648] sm:$0xff] %vm1064_vm7, %v1979_v63  ;;  %v5638_v9 = vcombine.low %v2243_v27, %v2247_v57  ;;  %v13650_v63 = vrot.slane %v5622_v53, %v13199_v11 }
 0x1ab   : > { %v13656_v27 = vrot.slane %v3802_v18, %v13199_v11  ;;  %v3817_v57 = vrot.slane %v3803_v33, %v13199_v11  ;;  %v13673_v18 = vrot.slane %v3770_v35, %v13199_v11 }
 0x1ac   : > { %v1981_v31 = vpop.permute.xlu0 %1980  ;;  %v2248_v28 = vld [vmem:[#allocation4 + $0x5f0] sm:$0xff]  ;;  %20039 = vst [vmem:[#allocation42_spill] sm:$0xff] %v13650_v63 }
 0x1ad   : > { %v1983_v7 = vpop.permute.xlu1 %1982  ;;  %2043 = vst.msk [vmem:[#allocation4 + $0x650] sm:$0xff] %vm1064_vm7, %v1981_v31  ;;  %v2249_v51 = vld [vmem:[#allocation4 + $0x5f8] sm:$0xff]  ;;  %v3818_v49 = vcombine.low %v2244_v40, %v2248_v28  ;;  %v3819_v19 = vcombine.high %v2244_v40, %v2248_v28  ;;  %20041 = vst [vmem:[#allocation44_spill] sm:$0xff] %v13656_v27  ;;  %v13667_v40 = vrot.slane %v5638_v9, %v13199_v11 }
 0x1ae   : > { %2044 = vst.msk [vmem:[#allocation4 + $0x658] sm:$0xff] %vm1064_vm7, %v1983_v7  ;;  %v5654_v46 = vcombine.low %v2245_v60, %v2249_v51  ;;  %v13664_v7 = vrot.slane %v5606_v16, %v13199_v11  ;;  %20046 = vst [vmem:[#allocation49_spill] sm:$0xff] %v13673_v18  ;;  %v3834_v35 = vcombine.low %v13673_v18, %v13653_v62  ;;  %v12390_v18 = vld [vmem:[#allocation4 + $0x288] sm:$0xff] }
 0x1af   : > { %v13659_v39 = vrot.slane %v3818_v49, %v13199_v11  ;;  %v3833_v14 = vrot.slane %v3819_v19, %v13199_v11  ;;  %20044 = vst [vmem:[#allocation47_spill] sm:$0xff] %v13667_v40  ;;  %v12391_v62 = vld [vmem:[#allocation4 + $0x2a8] sm:$0xff] }
 0x1b0   : > { %v1985_v28 = vpop.permute.xlu0 %1984  ;;  %20043 = vst [vmem:[#allocation46_spill] sm:$0xff] %v13664_v7  ;;  %v13670_v22 = vrot.slane %v5654_v46, %v13199_v11  ;;  %v5670_v16 = vcombine.low %v13664_v7, %v13650_v63  ;;  %v13708_v51 = vrot.slane %v3834_v35, %v13237_v52  ;;  %v20054_v46 = vcombine.high %v13630_v8, %v13633_v24 }
 0x1b1   : > { %20042 = vst [vmem:[#allocation45_spill] sm:$0xff] %v13659_v39  ;;  %v1987_v21 = vpop.permute.xlu1 %1986  ;;  %2045 = vst.msk [vmem:[#allocation4 + $0x660] sm:$0xff] %vm1064_vm7, %v1985_v28  ;;  %v3866_v33 = vcombine.low %v13656_v27, %v13659_v39  ;;  %v3882_v49 = vcombine.low %v3817_v57, %v3833_v14  ;;  %v3883_v19 = vcombine.high %v3817_v57, %v3833_v14  ;;  %v12393_v27 = vld [vmem:[#allocation4 + $0x2b8] sm:$0xff] }
 0x1b2   : > { %20045 = vst [vmem:[#allocation48_spill] sm:$0xff] %v13670_v22  ;;  %2046 = vst.msk [vmem:[#allocation4 + $0x668] sm:$0xff] %vm1064_vm7, %v1987_v21  ;;  %v5702_v9 = vcombine.low %v13667_v40, %v13670_v22  ;;  %v13705_v31 = vrot.slane %v5670_v16, %v13237_v52  ;;  %v13714_v57 = vrot.slane %v20054_v46, %v13237_v52  ;;  %v2258_v21 = vld [vmem:[#allocation4 + $0x640] sm:$0xff]  ;;  %v12392_v22 = vld [vmem:[#allocation4 + $0x298] sm:$0xff] }
 0x1b3   : > { %v13689_v12 = vrot.slane %v3882_v49, %v13237_v52  ;;  %v13695_v15 = vrot.slane %v3866_v33, %v13237_v52  ;;  %v13698_v53 = vrot.slane %v3883_v19, %v13237_v52  ;;  %20053 = vst [vmem:[#allocation56_spill] sm:$0xff] %v13708_v51  ;;  %v2217_v51 = vld [vmem:[#allocation4 + $0x4f8] sm:$0xff]  ;;  %v4791_v40 = vcombine.high %v12390_v18, %v12391_v62 }
 0x1b4   : > { %v1989_v4 = vpop.permute.xlu0 %1988  ;;  %v13692_v6 = vrot.slane %v5702_v9, %v13237_v52  ;;  %20052 = vst [vmem:[#allocation55_spill] sm:$0xff] %v13705_v31  ;;  %20055 = vst [vmem:[#allocation57_spill] sm:$0xff] %v13714_v57  ;;  %v2213_v31 = vld [vmem:[#allocation4 + $0x4d8] sm:$0xff]  ;;  %v4807_v39 = vcombine.high %v12392_v22, %v12393_v27  ;;  %v3530_v62 = vcombine.low %v2210_v26, %v2214_v30 }
 0x1b5   : > { %20048 = vst [vmem:[#allocation51_spill] sm:$0xff] %v13689_v12  ;;  %20050 = vst [vmem:[#allocation53_spill] sm:$0xff] %v13695_v15  ;;  %v1991_v60 = vpop.permute.xlu1 %1990  ;;  %v5382_v20 = vcombine.low %v2213_v31, %v2217_v51  ;;  %v5383_v47 = vcombine.high %v2213_v31, %v2217_v51  ;;  %v4805_v18 = vrot.slane %v4791_v40, %v13199_v11 }
 0x1b6   : > { %20049 = vst [vmem:[#allocation52_spill] sm:$0xff] %v13692_v6  ;;  %20051 = vst [vmem:[#allocation54_spill] sm:$0xff] %v13698_v53  ;;  %v2215_v6 = vld [vmem:[#allocation4 + $0x4e8] sm:$0xff]  ;;  %v4821_v27 = vrot.slane %v4807_v39, %v13199_v11  ;;  %v3531_v40 = vcombine.high %v2210_v26, %v2214_v30  ;;  %v13887_v39 = vrot.slane %v3530_v62, %v13199_v11 }
 0x1b7   : > { %2047 = vst.msk [vmem:[#allocation4 + $0x670] sm:$0xff] %vm1064_vm7, %v1989_v4  ;;  %2048 = vst.msk [vmem:[#allocation4 + $0x678] sm:$0xff] %vm1064_vm7, %v1991_v60  ;;  %v2260_v4 = vld [vmem:[#allocation4 + $0x650] sm:$0xff]  ;;  %v5397_v51 = vrot.slane %v5383_v47, %v13199_v11  ;;  %v12398_v26 = vld [vmem:[#allocation4 + $0x2c8] sm:$0xff] }
 0x1b8   : > { %v1993_v28 = vpop.permute.xlu0 %1992  ;;  %v2262_v33 = vld [vmem:[#allocation4 + $0x660] sm:$0xff]  ;;  %v4870_v47 = vcombine.low %v4805_v18, %v4821_v27  ;;  %v12399_v30 = vld [vmem:[#allocation4 + $0x2e8] sm:$0xff] }
 0x1b9   : > { %v1995_v8 = vpop.permute.xlu1 %1994  ;;  %2049 = vst.msk [vmem:[#allocation4 + $0x680] sm:$0xff] %vm1064_vm7, %v1993_v28  ;;  %v3939_v9 = vcombine.high %v2258_v21, %v2262_v33  ;;  %v13909_v62 = vld [vmem:[#allocation4 + $0x228] sm:$0xff] }
 0x1ba   : > { %2050 = vst.msk [vmem:[#allocation4 + $0x688] sm:$0xff] %vm1064_vm7, %v1995_v8  ;;  %20068 = vst [vmem:[#allocation70_spill] sm:$0xff] %v13909_v62 }
 0x1bb   : > { %v13731_v16 = vrot.slane %v3939_v9, %v13199_v11 }
 0x1bc   : > { %v1997_v35 = vpop.permute.xlu0 %1996 }
 0x1bd   : > { %v1999_v46 = vpop.permute.xlu1 %1998  ;;  %2051 = vst.msk [vmem:[#allocation4 + $0x690] sm:$0xff] %vm1064_vm7, %v1997_v35  ;;  %20056 = vst [vmem:[#allocation58_spill] sm:$0xff] %v13731_v16  ;;  %v2211_v16 = vld [vmem:[#allocation4 + $0x4c8] sm:$0xff] }
 0x1be   : > { %v2264_v60 = vld [vmem:[#allocation4 + $0x670] sm:$0xff]  ;;  %2052 = vst.msk [vmem:[#allocation4 + $0x698] sm:$0xff] %vm1064_vm7, %v1999_v46  ;;  %v5366_v1 = vcombine.low %v2211_v16, %v2215_v6  ;;  %v5367_v59 = vcombine.high %v2211_v16, %v2215_v6  ;;  %v5390_v6 = vrot.slane %v5382_v20, %v13199_v11  ;;  %v12394_v16 = vld [vmem:[#allocation4 + $0x280] sm:$0xff]  ;;  %v4855_v20 = vcombine.high %v13204_v29, %v13207_v25 }
 0x1bf   : > { %v3955_v49 = vcombine.high %v2260_v4, %v2264_v60  ;;  %v13898_v29 = vrot.slane %v2971_v36, %v13199_v11  ;;  %v13901_v25 = vrot.slane %v3531_v40, %v13199_v11 }
 0x1c0   : > { %v2001_v19 = vpop.permute.xlu0 %2000  ;;  %v2266_v4 = vld [vmem:[#allocation4 + $0x680] sm:$0xff]  ;;  %v5374_v22 = vrot.slane %v5366_v1, %v13199_v11  ;;  %v5381_v31 = vrot.slane %v5367_v59, %v13199_v11  ;;  %v4871_v59 = vcombine.high %v4805_v18, %v4821_v27  ;;  %v13916_v36 = vrot.slane %v4855_v20, %v13237_v52 }
 0x1c1   : > { %v13734_v24 = vrot.slane %v3955_v49, %v13199_v11  ;;  %v2003_v28 = vpop.permute.xlu1 %2002  ;;  %2053 = vst.msk [vmem:[#allocation4 + $0x6a0] sm:$0xff] %vm1064_vm7, %v2001_v19  ;;  %v11534_v49 = vpop.f32.mrb[0].mxu1  ;;  %v3019_v27 = vcombine.high %v13215_v17, %v13218_v37  ;;  %v13933_v20 = vld [vmem:[#allocation4 + $0x200] sm:$0xff] }
 0x1c2   : > { %2054 = vst.msk [vmem:[#allocation4 + $0x6a8] sm:$0xff] %vm1064_vm7, %v2003_v28  ;;  %912 = vrot.lane.b32.xlu0 %v11534_v49, %s12499_s18  ;;  %v668_v9 = vpop.f32.mrb[1].mxu1  ;;  %v5431_v1 = vcombine.high %v5374_v22, %v5390_v6  ;;  %v13926_v40 = vrot.slane %v4871_v59, %v13237_v52  ;;  %20075 = vst [vmem:[#allocation77_spill] sm:$0xff] %v13933_v20 }
 0x1c3   : > { %20057 = vst [vmem:[#allocation59_spill] sm:$0xff] %v13734_v24  ;;  %v13986_v3 = vrot.slane %v3019_v27, %v13237_v52 }
 0x1c4   : > { %v2005_v8 = vpop.permute.xlu0 %2004  ;;  %v11539_v46 = vpop.f32.mrb[2].mxu1  ;;  %v2268_v28 = vld [vmem:[#allocation4 + $0x690] sm:$0xff]  ;;  %20072 = vst [vmem:[#allocation74_spill] sm:$0xff] %v13926_v40 }
 0x1c5   : > { %v2007_v35 = vpop.permute.xlu1 %2006  ;;  %2055 = vst.msk [vmem:[#allocation4 + $0x6b0] sm:$0xff] %vm1064_vm7, %v2005_v8  ;;  %916 = vrot.lane.b32.xlu1 %v11539_v46, %s12499_s18  ;;  %v743_v14 = vpop.f32.mrb[3].mxu1 }
 0x1c6   : > { %2056 = vst.msk [vmem:[#allocation4 + $0x6b8] sm:$0xff] %vm1064_vm7, %v2007_v35  ;;  %910 = vrot.lane.b32.xlu0 %v668_v9, %s12499_s18 }
 0x1c8   : > { %v2270_v19 = vld [vmem:[#allocation4 + $0x6a0] sm:$0xff]  ;;  %v11544_v21 = vpop.f32.mrb[4].mxu1 }
 0x1c9   : > { %v4043_v60 = vcombine.high %v2266_v4, %v2270_v19  ;;  %914 = vrot.lane.b32.xlu1 %v743_v14, %s12499_s18  ;;  %v818_v49 = vpop.f32.mrb[5].mxu1 }
 0x1ca   : > { %918 = vrot.lane.b32.xlu0 %v818_v49, %s12499_s18 }
 0x1cb   : > { %v13748_v8 = vrot.slane %v4043_v60, %v13199_v11 }
 0x1cc   : > { %v2272_v2 = vld [vmem:[#allocation4 + $0x6b0] sm:$0xff]  ;;  %v11549_v19 = vpop.f32.mrb[6].mxu1 }
 0x1cd   : > { %v4059_v33 = vcombine.high %v2268_v28, %v2272_v2  ;;  %20058 = vst [vmem:[#allocation60_spill] sm:$0xff] %v13748_v8  ;;  %920 = vrot.lane.b32.xlu1 %v11544_v21, %s12499_s18  ;;  %v893_v2 = vpop.f32.mrb[7].mxu1 }
 0x1ce   : > { %922 = vrot.lane.b32.xlu0 %v893_v2, %s12499_s18 }
 0x1cf   : > { %v13751_v35 = vrot.slane %v4059_v33, %v13199_v11 }
 0x1d1   : > { %20059 = vst [vmem:[#allocation61_spill] sm:$0xff] %v13751_v35  ;;  %924 = vrot.lane.b32.xlu1 %v11549_v19, %s12499_s18 }
 0x234   : > { %v913_v33 = vpop.permute.xlu0 %912 }
 0x235   : > { %936 = vst.msk [vmem:[#allocation2 + $0x9] sm:$0xff] %vm934_vm6, %v913_v33 }
 0x237   : > { %v917_v60 = vpop.permute.xlu1 %916 }
 0x238   : > { %v911_v14 = vpop.permute.xlu0 %910  ;;  %938 = vst.msk [vmem:[#allocation2 + $0x21] sm:$0xff] %vm934_vm6, %v917_v60 }
 0x239   : > { %935 = vst.msk [vmem:[#allocation2 + $0x1] sm:$0xff] %vm934_vm6, %v911_v14 }
 0x23b   : > { %v915_v49 = vpop.permute.xlu1 %914 }
 0x23c   : > { %v1380_v46 = vld [vmem:[#allocation2 + $0x9] sm:$0xff]  ;;  %937 = vst.msk [vmem:[#allocation2 + $0x19] sm:$0xff] %vm934_vm6, %v915_v49  ;;  %v919_v21 = vpop.permute.xlu0 %918 }
 0x23d   : > { %v1719_v28 = vld [vmem:[#allocation2 + $0xa] sm:$0xff]  ;;  %1405 = vst.msk [vmem:[#allocation4 + $0x248] sm:$0xff] %vm1064_vm7, %v1380_v46  ;;  %1478 = vrot.lane.b32.xlu1 %v1380_v46, %s12500_s21 }
 0x23e   : > { %1744 = vst.msk [vmem:[#allocation4 + $0x488] sm:$0xff] %vm1064_vm7, %v1719_v28 }
 0x23f   : > { %939 = vst.msk [vmem:[#allocation2 + $0x31] sm:$0xff] %vm934_vm6, %v919_v21  ;;  %v921_v14 = vpop.permute.xlu1 %920  ;;  %v13778_v49 = vld [vmem:[#allocation2 + $0x21] sm:$0xff] }
 0x240   : > { %v1040_v19 = vld [vmem:[#allocation2] sm:$0xff]  ;;  %v13770_v2 = vld [vmem:[#allocation2 + $0x8] sm:$0xff]  ;;  %940 = vst.msk [vmem:[#allocation2 + $0x39] sm:$0xff] %vm934_vm6, %v921_v14  ;;  %v923_v21 = vpop.permute.xlu0 %922 }
 0x241   : > { %v1379_v33 = vld [vmem:[#allocation2 + $0x1] sm:$0xff]  ;;  %1065 = vst.msk [vmem:[#allocation4] sm:$0xff] %vm1064_vm7, %v1040_v19  ;;  %1066 = vst.msk [vmem:[#allocation4 + $0x8] sm:$0xff] %vm1064_vm7, %v13770_v2  ;;  %1623 = vrot.lane.b32.xlu1 %v1380_v46, %s12502_s22  ;;  %1137 = vrot.lane.b32.xlu0 %v1040_v19, %s12500_s21 }
 0x242   : > { %1404 = vst.msk [vmem:[#allocation4 + $0x240] sm:$0xff] %vm1064_vm7, %v1379_v33  ;;  %v13776_v60 = vld [vmem:[#allocation2 + $0x2] sm:$0xff]  ;;  %1407 = vst.msk [vmem:[#allocation4 + $0x258] sm:$0xff] %vm1064_vm7, %v13778_v49 }
 0x243   : > { %v13780_v4 = vld [vmem:[#allocation2 + $0x22] sm:$0xff]  ;;  %1743 = vst.msk [vmem:[#allocation4 + $0x480] sm:$0xff] %vm1064_vm7, %v13776_v60  ;;  %v13792_v9 = vld [vmem:[#allocation2 + $0x18] sm:$0xff]  ;;  %v925_v46 = vpop.permute.xlu1 %924 }
 0x244   : > { %1746 = vst.msk [vmem:[#allocation4 + $0x498] sm:$0xff] %vm1064_vm7, %v13780_v4  ;;  %v13794_v53 = vld [vmem:[#allocation2 + $0x20] sm:$0xff]  ;;  %1067 = vst.msk [vmem:[#allocation4 + $0x10] sm:$0xff] %vm1064_vm7, %v13792_v9 }
 0x245   : > { %941 = vst.msk [vmem:[#allocation2 + $0x49] sm:$0xff] %vm934_vm6, %v923_v21  ;;  %v13796_v14 = vld [vmem:[#allocation2 + $0x19] sm:$0xff]  ;;  %942 = vst.msk [vmem:[#allocation2 + $0x51] sm:$0xff] %vm934_vm6, %v925_v46  ;;  %1817 = vrot.lane.b32.xlu1 %v1719_v28, %s12500_s21  ;;  %1282 = vrot.lane.b32.xlu0 %v1040_v19, %s12502_s22 }
 0x246   : > { %1068 = vst.msk [vmem:[#allocation4 + $0x18] sm:$0xff] %vm1064_vm7, %v13794_v53  ;;  %1406 = vst.msk [vmem:[#allocation4 + $0x250] sm:$0xff] %vm1064_vm7, %v13796_v14  ;;  %v13804_v57 = vld [vmem:[#allocation2 + $0x1a] sm:$0xff]  ;;  %v13806_v12 = vld [vmem:[#allocation2 + $0x30] sm:$0xff] }
 0x247   : > { %v13808_v21 = vld [vmem:[#allocation2 + $0x31] sm:$0xff]  ;;  %1745 = vst.msk [vmem:[#allocation4 + $0x490] sm:$0xff] %vm1064_vm7, %v13804_v57  ;;  %1069 = vst.msk [vmem:[#allocation4 + $0x20] sm:$0xff] %vm1064_vm7, %v13806_v12  ;;  %v13821_v35 = vld [vmem:[#allocation2 + $0x39] sm:$0xff] }
 0x248   : > { %1408 = vst.msk [vmem:[#allocation4 + $0x260] sm:$0xff] %vm1064_vm7, %v13808_v21  ;;  %v13819_v10 = vld [vmem:[#allocation2 + $0x38] sm:$0xff]  ;;  %1409 = vst.msk [vmem:[#allocation4 + $0x268] sm:$0xff] %vm1064_vm7, %v13821_v35 }
 0x249   : > { %v13823_v8 = vld [vmem:[#allocation2 + $0x32] sm:$0xff]  ;;  %1070 = vst.msk [vmem:[#allocation4 + $0x28] sm:$0xff] %vm1064_vm7, %v13819_v10  ;;  %v13829_v19 = vld [vmem:[#allocation2 + $0x3a] sm:$0xff]  ;;  %1962 = vrot.lane.b32.xlu1 %v1719_v28, %s12502_s22  ;;  %1476 = vrot.lane.b32.xlu0 %v1379_v33, %s12500_s21 }
 0x24a   : > { %1747 = vst.msk [vmem:[#allocation4 + $0x4a0] sm:$0xff] %vm1064_vm7, %v13823_v8  ;;  %1748 = vst.msk [vmem:[#allocation4 + $0x4a8] sm:$0xff] %vm1064_vm7, %v13829_v19  ;;  %v13911_v18 = vld [vmem:[#allocation4 + $0x258] sm:$0xff] }
 0x24b   : > { %20069 = vst [vmem:[#allocation71_spill] sm:$0xff] %v13911_v18 }
 0x24c   : > { %v13833_v46 = vld [vmem:[#allocation2 + $0x48] sm:$0xff]  ;;  %v13845_v15 = vld [vmem:[#allocation2 + $0x50] sm:$0xff] }
 0x24d   : > { %20060 = vst [vmem:[#allocation62_spill] sm:$0xff] %v13833_v46  ;;  %v13835_v24 = vld [vmem:[#allocation2 + $0x49] sm:$0xff]  ;;  %1071 = vst.msk [vmem:[#allocation4 + $0x30] sm:$0xff] %vm1064_vm7, %v13833_v46  ;;  %v13847_v7 = vld [vmem:[#allocation2 + $0x51] sm:$0xff]  ;;  %1139 = vrot.lane.b32.xlu1 %v13770_v2, %s12500_s21  ;;  %1621 = vrot.lane.b32.xlu0 %v1379_v33, %s12502_s22 }
 0x24e   : > { %20061 = vst [vmem:[#allocation63_spill] sm:$0xff] %v13835_v24  ;;  %1410 = vst.msk [vmem:[#allocation4 + $0x270] sm:$0xff] %vm1064_vm7, %v13835_v24  ;;  %v13849_v28 = vld [vmem:[#allocation2 + $0x4a] sm:$0xff]  ;;  %v13855_v63 = vld [vmem:[#allocation2 + $0x52] sm:$0xff] }
 0x24f   : > { %20062 = vst [vmem:[#allocation64_spill] sm:$0xff] %v13845_v15  ;;  %20063 = vst [vmem:[#allocation65_spill] sm:$0xff] %v13847_v7  ;;  %v13868_v33 = vld [vmem:[#allocation4 + $0x4d0] sm:$0xff]  ;;  %v13983_v0 = vld [vmem:[#allocation4 + $0x260] sm:$0xff] }
 0x250   : > { %20064 = vst [vmem:[#allocation66_spill] sm:$0xff] %v13849_v28  ;;  %1072 = vst.msk [vmem:[#allocation4 + $0x38] sm:$0xff] %vm1064_vm7, %v13845_v15  ;;  %v3546_v42 = vcombine.low %v13868_v33, %v13870_v44  ;;  %v5430_v15 = vcombine.low %v5374_v22, %v5390_v6  ;;  %v12400_v22 = vld [vmem:[#allocation4 + $0x2c0] sm:$0xff]  ;;  %v13937_v17 = vld [vmem:[#allocation4 + $0x250] sm:$0xff] }
 0x251   : > { %1411 = vst.msk [vmem:[#allocation4 + $0x278] sm:$0xff] %vm1064_vm7, %v13847_v7  ;;  %20065 = vst [vmem:[#allocation67_spill] sm:$0xff] %v13855_v63  ;;  %1284 = vrot.lane.b32.xlu1 %v13770_v2, %s12502_s22  ;;  %1815 = vrot.lane.b32.xlu0 %v13776_v60, %s12500_s21  ;;  %v12395_v2 = vld [vmem:[#allocation4 + $0x2a0] sm:$0xff]  ;;  %v13954_v24 = vld [vmem:[#allocation4 + $0x210] sm:$0xff] }
 0x252   : > { %1749 = vst.msk [vmem:[#allocation4 + $0x4b0] sm:$0xff] %vm1064_vm7, %v13849_v28  ;;  %1750 = vst.msk [vmem:[#allocation4 + $0x4b8] sm:$0xff] %vm1064_vm7, %v13855_v63  ;;  %v2955_v28 = vcombine.high %v12394_v16, %v12395_v2  ;;  %v5446_v16 = vcombine.low %v5381_v31, %v5397_v51  ;;  %v5447_v2 = vcombine.high %v5381_v31, %v5397_v51  ;;  %v12401_v6 = vld [vmem:[#allocation4 + $0x2e0] sm:$0xff]  ;;  %v13920_v31 = vld [vmem:[#allocation4 + $0x238] sm:$0xff] }
 0x253   : > { %v13895_v41 = vrot.slane %v3546_v42, %v13199_v11  ;;  %20071 = vst [vmem:[#allocation73_spill] sm:$0xff] %v13920_v31  ;;  %v13923_v51 = vrot.slane %v4870_v47, %v13237_v52  ;;  %20077 = vst [vmem:[#allocation79_spill] sm:$0xff] %v13937_v17  ;;  %v12402_v47 = vld [vmem:[#allocation4 + $0x2d8] sm:$0xff]  ;;  %v13981_v61 = vld [vmem:[#allocation4 + $0x4a8] sm:$0xff] }
 0x254   : > { %v13890_v34 = vrot.slane %v2955_v28, %v13199_v11  ;;  %v13907_v28 = vld [vmem:[#allocation4 + $0x218] sm:$0xff]  ;;  %v13946_v54 = vrot.slane %v5446_v16, %v13237_v52  ;;  %20083 = vst [vmem:[#allocation85_spill] sm:$0xff] %v13954_v24  ;;  %v13965_v16 = vld [vmem:[#allocation4 + $0x490] sm:$0xff]  ;;  %20089 = vst [vmem:[#allocation91_spill] sm:$0xff] %v13981_v61 }
 0x255   : > { %1482 = vrot.lane.b32.xlu1 %v13778_v49, %s12500_s21  ;;  %1960 = vrot.lane.b32.xlu0 %v13776_v60, %s12502_s22  ;;  %v4823_v60 = vcombine.high %v12398_v26, %v12399_v30  ;;  %20067 = vst [vmem:[#allocation69_spill] sm:$0xff] %v13907_v28  ;;  %v13928_v26 = vld [vmem:[#allocation4 + $0x498] sm:$0xff]  ;;  %v13931_v30 = vrot.slane %v5431_v1, %v13237_v52  ;;  %v13956_v63 = vld [vmem:[#allocation4 + $0x270] sm:$0xff]  ;;  %20086 = vst [vmem:[#allocation88_spill] sm:$0xff] %v13965_v16 }
 0x256   : > { %20073 = vst [vmem:[#allocation75_spill] sm:$0xff] %v13928_v26  ;;  %20080 = vst [vmem:[#allocation82_spill] sm:$0xff] %v13946_v54  ;;  %v13949_v1 = vrot.slane %v5447_v2, %v13237_v52  ;;  %v3034_v2 = vcombine.low %v13890_v34, %v13898_v29  ;;  %v14004_v46 = vld [vmem:[#allocation4 + $0x488] sm:$0xff]  ;;  %v14021_v7 = vld [vmem:[#allocation4 + $0x480] sm:$0xff] }
 0x257   : > { %20074 = vst [vmem:[#allocation76_spill] sm:$0xff] %v13931_v30  ;;  %v13952_v30 = vrot.slane %v5430_v15, %v13237_v52  ;;  %20084 = vst [vmem:[#allocation86_spill] sm:$0xff] %v13956_v63  ;;  %v3595_v15 = vcombine.high %v13887_v39, %v13895_v41 }
 0x258   : > { %v13913_v42 = vld [vmem:[#allocation4 + $0x278] sm:$0xff]  ;;  %20081 = vst [vmem:[#allocation83_spill] sm:$0xff] %v13949_v1  ;;  %v4654_v1 = vcombine.low %v13892_v50, %v13909_v62  ;;  %20090 = vst [vmem:[#allocation92_spill] sm:$0xff] %v13983_v0  ;;  %v2866_v50 = vcombine.low %v13937_v17, %v13956_v63  ;;  %v13999_v62 = vld [vmem:[#allocation4 + $0x4a0] sm:$0xff] }
 0x259   : > { %1627 = vrot.lane.b32.xlu1 %v13778_v49, %s12502_s22  ;;  %1141 = vrot.lane.b32.xlu0 %v13792_v9, %s12500_s21  ;;  %20070 = vst [vmem:[#allocation72_spill] sm:$0xff] %v13913_v42  ;;  %v2987_v49 = vcombine.high %v12400_v22, %v12401_v6  ;;  %v13941_v22 = vld [vmem:[#allocation4 + $0x268] sm:$0xff]  ;;  %v12403_v6 = vld [vmem:[#allocation4 + $0x2f8] sm:$0xff]  ;;  %20082 = vst [vmem:[#allocation84_spill] sm:$0xff] %v13952_v30  ;;  %v4702_v37 = vcombine.low %v13911_v18, %v13913_v42 }
 0x25a   : > { %20078 = vst [vmem:[#allocation80_spill] sm:$0xff] %v13941_v22  ;;  %v4839_v59 = vcombine.high %v12402_v47, %v12403_v6  ;;  %v13943_v55 = vld [vmem:[#allocation4 + $0x4b8] sm:$0xff]  ;;  %v13961_v47 = vrot.slane %v4823_v60, %v13199_v11  ;;  %v13963_v6 = vld [vmem:[#allocation4 + $0x230] sm:$0xff]  ;;  %v13977_v60 = vld [vmem:[#allocation4 + $0x248] sm:$0xff]  ;;  %v4670_v18 = vcombine.low %v13907_v28, %v13920_v31  ;;  %v2818_v28 = vcombine.low %v13933_v20, %v13935_v43 }
 0x25b   : > { %20079 = vst [vmem:[#allocation81_spill] sm:$0xff] %v13943_v55  ;;  %20085 = vst [vmem:[#allocation87_spill] sm:$0xff] %v13963_v6  ;;  %v13967_v54 = vld [vmem:[#allocation4 + $0x4b0] sm:$0xff]  ;;  %v13989_v56 = vrot.slane %v2987_v49, %v13199_v11  ;;  %v5350_v42 = vcombine.low %v13928_v26, %v13943_v55  ;;  %v14006_v49 = vld [vmem:[#allocation4 + $0x240] sm:$0xff]  ;;  %v14013_v17 = vrot.slane %v4702_v37, %v13199_v11 }
 0x25c   : > { %20087 = vst [vmem:[#allocation89_spill] sm:$0xff] %v13967_v54  ;;  %20088 = vst [vmem:[#allocation90_spill] sm:$0xff] %v13977_v60  ;;  %v14002_v27 = vrot.slane %v4839_v59, %v13199_v11  ;;  %v12405_v26 = vld [vmem:[#allocation4 + $0x2f0] sm:$0xff]  ;;  %v5334_v59 = vcombine.low %v14004_v46, %v13981_v61  ;;  %v2834_v63 = vcombine.low %v13954_v24, %v13963_v6  ;;  %v2063_v6 = vld [vmem:[#allocation4 + $0x28] sm:$0xff] }
 0x25d   : > { %1821 = vrot.lane.b32.xlu1 %v13780_v4, %s12500_s21  ;;  %1286 = vrot.lane.b32.xlu0 %v13792_v9, %s12502_s22  ;;  %v4686_v9 = vcombine.low %v13977_v60, %v13941_v22  ;;  %20091 = vst [vmem:[#allocation93_spill] sm:$0xff] %v13999_v62  ;;  %20092 = vst [vmem:[#allocation94_spill] sm:$0xff] %v14004_v46  ;;  %v3514_v60 = vcombine.low %v13965_v16, %v13967_v54  ;;  %v12404_v22 = vld [vmem:[#allocation4 + $0x2d0] sm:$0xff]  ;;  %v2065_v20 = vld [vmem:[#allocation4 + $0x38] sm:$0xff] }
 0x25e   : > { %20093 = vst [vmem:[#allocation95_spill] sm:$0xff] %v14006_v49  ;;  %v3003_v55 = vcombine.high %v12404_v22, %v12405_v26  ;;  %v2850_v31 = vcombine.low %v14006_v49, %v13983_v0  ;;  %20094 = vst [vmem:[#allocation96_spill] sm:$0xff] %v14021_v7  ;;  %v14028_v26 = vrot.slane %v4654_v1, %v13199_v11  ;;  %v14137_v0 = vld [vmem:[#allocation4 + $0x58] sm:$0xff]  ;;  %v2060_v24 = vld [vmem:[#allocation4 + $0x10] sm:$0xff] }
 0x25f   : > { %v3498_v37 = vcombine.low %v14021_v7, %v13999_v62  ;;  %v14033_v22 = vrot.slane %v3595_v15, %v13237_v52  ;;  %v14036_v16 = vrot.slane %v4670_v18, %v13199_v11  ;;  %v14039_v54 = vrot.slane %v4686_v9, %v13199_v11  ;;  %v14187_v61 = vld [vmem:[#allocation4 + $0x80] sm:$0xff] }
 0x260   : > { %v14045_v49 = vrot.slane %v2866_v50, %v13199_v11  ;;  %v14048_v1 = vrot.slane %v2818_v28, %v13199_v11  ;;  %v14051_v7 = vrot.slane %v3514_v60, %v13199_v11  ;;  %v3017_v15 = vrot.slane %v3003_v55, %v13199_v11 }
 0x261   : > { %1966 = vrot.lane.b32.xlu1 %v13780_v4, %s12502_s22  ;;  %1480 = vrot.lane.b32.xlu0 %v13796_v14, %s12500_s21  ;;  %20095 = vst [vmem:[#allocation97_spill] sm:$0xff] %v14033_v22  ;;  %v14042_v4 = vrot.slane %v5350_v42, %v13199_v11  ;;  %v3035_v18 = vcombine.high %v13890_v34, %v13898_v29 }
 0x262   : > { %20097 = vst [vmem:[#allocation99_spill] sm:$0xff] %v14045_v49  ;;  %20098 = vst [vmem:[#allocation100_spill] sm:$0xff] %v14048_v1  ;;  %v4750_v9 = vcombine.low %v14039_v54, %v14013_v17  ;;  %v14059_v42 = vrot.slane %v5334_v59, %v13199_v11  ;;  %v14062_v50 = vrot.slane %v2834_v63, %v13199_v11 }
 0x263   : > { %20096 = vst [vmem:[#allocation98_spill] sm:$0xff] %v14042_v4  ;;  %20099 = vst [vmem:[#allocation101_spill] sm:$0xff] %v14051_v7  ;;  %v14065_v28 = vrot.slane %v2850_v31, %v13199_v11  ;;  %v4887_v55 = vcombine.high %v13210_v32, %v13221_v38  ;;  %v4902_v34 = vcombine.low %v13961_v47, %v14002_v27 }
 0x264   : > { %20100 = vst [vmem:[#allocation102_spill] sm:$0xff] %v14059_v42  ;;  %20101 = vst [vmem:[#allocation103_spill] sm:$0xff] %v14062_v50  ;;  %v14076_v29 = vrot.slane %v3498_v37, %v13199_v11  ;;  %v4718_v63 = vcombine.low %v14028_v26, %v14036_v16  ;;  %v5398_v31 = vcombine.low %v14059_v42, %v14042_v4 }
 0x265   : > { %20102 = vst [vmem:[#allocation104_spill] sm:$0xff] %v14065_v28  ;;  %1143 = vrot.lane.b32.xlu1 %v13794_v53, %s12500_s21  ;;  %1625 = vrot.lane.b32.xlu0 %v13796_v14, %s12502_s22  ;;  %v14083_v60 = vrot.slane %v3034_v2, %v13237_v52  ;;  %v2914_v14 = vcombine.low %v14065_v28, %v14045_v49  ;;  %v2058_v49 = vld [vmem:[#allocation4] sm:$0xff] }
 0x266   : > { %20103 = vst [vmem:[#allocation105_spill] sm:$0xff] %v14076_v29  ;;  %v4903_v32 = vcombine.high %v13961_v47, %v14002_v27  ;;  %v3051_v38 = vcombine.high %v13224_v23, %v13227_v58  ;;  %v3066_v59 = vcombine.low %v13989_v56, %v3017_v15  ;;  %v3562_v37 = vcombine.low %v14076_v29, %v14051_v7  ;;  %v14104_v27 = vld [vmem:[#allocation4 + $0x40] sm:$0xff]  ;;  %v14119_v29 = vld [vmem:[#allocation4 + $0x50] sm:$0xff] }
 0x267   : > { %v14095_v22 = vrot.slane %v4750_v9, %v13237_v52  ;;  %v14098_v2 = vrot.slane %v3035_v18, %v13237_v52  ;;  %v2882_v62 = vcombine.low %v14048_v1, %v14062_v50  ;;  %v3594_v47 = vcombine.low %v13887_v39, %v13895_v41  ;;  %v14106_v23 = vld [vmem:[#allocation4 + $0x60] sm:$0xff]  ;;  %v14121_v41 = vld [vmem:[#allocation4 + $0x70] sm:$0xff]  ;;  %v14123_v39 = vld [vmem:[#allocation4 + $0x48] sm:$0xff] }
 0x268   : > { %v14113_v58 = vrot.slane %v4887_v55, %v13237_v52  ;;  %v14116_v18 = vrot.slane %v4902_v34, %v13237_v52  ;;  %v3067_v9 = vcombine.high %v13989_v56, %v3017_v15  ;;  %v14126_v7 = vrot.slane %v4718_v63, %v13237_v52  ;;  %v14139_v56 = vld [vmem:[#allocation4 + $0x68] sm:$0xff]  ;;  %v14141_v15 = vld [vmem:[#allocation4 + $0x78] sm:$0xff] }
 0x269   : > { %20104 = vst [vmem:[#allocation106_spill] sm:$0xff] %v14095_v22  ;;  %1288 = vrot.lane.b32.xlu1 %v13794_v53, %s12502_s22  ;;  %1819 = vrot.lane.b32.xlu0 %v13804_v57, %s12500_s21  ;;  %v14129_v53 = vrot.slane %v5398_v31, %v13237_v52  ;;  %v14132_v55 = vrot.slane %v2914_v14, %v13237_v52  ;;  %v2062_v14 = vld [vmem:[#allocation4 + $0x20] sm:$0xff]  ;;  %v14192_v22 = vld [vmem:[#allocation4 + $0x90] sm:$0xff] }
 0x26a   : > { %20105 = vst [vmem:[#allocation107_spill] sm:$0xff] %v14116_v18  ;;  %20106 = vst [vmem:[#allocation108_spill] sm:$0xff] %v14126_v7  ;;  %v14135_v34 = vrot.slane %v3562_v37, %v13237_v52  ;;  %v14144_v1 = vrot.slane %v4903_v32, %v13237_v52  ;;  %v14147_v63 = vrot.slane %v3051_v38, %v13237_v52  ;;  %v2081_v18 = vld [vmem:[#allocation4 + $0xb8] sm:$0xff] }
 0x26b   : > { %20107 = vst [vmem:[#allocation109_spill] sm:$0xff] %v14129_v53  ;;  %20108 = vst [vmem:[#allocation110_spill] sm:$0xff] %v14132_v55  ;;  %v14150_v31 = vrot.slane %v3066_v59, %v13237_v52  ;;  %v2306_v37 = vcombine.low %v14104_v27, %v14106_v23  ;;  %v14155_v50 = vrot.slane %v2882_v62, %v13237_v52  ;;  %v2061_v59 = vld [vmem:[#allocation4 + $0x18] sm:$0xff]  ;;  %v2059_v53 = vld [vmem:[#allocation4 + $0x8] sm:$0xff] }
 0x26c   : > { %20109 = vst [vmem:[#allocation111_spill] sm:$0xff] %v14135_v34  ;;  %20110 = vst [vmem:[#allocation112_spill] sm:$0xff] %v14144_v1  ;;  %v14158_v28 = vrot.slane %v3594_v47, %v13237_v52  ;;  %v2322_v38 = vcombine.low %v14119_v29, %v14121_v41  ;;  %v14169_v62 = vrot.slane %v3067_v9, %v13237_v52  ;;  %v2064_v47 = vld [vmem:[#allocation4 + $0x30] sm:$0xff] }
 0x26d   : > { %20111 = vst [vmem:[#allocation113_spill] sm:$0xff] %v14155_v50  ;;  %1486 = vrot.lane.b32.xlu1 %v13821_v35, %s12500_s21  ;;  %1964 = vrot.lane.b32.xlu0 %v13804_v57, %s12502_s22  ;;  %v4142_v32 = vcombine.low %v14123_v39, %v14139_v56  ;;  %v4158_v43 = vcombine.low %v14137_v0, %v14141_v15  ;;  %v14194_v50 = vld [vmem:[#allocation4 + $0xa0] sm:$0xff] }
 0x26e   : > { %20112 = vst [vmem:[#allocation114_spill] sm:$0xff] %v14158_v28  ;;  %v2274_v9 = vcombine.low %v2058_v49, %v2062_v14  ;;  %v14190_v7 = vrot.slane %v2306_v37, %v13199_v11  ;;  %v14196_v49 = vld [vmem:[#allocation4 + $0xb0] sm:$0xff]  ;;  %v2290_v14 = vcombine.low %v2060_v24, %v2064_v47  ;;  %v14199_v57 = vrot.slane %v2322_v38, %v13199_v11  ;;  %v12407_v47 = vld [vmem:[#allocation4 + $0x520] sm:$0xff] }
 0x26f   : > { %v4110_v4 = vcombine.low %v2059_v53, %v2063_v6  ;;  %v4126_v42 = vcombine.low %v2061_v59, %v2065_v20  ;;  %v14208_v46 = vrot.slane %v4142_v32, %v13199_v11  ;;  %v14211_v34 = vrot.slane %v4158_v43, %v13199_v11  ;;  %v12406_v59 = vld [vmem:[#allocation4 + $0x500] sm:$0xff]  ;;  %v12409_v37 = vld [vmem:[#allocation4 + $0x530] sm:$0xff] }
 0x270   : > { %v14214_v24 = vrot.slane %v2274_v9, %v13199_v11  ;;  %v14217_v20 = vrot.slane %v2290_v14, %v13199_v11  ;;  %v20117_v53 = vcombine.high %v13868_v33, %v13870_v44  ;;  %v2410_v43 = vcombine.low %v14187_v61, %v14194_v50  ;;  %v12408_v14 = vld [vmem:[#allocation4 + $0x510] sm:$0xff] }
 0x271   : > { %1631 = vrot.lane.b32.xlu1 %v13821_v35, %s12502_s22  ;;  %1145 = vrot.lane.b32.xlu0 %v13806_v12, %s12500_s21  ;;  %v14220_v35 = vrot.slane %v4110_v4, %v13199_v11  ;;  %v14223_v6 = vrot.slane %v4126_v42, %v13199_v11  ;;  %v2426_v38 = vcombine.low %v14192_v22, %v14196_v49 }
 0x272   : > { %20113 = vst [vmem:[#allocation115_spill] sm:$0xff] %v14214_v24  ;;  %20114 = vst [vmem:[#allocation116_spill] sm:$0xff] %v14217_v20  ;;  %v3561_v32 = vrot.slane %v20117_v53, %v13199_v11  ;;  %v3634_v9 = vcombine.low %v12406_v59, %v12407_v47  ;;  %v2338_v4 = vcombine.low %v14214_v24, %v14217_v20  ;;  %v2219_v59 = vld [vmem:[#allocation4 + $0x508] sm:$0xff]  ;;  %v2225_v24 = vld [vmem:[#allocation4 + $0x538] sm:$0xff] }
 0x273   : > { %20115 = vst [vmem:[#allocation117_spill] sm:$0xff] %v14220_v35  ;;  %20116 = vst [vmem:[#allocation118_spill] sm:$0xff] %v14223_v6  ;;  %v2370_v42 = vcombine.low %v14190_v7, %v14199_v57  ;;  %v3650_v28 = vcombine.low %v12408_v14, %v12409_v37  ;;  %v4174_v44 = vcombine.low %v14220_v35, %v14223_v6  ;;  %v2223_v6 = vld [vmem:[#allocation4 + $0x528] sm:$0xff] }
 0x274   : > { %v4206_v47 = vcombine.low %v14208_v46, %v14211_v34  ;;  %v14256_v33 = vrot.slane %v2338_v4, %v13237_v52  ;;  %v14261_v20 = vrot.slane %v2410_v43, %v13199_v11  ;;  %v14264_v37 = vrot.slane %v2426_v38, %v13199_v11 }
 0x275   : > { %1825 = vrot.lane.b32.xlu1 %v13829_v19, %s12500_s21  ;;  %1290 = vrot.lane.b32.xlu0 %v13806_v12, %s12502_s22  ;;  %v2221_v12 = vld [vmem:[#allocation4 + $0x518] sm:$0xff]  ;;  %v14267_v14 = vrot.slane %v4174_v44, %v13237_v52  ;;  %v3610_v35 = vcombine.low %v13901_v25, %v3561_v32  ;;  %v14271_v55 = vrot.slane %v2370_v42, %v13237_v52 }
 0x276   : > { %20118 = vst [vmem:[#allocation119_spill] sm:$0xff] %v14256_v33  ;;  %v14274_v4 = vrot.slane %v3634_v9, %v13199_v11  ;;  %v3658_v30 = vrot.slane %v3650_v28, %v13199_v11  ;;  %v5470_v43 = vcombine.low %v2219_v59, %v2223_v6  ;;  %v5486_v38 = vcombine.low %v2221_v12, %v2225_v24  ;;  %v2075_v28 = vld [vmem:[#allocation4 + $0x88] sm:$0xff]  ;;  %v20210_v33 = vld [vmem:[#allocation76_spill] sm:$0xff] }
 0x277   : > { %20119 = vst [vmem:[#allocation120_spill] sm:$0xff] %v14267_v14  ;;  %20120 = vst [vmem:[#allocation121_spill] sm:$0xff] %v14271_v55  ;;  %v14282_v44 = vrot.slane %v4206_v47, %v13237_v52  ;;  %v3611_v53 = vcombine.high %v13901_v25, %v3561_v32  ;;  %v2371_v9 = vcombine.high %v14190_v7, %v14199_v57  ;;  %v2079_v47 = vld [vmem:[#allocation4 + $0xa8] sm:$0xff] }
 0x278   : > { %v5471_v1 = vcombine.high %v2219_v59, %v2223_v6  ;;  %v5487_v40 = vcombine.high %v2221_v12, %v2225_v24  ;;  %v2474_v5 = vcombine.low %v14261_v20, %v14264_v37  ;;  %v14298_v7 = vrot.slane %v3610_v35, %v13237_v52 }
 0x279   : > { %1970 = vrot.lane.b32.xlu1 %v13829_v19, %s12502_s22  ;;  %1484 = vrot.lane.b32.xlu0 %v13808_v21, %s12500_s21  ;;  %20121 = vst [vmem:[#allocation122_spill] sm:$0xff] %v14282_v44  ;;  %v5478_v6 = vrot.slane %v5470_v43, %v13199_v11  ;;  %v5494_v59 = vrot.slane %v5486_v38, %v13199_v11  ;;  %v20201_v44 = vld [vmem:[#allocation19_spill] sm:$0xff] }
 0x27a   : > { %v3698_v12 = vcombine.low %v14274_v4, %v3658_v30  ;;  %v14312_v35 = vrot.slane %v3611_v53, %v13237_v52  ;;  %v2475_v19 = vcombine.high %v14261_v20, %v14264_v37  ;;  %v4246_v25 = vcombine.low %v2075_v28, %v2079_v47 }
 0x27b   : > { %v4262_v24 = vcombine.low %v2077_v45, %v2081_v18  ;;  %v5485_v57 = vrot.slane %v5471_v1, %v13199_v11  ;;  %v5501_v42 = vrot.slane %v5487_v40, %v13199_v11  ;;  %v14322_v43 = vrot.slane %v2371_v9, %v13237_v52 }
 0x27c   : > { %v4143_v38 = vcombine.high %v14123_v39, %v14139_v56  ;;  %v4159_v53 = vcombine.high %v14137_v0, %v14141_v15  ;;  %v4247_v32 = vcombine.high %v2075_v28, %v2079_v47  ;;  %v4263_v20 = vcombine.high %v2077_v45, %v2081_v18 }
 0x27d   : > { %1147 = vrot.lane.b32.xlu1 %v13819_v10, %s12500_s21  ;;  %1629 = vrot.lane.b32.xlu0 %v13808_v21, %s12502_s22  ;;  %v14319_v21 = vrot.slane %v2474_v5, %v13237_v52  ;;  %20123 = vst [vmem:[#allocation124_spill] sm:$0xff] %v14322_v43  ;;  %v5535_v40 = vcombine.high %v5478_v6, %v5494_v59 }
 0x27e   : > { %v14333_v5 = vrot.slane %v3698_v12, %v13237_v52  ;;  %v3699_v1 = vcombine.high %v14274_v4, %v3658_v30  ;;  %v4254_v37 = vrot.slane %v4246_v25, %v13199_v11  ;;  %v4270_v39 = vrot.slane %v4262_v24, %v13199_v11 }
 0x27f   : > { %20122 = vst [vmem:[#allocation123_spill] sm:$0xff] %v14319_v21  ;;  %v2307_v0 = vcombine.high %v14104_v27, %v14106_v23  ;;  %v2323_v45 = vcombine.high %v14119_v29, %v14121_v41  ;;  %v5550_v18 = vcombine.low %v5485_v57, %v5501_v42  ;;  %v2411_v56 = vcombine.high %v14187_v61, %v14194_v50  ;;  %v20125_v27 = vld [vmem:[#allocation65_spill] sm:$0xff] }
 0x280   : > { %20124 = vst [vmem:[#allocation125_spill] sm:$0xff] %v14333_v5  ;;  %v2427_v15 = vcombine.high %v14192_v22, %v14196_v49  ;;  %v4157_v30 = vrot.slane %v4143_v38, %v13199_v11  ;;  %v4173_v4 = vrot.slane %v4159_v53, %v13199_v11  ;;  %v4261_v9 = vrot.slane %v4247_v32, %v13199_v11  ;;  %v12411_v5 = vld [vmem:[#allocation4 + $0x428] sm:$0xff] }
 0x281   : > { %1292 = vrot.lane.b32.xlu1 %v13819_v10, %s12502_s22  ;;  %1823 = vrot.lane.b32.xlu0 %v13823_v8, %s12500_s21  ;;  %v5534_v10 = vcombine.low %v5478_v6, %v5494_v59  ;;  %v4277_v28 = vrot.slane %v4263_v20, %v13199_v11  ;;  %v5551_v29 = vcombine.high %v5485_v57, %v5501_v42  ;;  %v20131_v57 = vld [vmem:[#allocation62_spill] sm:$0xff] }
 0x282   : > { %v14355_v61 = vrot.slane %v2475_v19, %v13237_v52  ;;  %v4207_v22 = vcombine.high %v14208_v46, %v14211_v34  ;;  %v14360_v50 = vrot.slane %v3699_v1, %v13237_v52  ;;  %v4311_v23 = vcombine.high %v4254_v37, %v4270_v39  ;;  %v20136_v1 = vld [vmem:[#allocation71_spill] sm:$0xff] }
 0x283   : > { %v2321_v41 = vrot.slane %v2307_v0, %v13199_v11  ;;  %v2337_v49 = vrot.slane %v2323_v45, %v13199_v11  ;;  %v14365_v47 = vrot.slane %v5535_v40, %v13237_v52  ;;  %v4310_v25 = vcombine.low %v4254_v37, %v4270_v39  ;;  %v20135_v40 = vld [vmem:[#allocation72_spill] sm:$0xff]  ;;  %v20138_v0 = vld [vmem:[#allocation6_spill] sm:$0xff] }
 0x284   : > { %20126 = vst [vmem:[#allocation65_spill] sm:$0xff] %v14355_v61  ;;  %20127 = vst [vmem:[#allocation126_spill] sm:$0xff] %v14360_v50  ;;  %v2441_v42 = vrot.slane %v2427_v15, %v13199_v11  ;;  %v14370_v19 = vrot.slane %v5534_v10, %v13237_v52  ;;  %v14373_v46 = vrot.slane %v5550_v18, %v13237_v52  ;;  %v20137_v39 = vld [vmem:[#allocation8_spill] sm:$0xff]  ;;  %v12410_v61 = vld [vmem:[#allocation4 + $0x408] sm:$0xff] }
 0x285   : > { %1490 = vrot.lane.b32.xlu1 %v20125_v27, %s12500_s21  ;;  %1968 = vrot.lane.b32.xlu0 %v13823_v8, %s12502_s22  ;;  %20128 = vst [vmem:[#allocation127_spill] sm:$0xff] %v14365_v47  ;;  %v2425_v8 = vrot.slane %v2411_v56, %v13199_v11  ;;  %v4222_v34 = vcombine.low %v4157_v30, %v4173_v4  ;;  %v20140_v56 = vld [vmem:[#allocation70_spill] sm:$0xff]  ;;  %v20141_v15 = vld [vmem:[#allocation68_spill] sm:$0xff]  ;;  %v12417_v47 = vld [vmem:[#allocation4 + $0x478] sm:$0xff] }
 0x286   : > { %20129 = vst [vmem:[#allocation128_spill] sm:$0xff] %v14370_v19  ;;  %20130 = vst [vmem:[#allocation129_spill] sm:$0xff] %v14373_v46  ;;  %v4326_v32 = vcombine.low %v4261_v9, %v4277_v28  ;;  %v14380_v24 = vrot.slane %v5551_v29, %v13237_v52  ;;  %v14383_v6 = vrot.slane %v4207_v22, %v13237_v52  ;;  %v20143_v29 = vld [vmem:[#allocation7_spill] sm:$0xff]  ;;  %v12416_v19 = vld [vmem:[#allocation4 + $0x458] sm:$0xff] }
 0x287   : > { %v4223_v59 = vcombine.high %v4157_v30, %v4173_v4  ;;  %v14386_v12 = vrot.slane %v4311_v23, %v13237_v52  ;;  %v2386_v38 = vcombine.low %v2321_v41, %v2337_v49  ;;  %v4327_v53 = vcombine.high %v4261_v9, %v4277_v28  ;;  %v14397_v30 = vld [vmem:[#allocation4 + $0x1c0] sm:$0xff]  ;;  %v20146_v23 = vld [vmem:[#allocation67_spill] sm:$0xff] }
 0x288   : > { %20132 = vst [vmem:[#allocation62_spill] sm:$0xff] %v14380_v24  ;;  %20133 = vst [vmem:[#allocation130_spill] sm:$0xff] %v14383_v6  ;;  %v2387_v20 = vcombine.high %v2321_v41, %v2337_v49  ;;  %v4703_v37 = vcombine.high %v20136_v1, %v20135_v40  ;;  %v2611_v45 = vcombine.high %v20138_v0, %v20137_v39  ;;  %v20142_v4 = vld [vmem:[#allocation10_spill] sm:$0xff]  ;;  %v20147_v41 = vld [vmem:[#allocation73_spill] sm:$0xff] }
 0x289   : > { %1635 = vrot.lane.b32.xlu1 %v20125_v27, %s12502_s22  ;;  %1149 = vrot.lane.b32.xlu0 %v20131_v57, %s12500_s21  ;;  %20134 = vst [vmem:[#allocation131_spill] sm:$0xff] %v14386_v12  ;;  %v14393_v10 = vrot.slane %v4310_v25, %v13237_v52  ;;  %v2490_v18 = vcombine.low %v2425_v8, %v2441_v42  ;;  %v20148_v49 = vld [vmem:[#allocation69_spill] sm:$0xff]  ;;  %v20149_v40 = vld [vmem:[#allocation80_spill] sm:$0xff]  ;;  %v20150_v1 = vld [vmem:[#allocation90_spill] sm:$0xff] }
 0x28a   : > { %v4655_v27 = vcombine.high %v20141_v15, %v20140_v56  ;;  %v2643_v22 = vcombine.high %v20143_v29, %v20142_v4  ;;  %v14402_v9 = vrot.slane %v4222_v34, %v13237_v52  ;;  %v14405_v28 = vrot.slane %v4326_v32, %v13237_v52  ;;  %v14415_v0 = vld [vmem:[#allocation4 + $0x1e0] sm:$0xff]  ;;  %v14417_v56 = vld [vmem:[#allocation4 + $0x1c8] sm:$0xff]  ;;  %v20202_v6 = vld [vmem:[#allocation20_spill] sm:$0xff] }
 0x28b   : > { %20139 = vst [vmem:[#allocation72_spill] sm:$0xff] %v14393_v10  ;;  %v4671_v25 = vcombine.high %v20148_v49, %v20147_v41  ;;  %v4687_v39 = vcombine.high %v20150_v1, %v20149_v40  ;;  %20151 = vst [vmem:[#allocation6_spill] sm:$0xff] %v14417_v56  ;;  %v14419_v34 = vld [vmem:[#allocation4 + $0x1e8] sm:$0xff]  ;;  %v14422_v32 = vrot.slane %v4223_v59, %v13237_v52  ;;  %v14438_v40 = vld [vmem:[#allocation4 + $0x1d0] sm:$0xff] }
 0x28c   : > { %20144 = vst [vmem:[#allocation71_spill] sm:$0xff] %v14402_v9  ;;  %20145 = vst [vmem:[#allocation8_spill] sm:$0xff] %v14405_v28  ;;  %v14425_v15 = vrot.slane %v2386_v38, %v13237_v52  ;;  %v14431_v4 = vrot.slane %v2387_v20, %v13237_v52  ;;  %v2491_v29 = vcombine.high %v2425_v8, %v2441_v42  ;;  %v14440_v59 = vld [vmem:[#allocation4 + $0x1f0] sm:$0xff]  ;;  %v14458_v42 = vld [vmem:[#allocation4 + $0x1f8] sm:$0xff] }
 0x28d   : > { %1829 = vrot.lane.b32.xlu1 %v20146_v23, %s12500_s21  ;;  %1294 = vrot.lane.b32.xlu0 %v20131_v57, %s12502_s22  ;;  %20152 = vst [vmem:[#allocation70_spill] sm:$0xff] %v14419_v34  ;;  %20153 = vst [vmem:[#allocation68_spill] sm:$0xff] %v14422_v32  ;;  %v14428_v57 = vrot.slane %v4327_v53, %v13237_v52  ;;  %v4751_v41 = vcombine.high %v14039_v54, %v14013_v17  ;;  %v14456_v17 = vld [vmem:[#allocation4 + $0x1d8] sm:$0xff]  ;;  %v20164_v28 = vld [vmem:[#allocation23_spill] sm:$0xff] }
 0x28e   : > { %20154 = vst [vmem:[#allocation10_spill] sm:$0xff] %v14425_v15  ;;  %20156 = vst [vmem:[#allocation67_spill] sm:$0xff] %v14431_v4  ;;  %v14436_v49 = vrot.slane %v4703_v37, %v13199_v11  ;;  %v14443_v38 = vrot.slane %v2611_v45, %v13237_v52  ;;  %v14446_v53 = vrot.slane %v2490_v18, %v13237_v52  ;;  %v20162_v45 = vld [vmem:[#allocation63_spill] sm:$0xff]  ;;  %v20165_v10 = vld [vmem:[#allocation24_spill] sm:$0xff] }
 0x28f   : > { %20155 = vst [vmem:[#allocation7_spill] sm:$0xff] %v14428_v57  ;;  %v14449_v20 = vrot.slane %v4655_v27, %v13199_v11  ;;  %v2714_v8 = vcombine.low %v14397_v30, %v14415_v0  ;;  %v14454_v54 = vrot.slane %v2643_v22, %v13237_v52  ;;  %20160 = vst [vmem:[#allocation90_spill] sm:$0xff] %v14456_v17  ;;  %v20184_v4 = vld [vmem:[#allocation94_spill] sm:$0xff] }
 0x290   : > { %20157 = vst [vmem:[#allocation73_spill] sm:$0xff] %v14443_v38  ;;  %20158 = vst [vmem:[#allocation69_spill] sm:$0xff] %v14446_v53  ;;  %v4550_v37 = vcombine.low %v14417_v56, %v14419_v34  ;;  %v4719_v18 = vcombine.high %v14028_v26, %v14036_v16  ;;  %v4685_v27 = vrot.slane %v4671_v25, %v13199_v11  ;;  %v20180_v53 = vld [vmem:[#allocation14_spill] sm:$0xff] }
 0x291   : > { %20159 = vst [vmem:[#allocation80_spill] sm:$0xff] %v14454_v54  ;;  %20161 = vst [vmem:[#allocation132_spill] sm:$0xff] %v14458_v42  ;;  %1974 = vrot.lane.b32.xlu1 %v20146_v23, %s12502_s22  ;;  %1488 = vrot.lane.b32.xlu0 %v20162_v45, %s12500_s21  ;;  %v4701_v22 = vrot.slane %v4687_v39, %v13199_v11  ;;  %v2730_v1 = vcombine.low %v14438_v40, %v14440_v59  ;;  %v20177_v54 = vld [vmem:[#allocation81_spill] sm:$0xff] }
 0x292   : > { %v14473_v57 = vrot.slane %v2491_v29, %v13237_v52  ;;  %v20166_v23 = vcombine.low %v20164_v28, %v20165_v10  ;;  %v20168_v16 = vcombine.high %v20164_v28, %v20165_v10  ;;  %v14488_v25 = vrot.slane %v4751_v41, %v13237_v52  ;;  %v20174_v41 = vld [vmem:[#allocation64_spill] sm:$0xff]  ;;  %v20181_v29 = vld [vmem:[#allocation11_spill] sm:$0xff] }
 0x293   : > { %v4766_v39 = vcombine.low %v4701_v22, %v14436_v49  ;;  %v4566_v50 = vcombine.low %v14456_v17, %v14458_v42  ;;  %v14503_v28 = vrot.slane %v4550_v37, %v13199_v11  ;;  %v5199_v10 = vcombine.high %v12410_v61, %v12411_v5  ;;  %v20178_v37 = vld [vmem:[#allocation75_spill] sm:$0xff]  ;;  %v12412_v5 = vld [vmem:[#allocation4 + $0x418] sm:$0xff]  ;;  %v12423_v42 = vld [vmem:[#allocation4 + $0x420] sm:$0xff] }
 0x294   : > { %20163 = vst [vmem:[#allocation63_spill] sm:$0xff] %v14473_v57  ;;  %v14479_v12 = vrot.slane %v20166_v23, %v13237_v52  ;;  %v14485_v26 = vrot.slane %v20168_v16, %v13237_v52  ;;  %v14496_v23 = vrot.slane %v2714_v8, %v13199_v11  ;;  %v14510_v16 = vrot.slane %v4719_v18, %v13237_v52  ;;  %v20175_v57 = vld [vmem:[#allocation12_spill] sm:$0xff]  ;;  %v12413_v61 = vld [vmem:[#allocation4 + $0x438] sm:$0xff] }
 0x295   : > { %20173 = vst [vmem:[#allocation134_spill] sm:$0xff] %v14503_v28  ;;  %1151 = vrot.lane.b32.xlu1 %v20174_v41, %s12500_s21  ;;  %1633 = vrot.lane.b32.xlu0 %v20162_v45, %s12502_s22  ;;  %v4734_v8 = vcombine.low %v14449_v20, %v4685_v27  ;;  %v5351_v38 = vcombine.high %v20178_v37, %v20177_v54  ;;  %v12414_v37 = vld [vmem:[#allocation4 + $0x448] sm:$0xff] }
 0x296   : > { %20167 = vst [vmem:[#allocation23_spill] sm:$0xff] %v14479_v12  ;;  %20169 = vst [vmem:[#allocation24_spill] sm:$0xff] %v14485_v26  ;;  %v20176_v26 = vld [vmem:[#allocation9_spill] sm:$0xff]  ;;  %v14518_v21 = vrot.slane %v2730_v1, %v13199_v11  ;;  %v4479_v45 = vcombine.high %v20181_v29, %v20180_v53  ;;  %v4784_v18 = vcombine.low %v14510_v16, %v14488_v25  ;;  %v12415_v1 = vld [vmem:[#allocation4 + $0x468] sm:$0xff] }
 0x297   : > { %20172 = vst [vmem:[#allocation133_spill] sm:$0xff] %v14496_v23  ;;  %v4447_v12 = vcombine.high %v20176_v26, %v20175_v57  ;;  %v14525_v24 = vrot.slane %v4766_v39, %v13237_v52  ;;  %v4767_v57 = vcombine.high %v4701_v22, %v14436_v49  ;;  %v14529_v26 = vrot.slane %v4566_v50, %v13199_v11  ;;  %v20183_v29 = vld [vmem:[#allocation91_spill] sm:$0xff]  ;;  %v20185_v49 = vld [vmem:[#allocation66_spill] sm:$0xff] }
 0x298   : > { %20179 = vst [vmem:[#allocation64_spill] sm:$0xff] %v14518_v21  ;;  %v5215_v54 = vcombine.high %v12412_v5, %v12413_v61  ;;  %v5231_v46 = vcombine.high %v12414_v37, %v12415_v1  ;;  %v5247_v53 = vcombine.high %v12416_v19, %v12417_v47  ;;  %v5335_v32 = vcombine.high %v20184_v4, %v20183_v29  ;;  %v20187_v5 = vld [vmem:[#allocation98_spill] sm:$0xff] }
 0x299   : > { %20182 = vst [vmem:[#allocation12_spill] sm:$0xff] %v14529_v26  ;;  %1296 = vrot.lane.b32.xlu1 %v20174_v41, %s12502_s22  ;;  %1827 = vrot.lane.b32.xlu0 %v20185_v49, %s12500_s21  ;;  %v14538_v50 = vrot.slane %v4734_v8, %v13237_v52  ;;  %v4735_v22 = vcombine.high %v14449_v20, %v4685_v27  ;;  %v20188_v61 = vld [vmem:[#allocation102_spill] sm:$0xff]  ;;  %v20192_v27 = vld [vmem:[#allocation108_spill] sm:$0xff] }
 0x29a   : > { %v14542_v39 = vrot.slane %v4447_v12, %v13237_v52  ;;  %v5399_v47 = vcombine.high %v20188_v61, %v20187_v5  ;;  %v14547_v19 = vrot.slane %v5199_v10, %v13199_v11  ;;  %v5365_v4 = vrot.slane %v5351_v38, %v13199_v11  ;;  %v20191_v12 = vld [vmem:[#allocation106_spill] sm:$0xff]  ;;  %v20193_v5 = vld [vmem:[#allocation31_spill] sm:$0xff] }
 0x29b   : > { %v14551_v41 = vrot.slane %v4479_v45, %v13237_v52  ;;  %v20190_v8 = vcombine.low %v13916_v36, %v14113_v58  ;;  %v4786_v20 = vcombine.low %v14538_v50, %v14525_v24  ;;  %v4783_v1 = vcombine.high %v20192_v27, %v20191_v12 }
 0x29c   : > { %20186 = vst [vmem:[#allocation9_spill] sm:$0xff] %v14542_v39  ;;  %v14561_v29 = vrot.slane %v4767_v57, %v13237_v52  ;;  %v14564_v10 = vrot.slane %v5215_v54, %v13199_v11  ;;  %v14567_v38 = vrot.slane %v5231_v46, %v13199_v11  ;;  %v14570_v45 = vrot.slane %v5247_v53, %v13199_v11  ;;  %v20194_v54 = vld [vmem:[#allocation30_spill] sm:$0xff]  ;;  %v20196_v46 = vld [vmem:[#allocation33_spill] sm:$0xff] }
 0x29d   : > { %20189 = vst [vmem:[#allocation81_spill] sm:$0xff] %v14551_v41  ;;  %v11624_v37 = vpack.i.bf16 %v20190_v8, %v4784_v18  ;;  %v5349_v18 = vrot.slane %v5335_v32, %v13199_v11  ;;  %1972 = vrot.lane.b32.xlu0 %v20185_v49, %s12502_s22  ;;  %v14577_v57 = vrot.slane %v4735_v22, %v13237_v52  ;;  %v20195_v8 = vld [vmem:[#allocation37_spill] sm:$0xff]  ;;  %v20199_v49 = vld [vmem:[#allocation107_spill] sm:$0xff] }
 0x29e   : > { %v5263_v61 = vcombine.high %v20194_v54, %v20193_v5  ;;  %v5295_v12 = vcombine.high %v20196_v46, %v20195_v8  ;;  %v14584_v53 = vrot.slane %v5399_v47, %v13237_v52  ;;  %v2778_v32 = vcombine.low %v14496_v23, %v14518_v21  ;;  %v12428_v23 = vld [vmem:[#allocation4 + $0x450] sm:$0xff] }
 0x29f   : > { %11625 = vrot.lane.b32.xlu1 %v11624_v37, %s12504_s25  ;;  %v5414_v27 = vcombine.low %v5349_v18, %v5365_v4  ;;  %v20200_v22 = vcombine.low %v13923_v51, %v20199_v49  ;;  %v20203_v5 = vcombine.high %v20201_v44, %v20202_v6  ;;  %v4788_v8 = vcombine.low %v14577_v57, %v14561_v29  ;;  %v20205_v37 = vld [vmem:[#allocation77_spill] sm:$0xff]  ;;  %v20207_v6 = vld [vmem:[#allocation112_spill] sm:$0xff] }
 0x2a0   : > { %v4785_v47 = vcombine.high %v14510_v16, %v14488_v25  ;;  %v5278_v46 = vcombine.low %v14547_v19, %v14564_v10  ;;  %v5310_v9 = vcombine.low %v14567_v38, %v14570_v45  ;;  %v14611_v25 = vrot.slane %v5263_v61, %v13237_v52 }
 0x2a1   : > { %v11634_v14 = vpack.i.bf16 %v20200_v22, %v4786_v20  ;;  %v11619_v54 = vpack.i.bf16 %v20203_v5, %v4783_v1  ;;  %v14614_v16 = vrot.slane %v5295_v12, %v13237_v52  ;;  %v14619_v22 = vrot.slane %v5414_v27, %v13237_v52  ;;  %v20204_v20 = vld [vmem:[#allocation78_spill] sm:$0xff] }
 0x2a2   : > { %v5415_v5 = vcombine.high %v5349_v18, %v5365_v4  ;;  %v2819_v15 = vcombine.high %v20205_v37, %v20204_v20  ;;  %v20209_v12 = vcombine.high %v13916_v36, %v14113_v58  ;;  %v5464_v1 = vcombine.low %v14584_v53, %v20210_v33  ;;  %v20211_v37 = vld [vmem:[#allocation87_spill] sm:$0xff]  ;;  %v20212_v20 = vld [vmem:[#allocation85_spill] sm:$0xff] }
 0x2a3   : > { %11635 = vrot.lane.b32.xlu1 %v11634_v14, %s12505_s26  ;;  %11620 = vrot.lane.b32.xlu0 %v11619_v54, %s12506_s29  ;;  %v20206_v54 = vld [vmem:[#allocation74_spill] sm:$0xff]  ;;  %v4787_v4 = vcombine.high %v14538_v50, %v14525_v24  ;;  %v14636_v27 = vrot.slane %v5278_v46, %v13237_v52  ;;  %v14639_v18 = vrot.slane %v5310_v9, %v13237_v52  ;;  %v20215_v46 = vld [vmem:[#allocation104_spill] sm:$0xff] }
 0x2a4   : > { %v20208_v61 = vcombine.low %v20206_v54, %v20207_v6  ;;  %v11629_v43 = vpack.i.bf16 %v20209_v12, %v4785_v47  ;;  %v2835_v14 = vcombine.high %v20212_v20, %v20211_v37  ;;  %v5328_v36 = vcombine.low %v14611_v25, %v14614_v16  ;;  %v20213_v9 = vld [vmem:[#allocation82_spill] sm:$0xff]  ;;  %v20214_v47 = vld [vmem:[#allocation99_spill] sm:$0xff] }
 0x2a5   : > { %v5279_v58 = vcombine.high %v14547_v19, %v14564_v10  ;;  %v5311_v24 = vcombine.high %v14567_v38, %v14570_v45  ;;  %v5466_v50 = vcombine.low %v14619_v22, %v20213_v9  ;;  %v20216_v12 = vld [vmem:[#allocation86_spill] sm:$0xff]  ;;  %v4789_v10 = vcombine.high %v14577_v57, %v14561_v29 }
 0x2a6   : > { %v11644_v44 = vpack.i.bf16 %v20208_v61, %v4788_v8  ;;  %v2915_v61 = vcombine.high %v20215_v46, %v20214_v47  ;;  %v11659_v20 = vpack.i.bf16 %v5464_v1, %v5328_v36  ;;  %v20218_v8 = vcombine.high %v13923_v51, %v20199_v49  ;;  %v20219_v47 = vld [vmem:[#allocation103_spill] sm:$0xff]  ;;  %v20221_v1 = vld [vmem:[#allocation92_spill] sm:$0xff] }
 0x2a7   : > { %11630 = vrot.lane.b32.xlu0 %v11629_v43, %s12508_s9  ;;  %v20217_v43 = vld [vmem:[#allocation79_spill] sm:$0xff]  ;;  %v14668_v38 = vrot.slane %v5415_v5, %v13237_v52  ;;  %v5330_v45 = vcombine.low %v14636_v27, %v14639_v18  ;;  %v14675_v41 = vrot.slane %v2835_v14, %v13199_v11  ;;  %v14682_v51 = vrot.slane %v5279_v58, %v13237_v52  ;;  %v14717_v58 = vld [vmem:[#allocation4 + $0x110] sm:$0xff] }
 0x2a8   : > { %11645 = vrot.lane.b32.xlu1 %v11644_v44, %s12507_s30  ;;  %v14658_v44 = vrot.slane %v2819_v15, %v13199_v11  ;;  %v2867_v37 = vcombine.high %v20217_v43, %v20216_v12  ;;  %v11639_v19 = vpack.i.bf16 %v20218_v8, %v4787_v4  ;;  %v20220_v15 = vld [vmem:[#allocation100_spill] sm:$0xff]  ;;  %v20222_v36 = vld [vmem:[#allocation95_spill] sm:$0xff]  ;;  %v14685_v29 = vrot.slane %v5311_v24, %v13237_v52  ;;  %v14696_v4 = vld [vmem:[#allocation4 + $0x100] sm:$0xff] }
 0x2a9   : > { %v2883_v46 = vcombine.high %v20220_v15, %v20219_v47  ;;  %v2851_v12 = vcombine.high %v20222_v36, %v20221_v1  ;;  %v14688_v57 = vrot.slane %v2778_v32, %v13237_v52  ;;  %v11669_v49 = vpack.i.bf16 %v5466_v50, %v5330_v45  ;;  %v14698_v8 = vld [vmem:[#allocation4 + $0x120] sm:$0xff]  ;;  %v20225_v32 = vld [vmem:[#allocation83_spill] sm:$0xff]  ;;  %v20228_v45 = vld [vmem:[#allocation101_spill] sm:$0xff] }
 0x2aa   : > { %v14691_v5 = vrot.slane %v2915_v61, %v13237_v52  ;;  %v14694_v14 = vrot.slane %v2867_v37, %v13199_v11  ;;  %v20224_v24 = vcombine.high %v20206_v54, %v20207_v6  ;;  %v5468_v50 = vcombine.low %v14668_v38, %v20225_v32  ;;  %v20227_v61 = vld [vmem:[#allocation109_spill] sm:$0xff]  ;;  %v14719_v6 = vld [vmem:[#allocation4 + $0x130] sm:$0xff] }
 0x2ab   : > { %11640 = vrot.lane.b32.xlu0 %v11639_v19, %s12509_s10  ;;  %20223 = vst [vmem:[#allocation75_spill] sm:$0xff] %v14688_v57  ;;  %v20229_v37 = vld [vmem:[#allocation105_spill] sm:$0xff]  ;;  %v14712_v15 = vrot.slane %v2883_v46, %v13237_v52  ;;  %v2865_v1 = vrot.slane %v2851_v12, %v13199_v11  ;;  %v2898_v36 = vcombine.low %v14658_v44, %v14675_v41  ;;  %v20230_v46 = vld [vmem:[#allocation39_spill] sm:$0xff]  ;;  %v20231_v12 = vld [vmem:[#allocation38_spill] sm:$0xff] }
 0x2ac   : > { %11660 = vrot.lane.b32.xlu1 %v11659_v20, %s12504_s25  ;;  %v11649_v43 = vpack.i.bf16 %v20224_v24, %v4789_v10  ;;  %v20226_v20 = vld [vmem:[#allocation84_spill] sm:$0xff]  ;;  %v3563_v47 = vcombine.high %v20229_v37, %v20228_v45  ;;  %v5332_v10 = vcombine.low %v14682_v51, %v14685_v29  ;;  %v5327_v24 = vcombine.high %v20231_v12, %v20230_v46  ;;  %v20236_v46 = vld [vmem:[#allocation89_spill] sm:$0xff] }
 0x2ad   : > { %v5463_v19 = vcombine.high %v20227_v61, %v20226_v20  ;;  %v20232_v45 = vld [vmem:[#allocation36_spill] sm:$0xff]  ;;  %v2948_v20 = vcombine.low %v14712_v15, %v14691_v5  ;;  %v5465_v54 = vcombine.high %v14584_v53, %v20210_v33  ;;  %v20234_v61 = vld [vmem:[#allocation35_spill] sm:$0xff] }
 0x2ae   : > { %v20233_v37 = vld [vmem:[#allocation32_spill] sm:$0xff]  ;;  %v11679_v26 = vpack.i.bf16 %v5468_v50, %v5332_v10  ;;  %v14739_v17 = vrot.slane %v3563_v47, %v13237_v52  ;;  %v5329_v47 = vcombine.high %v14611_v25, %v14614_v16 }
 0x2af   : > { %11650 = vrot.lane.b32.xlu0 %v11649_v43, %s12510_s11  ;;  %v3459_v39 = vcombine.high %v20233_v37, %v20232_v45  ;;  %v2930_v43 = vcombine.low %v2865_v1, %v14694_v14  ;;  %v1479_v55 = vpop.permute.xlu1 %1478  ;;  %v11654_v28 = vpack.i.bf16 %v5463_v19, %v5327_v24  ;;  %v20237_v12 = vld [vmem:[#allocation88_spill] sm:$0xff]  ;;  %v12422_v37 = vld [vmem:[#allocation4 + $0x400] sm:$0xff]  ;;  %v5467_v24 = vcombine.high %v14619_v22, %v20213_v9 }
 0x2b0   : > { %11670 = vrot.lane.b32.xlu1 %v11669_v49, %s12505_s26  ;;  %v20235_v49 = vld [vmem:[#allocation34_spill] sm:$0xff]  ;;  %v3515_v45 = vcombine.high %v20237_v12, %v20236_v46  ;;  %1550 = vst.msk [vmem:[#allocation4 + $0x308] sm:$0xff] %vm1064_vm7, %v1479_v55  ;;  %v3363_v56 = vcombine.high %v12422_v37, %v12423_v42  ;;  %v12424_v33 = vld [vmem:[#allocation4 + $0x410] sm:$0xff]  ;;  %v20238_v42 = vld [vmem:[#allocation93_spill] sm:$0xff]  ;;  %v11664_v16 = vpack.i.bf16 %v5465_v54, %v5329_v47 }
 0x2b1   : > { %v3427_v57 = vcombine.high %v20235_v49, %v20234_v61  ;;  %v12425_v53 = vld [vmem:[#allocation4 + $0x430] sm:$0xff]  ;;  %v12426_v61 = vld [vmem:[#allocation4 + $0x440] sm:$0xff]  ;;  %v14749_v55 = vrot.slane %v3459_v39, %v13237_v52  ;;  %v20240_v39 = vcombine.low %v13986_v3, %v14147_v63  ;;  %v14773_v22 = vrot.slane %v2898_v36, %v13237_v52 }
 0x2b2   : > { %v3379_v34 = vcombine.high %v12424_v33, %v12425_v53  ;;  %v12427_v49 = vld [vmem:[#allocation4 + $0x460] sm:$0xff]  ;;  %v12429_v50 = vld [vmem:[#allocation4 + $0x470] sm:$0xff]  ;;  %v20241_v33 = vld [vmem:[#allocation97_spill] sm:$0xff]  ;;  %v2899_v9 = vcombine.high %v14658_v44, %v14675_v41  ;;  %v5331_v36 = vcombine.high %v14636_v27, %v14639_v18  ;;  %v14796_v44 = vrot.slane %v3363_v56, %v13199_v11 }
 0x2b3   : > { %v3395_v21 = vcombine.high %v12426_v61, %v12427_v49  ;;  %v3411_v19 = vcombine.high %v12428_v23, %v12429_v50  ;;  %11655 = vrot.lane.b32.xlu0 %v11654_v28, %s12506_s29  ;;  %v20239_v10 = vld [vmem:[#allocation96_spill] sm:$0xff]  ;;  %v14754_v12 = vrot.slane %v3427_v57, %v13237_v52  ;;  %v14759_v23 = vrot.slane %v2930_v43, %v13237_v52  ;;  %v1138_v37 = vpop.permute.xlu0 %1137  ;;  %v12430_v56 = vld [vmem:[#allocation4 + $0x140] sm:$0xff] }
 0x2b4   : > { %11680 = vrot.lane.b32.xlu1 %v11679_v26, %s12507_s30  ;;  %v3499_v46 = vcombine.high %v20239_v10, %v20238_v42  ;;  %v2931_v28 = vcombine.high %v2865_v1, %v14694_v14  ;;  %v1624_v26 = vpop.permute.xlu1 %1623  ;;  %v11699_v25 = vpack.i.bf16 %v20240_v39, %v2948_v20  ;;  %v3628_v53 = vcombine.low %v14739_v17, %v20241_v33  ;;  %v12431_v47 = vld [vmem:[#allocation4 + $0x160] sm:$0xff]  ;;  %v12432_v42 = vld [vmem:[#allocation4 + $0x150] sm:$0xff]  ;;  %v12434_v39 = vld [vmem:[#allocation4 + $0x108] sm:$0xff] }
 0x2b5   : > { %v14768_v57 = vrot.slane %v3515_v45, %v13199_v11  ;;  %1695 = vst.msk [vmem:[#allocation4 + $0x3c8] sm:$0xff] %vm1064_vm7, %v1624_v26  ;;  %1210 = vst.msk [vmem:[#allocation4 + $0xc0] sm:$0xff] %vm1064_vm7, %v1138_v37  ;;  %v14778_v14 = vrot.slane %v3395_v21, %v13199_v11  ;;  %v14781_v20 = vrot.slane %v3411_v19, %v13199_v11  ;;  %v12433_v10 = vld [vmem:[#allocation4 + $0x170] sm:$0xff] }
 0x2b6   : > { %v3492_v1 = vcombine.low %v14754_v12, %v14749_v55  ;;  %v3513_v54 = vrot.slane %v3499_v46, %v13199_v11  ;;  %v2951_v41 = vcombine.high %v14773_v22, %v14759_v23  ;;  %v14793_v21 = vrot.slane %v2931_v28, %v13237_v52 }
 0x2b7   : > { %11665 = vrot.lane.b32.xlu0 %v11664_v16, %s12508_s9  ;;  %v14799_v43 = vrot.slane %v3379_v34, %v13199_v11  ;;  %v1283_v61 = vpop.permute.xlu0 %1282  ;;  %v11674_v50 = vpack.i.bf16 %v5467_v24, %v5331_v36  ;;  %v5469_v27 = vcombine.high %v14668_v38, %v20225_v32  ;;  %v14807_v19 = vrot.slane %v2899_v9, %v13237_v52  ;;  %v20243_v9 = vld [vmem:[#allocation110_spill] sm:$0xff] }
 0x2b8   : > { %11700 = vrot.lane.b32.xlu1 %v11699_v25, %s12504_s25  ;;  %v1818_v45 = vpop.permute.xlu1 %1817  ;;  %v11704_v49 = vpack.i.bf16 %v3628_v53, %v3492_v1  ;;  %v3578_v18 = vcombine.low %v3513_v54, %v14768_v57  ;;  %1355 = vst.msk [vmem:[#allocation4 + $0x180] sm:$0xff] %vm1064_vm7, %v1283_v61  ;;  %v2579_v34 = vcombine.high %v12430_v56, %v12431_v47  ;;  %v12435_v25 = vld [vmem:[#allocation4 + $0x128] sm:$0xff]  ;;  %v20244_v1 = vld [vmem:[#allocation113_spill] sm:$0xff] }
 0x2b9   : > { %1889 = vst.msk [vmem:[#allocation4 + $0x548] sm:$0xff] %vm1064_vm7, %v1818_v45  ;;  %v2595_v46 = vcombine.high %v12432_v42, %v12433_v10  ;;  %v2715_v24 = vcombine.high %v14397_v30, %v14415_v0  ;;  %v5333_v38 = vcombine.high %v14682_v51, %v14685_v29  ;;  %v3474_v32 = vcombine.low %v14778_v14, %v14781_v20 }
 0x2ba   : > { %v2731_v28 = vcombine.high %v14438_v40, %v14440_v59  ;;  %v20242_v26 = vcombine.high %v14083_v60, %v14150_v31  ;;  %v2953_v30 = vcombine.high %v14807_v19, %v14793_v21  ;;  %v3442_v0 = vcombine.low %v14796_v44, %v14799_v43 }
 0x2bb   : > { %11675 = vrot.lane.b32.xlu0 %v11674_v50, %s12509_s10  ;;  %v4383_v16 = vcombine.high %v12434_v39, %v12435_v25  ;;  %v1477_v29 = vpop.permute.xlu0 %1476  ;;  %v11684_v53 = vpack.i.bf16 %v5469_v27, %v5333_v38  ;;  %v2947_v36 = vcombine.high %v20244_v1, %v20243_v9  ;;  %v14829_v40 = vrot.slane %v3578_v18, %v13237_v52  ;;  %v20250_v38 = vld [vmem:[#allocation114_spill] sm:$0xff]  ;;  %v12440_v39 = vld [vmem:[#allocation4 + $0x158] sm:$0xff] }
 0x2bc   : > { %11705 = vrot.lane.b32.xlu1 %v11704_v49, %s12504_s25  ;;  %v11724_v37 = vpack.i.bf16 %v20242_v26, %v2951_v41  ;;  %v1963_v51 = vpop.permute.xlu1 %1962  ;;  %v3579_v59 = vcombine.high %v3513_v54, %v14768_v57  ;;  %1549 = vst.msk [vmem:[#allocation4 + $0x300] sm:$0xff] %vm1064_vm7, %v1477_v29  ;;  %v20245_v41 = vcombine.high %v14696_v4, %v14698_v8  ;;  %v12436_v57 = vld [vmem:[#allocation4 + $0x118] sm:$0xff]  ;;  %v2082_v9 = vld [vmem:[#allocation4 + $0xc0] sm:$0xff] }
 0x2bd   : > { %2034 = vst.msk [vmem:[#allocation4 + $0x608] sm:$0xff] %vm1064_vm7, %v1963_v51  ;;  %v20246_v61 = vcombine.high %v14717_v58, %v14719_v6  ;;  %v14847_v50 = vrot.slane %v2579_v34, %v13199_v11  ;;  %v12437_v54 = vld [vmem:[#allocation4 + $0x138] sm:$0xff]  ;;  %v14852_v4 = vrot.slane %v3474_v32, %v13237_v52  ;;  %v3475_v8 = vcombine.high %v14778_v14, %v14781_v20  ;;  %v20251_v32 = vld [vmem:[#allocation111_spill] sm:$0xff] }
 0x2be   : > { %v14838_v45 = vrot.slane %v20245_v41, %v13199_v11  ;;  %v4399_v27 = vcombine.high %v12436_v57, %v12437_v54  ;;  %v14857_v58 = vrot.slane %v2595_v46, %v13199_v11  ;;  %v20247_v6 = vcombine.high %v14098_v2, %v14169_v62  ;;  %v12441_v25 = vld [vmem:[#allocation4 + $0x178] sm:$0xff] }
 0x2bf   : > { %v14844_v49 = vrot.slane %v20246_v61, %v13199_v11  ;;  %11685 = vrot.lane.b32.xlu0 %v11684_v53, %s12510_s11  ;;  %v14863_v56 = vrot.slane %v3442_v0, %v13237_v52  ;;  %v3443_v47 = vcombine.high %v14796_v44, %v14799_v43  ;;  %v14868_v34 = vrot.slane %v2715_v24, %v13199_v11  ;;  %v1622_v10 = vpop.permute.xlu0 %1621  ;;  %v12438_v24 = vld [vmem:[#allocation4 + $0x148] sm:$0xff]  ;;  %v20253_v53 = vld [vmem:[#allocation40_spill] sm:$0xff] }
 0x2c0   : > { %11725 = vrot.lane.b32.xlu1 %v11724_v37, %s12509_s10  ;;  %v11734_v18 = vpack.i.bf16 %v20247_v6, %v2953_v30  ;;  %v1140_v42 = vpop.permute.xlu1 %1139  ;;  %v20249_v14 = vcombine.high %v13254_v48, %v13257_v13  ;;  %v3631_v46 = vcombine.high %v14829_v40, %v14298_v7  ;;  %v3627_v26 = vcombine.high %v20251_v32, %v20250_v38  ;;  %v12439_v30 = vld [vmem:[#allocation4 + $0x168] sm:$0xff] }
 0x2c1   : > { %20248 = vst [vmem:[#allocation14_spill] sm:$0xff] %v14868_v34  ;;  %v14878_v37 = vrot.slane %v3579_v59, %v13237_v52  ;;  %1211 = vst.msk [vmem:[#allocation4 + $0xc8] sm:$0xff] %vm1064_vm7, %v1140_v42  ;;  %v2626_v44 = vcombine.low %v14838_v45, %v14844_v49  ;;  %v14885_v43 = vrot.slane %v2731_v28, %v13199_v11 }
 0x2c2   : > { %v11689_v20 = vpack.i.bf16 %v20249_v14, %v2947_v36  ;;  %1694 = vst.msk [vmem:[#allocation4 + $0x3c0] sm:$0xff] %vm1064_vm7, %v1622_v10  ;;  %v4415_v0 = vcombine.high %v12438_v24, %v12439_v30  ;;  %v4431_v51 = vcombine.high %v12440_v39, %v12441_v25  ;;  %v3495_v29 = vcombine.high %v14863_v56, %v14852_v4  ;;  %v20254_v36 = vld [vmem:[#allocation41_spill] sm:$0xff]  ;;  %v20258_v14 = vld [vmem:[#allocation64_spill] sm:$0xff]  ;;  %v20264_v30 = vld [vmem:[#allocation6_spill] sm:$0xff] }
 0x2c3   : > { %20252 = vst [vmem:[#allocation11_spill] sm:$0xff] %v14885_v43  ;;  %v3491_v59 = vcombine.high %v20254_v36, %v20253_v53  ;;  %v14894_v41 = vrot.slane %v3475_v8, %v13237_v52  ;;  %v14897_v28 = vrot.slane %v3443_v47, %v13237_v52  ;;  %v2658_v61 = vcombine.low %v14847_v50, %v14857_v58  ;;  %v20265_v25 = vld [vmem:[#allocation132_spill] sm:$0xff]  ;;  %v2165_v53 = vld [vmem:[#allocation4 + $0x358] sm:$0xff]  ;;  %v15260_v36 = vld [vmem:[#allocation4 + $0x300] sm:$0xff] }
 0x2c4   : > { %11735 = vrot.lane.b32.xlu1 %v11734_v18, %s12510_s11  ;;  %11690 = vrot.lane.b32.xlu0 %v11689_v20, %s12506_s29  ;;  %v14902_v57 = vrot.slane %v4383_v16, %v13199_v11  ;;  %v14905_v54 = vrot.slane %v4399_v27, %v13199_v11  ;;  %v1285_v6 = vpop.permute.xlu1 %1284  ;;  %v1816_v18 = vpop.permute.xlu0 %1815  ;;  %v11744_v42 = vpack.i.bf16 %v3631_v46, %v3495_v29  ;;  %v20257_v16 = vld [vmem:[#allocation133_spill] sm:$0xff]  ;;  %v20266_v29 = vld [vmem:[#allocation90_spill] sm:$0xff] }
 0x2c5   : > { %v11694_v10 = vpack.i.bf16 %v3627_v26, %v3491_v59  ;;  %v3633_v8 = vcombine.high %v14878_v37, %v14312_v35  ;;  %v2949_v47 = vcombine.high %v14712_v15, %v14691_v5  ;;  %1356 = vst.msk [vmem:[#allocation4 + $0x188] sm:$0xff] %vm1064_vm7, %v1285_v6  ;;  %1888 = vst.msk [vmem:[#allocation4 + $0x540] sm:$0xff] %vm1064_vm7, %v1816_v18  ;;  %v20263_v15 = vld [vmem:[#allocation70_spill] sm:$0xff]  ;;  %v2163_v6 = vld [vmem:[#allocation4 + $0x348] sm:$0xff] }
 0x2c6   : > { %20255 = vst [vmem:[#allocation91_spill] sm:$0xff] %v14902_v57  ;;  %20256 = vst [vmem:[#allocation94_spill] sm:$0xff] %v14905_v54  ;;  %v20259_v20 = vcombine.high %v20257_v16, %v20258_v14  ;;  %v2794_v46 = vcombine.low %v14868_v34, %v14885_v43  ;;  %v14922_v26 = vrot.slane %v4415_v0, %v13199_v11  ;;  %v20267_v0 = vld [vmem:[#allocation134_spill] sm:$0xff]  ;;  %v20268_v18 = vld [vmem:[#allocation12_spill] sm:$0xff] }
 0x2c7   : > { %v14925_v24 = vrot.slane %v4431_v51, %v13199_v11  ;;  %v3497_v5 = vcombine.high %v14897_v28, %v14894_v41  ;;  %v4551_v39 = vcombine.high %v20264_v30, %v20263_v15  ;;  %v4567_v59 = vcombine.high %v20266_v29, %v20265_v25  ;;  %v12463_v43 = vld [vmem:[#allocation4 + $0x6b0] sm:$0xff] }
 0x2c8   : > { %v14917_v27 = vrot.slane %v20259_v20, %v13237_v52  ;;  %20261 = vst [vmem:[#allocation98_spill] sm:$0xff] %v14922_v26  ;;  %11745 = vrot.lane.b32.xlu1 %v11744_v42, %s12509_s10  ;;  %11695 = vrot.lane.b32.xlu0 %v11694_v10, %s12506_s29  ;;  %v20269_v16 = vcombine.low %v20267_v0, %v20268_v18  ;;  %v1483_v15 = vpop.permute.xlu1 %1482  ;;  %v1961_v30 = vpop.permute.xlu0 %1960 }
 0x2c9   : > { %20262 = vst [vmem:[#allocation102_spill] sm:$0xff] %v14925_v24  ;;  %v20271_v42 = vcombine.high %v20267_v0, %v20268_v18  ;;  %v14948_v14 = vrot.slane %v2626_v44, %v13237_v52  ;;  %v14951_v20 = vrot.slane %v2658_v61, %v13237_v52  ;;  %v11754_v25 = vpack.i.bf16 %v3633_v8, %v3497_v5  ;;  %v2167_v0 = vld [vmem:[#allocation4 + $0x368] sm:$0xff]  ;;  %v2169_v18 = vld [vmem:[#allocation4 + $0x378] sm:$0xff]  ;;  %v12442_v61 = vld [vmem:[#allocation4 + $0x340] sm:$0xff] }
 0x2ca   : > { %20260 = vst [vmem:[#allocation66_spill] sm:$0xff] %v14917_v27  ;;  %v14939_v51 = vrot.slane %v20269_v16, %v13237_v52  ;;  %v20275_v29 = vcombine.high %v13986_v3, %v14147_v63  ;;  %v4462_v44 = vcombine.low %v14902_v57, %v14905_v54  ;;  %1552 = vst.msk [vmem:[#allocation4 + $0x318] sm:$0xff] %vm1064_vm7, %v1483_v15  ;;  %v12444_v5 = vld [vmem:[#allocation4 + $0x350] sm:$0xff]  ;;  %v2269_v54 = vld [vmem:[#allocation4 + $0x698] sm:$0xff] }
 0x2cb   : > { %v14945_v10 = vrot.slane %v20271_v42, %v13237_v52  ;;  %20273 = vst [vmem:[#allocation37_spill] sm:$0xff] %v14948_v14  ;;  %20274 = vst [vmem:[#allocation33_spill] sm:$0xff] %v14951_v20  ;;  %v12443_v42 = vld [vmem:[#allocation4 + $0x360] sm:$0xff]  ;;  %v14963_v63 = vrot.slane %v2794_v46, %v13237_v52  ;;  %v14975_v15 = vrot.slane %v4567_v59, %v13199_v11 }
 0x2cc   : > { %20270 = vst [vmem:[#allocation31_spill] sm:$0xff] %v14939_v51  ;;  %v11709_v16 = vpack.i.bf16 %v20275_v29, %v2949_v47  ;;  %v3629_v51 = vcombine.high %v14739_v17, %v20241_v33  ;;  %2033 = vst.msk [vmem:[#allocation4 + $0x600] sm:$0xff] %vm1064_vm7, %v1961_v30  ;;  %v3122_v8 = vcombine.low %v12442_v61, %v12443_v42  ;;  %11755 = vrot.lane.b32.xlu1 %v11754_v25, %s12510_s11  ;;  %v1628_v61 = vpop.permute.xlu1 %1627  ;;  %v1142_v42 = vpop.permute.xlu0 %1141 }
 0x2cd   : > { %20272 = vst [vmem:[#allocation30_spill] sm:$0xff] %v14945_v10  ;;  %v12445_v10 = vld [vmem:[#allocation4 + $0x370] sm:$0xff]  ;;  %20276 = vst [vmem:[#allocation107_spill] sm:$0xff] %v14963_v63  ;;  %v4494_v17 = vcombine.low %v14922_v26, %v14925_v24  ;;  %v3493_v33 = vcombine.high %v14754_v12, %v14749_v55  ;;  %v14972_v47 = vrot.slane %v4551_v39, %v13199_v11  ;;  %v12464_v26 = vld [vmem:[#allocation4 + $0x680] sm:$0xff] }
 0x2ce   : > { %v3138_v3 = vcombine.low %v12444_v5, %v12445_v10  ;;  %11710 = vrot.lane.b32.xlu0 %v11709_v16, %s12508_s9  ;;  %20278 = vst [vmem:[#allocation77_spill] sm:$0xff] %v14975_v15  ;;  %v4958_v10 = vcombine.low %v2163_v6, %v2167_v0  ;;  %v4974_v30 = vcombine.low %v2165_v53, %v2169_v18  ;;  %1697 = vst.msk [vmem:[#allocation4 + $0x3d8] sm:$0xff] %vm1064_vm7, %v1628_v61 }
 0x2cf   : > { %20277 = vst [vmem:[#allocation78_spill] sm:$0xff] %v14972_v47  ;;  %v4959_v46 = vcombine.high %v2163_v6, %v2167_v0  ;;  %v4975_v29 = vcombine.high %v2165_v53, %v2169_v18  ;;  %v11714_v5 = vpack.i.bf16 %v3629_v51, %v3493_v33  ;;  %v2950_v25 = vcombine.low %v14773_v22, %v14759_v23 }
 0x2d0   : > { %v14980_v16 = vrot.slane %v4462_v44, %v13237_v52  ;;  %v2627_v55 = vcombine.high %v14838_v45, %v14844_v49  ;;  %1212 = vst.msk [vmem:[#allocation4 + $0xd0] sm:$0xff] %vm1064_vm7, %v1142_v42  ;;  %v3130_v12 = vrot.slane %v3122_v8, %v13199_v11  ;;  %v3146_v53 = vrot.slane %v3138_v3, %v13199_v11  ;;  %v1822_v0 = vpop.permute.xlu1 %1821  ;;  %v1287_v18 = vpop.permute.xlu0 %1286  ;;  %v12447_v42 = vld [vmem:[#allocation4 + $0x3a0] sm:$0xff] }
 0x2d1   : > { %v14989_v39 = vrot.slane %v4494_v17, %v13237_v52  ;;  %v2659_v23 = vcombine.high %v14847_v50, %v14857_v58  ;;  %v4630_v45 = vcombine.low %v14972_v47, %v14975_v15  ;;  %v4966_v6 = vrot.slane %v4958_v10, %v13199_v11  ;;  %v2171_v17 = vld [vmem:[#allocation4 + $0x388] sm:$0xff]  ;;  %1891 = vst.msk [vmem:[#allocation4 + $0x558] sm:$0xff] %vm1064_vm7, %v1822_v0  ;;  %v12449_v0 = vld [vmem:[#allocation4 + $0x3b0] sm:$0xff] }
 0x2d2   : > { %20279 = vst [vmem:[#allocation74_spill] sm:$0xff] %v14980_v16  ;;  %11715 = vrot.lane.b32.xlu0 %v11714_v5, %s12508_s9  ;;  %v4982_v51 = vrot.slane %v4974_v30, %v13199_v11  ;;  %v15005_v50 = vrot.slane %v4959_v46, %v13199_v11  ;;  %v15008_v58 = vrot.slane %v4975_v29, %v13199_v11  ;;  %1357 = vst.msk [vmem:[#allocation4 + $0x190] sm:$0xff] %vm1064_vm7, %v1287_v18  ;;  %v2173_v30 = vld [vmem:[#allocation4 + $0x398] sm:$0xff]  ;;  %v2175_v46 = vld [vmem:[#allocation4 + $0x3a8] sm:$0xff] }
 0x2d3   : > { %20280 = vst [vmem:[#allocation112_spill] sm:$0xff] %v14989_v39  ;;  %v20281_v44 = vcombine.low %v14083_v60, %v14150_v31  ;;  %v2952_v3 = vcombine.low %v14807_v19, %v14793_v21  ;;  %v2177_v29 = vld [vmem:[#allocation4 + $0x3b8] sm:$0xff]  ;;  %v3186_v61 = vcombine.low %v3130_v12, %v3146_v53  ;;  %v15024_v31 = vrot.slane %v2627_v55, %v13237_v52  ;;  %v12446_v19 = vld [vmem:[#allocation4 + $0x380] sm:$0xff]  ;;  %v2227_v15 = vld [vmem:[#allocation4 + $0x548] sm:$0xff] }
 0x2d4   : > { %v15027_v21 = vrot.slane %v2659_v23, %v13237_v52  ;;  %v3226_v5 = vcombine.low %v12446_v19, %v12447_v42  ;;  %v15031_v49 = vrot.slane %v4630_v45, %v13237_v52  ;;  %v5022_v10 = vcombine.low %v4966_v6, %v4982_v51  ;;  %v1967_v59 = vpop.permute.xlu1 %1966  ;;  %v12465_v16 = vld [vmem:[#allocation4 + $0x6a0] sm:$0xff] }
 0x2d5   : > { %v11719_v8 = vpack.i.bf16 %v20281_v44, %v2950_v25  ;;  %20282 = vst [vmem:[#allocation76_spill] sm:$0xff] %v15024_v31  ;;  %v12448_v25 = vld [vmem:[#allocation4 + $0x390] sm:$0xff]  ;;  %v3187_v44 = vcombine.high %v3130_v12, %v3146_v53  ;;  %v5023_v33 = vcombine.high %v4966_v6, %v4982_v51  ;;  %v5038_v55 = vcombine.low %v15005_v50, %v15008_v58 }
 0x2d6   : > { %20283 = vst [vmem:[#allocation87_spill] sm:$0xff] %v15027_v21  ;;  %v3242_v18 = vcombine.low %v12448_v25, %v12449_v0  ;;  %20284 = vst [vmem:[#allocation85_spill] sm:$0xff] %v15031_v49  ;;  %v20285_v19 = vcombine.low %v14098_v2, %v14169_v62  ;;  %v3630_v12 = vcombine.low %v14829_v40, %v14298_v7 }
 0x2d7   : > { %11720 = vrot.lane.b32.xlu0 %v11719_v8, %s12505_s26  ;;  %v1481_v8 = vpop.permute.xlu0 %1480  ;;  %v5062_v53 = vcombine.low %v2171_v17, %v2175_v46  ;;  %v5078_v45 = vcombine.low %v2173_v30, %v2177_v29  ;;  %2036 = vst.msk [vmem:[#allocation4 + $0x618] sm:$0xff] %vm1064_vm7, %v1967_v59  ;;  %v5063_v6 = vcombine.high %v2171_v17, %v2175_v46  ;;  %v12453_v46 = vld [vmem:[#allocation4 + $0x5f8] sm:$0xff] }
 0x2d8   : > { %v11729_v42 = vpack.i.bf16 %v20285_v19, %v2952_v3  ;;  %1551 = vst.msk [vmem:[#allocation4 + $0x310] sm:$0xff] %vm1064_vm7, %v1481_v8  ;;  %v5079_v51 = vcombine.high %v2173_v30, %v2177_v29  ;;  %v5039_v25 = vcombine.high %v15005_v50, %v15008_v58  ;;  %v15047_v0 = vrot.slane %v3186_v61, %v13237_v52  ;;  %v12450_v58 = vld [vmem:[#allocation4 + $0x598] sm:$0xff]  ;;  %v12454_v8 = vld [vmem:[#allocation4 + $0x588] sm:$0xff] }
 0x2d9   : > { %v3494_v2 = vcombine.low %v14863_v56, %v14852_v4  ;;  %v3234_v62 = vrot.slane %v3226_v5, %v13199_v11  ;;  %v3250_v7 = vrot.slane %v3242_v18, %v13199_v11  ;;  %v15055_v40 = vrot.slane %v3187_v44, %v13237_v52  ;;  %v12451_v3 = vld [vmem:[#allocation4 + $0x5b8] sm:$0xff]  ;;  %v1144_v4 = vpop.permute.xlu1 %1143  ;;  %v12455_v19 = vld [vmem:[#allocation4 + $0x5a8] sm:$0xff] }
 0x2da   : > { %20286 = vst [vmem:[#allocation82_spill] sm:$0xff] %v15047_v0  ;;  %v15058_v59 = vrot.slane %v5022_v10, %v13237_v52  ;;  %v15061_v50 = vrot.slane %v5023_v33, %v13237_v52  ;;  %v5623_v17 = vcombine.high %v12450_v58, %v12451_v3  ;;  %v12452_v30 = vld [vmem:[#allocation4 + $0x5d8] sm:$0xff]  ;;  %v3632_v5 = vcombine.low %v14878_v37, %v14312_v35  ;;  %v12456_v58 = vld [vmem:[#allocation4 + $0x5c8] sm:$0xff] }
 0x2db   : > { %11730 = vrot.lane.b32.xlu0 %v11729_v42, %s12507_s30  ;;  %20287 = vst [vmem:[#allocation99_spill] sm:$0xff] %v15055_v40  ;;  %v5655_v29 = vcombine.high %v12452_v30, %v12453_v46  ;;  %v1626_v56 = vpop.permute.xlu0 %1625  ;;  %v11739_v61 = vpack.i.bf16 %v3630_v12, %v3494_v2  ;;  %v5070_v18 = vrot.slane %v5062_v53, %v13199_v11  ;;  %1213 = vst.msk [vmem:[#allocation4 + $0xd8] sm:$0xff] %vm1064_vm7, %v1144_v4  ;;  %v12457_v12 = vld [vmem:[#allocation4 + $0x5e8] sm:$0xff]  ;;  %v20290_v46 = vld [vmem:[#allocation25_spill] sm:$0xff] }
 0x2dc   : > { %20288 = vst [vmem:[#allocation104_spill] sm:$0xff] %v15058_v59  ;;  %v5086_v10 = vrot.slane %v5078_v45, %v13199_v11  ;;  %1696 = vst.msk [vmem:[#allocation4 + $0x3d0] sm:$0xff] %vm1064_vm7, %v1626_v56  ;;  %v5077_v33 = vrot.slane %v5063_v6, %v13199_v11  ;;  %v5093_v44 = vrot.slane %v5079_v51, %v13199_v11  ;;  %v20289_v30 = vld [vmem:[#allocation15_spill] sm:$0xff] }
 0x2dd   : > { %v5607_v42 = vcombine.high %v12454_v8, %v12455_v19  ;;  %v5639_v2 = vcombine.high %v12456_v58, %v12457_v12  ;;  %v3496_v35 = vcombine.low %v14897_v28, %v14894_v41  ;;  %v15075_v37 = vrot.slane %v5038_v55, %v13237_v52  ;;  %v20296_v58 = vld [vmem:[#allocation44_spill] sm:$0xff]  ;;  %v20298_v12 = vld [vmem:[#allocation47_spill] sm:$0xff] }
 0x2de   : > { %v15078_v53 = vrot.slane %v5039_v25, %v13237_v52  ;;  %v3290_v45 = vcombine.low %v3234_v62, %v3250_v7  ;;  %v5637_v6 = vrot.slane %v5623_v17, %v13199_v11  ;;  %v5669_v51 = vrot.slane %v5655_v29, %v13199_v11  ;;  %v20295_v29 = vld [vmem:[#allocation45_spill] sm:$0xff] }
 0x2df   : > { %11740 = vrot.lane.b32.xlu0 %v11739_v61, %s12505_s26  ;;  %v3291_v3 = vcombine.high %v3234_v62, %v3250_v7  ;;  %v20291_v4 = vcombine.low %v20289_v30, %v20290_v46  ;;  %v1289_v61 = vpop.permute.xlu1 %1288  ;;  %v1820_v41 = vpop.permute.xlu0 %1819  ;;  %v11749_v28 = vpack.i.bf16 %v3632_v5, %v3496_v35  ;;  %v5126_v55 = vcombine.low %v5070_v18, %v5086_v10 }
 0x2e0   : > { %v5127_v8 = vcombine.high %v5070_v18, %v5086_v10  ;;  %v20293_v25 = vcombine.high %v20289_v30, %v20290_v46  ;;  %1358 = vst.msk [vmem:[#allocation4 + $0x198] sm:$0xff] %vm1064_vm7, %v1289_v61  ;;  %1890 = vst.msk [vmem:[#allocation4 + $0x550] sm:$0xff] %vm1064_vm7, %v1820_v41  ;;  %v5142_v62 = vcombine.low %v5077_v33, %v5093_v44  ;;  %v20297_v10 = vld [vmem:[#allocation48_spill] sm:$0xff]  ;;  %v20300_v46 = vld [vmem:[#allocation43_spill] sm:$0xff] }
 0x2e1   : > { %v15086_v56 = vrot.slane %v20291_v4, %v13237_v52  ;;  %v5621_v7 = vrot.slane %v5607_v42, %v13199_v11  ;;  %v5653_v17 = vrot.slane %v5639_v2, %v13199_v11  ;;  %v3867_v5 = vcombine.high %v20296_v58, %v20295_v29  ;;  %v20301_v4 = vld [vmem:[#allocation49_spill] sm:$0xff]  ;;  %v20302_v41 = vld [vmem:[#allocation42_spill] sm:$0xff] }
 0x2e2   : > { %v15092_v19 = vrot.slane %v20293_v25, %v13237_v52  ;;  %v5143_v18 = vcombine.high %v5077_v33, %v5093_v44  ;;  %v5703_v35 = vcombine.high %v20298_v12, %v20297_v10  ;;  %v15104_v30 = vrot.slane %v3290_v45, %v13237_v52  ;;  %v20303_v25 = vld [vmem:[#allocation46_spill] sm:$0xff]  ;;  %v2265_v33 = vld [vmem:[#allocation4 + $0x678] sm:$0xff]  ;;  %v20305_v10 = vld [vmem:[#allocation28_spill] sm:$0xff] }
 0x2e3   : > { %20292 = vst [vmem:[#allocation86_spill] sm:$0xff] %v15086_v56  ;;  %11750 = vrot.lane.b32.xlu0 %v11749_v28, %s12507_s30  ;;  %v3835_v61 = vcombine.high %v20301_v4, %v20300_v46  ;;  %v5671_v42 = vcombine.high %v20303_v25, %v20302_v41  ;;  %v5686_v23 = vcombine.low %v5621_v7, %v5637_v6  ;;  %v1487_v29 = vpop.permute.xlu1 %1486  ;;  %v1965_v28 = vpop.permute.xlu0 %1964  ;;  %v20306_v45 = vld [vmem:[#allocation29_spill] sm:$0xff] }
 0x2e4   : > { %20294 = vst [vmem:[#allocation79_spill] sm:$0xff] %v15092_v19  ;;  %20299 = vst [vmem:[#allocation103_spill] sm:$0xff] %v15104_v30  ;;  %v5718_v2 = vcombine.low %v5653_v17, %v5669_v51  ;;  %v15111_v60 = vrot.slane %v3291_v3, %v13237_v52  ;;  %v5687_v44 = vcombine.high %v5621_v7, %v5637_v6  ;;  %v2261_v25 = vld [vmem:[#allocation4 + $0x658] sm:$0xff] }
 0x2e5   : > { %v5719_v58 = vcombine.high %v5653_v17, %v5669_v51  ;;  %v20307_v12 = vcombine.low %v20305_v10, %v20306_v45  ;;  %v20309_v46 = vcombine.high %v20305_v10, %v20306_v45  ;;  %1554 = vst.msk [vmem:[#allocation4 + $0x328] sm:$0xff] %vm1064_vm7, %v1487_v29  ;;  %2035 = vst.msk [vmem:[#allocation4 + $0x610] sm:$0xff] %vm1064_vm7, %v1965_v28  ;;  %v2263_v29 = vld [vmem:[#allocation4 + $0x668] sm:$0xff]  ;;  %v12458_v28 = vld [vmem:[#allocation4 + $0x650] sm:$0xff] }
 0x2e6   : > { %20304 = vst [vmem:[#allocation100_spill] sm:$0xff] %v15111_v60  ;;  %v15128_v3 = vrot.slane %v5126_v55, %v13237_v52  ;;  %v15131_v6 = vrot.slane %v5127_v8, %v13237_v52  ;;  %v15134_v51 = vrot.slane %v5142_v62, %v13237_v52  ;;  %v15137_v7 = vrot.slane %v3867_v5, %v13237_v52  ;;  %v12459_v55 = vld [vmem:[#allocation4 + $0x670] sm:$0xff]  ;;  %v15355_v60 = vld [vmem:[#allocation4 + $0x540] sm:$0xff] }
 0x2e7   : > { %v15117_v22 = vrot.slane %v20307_v12, %v13237_v52  ;;  %v15123_v4 = vrot.slane %v20309_v46, %v13237_v52  ;;  %v15140_v17 = vrot.slane %v5143_v18, %v13237_v52  ;;  %v15143_v41 = vrot.slane %v5703_v35, %v13237_v52  ;;  %v1632_v35 = vpop.permute.xlu1 %1631  ;;  %v1146_v12 = vpop.permute.xlu0 %1145  ;;  %v2259_v46 = vld [vmem:[#allocation4 + $0x648] sm:$0xff] }
 0x2e8   : > { %20311 = vst [vmem:[#allocation83_spill] sm:$0xff] %v15128_v3  ;;  %20312 = vst [vmem:[#allocation101_spill] sm:$0xff] %v15137_v7  ;;  %v3954_v10 = vcombine.low %v12458_v28, %v12459_v55  ;;  %v15146_v8 = vrot.slane %v3835_v61, %v13237_v52  ;;  %v15149_v62 = vrot.slane %v5671_v42, %v13237_v52  ;;  %v12460_v55 = vld [vmem:[#allocation4 + $0x640] sm:$0xff]  ;;  %v20328_v7 = vld [vmem:[#allocation115_spill] sm:$0xff] }
 0x2e9   : > { %20308 = vst [vmem:[#allocation92_spill] sm:$0xff] %v15117_v22  ;;  %20310 = vst [vmem:[#allocation95_spill] sm:$0xff] %v15123_v4  ;;  %v15152_v5 = vrot.slane %v5686_v23, %v13237_v52  ;;  %v15155_v18 = vrot.slane %v5718_v2, %v13237_v52  ;;  %v5790_v45 = vcombine.low %v2261_v25, %v2265_v33  ;;  %v12461_v42 = vld [vmem:[#allocation4 + $0x660] sm:$0xff]  ;;  %v2273_v23 = vld [vmem:[#allocation4 + $0x6b8] sm:$0xff] }
 0x2ea   : > { %20313 = vst [vmem:[#allocation105_spill] sm:$0xff] %v15146_v8  ;;  %v15158_v31 = vrot.slane %v5687_v44, %v13237_v52  ;;  %v15161_v28 = vrot.slane %v5719_v58, %v13237_v52  ;;  %v5791_v61 = vcombine.high %v2261_v25, %v2265_v33  ;;  %v3938_v21 = vcombine.low %v12460_v55, %v12461_v42  ;;  %v20316_v25 = vld [vmem:[#allocation52_spill] sm:$0xff]  ;;  %v20317_v55 = vld [vmem:[#allocation55_spill] sm:$0xff] }
 0x2eb   : > { %1699 = vst.msk [vmem:[#allocation4 + $0x3e8] sm:$0xff] %vm1064_vm7, %v1632_v35  ;;  %1214 = vst.msk [vmem:[#allocation4 + $0xe0] sm:$0xff] %vm1064_vm7, %v1146_v12  ;;  %v5774_v2 = vcombine.low %v2259_v46, %v2263_v29  ;;  %v5775_v35 = vcombine.high %v2259_v46, %v2263_v29  ;;  %v3962_v12 = vrot.slane %v3954_v10, %v13199_v11  ;;  %v2271_v44 = vld [vmem:[#allocation4 + $0x6a8] sm:$0xff]  ;;  %v12462_v58 = vld [vmem:[#allocation4 + $0x690] sm:$0xff]  ;;  %v1826_v34 = vpop.permute.xlu1 %1825  ;;  %v1291_v39 = vpop.permute.xlu0 %1290 }
 0x2ec   : > { %v15181_v57 = vrot.slane %v5790_v45, %v13199_v11  ;;  %v4058_v33 = vcombine.low %v12462_v58, %v12463_v43  ;;  %v5894_v42 = vcombine.low %v2269_v54, %v2273_v23  ;;  %v15186_v10 = vrot.slane %v5791_v61, %v13199_v11  ;;  %1893 = vst.msk [vmem:[#allocation4 + $0x568] sm:$0xff] %vm1064_vm7, %v1826_v34  ;;  %v2267_v45 = vld [vmem:[#allocation4 + $0x688] sm:$0xff] }
 0x2ed   : > { %v3946_v46 = vrot.slane %v3938_v21, %v13199_v11  ;;  %1359 = vst.msk [vmem:[#allocation4 + $0x1a0] sm:$0xff] %vm1064_vm7, %v1291_v39  ;;  %v5782_v24 = vrot.slane %v5774_v2, %v13199_v11  ;;  %v5895_v58 = vcombine.high %v2269_v54, %v2273_v23  ;;  %v4042_v4 = vcombine.low %v12464_v26, %v12465_v16  ;;  %v12469_v39 = vld [vmem:[#allocation4 + $0x30] sm:$0xff]  ;;  %v2159_v32 = vld [vmem:[#allocation4 + $0x328] sm:$0xff] }
 0x2ee   : > { %v5878_v29 = vcombine.low %v2267_v45, %v2271_v44  ;;  %v15195_v61 = vrot.slane %v5775_v35, %v13199_v11  ;;  %v5879_v19 = vcombine.high %v2267_v45, %v2271_v44  ;;  %v15201_v2 = vrot.slane %v4058_v33, %v13199_v11  ;;  %v12466_v35 = vld [vmem:[#allocation4 + $0x18] sm:$0xff] }
 0x2ef   : > { %v4002_v49 = vcombine.low %v3946_v46, %v3962_v12  ;;  %v4003_v21 = vcombine.high %v3946_v46, %v3962_v12  ;;  %v5838_v34 = vcombine.low %v5782_v24, %v15181_v57  ;;  %v1971_v43 = vpop.permute.xlu1 %1970  ;;  %v1485_v54 = vpop.permute.xlu0 %1484  ;;  %v5902_v23 = vrot.slane %v5894_v42, %v13199_v11  ;;  %v12467_v12 = vld [vmem:[#allocation4 + $0x38] sm:$0xff]  ;;  %v12468_v42 = vld [vmem:[#allocation4 + $0x10] sm:$0xff] }
 0x2f0   : > { %v5839_v26 = vcombine.high %v5782_v24, %v15181_v57  ;;  %v5854_v16 = vcombine.low %v15195_v61, %v15186_v10  ;;  %v4127_v46 = vcombine.high %v12466_v35, %v12467_v12  ;;  %2038 = vst.msk [vmem:[#allocation4 + $0x628] sm:$0xff] %vm1064_vm7, %v1971_v43  ;;  %1553 = vst.msk [vmem:[#allocation4 + $0x320] sm:$0xff] %vm1064_vm7, %v1485_v54  ;;  %v12470_v43 = vld [vmem:[#allocation4 + $0x28] sm:$0xff] }
 0x2f1   : > { %v5909_v44 = vrot.slane %v5895_v58, %v13199_v11  ;;  %v5855_v33 = vcombine.high %v15195_v61, %v15186_v10  ;;  %v4050_v45 = vrot.slane %v4042_v4, %v13199_v11  ;;  %v2291_v57 = vcombine.high %v12468_v42, %v12469_v39  ;;  %v12471_v54 = vld [vmem:[#allocation4 + $0x8] sm:$0xff]  ;;  %v12472_v61 = vld [vmem:[#allocation4 + $0x20] sm:$0xff] }
 0x2f2   : > { %v5886_v24 = vrot.slane %v5878_v29, %v13199_v11  ;;  %v15215_v22 = vrot.slane %v4002_v49, %v13237_v52  ;;  %v15218_v35 = vrot.slane %v4003_v21, %v13237_v52  ;;  %v4111_v12 = vcombine.high %v12471_v54, %v12470_v43  ;;  %v12473_v4 = vld [vmem:[#allocation4] sm:$0xff]  ;;  %v20321_v42 = vld [vmem:[#allocation59_spill] sm:$0xff] }
 0x2f3   : > { %v5893_v58 = vrot.slane %v5879_v19, %v13199_v11  ;;  %v4074_v10 = vcombine.low %v4050_v45, %v15201_v2  ;;  %v2275_v20 = vcombine.high %v12473_v4, %v12472_v61  ;;  %v20320_v39 = vld [vmem:[#allocation58_spill] sm:$0xff]  ;;  %v1148_v49 = vpop.permute.xlu1 %1147  ;;  %v1630_v56 = vpop.permute.xlu0 %1629  ;;  %v15229_v21 = vrot.slane %v5838_v34, %v13237_v52 }
 0x2f4   : > { %20318 = vst [vmem:[#allocation36_spill] sm:$0xff] %v15215_v22  ;;  %20319 = vst [vmem:[#allocation32_spill] sm:$0xff] %v15218_v35  ;;  %v20322_v29 = vcombine.low %v20320_v39, %v20321_v42  ;;  %v5910_v63 = vcombine.low %v5886_v24, %v5902_v23  ;;  %v4141_v43 = vrot.slane %v4127_v46, %v13199_v11  ;;  %v20327_v46 = vld [vmem:[#allocation116_spill] sm:$0xff]  ;;  %v2110_v40 = vld [vmem:[#allocation4 + $0x1a0] sm:$0xff] }
 0x2f5   : > { %20324 = vst [vmem:[#allocation34_spill] sm:$0xff] %v15229_v21  ;;  %v20325_v19 = vcombine.high %v20320_v39, %v20321_v42  ;;  %1215 = vst.msk [vmem:[#allocation4 + $0xe8] sm:$0xff] %vm1064_vm7, %v1148_v49  ;;  %v15241_v61 = vrot.slane %v5839_v26, %v13237_v52  ;;  %v5911_v4 = vcombine.high %v5886_v24, %v5902_v23  ;;  %v20330_v26 = vld [vmem:[#allocation118_spill] sm:$0xff]  ;;  %v2157_v22 = vld [vmem:[#allocation4 + $0x318] sm:$0xff] }
 0x2f6   : > { %v15226_v14 = vrot.slane %v20322_v29, %v13237_v52  ;;  %1698 = vst.msk [vmem:[#allocation4 + $0x3e0] sm:$0xff] %vm1064_vm7, %v1630_v56  ;;  %v5926_v29 = vcombine.low %v5893_v58, %v5909_v44  ;;  %v2305_v34 = vrot.slane %v2291_v57, %v13199_v11  ;;  %v2339_v8 = vcombine.high %v20328_v7, %v20327_v46 }
 0x2f7   : > { %v15236_v54 = vrot.slane %v20325_v19, %v13237_v52  ;;  %v4075_v39 = vcombine.high %v4050_v45, %v15201_v2  ;;  %v4125_v42 = vrot.slane %v4111_v12, %v13199_v11  ;;  %v5927_v49 = vcombine.high %v5893_v58, %v5909_v44  ;;  %v20331_v19 = vld [vmem:[#allocation117_spill] sm:$0xff]  ;;  %v1293_v57 = vpop.permute.xlu1 %1292  ;;  %v15262_v7 = vld [vmem:[#allocation4 + $0x320] sm:$0xff]  ;;  %v20333_v44 = vld [vmem:[#allocation60_spill] sm:$0xff] }
 0x2f8   : > { %20323 = vst [vmem:[#allocation35_spill] sm:$0xff] %v15226_v14  ;;  %v15245_v14 = vrot.slane %v5854_v16, %v13237_v52  ;;  %v15252_v56 = vrot.slane %v4074_v10, %v13237_v52  ;;  %v4175_v23 = vcombine.high %v20331_v19, %v20330_v26  ;;  %v2289_v24 = vrot.slane %v2275_v20, %v13199_v11  ;;  %v20334_v45 = vld [vmem:[#allocation61_spill] sm:$0xff] }
 0x2f9   : > { %20326 = vst [vmem:[#allocation89_spill] sm:$0xff] %v15236_v54  ;;  %v1824_v54 = vpop.permute.xlu0 %1823  ;;  %v15258_v16 = vrot.slane %v5910_v63, %v13237_v52  ;;  %v4190_v2 = vcombine.low %v4125_v42, %v4141_v43  ;;  %v20335_v12 = vcombine.low %v20333_v44, %v20334_v45  ;;  %v20337_v20 = vcombine.high %v20333_v44, %v20334_v45 }
 0x2fa   : > { %20329 = vst [vmem:[#allocation88_spill] sm:$0xff] %v15252_v56  ;;  %1360 = vst.msk [vmem:[#allocation4 + $0x1a8] sm:$0xff] %vm1064_vm7, %v1293_v57  ;;  %v15279_v63 = vrot.slane %v5911_v4, %v13237_v52  ;;  %v15282_v46 = vrot.slane %v5926_v29, %v13237_v52  ;;  %v2354_v26 = vcombine.low %v2289_v24, %v2305_v34  ;;  %v20343_v45 = vmov 0.0  }
 0x2fb   : > { %20332 = vst [vmem:[#allocation93_spill] sm:$0xff] %v15258_v16  ;;  %v15268_v58 = vrot.slane %v20335_v12, %v13237_v52  ;;  %v15274_v10 = vrot.slane %v20337_v20, %v13237_v52  ;;  %1892 = vst.msk [vmem:[#allocation4 + $0x560] sm:$0xff] %vm1064_vm7, %v1824_v54  ;;  %v15287_v12 = vrot.slane %v5855_v33, %v13237_v52  ;;  %v1491_v33 = vpop.permute.xlu1 %1490 }
 0x2fc   : > { %v15290_v44 = vrot.slane %v2339_v8, %v13237_v52  ;;  %v15293_v57 = vrot.slane %v4075_v39, %v13237_v52  ;;  %v4191_v54 = vcombine.high %v4125_v42, %v4141_v43  ;;  %v15296_v4 = vrot.slane %v5927_v49, %v13237_v52  ;;  %v15309_v39 = vld [vmem:[#allocation4 + $0x3c0] sm:$0xff]  ;;  %1556 = vst.msk [vmem:[#allocation4 + $0x338] sm:$0xff] %vm1064_vm7, %v1491_v33 }
 0x2fd   : > { %20336 = vst [vmem:[#allocation96_spill] sm:$0xff] %v15268_v58  ;;  %20338 = vst [vmem:[#allocation97_spill] sm:$0xff] %v15274_v10  ;;  %v15300_v29 = vcombine.high %v15252_v56, %v20343_v45  ;;  %v15303_v20 = vrot.slane %v4175_v23, %v13237_v52  ;;  %v2355_v19 = vcombine.high %v2289_v24, %v2305_v34  ;;  %v1969_v38 = vpop.permute.xlu0 %1968  ;;  %v15311_v43 = vld [vmem:[#allocation4 + $0x3e0] sm:$0xff]  ;;  %v2183_v23 = vld [vmem:[#allocation4 + $0x3e8] sm:$0xff] }
 0x2fe   : > { %20339 = vst [vmem:[#allocation133_spill] sm:$0xff] %v15287_v12  ;;  %20340 = vst [vmem:[#allocation64_spill] sm:$0xff] %v15290_v44  ;;  %v15307_v8 = vcombine.high %v15258_v16, %v20343_v45  ;;  %v15314_v42 = vrot.slane %v4190_v2, %v13237_v52  ;;  %v15318_v49 = vcombine.high %v15268_v58, %v20343_v45 }
 0x2ff   : > { %20341 = vst [vmem:[#allocation70_spill] sm:$0xff] %v15293_v57  ;;  %20342 = vst [vmem:[#allocation6_spill] sm:$0xff] %v15296_v4  ;;  %v15322_v34 = vcombine.high %v15274_v10, %v20343_v45  ;;  %v15328_v24 = vcombine.high %v15279_v63, %v20343_v45  ;;  %v15332_v2 = vcombine.high %v15282_v46, %v20343_v45  ;;  %v2179_v45 = vld [vmem:[#allocation4 + $0x3c8] sm:$0xff]  ;;  %v1636_v1 = vpop.permute.xlu1 %1635  ;;  %v2106_v10 = vld [vmem:[#allocation4 + $0x180] sm:$0xff] }
 0x300   : > { %20344 = vst [vmem:[#allocation132_spill] sm:$0xff] %v15300_v29  ;;  %20345 = vst [vmem:[#allocation90_spill] sm:$0xff] %v15303_v20  ;;  %v15335_v56 = vrot.slane %v2354_v26, %v13237_v52  ;;  %v15346_v57 = vrot.slane %v4191_v54, %v13237_v52  ;;  %v2086_v26 = vld [vmem:[#allocation4 + $0xe0] sm:$0xff]  ;;  %v5094_v13 = vcombine.low %v2179_v45, %v2183_v23 }
 0x301   : > { %20346 = vst [vmem:[#allocation134_spill] sm:$0xff] %v15314_v42  ;;  %20347 = vst [vmem:[#allocation12_spill] sm:$0xff] %v15318_v49  ;;  %v15353_v49 = vrot.slane %v2355_v19, %v13237_v52  ;;  %v1150_v58 = vpop.permute.xlu0 %1149  ;;  %v2231_v19 = vld [vmem:[#allocation4 + $0x568] sm:$0xff]  ;;  %v5095_v27 = vcombine.high %v2179_v45, %v2183_v23  ;;  %v2443_v20 = vcombine.high %v2082_v9, %v2086_v26 }
 0x302   : > { %20348 = vst [vmem:[#allocation15_spill] sm:$0xff] %v15322_v34  ;;  %2037 = vst.msk [vmem:[#allocation4 + $0x620] sm:$0xff] %vm1064_vm7, %v1969_v38  ;;  %v2155_v34 = vld [vmem:[#allocation4 + $0x308] sm:$0xff]  ;;  %v15357_v54 = vld [vmem:[#allocation4 + $0x560] sm:$0xff]  ;;  %v15387_v35 = vrot.slane %v5094_v13, %v13199_v11  ;;  %v5502_v38 = vcombine.low %v2227_v15, %v2231_v19  ;;  %v5503_v42 = vcombine.high %v2227_v15, %v2231_v19 }
 0x303   : > { %20349 = vst [vmem:[#allocation25_spill] sm:$0xff] %v15335_v56  ;;  %20353 = vst [vmem:[#allocation45_spill] sm:$0xff] %v15346_v57  ;;  %v4926_v29 = vcombine.low %v2155_v34, %v2159_v32  ;;  %v4927_v48 = vcombine.high %v2155_v34, %v2159_v32  ;;  %v15378_v32 = vld [vmem:[#allocation4 + $0x600] sm:$0xff]  ;;  %v2161_v44 = vld [vmem:[#allocation4 + $0x338] sm:$0xff]  ;;  %v2682_v34 = vcombine.low %v2106_v10, %v2110_v40 }
 0x304   : > { %20357 = vst [vmem:[#allocation44_spill] sm:$0xff] %v15353_v49  ;;  %1701 = vst.msk [vmem:[#allocation4 + $0x3f8] sm:$0xff] %vm1064_vm7, %v1636_v1  ;;  %v2442_v1 = vcombine.low %v2082_v9, %v2086_v26  ;;  %v1830_v9 = vpop.permute.xlu1 %1829  ;;  %v2255_v56 = vld [vmem:[#allocation4 + $0x628] sm:$0xff]  ;;  %v4942_v45 = vcombine.low %v2157_v22, %v2161_v44  ;;  %v4943_v23 = vcombine.high %v2157_v22, %v2161_v44 }
 0x305   : > { %1216 = vst.msk [vmem:[#allocation4 + $0xf0] sm:$0xff] %vm1064_vm7, %v1150_v58  ;;  %v15376_v47 = vrot.slane %v4926_v29, %v13199_v11  ;;  %v1295_v26 = vpop.permute.xlu0 %1294  ;;  %v15390_v29 = vrot.slane %v4927_v48, %v13199_v11  ;;  %1895 = vst.msk [vmem:[#allocation4 + $0x578] sm:$0xff] %vm1064_vm7, %v1830_v9  ;;  %v15399_v13 = vrot.slane %v5095_v27, %v13199_v11  ;;  %v2251_v48 = vld [vmem:[#allocation4 + $0x608] sm:$0xff]  ;;  %v2181_v27 = vld [vmem:[#allocation4 + $0x3d8] sm:$0xff] }
 0x306   : > { %1361 = vst.msk [vmem:[#allocation4 + $0x1b0] sm:$0xff] %vm1064_vm7, %v1295_v26  ;;  %v15402_v49 = vrot.slane %v2442_v1, %v13199_v11  ;;  %v15405_v15 = vrot.slane %v2443_v20, %v13199_v11  ;;  %v2683_v19 = vcombine.high %v2106_v10, %v2110_v40  ;;  %v4950_v9 = vrot.slane %v4942_v45, %v13199_v11  ;;  %v2087_v44 = vld [vmem:[#allocation4 + $0xe8] sm:$0xff] }
 0x307   : > { %v5742_v26 = vcombine.low %v2251_v48, %v2255_v56  ;;  %v5743_v58 = vcombine.high %v2251_v48, %v2255_v56  ;;  %v3090_v22 = vcombine.low %v15260_v36, %v15262_v7  ;;  %v15411_v30 = vrot.slane %v4943_v23, %v13199_v11 }
 0x308   : > { %20362 = vst [vmem:[#allocation48_spill] sm:$0xff] %v15405_v15  ;;  %v1975_v16 = vpop.permute.xlu1 %1974  ;;  %v15414_v1 = vrot.slane %v5502_v38, %v13199_v11  ;;  %v15417_v40 = vrot.slane %v5503_v42, %v13199_v11  ;;  %v3258_v56 = vcombine.low %v15309_v39, %v15311_v43  ;;  %v4990_v10 = vcombine.low %v15376_v47, %v4950_v9  ;;  %v2083_v38 = vld [vmem:[#allocation4 + $0xc8] sm:$0xff] }
 0x309   : > { %v15392_v33 = vld [vmem:[#allocation4 + $0x620] sm:$0xff]  ;;  %v1489_v57 = vpop.permute.xlu0 %1488  ;;  %2040 = vst.msk [vmem:[#allocation4 + $0x638] sm:$0xff] %vm1064_vm7, %v1975_v16  ;;  %v4991_v45 = vcombine.high %v15376_v47, %v4950_v9  ;;  %v15426_v23 = vrot.slane %v2682_v34, %v13199_v11  ;;  %v4278_v15 = vcombine.low %v2083_v38, %v2087_v44  ;;  %v4279_v42 = vcombine.high %v2083_v38, %v2087_v44 }
 0x30a   : > { %1555 = vst.msk [vmem:[#allocation4 + $0x330] sm:$0xff] %vm1064_vm7, %v1489_v57  ;;  %v15429_v4 = vrot.slane %v2683_v19, %v13199_v11  ;;  %v15433_v16 = vrot.slane %v5742_v26, %v13199_v11  ;;  %v15436_v57 = vrot.slane %v5743_v58, %v13199_v11  ;;  %v15439_v47 = vrot.slane %v3090_v22, %v13199_v11 }
 0x30b   : > { %v2185_v0 = vld [vmem:[#allocation4 + $0x3f8] sm:$0xff]  ;;  %v15445_v19 = vrot.slane %v3258_v56, %v13199_v11  ;;  %v20364_v26 = vcombine.high %v15260_v36, %v15262_v7  ;;  %v15456_v58 = vrot.slane %v4990_v10, %v13237_v52  ;;  %v3666_v36 = vcombine.low %v15355_v60, %v15357_v54 }
 0x30c   : > { %v5110_v20 = vcombine.low %v2181_v27, %v2185_v0  ;;  %v5111_v48 = vcombine.high %v2181_v27, %v2185_v0  ;;  %20363 = vst [vmem:[#allocation47_spill] sm:$0xff] %v15429_v4  ;;  %v1152_v34 = vpop.permute.xlu1 %1151  ;;  %v5006_v0 = vcombine.low %v15390_v29, %v15411_v30  ;;  %v2233_v38 = vld [vmem:[#allocation4 + $0x578] sm:$0xff]  ;;  %v15465_v7 = vrot.slane %v4278_v15, %v13199_v11 }
 0x30d   : > { %v1634_v9 = vpop.permute.xlu0 %1633  ;;  %v15451_v27 = vrot.slane %v20364_v26, %v13199_v11  ;;  %1217 = vst.msk [vmem:[#allocation4 + $0xf8] sm:$0xff] %vm1064_vm7, %v1152_v34  ;;  %20366 = vst [vmem:[#allocation49_spill] sm:$0xff] %v15456_v58  ;;  %v15468_v34 = vrot.slane %v4279_v42, %v13199_v11 }
 0x30e   : > { %v5118_v12 = vrot.slane %v5110_v20, %v13199_v11  ;;  %v5125_v44 = vrot.slane %v5111_v48, %v13199_v11  ;;  %1700 = vst.msk [vmem:[#allocation4 + $0x3f0] sm:$0xff] %vm1064_vm7, %v1634_v9  ;;  %v5005_v20 = vrot.slane %v4991_v45, %v13237_v52  ;;  %20367 = vst [vmem:[#allocation42_spill] sm:$0xff] %v15465_v7  ;;  %v2229_v45 = vld [vmem:[#allocation4 + $0x558] sm:$0xff] }
 0x30f   : > { %20365 = vst [vmem:[#allocation43_spill] sm:$0xff] %v15451_v27  ;;  %20368 = vst [vmem:[#allocation46_spill] sm:$0xff] %v15468_v34  ;;  %v5014_v4 = vrot.slane %v5006_v0, %v13237_v52  ;;  %v5518_v7 = vcombine.low %v2229_v45, %v2233_v38  ;;  %v5519_v42 = vcombine.high %v2229_v45, %v2233_v38 }
 0x310   : > { %v5158_v22 = vcombine.low %v15387_v35, %v5118_v12  ;;  %v5159_v56 = vcombine.high %v15387_v35, %v5118_v12  ;;  %v5174_v48 = vcombine.low %v15399_v13, %v5125_v44  ;;  %v5007_v35 = vcombine.high %v15390_v29, %v15411_v30  ;;  %v1297_v26 = vpop.permute.xlu1 %1296 }
 0x311   : > { %v5175_v12 = vcombine.high %v15399_v13, %v5125_v44  ;;  %v1828_v27 = vpop.permute.xlu0 %1827  ;;  %1362 = vst.msk [vmem:[#allocation4 + $0x1b8] sm:$0xff] %vm1064_vm7, %v1297_v26  ;;  %v5056_v29 = vcombine.low %v5005_v20, %v15061_v50  ;;  %v2111_v44 = vld [vmem:[#allocation4 + $0x1a8] sm:$0xff]  ;;  %v5526_v38 = vrot.slane %v5518_v7, %v13199_v11  ;;  %v5057_v7 = vcombine.high %v5005_v20, %v15061_v50 }
 0x312   : > { %v15471_v10 = vrot.slane %v5158_v22, %v13237_v52  ;;  %v5173_v9 = vrot.slane %v5159_v56, %v13237_v52  ;;  %v5182_v15 = vrot.slane %v5174_v48, %v13237_v52  ;;  %1894 = vst.msk [vmem:[#allocation4 + $0x570] sm:$0xff] %vm1064_vm7, %v1828_v27  ;;  %v5055_v22 = vcombine.high %v15456_v58, %v15058_v59  ;;  %v15502_v58 = vld [vmem:[#allocation4 + $0x638] sm:$0xff] }
 0x313   : > { %v15489_v56 = vrot.slane %v5175_v12, %v13237_v52  ;;  %v20370_v27 = vcombine.high %v15309_v39, %v15311_v43  ;;  %v5021_v59 = vrot.slane %v5007_v35, %v13237_v52  ;;  %v5567_v39 = vcombine.high %v15414_v1, %v5526_v38 }
 0x314   : > { %20369 = vst [vmem:[#allocation28_spill] sm:$0xff] %v15471_v10  ;;  %v5191_v30 = vcombine.high %v15128_v3, %v15471_v10  ;;  %v5192_v13 = vcombine.low %v15131_v6, %v5173_v9  ;;  %v5193_v0 = vcombine.high %v15131_v6, %v5173_v9  ;;  %v5194_v3 = vcombine.low %v15134_v51, %v5182_v15  ;;  %v2107_v6 = vld [vmem:[#allocation4 + $0x188] sm:$0xff]  ;;  %v15504_v9 = vpop.permute.xlu1 %11625 }
 0x315   : > { %v15496_v48 = vrot.slane %v20370_v27, %v13199_v11  ;;  %v15500_v10 = vrot.slane %v5519_v42, %v13199_v11  ;;  %v1973_v12 = vpop.permute.xlu0 %1972  ;;  %v4518_v43 = vcombine.low %v2107_v6, %v2111_v44  ;;  %v5058_v42 = vcombine.low %v5014_v4, %v15075_v37  ;;  %v2088_v27 = vld [vmem:[#allocation4 + $0xf0] sm:$0xff] }
 0x316   : > { %v11759_v45 = vpack.i.bf16 %v5191_v30, %v5055_v22  ;;  %v11764_v26 = vpack.i.bf16 %v5192_v13, %v5056_v29  ;;  %2039 = vst.msk [vmem:[#allocation4 + $0x630] sm:$0xff] %vm1064_vm7, %v1973_v12  ;;  %v15513_v22 = vld [vmem:[#allocation4 + $0x618] sm:$0xff]  ;;  %v15516_v30 = vrot.slane %v3666_v36, %v13199_v11  ;;  %v4519_v29 = vcombine.high %v2107_v6, %v2111_v44 }
 0x317   : > { %20371 = vst [vmem:[#allocation29_spill] sm:$0xff] %v15496_v48  ;;  %v11769_v50 = vpack.i.bf16 %v5193_v0, %v5057_v7  ;;  %v5195_v20 = vcombine.high %v15134_v51, %v5182_v15  ;;  %v5196_v35 = vcombine.low %v15140_v17, %v15489_v56  ;;  %v5758_v13 = vcombine.low %v15513_v22, %v15502_v58  ;;  %v2084_v7 = vld [vmem:[#allocation4 + $0xd0] sm:$0xff]  ;;  %v20373_v48 = vld [vmem:[#allocation127_spill] sm:$0xff] }
 0x318   : > { %11760 = vrot.lane.b32.xlu1 %v11759_v45, %s12506_s29  ;;  %11765 = vrot.lane.b32.xlu0 %v11764_v26, %s12504_s25  ;;  %v11774_v45 = vpack.i.bf16 %v5194_v3, %v5058_v42  ;;  %v15524_v26 = vrot.slane %v5567_v39, %v13237_v52  ;;  %v5566_v12 = vcombine.low %v15414_v1, %v5526_v38  ;;  %v15529_v44 = vpop.permute.xlu1 %11635 }
 0x319   : > { %v5582_v36 = vcombine.low %v15417_v40, %v15500_v10  ;;  %v11621_v0 = vpop.permute.xlu0 %11620  ;;  %v5059_v51 = vcombine.high %v5014_v4, %v15075_v37  ;;  %v5060_v15 = vcombine.low %v5021_v59, %v15078_v53  ;;  %v15534_v6 = vrot.slane %v5758_v13, %v13199_v11 }
 0x31a   : > { %v3906_v3 = vcombine.low %v15378_v32, %v15392_v33  ;;  %v2458_v1 = vcombine.low %v2084_v7, %v2088_v27  ;;  %v15541_v38 = vrot.slane %v4518_v43, %v13199_v11  ;;  %v15544_v37 = vrot.slane %v4519_v29, %v13199_v11 }
 0x31b   : > { %v11779_v4 = vpack.i.bf16 %v5195_v20, %v5059_v51  ;;  %v11784_v39 = vpack.i.bf16 %v5196_v35, %v5060_v15  ;;  %v5197_v42 = vcombine.high %v15140_v17, %v15489_v56  ;;  %v2459_v13 = vcombine.high %v2084_v7, %v2088_v27  ;;  %v15574_v51 = vld [vmem:[#allocation4 + $0x1b0] sm:$0xff] }
 0x31c   : > { %11770 = vrot.lane.b32.xlu1 %v11769_v50, %s12508_s9  ;;  %11775 = vrot.lane.b32.xlu0 %v11774_v45, %s12505_s26  ;;  %20372 = vst [vmem:[#allocation58_spill] sm:$0xff] %v15544_v37  ;;  %v5600_v50 = vcombine.low %v20373_v48, %v15524_v26  ;;  %v15551_v45 = vrot.slane %v5566_v12, %v13237_v52  ;;  %v11623_v29 = vunpack.i.h.bf16 %v11621_v0  ;;  %v15558_v37 = vpop.permute.xlu1 %11645  ;;  %v11622_v12 = vunpack.i.l.bf16 %v11621_v0 }
 0x31d   : > { %v15554_v34 = vrot.slane %v5582_v36, %v13237_v52  ;;  %v5806_v43 = vcombine.low %v15433_v16, %v15534_v6  ;;  %20375 = vst [vmem:[#allocation116_spill] sm:$0xff] %v15558_v37  ;;  %v11631_v20 = vpop.permute.xlu0 %11630  ;;  %v5061_v35 = vcombine.high %v5021_v59, %v15078_v53  ;;  %v15562_v17 = vrot.slane %v3906_v3, %v13199_v11  ;;  %v20380_v3 = vld [vmem:[#allocation128_spill] sm:$0xff] }
 0x31e   : > { %20374 = vst [vmem:[#allocation59_spill] sm:$0xff] %v15551_v45  ;;  %v20376_v56 = vcombine.high %v15355_v60, %v15357_v54  ;;  %v5759_v36 = vcombine.high %v15513_v22, %v15502_v58  ;;  %v15577_v59 = vrot.slane %v2458_v1, %v13199_v11  ;;  %v20377_v60 = vcombine.high %v15378_v32, %v15392_v33  ;;  %v20381_v33 = vld [vmem:[#allocation129_spill] sm:$0xff] }
 0x31f   : > { %v11628_v54 = vunpack.i.h.bf16 %v15504_v9  ;;  %v11789_v0 = vpack.i.bf16 %v5197_v42, %v5061_v35  ;;  %v5583_v15 = vcombine.high %v15417_v40, %v15500_v10  ;;  %v15589_v7 = vrot.slane %v2459_v13, %v13199_v11  ;;  %v20383_v10 = vld [vmem:[#allocation19_spill] sm:$0xff]  ;;  %v20384_v42 = vld [vmem:[#allocation20_spill] sm:$0xff] }
 0x320   : > { %v15568_v27 = vrot.slane %v20376_v56, %v13199_v11  ;;  %11780 = vrot.lane.b32.xlu1 %v11779_v4, %s12509_s10  ;;  %11785 = vrot.lane.b32.xlu0 %v11784_v39, %s12507_s30  ;;  %v15583_v53 = vrot.slane %v20377_v60, %v13199_v11  ;;  %v20379_v58 = vcombine.low %v15149_v62, %v15143_v41  ;;  %v15601_v39 = vld [vmem:[#allocation4 + $0x190] sm:$0xff]  ;;  %v11627_v40 = vunpack.i.l.bf16 %v15504_v9  ;;  %v15608_v56 = vpop.permute.xlu1 %11660 }
 0x321   : > { %v5599_v1 = vcombine.high %v20380_v3, %v15551_v45  ;;  %v5602_v32 = vcombine.low %v20381_v33, %v15554_v34  ;;  %v15599_v4 = vrot.slane %v5806_v43, %v13237_v52  ;;  %v20385_v13 = vcombine.low %v20383_v10, %v20384_v42  ;;  %v20386_v43 = vld [vmem:[#allocation108_spill] sm:$0xff]  ;;  %v20387_v3 = vld [vmem:[#allocation106_spill] sm:$0xff] }
 0x322   : > { %20378 = vst [vmem:[#allocation115_spill] sm:$0xff] %v15583_v53  ;;  %v11799_v22 = vpack.i.bf16 %v20379_v58, %v5600_v50  ;;  %v11641_v50 = vpop.permute.xlu0 %11640  ;;  %v5601_v60 = vcombine.high %v20373_v48, %v15524_v26  ;;  %v2698_v58 = vcombine.low %v15601_v39, %v15574_v51  ;;  %v20388_v45 = vcombine.low %v20386_v43, %v20387_v3 }
 0x323   : > { %20382 = vst [vmem:[#allocation118_spill] sm:$0xff] %v15599_v4  ;;  %v6839_v35 = vsel %vm1064_vm7, %v20385_v13, %v11623_v29  ;;  %v11632_v9 = vunpack.i.l.bf16 %v11631_v20  ;;  %v5807_v29 = vcombine.high %v15433_v16, %v15534_v6  ;;  %v15623_v10 = vrot.slane %v5759_v36, %v13199_v11 }
 0x324   : > { %v6838_v53 = vsel %vm1064_vm7, %v20388_v45, %v11622_v12  ;;  %11790 = vrot.lane.b32.xlu1 %v11789_v0, %s12510_s11  ;;  %11800 = vrot.lane.b32.xlu0 %v11799_v22, %s12504_s25  ;;  %v11638_v48 = vunpack.i.h.bf16 %v15529_v44  ;;  %v11637_v26 = vunpack.i.l.bf16 %v15529_v44  ;;  %v11633_v42 = vunpack.i.h.bf16 %v11631_v20 }
 0x325   : > { %v5597_v3 = vrot.slane %v5583_v15, %v13237_v52  ;;  %v20389_v45 = vcombine.high %v20317_v55, %v20316_v25  ;;  %v20390_v0 = vcombine.low %v15152_v5, %v15155_v18  ;;  %v5871_v16 = vcombine.high %v15599_v4, %v15229_v21  ;;  %v20406_v25 = vld [vmem:[#allocation84_spill] sm:$0xff] }
 0x326   : > { %v5603_v6 = vcombine.high %v20381_v33, %v15554_v34  ;;  %v6852_v36 = vsel %vm6744_vm8, %v6838_v53, %v11627_v40  ;;  %v6853_v44 = vsel %vm6744_vm8, %v6839_v35, %v11628_v54  ;;  %v15640_v20 = vpop.permute.xlu0 %11650  ;;  %v20392_v15 = vcombine.high %v15149_v62, %v15143_v41  ;;  %v15657_v41 = vld [vmem:[#allocation4 + $0x330] sm:$0xff]  ;;  %v15661_v40 = vpop.permute.xlu1 %11670  ;;  %v20393_v35 = vld [vmem:[#allocation62_spill] sm:$0xff] }
 0x327   : > { %v11794_v12 = vpack.i.bf16 %v20389_v45, %v5599_v1  ;;  %v11809_v22 = vpack.i.bf16 %v20390_v0, %v5602_v32  ;;  %20391 = vst [vmem:[#allocation117_spill] sm:$0xff] %v15640_v20  ;;  %v15646_v13 = vrot.slane %v2698_v58, %v13199_v11  ;;  %v15648_v32 = vld [vmem:[#allocation4 + $0x3f0] sm:$0xff]  ;;  %v6866_v45 = vsel %vm6759_vm9, %v6852_v36, %v11632_v9 }
 0x328   : > { %v11804_v1 = vpack.i.bf16 %v20392_v15, %v5601_v60  ;;  %v5821_v34 = vrot.slane %v5807_v29, %v13237_v52  ;;  %v5822_v53 = vcombine.low %v15436_v57, %v15623_v10  ;;  %v6867_v54 = vsel %vm6759_vm9, %v6853_v44, %v11633_v42  ;;  %v15664_v58 = vld [vmem:[#allocation4 + $0x3d0] sm:$0xff] }
 0x329   : > { %11795 = vrot.lane.b32.xlu1 %v11794_v12, %s12506_s29  ;;  %11810 = vrot.lane.b32.xlu0 %v11809_v22, %s12505_s26  ;;  %v11642_v33 = vunpack.i.l.bf16 %v11641_v50  ;;  %v5604_v60 = vcombine.low %v20393_v35, %v5597_v3  ;;  %v11643_v9 = vunpack.i.h.bf16 %v11641_v50  ;;  %v11814_v12 = vpack.i.bf16 %v15307_v8, %v5871_v16  ;;  %v15670_v22 = vld [vmem:[#allocation4 + $0x310] sm:$0xff] }
 0x32a   : > { %v20394_v29 = vcombine.high %v15152_v5, %v15155_v18  ;;  %v3274_v36 = vcombine.low %v15664_v58, %v15648_v32  ;;  %v6880_v42 = vsel %vm6774_vm10, %v6866_v45, %v11637_v26  ;;  %v11656_v44 = vpop.permute.xlu0 %11655  ;;  %v5605_v15 = vcombine.high %v20393_v35, %v5597_v3  ;;  %v15680_v50 = vld [vmem:[#allocation4 + $0x570] sm:$0xff] }
 0x32b   : > { %v2746_v43 = vcombine.low %v15426_v23, %v15646_v13  ;;  %v3106_v8 = vcombine.low %v15670_v22, %v15657_v41  ;;  %v6881_v18 = vsel %vm6774_vm10, %v6867_v54, %v11638_v48  ;;  %v5872_v26 = vcombine.low %v5821_v34, %v15241_v61  ;;  %v15697_v54 = vld [vmem:[#allocation4 + $0x550] sm:$0xff] }
 0x32c   : > { %v11819_v0 = vpack.i.bf16 %v20394_v29, %v5603_v6  ;;  %v5830_v3 = vrot.slane %v5822_v53, %v13237_v52  ;;  %v11662_v16 = vunpack.i.l.bf16 %v15608_v56  ;;  %v15690_v6 = vsel %vm6789_vm11, %v6880_v42, %v11642_v33  ;;  %v15709_v42 = vpop.permute.xlu1 %11680  ;;  %v20402_v29 = vld [vmem:[#allocation38_spill] sm:$0xff] }
 0x32d   : > { %11805 = vrot.lane.b32.xlu1 %v11804_v1, %s12508_s9  ;;  %11815 = vrot.lane.b32.xlu0 %v11814_v12, %s12506_s29  ;;  %20395 = vst [vmem:[#allocation60_spill] sm:$0xff] %v15690_v6  ;;  %v20396_v45 = vcombine.low %v15158_v31, %v15161_v28  ;;  %v5823_v48 = vcombine.high %v15436_v57, %v15623_v10  ;;  %20398 = vst [vmem:[#allocation127_spill] sm:$0xff] %v15709_v42  ;;  %v20408_v6 = vld [vmem:[#allocation133_spill] sm:$0xff]  ;;  %v20432_v42 = vld [vmem:[#allocation22_spill] sm:$0xff] }
 0x32e   : > { %v15700_v1 = vsel %vm6789_vm11, %v6881_v18, %v11643_v9  ;;  %v5873_v12 = vcombine.high %v5821_v34, %v15241_v61  ;;  %v15704_v53 = vrot.slane %v3274_v36, %v13199_v11  ;;  %v3682_v33 = vcombine.low %v15697_v54, %v15680_v50  ;;  %v15720_v34 = vld [vmem:[#allocation4 + $0x630] sm:$0xff] }
 0x32f   : > { %v11829_v35 = vpack.i.bf16 %v20396_v45, %v5604_v60  ;;  %20397 = vst [vmem:[#allocation61_spill] sm:$0xff] %v15700_v1  ;;  %v11666_v60 = vpop.permute.xlu0 %11665  ;;  %v20399_v57 = vcombine.high %v15158_v31, %v15161_v28  ;;  %v15715_v9 = vrot.slane %v2746_v43, %v13237_v52  ;;  %v15718_v61 = vrot.slane %v3106_v8, %v13199_v11 }
 0x330   : > { %v11672_v36 = vunpack.i.l.bf16 %v15661_v40  ;;  %v11657_v18 = vunpack.i.l.bf16 %v11656_v44  ;;  %v11824_v45 = vpack.i.bf16 %v15279_v63, %v5872_v26  ;;  %v5874_v31 = vcombine.low %v5830_v3, %v15245_v14  ;;  %v20405_v26 = vld [vmem:[#allocation109_spill] sm:$0xff]  ;;  %v15763_v1 = vpop.permute.xlu1 %11700 }
 0x331   : > { %v11839_v10 = vpack.i.bf16 %v20399_v57, %v5605_v15  ;;  %20400 = vst [vmem:[#allocation129_spill] sm:$0xff] %v15715_v9  ;;  %11820 = vrot.lane.b32.xlu1 %v11819_v0, %s12509_s10  ;;  %11830 = vrot.lane.b32.xlu0 %v11829_v35, %s12507_s30  ;;  %v11658_v28 = vunpack.i.h.bf16 %v11656_v44  ;;  %v5875_v43 = vcombine.high %v5830_v3, %v15245_v14  ;;  %v15733_v57 = vld [vmem:[#allocation4 + $0x610] sm:$0xff]  ;;  %v20401_v35 = vld [vmem:[#allocation75_spill] sm:$0xff]  ;;  %v11667_v21 = vunpack.i.l.bf16 %v11666_v60 }
 0x332   : > { %v15729_v15 = vrot.slane %v5823_v48, %v13237_v52  ;;  %v2506_v8 = vcombine.low %v15402_v49, %v15577_v59  ;;  %v11834_v62 = vpack.i.bf16 %v15328_v24, %v5873_v12  ;;  %v3322_v0 = vcombine.low %v15445_v19, %v15704_v53 }
 0x333   : > { %v15739_v63 = vrot.slane %v3682_v33, %v13199_v11  ;;  %v3922_v44 = vcombine.low %v15733_v57, %v15720_v34  ;;  %v15745_v3 = vpop.permute.xlu0 %11675  ;;  %v2811_v48 = vcombine.high %v15715_v9, %v20401_v35  ;;  %v3154_v24 = vcombine.low %v15439_v47, %v15718_v61  ;;  %v20403_v33 = vld [vmem:[#allocation39_spill] sm:$0xff] }
 0x334   : > { %v20404_v5 = vcombine.low %v20402_v29, %v20403_v33  ;;  %v11844_v14 = vpack.i.bf16 %v15282_v46, %v5874_v31  ;;  %v20407_v55 = vcombine.low %v20405_v26, %v20406_v25  ;;  %v11849_v12 = vpack.i.bf16 %v15332_v2, %v5875_v43  ;;  %v20411_v2 = vld [vmem:[#allocation13_spill] sm:$0xff]  ;;  %v20412_v31 = vld [vmem:[#allocation16_spill] sm:$0xff] }
 0x335   : > { %11825 = vrot.lane.b32.xlu1 %v11824_v45, %s12504_s25  ;;  %11835 = vrot.lane.b32.xlu0 %v11834_v62, %s12508_s9  ;;  %v5876_v29 = vcombine.low %v15729_v15, %v20408_v6  ;;  %v15772_v62 = vrot.slane %v3322_v0, %v13237_v52  ;;  %v3730_v46 = vcombine.low %v15516_v30, %v15739_v63  ;;  %v20415_v26 = vunpack.i.h.bf16 %v15608_v56 }
 0x336   : > { %v6842_v4 = vsel %vm1064_vm7, %v20404_v5, %v11657_v18  ;;  %v6843_v20 = vsel %vm1064_vm7, %v20407_v55, %v11658_v28  ;;  %v15769_v5 = vrot.slane %v2506_v8, %v13237_v52  ;;  %v11668_v18 = vunpack.i.h.bf16 %v11666_v60 }
 0x337   : > { %20410 = vst [vmem:[#allocation20_spill] sm:$0xff] %v15772_v62  ;;  %v3930_v25 = vrot.slane %v3922_v44, %v13199_v11  ;;  %v6856_v55 = vsel %vm6744_vm8, %v6842_v4, %v11662_v16  ;;  %v15778_v45 = vpop.permute.xlu0 %11685  ;;  %v20413_v28 = vcombine.high %v20411_v2, %v20412_v31  ;;  %v15784_v8 = vrot.slane %v3154_v24, %v13237_v52  ;;  %v20416_v24 = vld [vmem:[#allocation6_spill] sm:$0xff]  ;;  %v20424_v2 = vld [vmem:[#allocation119_spill] sm:$0xff] }
 0x338   : > { %20409 = vst [vmem:[#allocation19_spill] sm:$0xff] %v15769_v5  ;;  %v2507_v60 = vcombine.high %v15402_v49, %v15577_v59  ;;  %v6857_v44 = vsel %vm6744_vm8, %v6843_v20, %v20415_v26  ;;  %v6870_v4 = vsel %vm6759_vm9, %v6856_v55, %v11667_v21  ;;  %v2747_v16 = vcombine.high %v15426_v23, %v15646_v13  ;;  %v20417_v20 = vld [vmem:[#allocation103_spill] sm:$0xff]  ;;  %v15809_v23 = vpop.permute.xlu1 %11705 }
 0x339   : > { %v11864_v43 = vpack.i.bf16 %v2811_v48, %v20413_v28  ;;  %20414 = vst [vmem:[#allocation108_spill] sm:$0xff] %v15784_v8  ;;  %11840 = vrot.lane.b32.xlu1 %v11839_v10, %s12510_s11  ;;  %11845 = vrot.lane.b32.xlu0 %v11844_v14, %s12505_s26  ;;  %v11703_v48 = vunpack.i.h.bf16 %v15763_v1  ;;  %v11854_v33 = vpack.i.bf16 %v20416_v24, %v5876_v29  ;;  %v20418_v10 = vld [vmem:[#allocation123_spill] sm:$0xff]  ;;  %v20420_v28 = vld [vmem:[#allocation82_spill] sm:$0xff]  ;;  %v11678_v31 = vunpack.i.h.bf16 %v15745_v3 }
 0x33a   : > { %v3970_v49 = vcombine.low %v15562_v17, %v3930_v25  ;;  %v3971_v59 = vcombine.high %v15562_v17, %v3930_v25  ;;  %v6871_v56 = vsel %vm6759_vm9, %v6857_v44, %v11668_v18  ;;  %v3355_v21 = vcombine.high %v20417_v20, %v15772_v62  ;;  %v20438_v62 = vld [vmem:[#allocation56_spill] sm:$0xff] }
 0x33b   : > { %v2539_v55 = vcombine.high %v20418_v10, %v15769_v5  ;;  %v15807_v14 = vrot.slane %v3730_v46, %v13237_v52  ;;  %v6884_v13 = vsel %vm6774_vm10, %v6870_v4, %v11672_v36  ;;  %v11691_v29 = vpop.permute.xlu0 %11690  ;;  %v3219_v26 = vcombine.high %v15784_v8, %v20420_v28  ;;  %v20434_v10 = vld [vmem:[#allocation113_spill] sm:$0xff]  ;;  %v20435_v5 = vld [vmem:[#allocation110_spill] sm:$0xff] }
 0x33c   : > { %v15815_v17 = vrot.slane %v2507_v60, %v13237_v52  ;;  %v3155_v18 = vcombine.high %v15439_v47, %v15718_v61  ;;  %v11702_v25 = vunpack.i.l.bf16 %v15763_v1  ;;  %v15823_v46 = vrot.slane %v3970_v49, %v13237_v52  ;;  %v20423_v49 = vld [vmem:[#allocation125_spill] sm:$0xff] }
 0x33d   : > { %20419 = vst [vmem:[#allocation106_spill] sm:$0xff] %v15807_v14  ;;  %11850 = vrot.lane.b32.xlu0 %v11849_v12, %s12509_s10  ;;  %11865 = vrot.lane.b32.xlu1 %v11864_v43, %s12506_s29  ;;  %v15826_v36 = vrot.slane %v3971_v59, %v13237_v52  ;;  %v2761_v44 = vrot.slane %v2747_v16, %v13237_v52  ;;  %v20422_v60 = vunpack.i.h.bf16 %v15661_v40  ;;  %v11693_v0 = vunpack.i.h.bf16 %v11691_v29  ;;  %v20425_v40 = vld [vmem:[#allocation121_spill] sm:$0xff] }
 0x33e   : > { %20421 = vst [vmem:[#allocation62_spill] sm:$0xff] %v15823_v46  ;;  %v11692_v47 = vunpack.i.l.bf16 %v11691_v29  ;;  %v3323_v1 = vcombine.high %v15445_v19, %v15704_v53  ;;  %v11677_v12 = vunpack.i.l.bf16 %v15745_v3  ;;  %v11869_v43 = vpack.i.bf16 %v3355_v21, %v3219_v26  ;;  %v20427_v29 = vld [vmem:[#allocation65_spill] sm:$0xff]  ;;  %v20428_v21 = vld [vmem:[#allocation36_spill] sm:$0xff] }
 0x33f   : > { %v6885_v4 = vsel %vm6774_vm10, %v6871_v56, %v20422_v60  ;;  %v3763_v59 = vcombine.high %v20423_v49, %v15807_v14  ;;  %v11696_v16 = vpop.permute.xlu0 %11695  ;;  %v20426_v24 = vcombine.high %v20424_v2, %v20425_v40  ;;  %v2540_v60 = vcombine.low %v20427_v29, %v15815_v17  ;;  %v20429_v26 = vld [vmem:[#allocation32_spill] sm:$0xff]  ;;  %v20430_v40 = vld [vmem:[#allocation66_spill] sm:$0xff]  ;;  %v20431_v2 = vld [vmem:[#allocation21_spill] sm:$0xff] }
 0x340   : > { %v15845_v19 = vrot.slane %v3155_v18, %v13237_v52  ;;  %v11707_v53 = vunpack.i.l.bf16 %v15809_v23  ;;  %v4035_v3 = vcombine.high %v15823_v46, %v20428_v21  ;;  %v4036_v61 = vcombine.low %v15826_v36, %v20429_v26  ;;  %v20439_v8 = vld [vmem:[#allocation53_spill] sm:$0xff] }
 0x341   : > { %v11859_v56 = vpack.i.bf16 %v2539_v55, %v20426_v24  ;;  %11855 = vrot.lane.b32.xlu0 %v11854_v33, %s12507_s30  ;;  %11870 = vrot.lane.b32.xlu1 %v11869_v43, %s12506_s29  ;;  %v2812_v24 = vcombine.low %v2761_v44, %v20430_v40  ;;  %v15855_v55 = vpop.permute.xlu1 %11725  ;;  %v20433_v18 = vcombine.low %v20431_v2, %v20432_v42  ;;  %v11698_v14 = vunpack.i.h.bf16 %v11696_v16 }
 0x342   : > { %v20436_v33 = vcombine.low %v20434_v10, %v20435_v5  ;;  %v2813_v49 = vcombine.high %v2761_v44, %v20430_v40  ;;  %v3337_v46 = vrot.slane %v3323_v1, %v13237_v52  ;;  %v15868_v21 = vsel %vm6789_vm11, %v6884_v13, %v11677_v12  ;;  %v20442_v5 = vld [vmem:[#allocation64_spill] sm:$0xff]  ;;  %v20445_v44 = vld [vmem:[#allocation99_spill] sm:$0xff]  ;;  %v2089_v12 = vld [vmem:[#allocation4 + $0xf8] sm:$0xff] }
 0x343   : > { %v6735_v37 = vsel %vm1064_vm7, %v20433_v18, %v11693_v0  ;;  %20437 = vst [vmem:[#allocation38_spill] sm:$0xff] %v15868_v21  ;;  %v11697_v20 = vunpack.i.l.bf16 %v11696_v16  ;;  %v20440_v28 = vcombine.high %v20438_v62, %v20439_v8  ;;  %v15874_v2 = vsel %vm6789_vm11, %v6885_v4, %v11678_v31  ;;  %v11711_v0 = vpop.permute.xlu0 %11710  ;;  %v20443_v10 = vld [vmem:[#allocation124_spill] sm:$0xff]  ;;  %v20454_v62 = vld [vmem:[#allocation114_spill] sm:$0xff] }
 0x344   : > { %v6734_v43 = vsel %vm1064_vm7, %v20436_v33, %v11692_v47  ;;  %20441 = vst [vmem:[#allocation39_spill] sm:$0xff] %v15874_v2  ;;  %v20444_v47 = vcombine.low %v20442_v5, %v20443_v10  ;;  %v3220_v1 = vcombine.low %v15845_v19, %v20445_v44  ;;  %v3731_v13 = vcombine.high %v15516_v30, %v15739_v63  ;;  %v20446_v31 = vld [vmem:[#allocation132_spill] sm:$0xff] }
 0x345   : > { %v11874_v42 = vpack.i.bf16 %v20440_v28, %v3763_v59  ;;  %v6749_v40 = vsel %vm6744_vm8, %v6734_v43, %v11702_v25  ;;  %v6750_v28 = vsel %vm6744_vm8, %v6735_v37, %v11703_v48  ;;  %11860 = vrot.lane.b32.xlu0 %v11859_v56, %s12506_s29  ;;  %v11879_v4 = vpack.i.bf16 %v20446_v31, %v4035_v3  ;;  %v15889_v59 = vld [vmem:[#allocation4 + $0x1b8] sm:$0xff]  ;;  %v20449_v8 = vld [vmem:[#allocation80_spill] sm:$0xff]  ;;  %v20453_v56 = vld [vmem:[#allocation111_spill] sm:$0xff] }
 0x346   : > { %v11884_v18 = vpack.i.bf16 %v2540_v60, %v20444_v47  ;;  %v20447_v60 = vld [vmem:[#allocation70_spill] sm:$0xff]  ;;  %v20448_v47 = vld [vmem:[#allocation73_spill] sm:$0xff]  ;;  %v20452_v43 = vld [vmem:[#allocation100_spill] sm:$0xff] }
 0x347   : > { %11875 = vrot.lane.b32.xlu1 %v11874_v42, %s12506_s29  ;;  %v11904_v33 = vpack.i.bf16 %v20447_v60, %v4036_v61  ;;  %v20450_v30 = vcombine.low %v20448_v47, %v20449_v8  ;;  %v20451_v16 = vcombine.high %v20448_v47, %v20449_v8  ;;  %v3356_v37 = vcombine.low %v20452_v43, %v3337_v46  ;;  %v2085_v48 = vld [vmem:[#allocation4 + $0xd8] sm:$0xff]  ;;  %v20457_v2 = vld [vmem:[#allocation40_spill] sm:$0xff]  ;;  %v11716_v8 = vpop.permute.xlu0 %11715 }
 0x348   : > { %v20455_v42 = vcombine.low %v20453_v56, %v20454_v62  ;;  %v20456_v31 = vld [vmem:[#allocation41_spill] sm:$0xff]  ;;  %v4294_v60 = vcombine.low %v2085_v48, %v2089_v12  ;;  %v4295_v9 = vcombine.high %v2085_v48, %v2089_v12 }
 0x349   : > { %v11889_v63 = vpack.i.bf16 %v2812_v24, %v20450_v30  ;;  %v11914_v25 = vpack.i.bf16 %v2813_v49, %v20451_v16  ;;  %v20458_v21 = vcombine.low %v20456_v31, %v20457_v2  ;;  %v15907_v24 = vld [vmem:[#allocation4 + $0x198] sm:$0xff]  ;;  %v15909_v30 = vpop.permute.xlu1 %11735  ;;  %v3357_v49 = vcombine.high %v20452_v43, %v3337_v46  ;;  %11880 = vrot.lane.b32.xlu0 %v11879_v4, %s12506_s29  ;;  %v20462_v31 = vld [vmem:[#allocation126_spill] sm:$0xff] }
 0x34a   : > { %v6739_v3 = vsel %vm1064_vm7, %v20455_v42, %v11698_v14  ;;  %v3745_v16 = vrot.slane %v3731_v13, %v13237_v52  ;;  %v4534_v62 = vcombine.low %v15907_v24, %v15889_v59  ;;  %v20459_v14 = vld [vmem:[#allocation48_spill] sm:$0xff]  ;;  %v11727_v2 = vunpack.i.l.bf16 %v15855_v55 }
 0x34b   : > { %v6738_v61 = vsel %vm1064_vm7, %v20458_v21, %v11697_v20  ;;  %v2522_v47 = vcombine.low %v20459_v14, %v15589_v7  ;;  %11885 = vrot.lane.b32.xlu1 %v11884_v18, %s12504_s25  ;;  %v2541_v20 = vcombine.high %v20427_v29, %v15815_v17  ;;  %v4302_v21 = vrot.slane %v4294_v60, %v13199_v11  ;;  %v20461_v17 = vld [vmem:[#allocation42_spill] sm:$0xff] }
 0x34c   : > { %v15924_v46 = vrot.slane %v4295_v9, %v13199_v11  ;;  %v11712_v13 = vunpack.i.l.bf16 %v11711_v0  ;;  %v6753_v12 = vsel %vm6744_vm8, %v6738_v61, %v11707_v53  ;;  %v3221_v43 = vcombine.high %v15845_v19, %v20445_v44  ;;  %v11721_v9 = vpop.permute.xlu0 %11720  ;;  %v20464_v61 = vld [vmem:[#allocation46_spill] sm:$0xff] }
 0x34d   : > { %v15930_v48 = vrot.slane %v4534_v62, %v13199_v11  ;;  %v11713_v18 = vunpack.i.h.bf16 %v11711_v0  ;;  %v20460_v4 = vunpack.i.h.bf16 %v15809_v23  ;;  %v4343_v29 = vcombine.high %v20461_v17, %v4302_v21  ;;  %11890 = vrot.lane.b32.xlu0 %v11889_v63, %s12504_s25 }
 0x34e   : > { %v2530_v60 = vrot.slane %v2522_v47, %v13237_v52  ;;  %v11894_v42 = vpack.i.bf16 %v3356_v37, %v3220_v1  ;;  %v3764_v35 = vcombine.low %v20462_v31, %v3745_v16  ;;  %v3765_v53 = vcombine.high %v20462_v31, %v3745_v16  ;;  %v15947_v1 = vpop.permute.xlu1 %11745 }
 0x34f   : > { %v6754_v56 = vsel %vm6744_vm8, %v6739_v3, %v20460_v4  ;;  %v4342_v19 = vcombine.low %v20461_v17, %v4302_v21  ;;  %v11722_v44 = vunpack.i.l.bf16 %v11721_v9  ;;  %11905 = vrot.lane.b32.xlu1 %v11904_v33, %s12504_s25  ;;  %v11919_v23 = vpack.i.bf16 %v3357_v49, %v3221_v43  ;;  %v20465_v43 = vld [vmem:[#allocation69_spill] sm:$0xff] }
 0x350   : > { %v20463_v0 = vcombine.high %v20442_v5, %v20443_v10  ;;  %v4358_v62 = vcombine.low %v20464_v61, %v15924_v46  ;;  %v6764_v37 = vsel %vm6759_vm9, %v6749_v40, %v11712_v13  ;;  %v11717_v16 = vunpack.i.l.bf16 %v11716_v8  ;;  %v11731_v10 = vpop.permute.xlu0 %11730  ;;  %v20467_v4 = vld [vmem:[#allocation101_spill] sm:$0xff] }
 0x351   : > { %v11723_v47 = vunpack.i.h.bf16 %v11721_v9  ;;  %v4582_v21 = vcombine.low %v15541_v38, %v15930_v48  ;;  %v6765_v33 = vsel %vm6759_vm9, %v6750_v28, %v11713_v18  ;;  %v11718_v63 = vunpack.i.h.bf16 %v11716_v8  ;;  %11895 = vrot.lane.b32.xlu0 %v11894_v42, %s12504_s25  ;;  %v20471_v42 = vld [vmem:[#allocation25_spill] sm:$0xff] }
 0x352   : > { %v11909_v3 = vpack.i.bf16 %v2541_v20, %v20463_v0  ;;  %v4357_v49 = vrot.slane %v4343_v29, %v13237_v52  ;;  %v2542_v5 = vcombine.low %v20465_v43, %v2530_v60  ;;  %v20466_v20 = vld [vmem:[#allocation105_spill] sm:$0xff]  ;;  %v15962_v9 = vrot.slane %v4342_v19, %v13237_v52 }
 0x353   : > { %v20468_v17 = vcombine.low %v20466_v20, %v20467_v4  ;;  %v20469_v40 = vcombine.high %v20466_v20, %v20467_v4  ;;  %v2543_v28 = vcombine.high %v20465_v43, %v2530_v60  ;;  %v6779_v18 = vsel %vm6774_vm10, %v6764_v37, %v11722_v44  ;;  %11915 = vrot.lane.b32.xlu1 %v11914_v25, %s12508_s9  ;;  %v20470_v25 = vld [vmem:[#allocation131_spill] sm:$0xff]  ;;  %v20472_v43 = vld [vmem:[#allocation10_spill] sm:$0xff] }
 0x354   : > { %v4366_v29 = vrot.slane %v4358_v62, %v13237_v52  ;;  %v6780_v19 = vsel %vm6774_vm10, %v6765_v33, %v11723_v47  ;;  %v15975_v0 = vrot.slane %v4582_v21, %v13237_v52  ;;  %v2699_v60 = vcombine.high %v15601_v39, %v15574_v51 }
 0x355   : > { %v11899_v31 = vpack.i.bf16 %v20468_v17, %v3764_v35  ;;  %v11924_v13 = vpack.i.bf16 %v20469_v40, %v3765_v53  ;;  %v2523_v35 = vcombine.high %v20459_v14, %v15589_v7  ;;  %v6768_v53 = vsel %vm6759_vm9, %v6753_v12, %v11717_v16  ;;  %v11741_v12 = vpop.permute.xlu0 %11740  ;;  %v20474_v16 = vld [vmem:[#allocation72_spill] sm:$0xff]  ;;  %v20478_v17 = vld [vmem:[#allocation31_spill] sm:$0xff] }
 0x356   : > { %v6769_v44 = vsel %vm6759_vm9, %v6754_v56, %v11718_v63  ;;  %v4376_v37 = vcombine.low %v20470_v25, %v4357_v49  ;;  %v20473_v62 = vcombine.low %v20471_v42, %v20472_v43  ;;  %v4359_v7 = vcombine.high %v20464_v61, %v15924_v46 }
 0x357   : > { %v6794_v14 = vsel %vm6789_vm11, %v6779_v18, %v11727_v2  ;;  %v4375_v47 = vcombine.high %v20474_v16, %v15962_v9  ;;  %v20475_v51 = vcombine.high %v20471_v42, %v20472_v43  ;;  %v4583_v56 = vcombine.high %v15541_v38, %v15930_v48  ;;  %11920 = vrot.lane.b32.xlu1 %v11919_v23, %s12508_s9  ;;  %v20477_v2 = vld [vmem:[#allocation8_spill] sm:$0xff]  ;;  %v20479_v48 = vld [vmem:[#allocation90_spill] sm:$0xff] }
 0x358   : > { %v15984_v20 = vpack.i.bf16 %v2542_v5, %v20473_v62  ;;  %v11732_v21 = vunpack.i.l.bf16 %v11731_v10  ;;  %v20476_v33 = vunpack.i.h.bf16 %v15855_v55  ;;  %11900 = vrot.lane.b32.xlu0 %v11899_v31, %s12504_s25  ;;  %v4378_v46 = vcombine.low %v20477_v2, %v4366_v29  ;;  %v20482_v43 = vld [vmem:[#allocation120_spill] sm:$0xff] }
 0x359   : > { %v15994_v39 = vpack.i.bf16 %v2543_v28, %v20475_v51  ;;  %v4377_v61 = vcombine.high %v20470_v25, %v4357_v49  ;;  %v11733_v5 = vunpack.i.h.bf16 %v11731_v10  ;;  %v11742_v4 = vunpack.i.l.bf16 %v11741_v12  ;;  %v20480_v28 = vld [vmem:[#allocation130_spill] sm:$0xff] }
 0x35a   : > { %v6795_v63 = vsel %vm6789_vm11, %v6780_v19, %v20476_v33  ;;  %v4647_v40 = vcombine.high %v15975_v0, %v20478_v17  ;;  %v2713_v38 = vrot.slane %v2699_v60, %v13199_v11  ;;  %v20481_v55 = vcombine.low %v20479_v48, %v20480_v28  ;;  %v20483_v49 = vld [vmem:[#allocation122_spill] sm:$0xff] }
 0x35b   : > { %v4379_v19 = vcombine.high %v20477_v2, %v4366_v29  ;;  %v4373_v23 = vrot.slane %v4359_v7, %v13237_v52  ;;  %v2537_v31 = vrot.slane %v2523_v35, %v13237_v52  ;;  %v11743_v42 = vunpack.i.h.bf16 %v11741_v12  ;;  %11925 = vrot.lane.b32.xlu1 %v11924_v13, %s12508_s9  ;;  %v20485_v29 = vld [vmem:[#allocation134_spill] sm:$0xff]  ;;  %v20486_v35 = vld [vmem:[#allocation71_spill] sm:$0xff] }
 0x35c   : > { %v11934_v18 = vpack.i.bf16 %v4376_v37, %v20481_v55  ;;  %v20484_v10 = vcombine.high %v20482_v43, %v20483_v49  ;;  %v4597_v62 = vrot.slane %v4583_v56, %v13237_v52  ;;  %v4535_v60 = vcombine.high %v15907_v24, %v15889_v59  ;;  %11910 = vrot.lane.b32.xlu0 %v11909_v3, %s12508_s9  ;;  %v11751_v24 = vpop.permute.xlu0 %11750  ;;  %v20492_v55 = vld [vmem:[#allocation47_spill] sm:$0xff] }
 0x35d   : > { %v11747_v51 = vunpack.i.l.bf16 %v15947_v1  ;;  %v16022_v37 = vsel %vm6804_vm12, %v6794_v14, %v11732_v21  ;;  %v20487_v7 = vcombine.low %v20485_v29, %v20486_v35  ;;  %v16033_v33 = vsel %vm6804_vm12, %v6795_v63, %v11733_v5  ;;  %v20489_v14 = vld [vmem:[#allocation26_spill] sm:$0xff]  ;;  %v20490_v21 = vld [vmem:[#allocation27_spill] sm:$0xff] }
 0x35e   : > { %v11929_v25 = vpack.i.bf16 %v4375_v47, %v20484_v10  ;;  %v20488_v47 = vcombine.high %v20479_v48, %v20480_v28  ;;  %v6783_v59 = vsel %vm6774_vm10, %v6768_v53, %v11742_v4  ;;  %v20491_v2 = vcombine.high %v20489_v14, %v20490_v21  ;;  %v20496_v5 = vld [vmem:[#allocation30_spill] sm:$0xff] }
 0x35f   : > { %v11944_v12 = vpack.i.bf16 %v4378_v46, %v20487_v7  ;;  %v2762_v3 = vcombine.low %v20492_v55, %v2713_v38  ;;  %v20493_v10 = vcombine.high %v20485_v29, %v20486_v35  ;;  %v20494_v7 = vld [vmem:[#allocation7_spill] sm:$0xff]  ;;  %v6784_v53 = vsel %vm6774_vm10, %v6769_v44, %v11743_v42  ;;  %11935 = vrot.lane.b32.xlu1 %v11934_v18, %s12504_s25  ;;  %v20499_v18 = vld [vmem:[#allocation68_spill] sm:$0xff] }
 0x360   : > { %v11939_v56 = vpack.i.bf16 %v4377_v61, %v20488_v47  ;;  %v11954_v13 = vpack.i.bf16 %v4647_v40, %v20491_v2  ;;  %v4380_v48 = vcombine.low %v20494_v7, %v4373_v23  ;;  %v20495_v61 = vld [vmem:[#allocation63_spill] sm:$0xff]  ;;  %v4648_v4 = vcombine.low %v4597_v62, %v20496_v5  ;;  %11930 = vrot.lane.b32.xlu0 %v11929_v25, %s12506_s29 }
 0x361   : > { %v16043_v46 = vpack.i.bf16 %v4379_v19, %v20493_v10  ;;  %v2544_v28 = vcombine.low %v20495_v61, %v2537_v31  ;;  %v2545_v63 = vcombine.high %v20495_v61, %v2537_v31  ;;  %v4549_v47 = vrot.slane %v4535_v60, %v13199_v11  ;;  %v20504_v10 = vld [vmem:[#allocation9_spill] sm:$0xff] }
 0x362   : > { %v3107_v40 = vcombine.high %v15670_v22, %v15657_v41  ;;  %v11753_v2 = vunpack.i.h.bf16 %v11751_v24  ;;  %v11752_v8 = vunpack.i.l.bf16 %v11751_v24  ;;  %v6798_v19 = vsel %vm6789_vm11, %v6783_v59, %v11747_v51  ;;  %v20498_v51 = vld [vmem:[#allocation45_spill] sm:$0xff]  ;;  %v20501_v59 = vld [vmem:[#allocation44_spill] sm:$0xff] }
 0x363   : > { %v4649_v29 = vcombine.high %v4597_v62, %v20496_v5  ;;  %v4381_v31 = vcombine.high %v20494_v7, %v4373_v23  ;;  %v16059_v44 = vrot.slane %v2762_v3, %v13237_v52  ;;  %v3275_v41 = vcombine.high %v15664_v58, %v15648_v32  ;;  %v20502_v62 = vld [vmem:[#allocation67_spill] sm:$0xff]  ;;  %v20505_v7 = vld [vmem:[#allocation81_spill] sm:$0xff]  ;;  %v20507_v32 = vld [vmem:[#allocation58_spill] sm:$0xff]  ;;  %11945 = vrot.lane.b32.xlu1 %v11944_v12, %s12505_s26 }
 0x364   : > { %v3121_v42 = vrot.slane %v3107_v40, %v13199_v11  ;;  %v20497_v22 = vunpack.i.h.bf16 %v15947_v1  ;;  %v20500_v35 = vcombine.low %v20498_v51, %v20499_v18  ;;  %v20503_v24 = vcombine.low %v20501_v59, %v20502_v62  ;;  %v20508_v1 = vld [vmem:[#allocation43_spill] sm:$0xff]  ;;  %11940 = vrot.lane.b32.xlu0 %v11939_v56, %s12508_s9 }
 0x365   : > { %v2763_v3 = vcombine.high %v20492_v55, %v2713_v38  ;;  %v20506_v61 = vcombine.low %v20504_v10, %v20505_v7  ;;  %v4598_v58 = vcombine.low %v20507_v32, %v4549_v47  ;;  %v20509_v38 = vcombine.high %v20504_v10, %v20505_v7  ;;  %v20512_v12 = vld [vmem:[#allocation107_spill] sm:$0xff] }
 0x366   : > { %v6799_v60 = vsel %vm6789_vm11, %v6784_v53, %v20497_v22  ;;  %v11974_v25 = vpack.i.bf16 %v4380_v48, %v20500_v35  ;;  %v16073_v23 = vpack.i.bf16 %v2544_v28, %v20503_v24  ;;  %v3170_v40 = vcombine.low %v20508_v1, %v3121_v42  ;;  %v20533_v22 = vld [vmem:[#allocation24_spill] sm:$0xff] }
 0x367   : > { %v11969_v5 = vpack.i.bf16 %v4648_v4, %v20506_v61  ;;  %v3289_v53 = vrot.slane %v3275_v41, %v13199_v11  ;;  %v16084_v48 = vsel %vm6804_vm12, %v6798_v19, %v11752_v8  ;;  %v16091_v55 = vpack.i.bf16 %v4649_v29, %v20509_v38  ;;  %11955 = vrot.lane.b32.xlu1 %v11954_v13, %s12506_s29  ;;  %v20515_v61 = vld [vmem:[#allocation37_spill] sm:$0xff]  ;;  %v20537_v29 = vld [vmem:[#allocation50_spill] sm:$0xff] }
 0x368   : > { %v20510_v28 = vcombine.high %v20501_v59, %v20502_v62  ;;  %v16099_v41 = vsel %vm6804_vm12, %v6799_v60, %v11753_v2  ;;  %v20511_v8 = vcombine.high %v20498_v51, %v20499_v18  ;;  %v2814_v56 = vcombine.low %v16059_v44, %v20512_v12  ;;  %v20514_v51 = vld [vmem:[#allocation86_spill] sm:$0xff]  ;;  %11950 = vrot.lane.b32.xlu0 %v15984_v20, %s12505_s26 }
 0x369   : > { %v3178_v35 = vrot.slane %v3170_v40, %v13237_v52  ;;  %v16112_v59 = vrot.slane %v2763_v3, %v13237_v52  ;;  %v3171_v2 = vcombine.high %v20508_v1, %v3121_v42  ;;  %v16117_v60 = vrot.slane %v4598_v58, %v13237_v52  ;;  %v20516_v58 = vld [vmem:[#allocation33_spill] sm:$0xff]  ;;  %v20518_v40 = vld [vmem:[#allocation92_spill] sm:$0xff] }
 0x36a   : > { %v16096_v4 = vpack.i.bf16 %v2545_v63, %v20510_v28  ;;  %v16104_v19 = vpack.i.bf16 %v4381_v31, %v20511_v8  ;;  %v20513_v63 = vld [vmem:[#allocation29_spill] sm:$0xff]  ;;  %v4599_v31 = vcombine.high %v20507_v32, %v4549_v47  ;;  %v20517_v47 = vcombine.low %v20515_v61, %v20516_v58  ;;  %v20519_v8 = vld [vmem:[#allocation79_spill] sm:$0xff] }
 0x36b   : > { %v3338_v62 = vcombine.low %v20513_v63, %v3289_v53  ;;  %v3222_v18 = vcombine.low %v3178_v35, %v20514_v51  ;;  %v3223_v24 = vcombine.high %v3178_v35, %v20514_v51  ;;  %v3185_v42 = vrot.slane %v3171_v2, %v13237_v52  ;;  %11965 = vrot.lane.b32.xlu1 %v15994_v39, %s12509_s10  ;;  %v20532_v39 = vld [vmem:[#allocation23_spill] sm:$0xff] }
 0x36c   : > { %v3339_v7 = vcombine.high %v20513_v63, %v3289_v53  ;;  %v16132_v32 = vpack.i.bf16 %v2814_v56, %v20517_v47  ;;  %v3683_v1 = vcombine.high %v15697_v54, %v15680_v50  ;;  %v20520_v63 = vld [vmem:[#allocation85_spill] sm:$0xff]  ;;  %v11738_v2 = vunpack.i.h.bf16 %v15909_v30  ;;  %11960 = vrot.lane.b32.xlu0 %v16043_v46, %s12509_s10  ;;  %v20534_v56 = vld [vmem:[#allocation115_spill] sm:$0xff] }
 0x36d   : > { %v3346_v3 = vrot.slane %v3338_v62, %v13237_v52  ;;  %v3224_v53 = vcombine.low %v3185_v42, %v20519_v8  ;;  %v16147_v62 = vrot.slane %v4599_v31, %v13237_v52  ;;  %v3225_v50 = vcombine.high %v3185_v42, %v20519_v8  ;;  %v20525_v8 = vld [vmem:[#allocation108_spill] sm:$0xff] }
 0x36e   : > { %v3353_v35 = vrot.slane %v3339_v7, %v13237_v52  ;;  %v3697_v54 = vrot.slane %v3683_v1, %v13199_v11  ;;  %v20521_v7 = vld [vmem:[#allocation95_spill] sm:$0xff] }
 0x36f   : > { %v3358_v38 = vcombine.low %v20518_v40, %v3346_v3  ;;  %v3359_v28 = vcombine.high %v20518_v40, %v3346_v3  ;;  %v3923_v40 = vcombine.high %v15733_v57, %v15720_v34  ;;  %v11737_v34 = vunpack.i.l.bf16 %v15909_v30  ;;  %11975 = vrot.lane.b32.xlu1 %v11974_v25, %s12507_s30 }
 0x370   : > { %v3360_v47 = vcombine.low %v20521_v7, %v3353_v35  ;;  %v3361_v31 = vcombine.high %v20521_v7, %v3353_v35  ;;  %v3746_v42 = vcombine.low %v15568_v27, %v3697_v54  ;;  %v3747_v1 = vcombine.high %v15568_v27, %v3697_v54  ;;  %11970 = vrot.lane.b32.xlu0 %v11969_v5, %s12504_s25 }
 0x371   : > { %v16156_v51 = vpack.i.bf16 %v3358_v38, %v3222_v18  ;;  %v16158_v3 = vpack.i.bf16 %v3359_v28, %v3223_v24  ;;  %v20522_v18 = vld [vmem:[#allocation75_spill] sm:$0xff]  ;;  %v20523_v24 = vld [vmem:[#allocation129_spill] sm:$0xff]  ;;  %v3937_v54 = vrot.slane %v3923_v40, %v13199_v11 }
 0x372   : > { %v16168_v46 = vpack.i.bf16 %v3360_v47, %v3224_v53  ;;  %v16174_v13 = vpack.i.bf16 %v3361_v31, %v3225_v50  ;;  %v3754_v35 = vrot.slane %v3746_v42, %v13237_v52  ;;  %v3761_v27 = vrot.slane %v3747_v1, %v13237_v52  ;;  %v20530_v50 = vld [vmem:[#allocation19_spill] sm:$0xff]  ;;  %v11756_v42 = vpop.permute.xlu1 %11755 }
 0x373   : > { %v20531_v31 = vld [vmem:[#allocation123_spill] sm:$0xff]  ;;  %v3986_v5 = vcombine.low %v20534_v56, %v3937_v54  ;;  %v3987_v10 = vcombine.high %v20534_v56, %v3937_v54  ;;  %v11758_v20 = vunpack.i.h.bf16 %v11756_v42  ;;  %11985 = vrot.lane.b32.xlu1 %v16091_v55, %s12508_s9  ;;  %v11757_v7 = vunpack.i.l.bf16 %v11756_v42 }
 0x374   : > { %v3766_v1 = vcombine.low %v20532_v39, %v3754_v35  ;;  %v3767_v40 = vcombine.high %v20532_v39, %v3754_v35  ;;  %v3768_v30 = vcombine.low %v20533_v22, %v3761_v27  ;;  %v3769_v25 = vcombine.high %v20533_v22, %v3761_v27  ;;  %v20538_v47 = vld [vmem:[#allocation51_spill] sm:$0xff]  ;;  %v20541_v22 = vld [vmem:[#allocation57_spill] sm:$0xff]  ;;  %v20542_v27 = vld [vmem:[#allocation54_spill] sm:$0xff]  ;;  %11980 = vrot.lane.b32.xlu0 %v16073_v23, %s12507_s30 }
 0x375   : > { %v20539_v38 = vcombine.low %v20537_v29, %v20538_v47  ;;  %v20540_v39 = vcombine.high %v20537_v29, %v20538_v47  ;;  %v20543_v28 = vcombine.low %v20541_v22, %v20542_v27  ;;  %v20544_v54 = vcombine.high %v20541_v22, %v20542_v27  ;;  %v20545_v47 = vld [vmem:[#allocation116_spill] sm:$0xff] }
 0x376   : > { %v3994_v29 = vrot.slane %v3986_v5, %v13237_v52  ;;  %v16236_v23 = vsel %vm6819_vm13, %v16022_v37, %v11737_v34  ;;  %v20550_v5 = vld [vmem:[#allocation35_spill] sm:$0xff] }
 0x377   : > { %v16201_v53 = vpack.i.bf16 %v20539_v38, %v3766_v1  ;;  %v16206_v35 = vpack.i.bf16 %v20540_v39, %v3767_v40  ;;  %v16211_v56 = vpack.i.bf16 %v20543_v28, %v3768_v30  ;;  %v16216_v57 = vpack.i.bf16 %v20544_v54, %v3769_v25  ;;  %v20547_v40 = vld [vmem:[#allocation60_spill] sm:$0xff]  ;;  %v20549_v39 = vld [vmem:[#allocation61_spill] sm:$0xff]  ;;  %11995 = vrot.lane.b32.xlu1 %v16096_v4, %s12510_s11 }
 0x378   : > { %v4001_v38 = vrot.slane %v3987_v10, %v13237_v52  ;;  %v20546_v1 = vunpack.i.l.bf16 %v20545_v47  ;;  %v20548_v25 = vunpack.i.h.bf16 %v20545_v47  ;;  %v16240_v10 = vsel %vm6819_vm13, %v16033_v33, %v11738_v2  ;;  %v20551_v54 = vld [vmem:[#allocation89_spill] sm:$0xff]  ;;  %v20555_v2 = vld [vmem:[#allocation127_spill] sm:$0xff]  ;;  %11990 = vrot.lane.b32.xlu0 %v16104_v19, %s12510_s11 }
 0x379   : > { %v4038_v22 = vcombine.low %v3994_v29, %v20550_v5  ;;  %v4039_v27 = vcombine.high %v3994_v29, %v20550_v5  ;;  %v20552_v47 = vld [vmem:[#allocation117_spill] sm:$0xff]  ;;  %v20557_v29 = vld [vmem:[#allocation38_spill] sm:$0xff]  ;;  %v20562_v4 = vunpack.i.h.bf16 %v20555_v2 }
 0x37a   : > { %v6908_v30 = vsel %vm6804_vm12, %v20547_v40, %v20546_v1  ;;  %v6909_v55 = vsel %vm6804_vm12, %v20549_v39, %v20548_v25  ;;  %v4040_v28 = vcombine.low %v4001_v38, %v20551_v54  ;;  %v4041_v1 = vcombine.high %v4001_v38, %v20551_v54  ;;  %v20558_v38 = vld [vmem:[#allocation96_spill] sm:$0xff] }
 0x37b   : > { %v20553_v40 = vunpack.i.l.bf16 %v20552_v47  ;;  %v20554_v37 = vunpack.i.h.bf16 %v20552_v47  ;;  %v20556_v39 = vunpack.i.l.bf16 %v20555_v2  ;;  %v20560_v47 = vld [vmem:[#allocation97_spill] sm:$0xff]  ;;  %v16302_v2 = vsel %vm6819_vm13, %v16084_v48, %v11757_v7  ;;  %12005 = vrot.lane.b32.xlu1 %v16132_v32, %s12505_s26  ;;  %v20581_v7 = vld [vmem:[#allocation102_spill] sm:$0xff] }
 0x37c   : > { %20572 = vst [vmem:[#allocation133_spill] sm:$0xff] %v16302_v2  ;;  %v20587_v32 = vcombine.high %v20515_v61, %v20516_v58 }
 0x37d   : > { %v16249_v25 = vsel %vm6819_vm13, %v6908_v30, %v20553_v40  ;;  %v16254_v34 = vsel %vm6819_vm13, %v6909_v55, %v20554_v37  ;;  %v6912_v5 = vsel %vm6804_vm12, %v20557_v29, %v20556_v39  ;;  %v16267_v30 = vpack.i.bf16 %v20558_v38, %v4038_v22  ;;  %v20559_v55 = vld [vmem:[#allocation12_spill] sm:$0xff]  ;;  %v20561_v37 = vld [vmem:[#allocation15_spill] sm:$0xff] }
 0x37e   : > { %v16270_v54 = vpack.i.bf16 %v20559_v55, %v4039_v27  ;;  %v16273_v40 = vpack.i.bf16 %v20560_v47, %v4040_v28  ;;  %v16276_v33 = vpack.i.bf16 %v20561_v37, %v4041_v1  ;;  %v20563_v39 = vld [vmem:[#allocation39_spill] sm:$0xff]  ;;  %v20564_v22 = vunpack.i.l.bf16 %v15778_v45  ;;  %v20566_v27 = vld [vmem:[#allocation74_spill] sm:$0xff]  ;;  %v20567_v38 = vld [vmem:[#allocation112_spill] sm:$0xff] }
 0x37f   : > { %v6913_v19 = vsel %vm6804_vm12, %v20563_v39, %v20562_v4  ;;  %v20568_v28 = vcombine.low %v20566_v27, %v20567_v38  ;;  %v20569_v1 = vcombine.low %v16117_v60, %v20520_v63  ;;  %v20570_v47 = vunpack.i.h.bf16 %v15778_v45  ;;  %v20574_v4 = vld [vmem:[#allocation14_spill] sm:$0xff]  ;;  %v20575_v39 = vld [vmem:[#allocation11_spill] sm:$0xff] }
 0x380   : > { %v16287_v29 = vsel %vm6819_vm13, %v6912_v5, %v20564_v22  ;;  %v16306_v5 = vsel %vm6819_vm13, %v16099_v41, %v11758_v20  ;;  %v20576_v22 = vcombine.high %v20574_v4, %v20575_v39  ;;  %v4515_v41 = vcombine.high %v20566_v27, %v20567_v38  ;;  %v20580_v20 = vld [vmem:[#allocation98_spill] sm:$0xff] }
 0x381   : > { %20565 = vst [vmem:[#allocation109_spill] sm:$0xff] %v16287_v29  ;;  %v11999_v55 = vpack.i.bf16 %v20569_v1, %v20568_v28  ;;  %v16298_v37 = vsel %vm6819_vm13, %v6913_v19, %v20570_v47  ;;  %20573 = vst [vmem:[#allocation65_spill] sm:$0xff] %v16306_v5  ;;  %v20577_v28 = vld [vmem:[#allocation91_spill] sm:$0xff]  ;;  %v20578_v1 = vld [vmem:[#allocation94_spill] sm:$0xff]  ;;  %v20582_v47 = vcombine.high %v20580_v20, %v20581_v7 }
 0x382   : > { %20571 = vst [vmem:[#allocation84_spill] sm:$0xff] %v16298_v37  ;;  %v2809_v42 = vrot.slane %v20576_v22, %v13237_v52  ;;  %v20579_v45 = vcombine.high %v20577_v28, %v20578_v1  ;;  %v20583_v39 = vld [vmem:[#allocation78_spill] sm:$0xff]  ;;  %v20584_v22 = vld [vmem:[#allocation77_spill] sm:$0xff]  ;;  %v20588_v27 = vcombine.high %v16059_v44, %v20512_v12  ;;  %v20589_v7 = vld [vmem:[#allocation87_spill] sm:$0xff] }
 0x383   : > { %12000 = vrot.lane.b32.xlu0 %v11999_v55, %s12505_s26  ;;  %v4509_v4 = vrot.slane %v20582_v47, %v13237_v52  ;;  %v20585_v28 = vcombine.high %v20583_v39, %v20584_v22  ;;  %v20590_v47 = vld [vmem:[#allocation76_spill] sm:$0xff] }
 0x384   : > { %v4477_v11 = vrot.slane %v20579_v45, %v13237_v52  ;;  %v20586_v45 = vcombine.high %v16117_v60, %v20520_v63  ;;  %v12014_v38 = vpack.i.bf16 %v20588_v27, %v20587_v32  ;;  %v2816_v55 = vcombine.low %v16112_v59, %v2809_v42 }
 0x385   : > { %v4645_v1 = vrot.slane %v20585_v28, %v13237_v52  ;;  %v2680_v39 = vcombine.low %v20590_v47, %v20589_v7  ;;  %v2817_v58 = vcombine.high %v16112_v59, %v2809_v42  ;;  %v2681_v12 = vcombine.high %v20590_v47, %v20589_v7 }
 0x386   : > { %v12009_v48 = vpack.i.bf16 %v20586_v45, %v4515_v41  ;;  %v4516_v60 = vcombine.low %v4477_v11, %v4509_v4  ;;  %v4517_v44 = vcombine.high %v4477_v11, %v4509_v4  ;;  %v20595_v27 = vcombine.high %v15729_v15, %v20408_v6 }
 0x387   : > { %v4652_v20 = vcombine.low %v16147_v62, %v4645_v1  ;;  %12015 = vrot.lane.b32.xlu0 %v12014_v38, %s12509_s10  ;;  %v12024_v63 = vpack.i.bf16 %v2816_v55, %v2680_v39  ;;  %v4653_v61 = vcombine.high %v16147_v62, %v4645_v1  ;;  %v12034_v22 = vpack.i.bf16 %v2817_v58, %v2681_v12 }
 0x388   : > { %12010 = vrot.lane.b32.xlu1 %v12009_v48, %s12509_s10 }
 0x389   : > { %v12019_v41 = vpack.i.bf16 %v4652_v20, %v4516_v60  ;;  %v12029_v48 = vpack.i.bf16 %v4653_v61, %v4517_v44  ;;  %v12511_v20 = vmov 0  }
 0x38a   : > { %v11761_v59 = vpop.permute.xlu1 %11760  ;;  %v16360_v62 = vpop.permute.xlu0 %11765  ;;  %12109 = vset.pattern.permute.xlu0 %v12511_v20 }
 0x38b   : > { %12020 = vrot.lane.b32.xlu0 %v12019_v41, %s12507_s30  ;;  %v11768_v20 = vunpack.i.h.bf16 %v16360_v62  ;;  %v11767_v19 = vunpack.i.l.bf16 %v16360_v62 }
 0x38c   : > { %12025 = vrot.lane.b32.xlu1 %v12024_v63, %s12507_s30 }
 0x38e   : > { %v16366_v11 = vpop.permute.xlu1 %11770  ;;  %v16368_v42 = vpop.permute.xlu0 %11775 }
 0x38f   : > { %12035 = vrot.lane.b32.xlu0 %v12034_v22, %s12510_s11  ;;  %v11777_v62 = vunpack.i.l.bf16 %v16368_v42 }
 0x390   : > { %12030 = vrot.lane.b32.xlu1 %v12029_v48, %s12510_s11 }
 0x392   : > { %v16376_v28 = vpop.permute.xlu1 %11780  ;;  %v16378_v1 = vpop.permute.xlu0 %11785 }
 0x393   : > { %12045 = vrot.lane.b32.xlu0 %v16158_v3, %s12509_s10  ;;  %v20592_v3 = vld [vmem:[#allocation70_spill] sm:$0xff] }
 0x394   : > { %12040 = vrot.lane.b32.xlu1 %v16156_v51, %s12505_s26  ;;  %v20591_v51 = vmov 0.0  }
 0x395   : > { %v4107_v4 = vcombine.high %v20592_v3, %v20591_v51  ;;  %v11762_v3 = vunpack.i.l.bf16 %v11761_v59 }
 0x396   : > { %v16390_v32 = vpop.permute.xlu0 %11800 }
 0x397   : > { %12055 = vrot.lane.b32.xlu0 %v16174_v13, %s12510_s11  ;;  %v20593_v13 = vcombine.high %v15826_v36, %v20429_v26 }
 0x398   : > { %12050 = vrot.lane.b32.xlu1 %v16168_v46, %s12507_s30 }
 0x399   : > { %v12074_v46 = vpack.i.bf16 %v4107_v4, %v20593_v13 }
 0x39b   : > { %12065 = vrot.lane.b32.xlu0 %v16206_v35, %s12509_s10  ;;  %v16388_v35 = vpop.permute.xlu1 %11790  ;;  %v16400_v26 = vpop.permute.xlu0 %11810 }
 0x39c   : > { %12060 = vrot.lane.b32.xlu1 %v16201_v53, %s12505_s26  ;;  %v20594_v53 = vld [vmem:[#allocation6_spill] sm:$0xff] }
 0x39d   : > { %v5945_v45 = vcombine.high %v20594_v53, %v20591_v51  ;;  %v11763_v51 = vunpack.i.h.bf16 %v11761_v59  ;;  %v20601_v53 = vld [vmem:[#allocation49_spill] sm:$0xff]  ;;  %v11773_v59 = vunpack.i.h.bf16 %v16366_v11 }
 0x39f   : > { %12075 = vrot.lane.b32.xlu0 %v12074_v46, %s12508_s9  ;;  %v12079_v38 = vpack.i.bf16 %v5945_v45, %v20595_v27  ;;  %v16398_v36 = vpop.permute.xlu1 %11795  ;;  %v16406_v55 = vpop.permute.xlu0 %11815  ;;  %v20600_v46 = vld [vmem:[#allocation104_spill] sm:$0xff] }
 0x3a0   : > { %12070 = vrot.lane.b32.xlu1 %v16211_v56, %s12507_s30  ;;  %v5054_v45 = vcombine.low %v20601_v53, %v20600_v46  ;;  %v20602_v27 = vld [vmem:[#allocation28_spill] sm:$0xff] }
 0x3a3   : > { %12080 = vrot.lane.b32.xlu0 %v12079_v38, %s12510_s11  ;;  %v16404_v56 = vpop.permute.xlu1 %11805  ;;  %v16412_v15 = vpop.permute.xlu0 %11830  ;;  %v20603_v38 = vld [vmem:[#allocation83_spill] sm:$0xff] }
 0x3a4   : > { %12085 = vrot.lane.b32.xlu1 %v16216_v57, %s12510_s11  ;;  %v6932_v57 = vld [vmem:[%s19492_s5] sm:$0xff]  ;;  %v11807_v29 = vunpack.i.l.bf16 %v16404_v56 }
 0x3a7   : > { %v16410_v6 = vpop.permute.xlu1 %11820  ;;  %v16421_v7 = vpop.permute.xlu0 %11835  ;;  %6935 = vperm.xlu0 %12109, %v6932_v57   ;;  %v5190_v57 = vcombine.low %v20603_v38, %v20602_v27  ;;  %v11778_v27 = vunpack.i.h.bf16 %v16368_v42  ;;  %v11783_v38 = vunpack.i.h.bf16 %v16376_v28 }
 0x3a8   : > { %12090 = vrot.lane.b32.xlu1 %v16267_v30, %s12505_s26 }
 0x3a9   : > { %v6841_v52 = vsel %vm1064_vm7, %v5190_v57, %v11763_v51 }
 0x3aa   : > { %v6855_v46 = vsel %vm6744_vm8, %v6841_v52, %v11768_v20  ;;  %v20605_v52 = vld [vmem:[#allocation59_spill] sm:$0xff]  ;;  %v20606_v20 = vld [vmem:[#allocation128_spill] sm:$0xff] }
 0x3ab   : > { %v16419_v30 = vpop.permute.xlu1 %11825  ;;  %v16427_v47 = vpop.permute.xlu0 %11845 }
 0x3ac   : > { %12095 = vrot.lane.b32.xlu1 %v16270_v54, %s12509_s10 }
 0x3af   : > { %v16425_v54 = vpop.permute.xlu1 %11840  ;;  %v16431_v60 = vpop.permute.xlu0 %11850 }
 0x3b0   : > { %12100 = vrot.lane.b32.xlu1 %v16273_v40, %s12507_s30  ;;  %20596 = vst [vmem:[#allocation32_spill] sm:$0xff] %v16431_v60 }
 0x3b3   : > { %v16429_v39 = vpop.permute.xlu1 %11865  ;;  %v16435_v40 = vpop.permute.xlu0 %11855 }
 0x3b4   : > { %12105 = vrot.lane.b32.xlu1 %v16276_v33, %s12510_s11  ;;  %20597 = vst [vmem:[#allocation66_spill] sm:$0xff] %v16435_v40 }
 0x3b7   : > { %v16433_v63 = vpop.permute.xlu1 %11870  ;;  %v16439_v61 = vpop.permute.xlu0 %11860 }
 0x3bb   : > { %v16437_v41 = vpop.permute.xlu1 %11875  ;;  %v16443_v44 = vpop.permute.xlu0 %11880 }
 0x3bc   : > { %20598 = vst [vmem:[#allocation21_spill] sm:$0xff] %v16443_v44  ;;  %v11772_v44 = vunpack.i.l.bf16 %v16366_v11  ;;  %v11797_v11 = vunpack.i.l.bf16 %v16398_v36 }
 0x3bf   : > { %v16441_v58 = vpop.permute.xlu1 %11885  ;;  %v16447_v12 = vpop.permute.xlu0 %11890 }
 0x3c3   : > { %v16445_v33 = vpop.permute.xlu1 %11905  ;;  %v16451_v22 = vpop.permute.xlu0 %11895 }
 0x3c4   : > { %20599 = vst [vmem:[#allocation22_spill] sm:$0xff] %v16445_v33  ;;  %v6840_v33 = vsel %vm1064_vm7, %v5054_v45, %v11762_v3  ;;  %v6869_v3 = vsel %vm6759_vm9, %v6855_v46, %v11773_v59  ;;  %v11782_v45 = vunpack.i.l.bf16 %v16376_v28  ;;  %v11788_v59 = vunpack.i.h.bf16 %v16378_v1 }
 0x3c5   : > { %v6854_v53 = vsel %vm6744_vm8, %v6840_v33, %v11767_v19  ;;  %v5598_v19 = vcombine.low %v20606_v20, %v20605_v52  ;;  %v11798_v33 = vunpack.i.h.bf16 %v16398_v36  ;;  %v11793_v52 = vunpack.i.h.bf16 %v16388_v35  ;;  %v20608_v20 = vld [vmem:[#allocation52_spill] sm:$0xff] }
 0x3c6   : > { %v6868_v51 = vsel %vm6759_vm9, %v6854_v53, %v11772_v44  ;;  %v6883_v44 = vsel %vm6774_vm10, %v6869_v3, %v11778_v27  ;;  %v11787_v53 = vunpack.i.l.bf16 %v16378_v1  ;;  %v11792_v36 = vunpack.i.l.bf16 %v16388_v35  ;;  %v20607_v3 = vld [vmem:[#allocation55_spill] sm:$0xff] }
 0x3c7   : > { %v16449_v48 = vpop.permute.xlu1 %11915  ;;  %v6882_v42 = vsel %vm6774_vm10, %v6868_v51, %v11777_v62  ;;  %v6844_v28 = vsel %vm1064_vm7, %v5598_v19, %v11797_v11  ;;  %v6897_v37 = vsel %vm6789_vm11, %v6883_v44, %v11783_v38  ;;  %v11802_v62 = vunpack.i.l.bf16 %v16390_v32 }
 0x3c8   : > { %v6896_v46 = vsel %vm6789_vm11, %v6882_v42, %v11782_v45  ;;  %v20609_v45 = vcombine.low %v20607_v3, %v20608_v20  ;;  %v11808_v11 = vunpack.i.h.bf16 %v16404_v56  ;;  %v11803_v19 = vunpack.i.h.bf16 %v16390_v32 }
 0x3c9   : > { %v6858_v38 = vsel %vm6744_vm8, %v6844_v28, %v11802_v62  ;;  %v11822_v35 = vunpack.i.l.bf16 %v16410_v6  ;;  %v6910_v44 = vsel %vm6804_vm12, %v6896_v46, %v11787_v53  ;;  %v6911_v60 = vsel %vm6804_vm12, %v6897_v37, %v11788_v59  ;;  %v20610_v28 = vld [vmem:[#allocation34_spill] sm:$0xff] }
 0x3ca   : > { %v16455_v13 = vpop.permute.xlu0 %11900  ;;  %v6845_v1 = vsel %vm1064_vm7, %v20609_v45, %v11798_v33  ;;  %v6872_v42 = vsel %vm6759_vm9, %v6858_v38, %v11807_v29  ;;  %v16516_v32 = vsel %vm6819_vm13, %v6910_v44, %v11792_v36  ;;  %v16519_v56 = vsel %vm6819_vm13, %v6911_v60, %v11793_v52  ;;  %v20611_v46 = vld [vmem:[#allocation118_spill] sm:$0xff] }
 0x3cb   : > { %v16453_v4 = vpop.permute.xlu1 %11920  ;;  %v6859_v3 = vsel %vm6744_vm8, %v6845_v1, %v11803_v19  ;;  %v5870_v53 = vcombine.low %v20611_v46, %v20610_v28  ;;  %v11818_v37 = vunpack.i.h.bf16 %v16406_v55  ;;  %v11823_v59 = vunpack.i.h.bf16 %v16410_v6 }
 0x3cc   : > { %v6873_v29 = vsel %vm6759_vm9, %v6859_v3, %v11808_v11  ;;  %v11813_v62 = vunpack.i.h.bf16 %v16400_v26  ;;  %v11817_v45 = vunpack.i.l.bf16 %v16406_v55  ;;  %v11832_v36 = vunpack.i.l.bf16 %v16412_v15 }
 0x3cd   : > { %v11562_v11 = vpack.c.bf16 %v16519_v56, %v16516_v32  ;;  %v11833_v44 = vunpack.i.h.bf16 %v16412_v15  ;;  %v11863_v6 = vunpack.i.h.bf16 %v16439_v61  ;;  %v11887_v28 = vunpack.i.l.bf16 %v16441_v58  ;;  %v20639_v56 = vld [vmem:[#allocation32_spill] sm:$0xff] }
 0x3ce   : > { %v16469_v5 = vpop.permute.xlu0 %11910  ;;  %v6887_v38 = vsel %vm6774_vm10, %v6873_v29, %v11813_v62  ;;  %v16545_v29 = vsel %vm1064_vm7, %v5870_v53, %v11817_v45  ;;  %v11828_v45 = vunpack.i.h.bf16 %v16419_v30 }
 0x3cf   : > { %v16467_v2 = vpop.permute.xlu1 %11925 }
 0x3d0   : > { %20604 = vst [vmem:[#allocation113_spill] sm:$0xff] %v16467_v2  ;;  %v11812_v2 = vunpack.i.l.bf16 %v16400_v26  ;;  %v11862_v26 = vunpack.i.l.bf16 %v16439_v61 }
 0x3d2   : > { %v11931_v40 = vpop.permute.xlu0 %11930  ;;  %v6886_v1 = vsel %vm6774_vm10, %v6872_v42, %v11812_v2  ;;  %v20612_v2 = vld [vmem:[#allocation93_spill] sm:$0xff] }
 0x3d3   : > { %v16480_v57 = vpop.permute.xlu1 %11935  ;;  %v6900_v60 = vsel %vm6789_vm11, %v6886_v1, %v11822_v35  ;;  %v11933_v52 = vunpack.i.h.bf16 %v11931_v40  ;;  %v11932_v19 = vunpack.i.l.bf16 %v11931_v40  ;;  %v16539_v42 = vsel %vm1064_vm7, %v20612_v2, %v11818_v37 }
 0x3d4   : > { %v6901_v35 = vsel %vm6789_vm11, %v6887_v38, %v11823_v59  ;;  %v11888_v40 = vunpack.i.h.bf16 %v16441_v58  ;;  %v11938_v15 = vunpack.i.h.bf16 %v16480_v57  ;;  %v11937_v46 = vunpack.i.l.bf16 %v16480_v57  ;;  %v20617_v38 = vld [vmem:[#allocation121_spill] sm:$0xff] }
 0x3d5   : > { %v16550_v61 = vsel %vm6804_vm12, %v6900_v60, %v11832_v36  ;;  %v20613_v37 = vcombine.low %v20474_v16, %v15962_v9  ;;  %v20614_v59 = vcombine.low %v20482_v43, %v20483_v49  ;;  %v20615_v57 = vcombine.low %v20531_v31, %v20530_v50  ;;  %v20616_v60 = vld [vmem:[#allocation119_spill] sm:$0xff] }
 0x3d6   : > { %v11941_v27 = vpop.permute.xlu0 %11940  ;;  %v20618_v2 = vcombine.low %v20616_v60, %v20617_v38  ;;  %v16572_v43 = vsel %vm6804_vm12, %v6901_v35, %v11833_v44  ;;  %v11912_v50 = vunpack.i.l.bf16 %v16469_v5 }
 0x3d7   : > { %v16496_v51 = vpop.permute.xlu1 %11945  ;;  %v6835_v62 = vsel %vm1064_vm7, %v20613_v37, %v11933_v52  ;;  %v6834_v58 = vsel %vm1064_vm7, %v20614_v59, %v11932_v19  ;;  %v11943_v1 = vunpack.i.h.bf16 %v11941_v27  ;;  %v11942_v53 = vunpack.i.l.bf16 %v11941_v27 }
 0x3d8   : > { %v6731_v36 = vsel %vm1064_vm7, %v20615_v57, %v11863_v6  ;;  %v6730_v9 = vsel %vm1064_vm7, %v20618_v2, %v11862_v26  ;;  %v11913_v19 = vunpack.i.h.bf16 %v16469_v5  ;;  %v11948_v31 = vunpack.i.h.bf16 %v16496_v51 }
 0x3d9   : > { %v6745_v49 = vsel %vm6744_vm8, %v6730_v9, %v11887_v28  ;;  %v6746_v27 = vsel %vm6744_vm8, %v6731_v36, %v11888_v40  ;;  %v11947_v6 = vunpack.i.l.bf16 %v16496_v51  ;;  %v6848_v26 = vsel %vm6744_vm8, %v6834_v58, %v11937_v46 }
 0x3da   : > { %v16513_v33 = vpop.permute.xlu0 %11950  ;;  %v6849_v37 = vsel %vm6744_vm8, %v6835_v62, %v11938_v15  ;;  %v6862_v59 = vsel %vm6759_vm9, %v6848_v26, %v11942_v53  ;;  %v11868_v51 = vunpack.i.h.bf16 %v16429_v39  ;;  %v11867_v46 = vunpack.i.l.bf16 %v16429_v39 }
 0x3db   : > { %v16511_v20 = vpop.permute.xlu1 %11955  ;;  %v6863_v44 = vsel %vm6759_vm9, %v6849_v37, %v11943_v1  ;;  %v11953_v35 = vunpack.i.h.bf16 %v16513_v33  ;;  %v11952_v40 = vunpack.i.l.bf16 %v16513_v33  ;;  %v6760_v15 = vsel %vm6759_vm9, %v6745_v49, %v11912_v50 }
 0x3dc   : > { %v6761_v62 = vsel %vm6759_vm9, %v6746_v27, %v11913_v19  ;;  %v6877_v9 = vsel %vm6774_vm10, %v6863_v44, %v11948_v31 }
 0x3dd   : > { %v6775_v33 = vsel %vm6774_vm10, %v6760_v15, %v11952_v40  ;;  %v11892_v15 = vunpack.i.l.bf16 %v16447_v12 }
 0x3de   : > { %v11961_v3 = vpop.permute.xlu0 %11960 }
 0x3df   : > { %v11966_v55 = vpop.permute.xlu1 %11965  ;;  %v11963_v36 = vunpack.i.h.bf16 %v11961_v3  ;;  %v11962_v5 = vunpack.i.l.bf16 %v11961_v3  ;;  %v6876_v3 = vsel %vm6774_vm10, %v6862_v59, %v11947_v6 }
 0x3e0   : > { %v11968_v28 = vunpack.i.h.bf16 %v11966_v55  ;;  %v11967_v57 = vunpack.i.l.bf16 %v11966_v55  ;;  %v6776_v55 = vsel %vm6774_vm10, %v6761_v62, %v11953_v35 }
 0x3e1   : > { %v6890_v49 = vsel %vm6789_vm11, %v6876_v3, %v11962_v5  ;;  %v6891_v27 = vsel %vm6789_vm11, %v6877_v9, %v11963_v36  ;;  %v11893_v5 = vunpack.i.h.bf16 %v16447_v12  ;;  %v11957_v3 = vunpack.i.l.bf16 %v16511_v20 }
 0x3e2   : > { %v16569_v52 = vpop.permute.xlu0 %11970  ;;  %v6790_v26 = vsel %vm6789_vm11, %v6775_v33, %v11967_v57  ;;  %v6791_v39 = vsel %vm6789_vm11, %v6776_v55, %v11968_v28  ;;  %v11958_v55 = vunpack.i.h.bf16 %v16511_v20  ;;  %v11918_v9 = vunpack.i.h.bf16 %v16449_v48 }
 0x3e3   : > { %v11976_v16 = vpop.permute.xlu1 %11975  ;;  %v11972_v12 = vunpack.i.l.bf16 %v16569_v52  ;;  %v11873_v20 = vunpack.i.h.bf16 %v16433_v63 }
 0x3e4   : > { %v11978_v58 = vunpack.i.h.bf16 %v11976_v16  ;;  %v11977_v1 = vunpack.i.l.bf16 %v11976_v16 }
 0x3e6   : > { %v11981_v38 = vpop.permute.xlu0 %11980  ;;  %v6904_v31 = vsel %vm6804_vm12, %v6890_v49, %v11977_v1  ;;  %v6905_v59 = vsel %vm6804_vm12, %v6891_v27, %v11978_v58  ;;  %v11827_v1 = vunpack.i.l.bf16 %v16419_v30  ;;  %v11838_v58 = vunpack.i.h.bf16 %v16421_v7  ;;  %v20619_v49 = vld [vmem:[#allocation13_spill] sm:$0xff]  ;;  %v20620_v27 = vld [vmem:[#allocation16_spill] sm:$0xff] }
 0x3e7   : > { %v16586_v60 = vpop.permute.xlu1 %11985  ;;  %v11983_v53 = vunpack.i.h.bf16 %v11981_v38  ;;  %v11982_v2 = vunpack.i.l.bf16 %v11981_v38  ;;  %v11878_v30 = vunpack.i.h.bf16 %v16437_v41 }
 0x3e9   : > { %v6805_v35 = vsel %vm6804_vm12, %v6790_v26, %v11982_v2  ;;  %v6806_v6 = vsel %vm6804_vm12, %v6791_v39, %v11983_v53  ;;  %v11917_v26 = vunpack.i.l.bf16 %v16449_v48  ;;  %v11973_v39 = vunpack.i.h.bf16 %v16569_v52 }
 0x3ea   : > { %v11991_v16 = vpop.permute.xlu0 %11990 }
 0x3eb   : > { %v11996_v19 = vpop.permute.xlu1 %11995  ;;  %v11993_v38 = vunpack.i.h.bf16 %v11991_v16  ;;  %v11992_v40 = vunpack.i.l.bf16 %v11991_v16 }
 0x3ec   : > { %v11998_v50 = vunpack.i.h.bf16 %v11996_v19  ;;  %v11997_v37 = vunpack.i.l.bf16 %v11996_v19  ;;  %v20621_v19 = vcombine.low %v20619_v49, %v20620_v27 }
 0x3ed   : > { %v6918_v57 = vsel %vm6819_vm13, %v6904_v31, %v11992_v40  ;;  %v6919_v36 = vsel %vm6819_vm13, %v6905_v59, %v11993_v38  ;;  %v11872_v38 = vunpack.i.l.bf16 %v16433_v63  ;;  %v11898_v40 = vunpack.i.h.bf16 %v16451_v22 }
 0x3ee   : > { %v6820_v44 = vsel %vm6819_vm13, %v6805_v35, %v11997_v37  ;;  %v6821_v28 = vsel %vm6819_vm13, %v6806_v6, %v11998_v50  ;;  %v11550_v33 = vpack.c.bf16 %v6919_v36, %v6918_v57  ;;  %v6732_v16 = vsel %vm1064_vm7, %v20621_v19, %v11867_v46 }
 0x3ef   : > { %v12006_v62 = vpop.permute.xlu1 %12005  ;;  %v11552_v53 = vpack.c.bf16 %v6821_v28, %v6820_v44  ;;  %v20622_v50 = vcombine.low %v20523_v24, %v20522_v18  ;;  %v6747_v52 = vsel %vm6744_vm8, %v6732_v16, %v11892_v15  ;;  %v11897_v35 = vunpack.i.l.bf16 %v16451_v22 }
 0x3f0   : > { %11551 = vmatprep.subr.bf16.mxu0 %v11550_v33  ;;  %v20623_v18 = vcombine.low %v15975_v0, %v20478_v17  ;;  %v11988_v31 = vunpack.i.h.bf16 %v16586_v60  ;;  %v11987_v59 = vunpack.i.l.bf16 %v16586_v60  ;;  %v6762_v44 = vsel %vm6759_vm9, %v6747_v52, %v11917_v26 }
 0x3f1   : > { %v6733_v37 = vsel %vm1064_vm7, %v20622_v50, %v11868_v51  ;;  %11553 = vmatpush1.bf16.msra.mxu0 %v11552_v53  ;;  %v20624_v51 = vcombine.low %v20489_v14, %v20490_v21  ;;  %v12008_v0 = vunpack.i.h.bf16 %v12006_v62  ;;  %v12007_v17 = vunpack.i.l.bf16 %v12006_v62 }
 0x3f2   : > { %v6748_v48 = vsel %vm6744_vm8, %v6733_v37, %v11893_v5  ;;  %v6837_v24 = vsel %vm1064_vm7, %v20623_v18, %v11958_v55  ;;  %v11923_v60 = vunpack.i.h.bf16 %v16453_v4 }
 0x3f3   : > { %v6836_v63 = vsel %vm1064_vm7, %v20624_v51, %v11957_v3  ;;  %v6763_v22 = vsel %vm6759_vm9, %v6748_v48, %v11918_v9  ;;  %v6851_v28 = vsel %vm6744_vm8, %v6837_v24, %v11973_v39  ;;  %v11922_v3 = vunpack.i.l.bf16 %v16453_v4 }
 0x3f4   : > { %v6850_v57 = vsel %vm6744_vm8, %v6836_v63, %v11972_v12  ;;  %v6865_v26 = vsel %vm6759_vm9, %v6851_v28, %v11988_v31  ;;  %v6778_v27 = vsel %vm6774_vm10, %v6763_v22, %v12008_v0 }
 0x3f5   : > { %v12001_v2 = vpop.permute.xlu0 %12000  ;;  %v6864_v9 = vsel %vm6759_vm9, %v6850_v57, %v11987_v59 }
 0x3f6   : > { %v12003_v36 = vunpack.i.h.bf16 %v12001_v2  ;;  %v12002_v5 = vunpack.i.l.bf16 %v12001_v2  ;;  %v6777_v2 = vsel %vm6774_vm10, %v6762_v44, %v12007_v17  ;;  %v20625_v17 = vld [vmem:[#allocation82_spill] sm:$0xff] }
 0x3f8   : > { %v6878_v19 = vsel %vm6774_vm10, %v6864_v9, %v12002_v5  ;;  %v6879_v16 = vsel %vm6774_vm10, %v6865_v26, %v12003_v36  ;;  %v20626_v36 = vcombine.low %v20525_v8, %v20625_v17 }
 0x3f9   : > { %v12016_v46 = vpop.permute.xlu0 %12015 }
 0x3fa   : > { %v12011_v6 = vpop.permute.xlu1 %12010  ;;  %v12018_v21 = vunpack.i.h.bf16 %v12016_v46  ;;  %v12017_v33 = vunpack.i.l.bf16 %v12016_v46  ;;  %v6736_v5 = vsel %vm1064_vm7, %v20626_v36, %v11872_v38 }
 0x3fb   : > { %v12013_v15 = vunpack.i.h.bf16 %v12011_v6  ;;  %v12012_v14 = vunpack.i.l.bf16 %v12011_v6 }
 0x3fc   : > { %v6792_v37 = vsel %vm6789_vm11, %v6777_v2, %v12017_v33  ;;  %v6793_v48 = vsel %vm6789_vm11, %v6778_v27, %v12018_v21 }
 0x3fd   : > { %v12021_v55 = vpop.permute.xlu0 %12020  ;;  %v6892_v50 = vsel %vm6789_vm11, %v6878_v19, %v12012_v14  ;;  %v6893_v4 = vsel %vm6789_vm11, %v6879_v16, %v12013_v15  ;;  %v20627_v15 = vld [vmem:[#allocation103_spill] sm:$0xff]  ;;  %v20628_v14 = vld [vmem:[#allocation20_spill] sm:$0xff]  ;;  %v11837_v19 = vunpack.i.l.bf16 %v16421_v7  ;;  %v11842_v16 = vunpack.i.l.bf16 %v16425_v54 }
 0x3fe   : > { %v12026_v53 = vpop.permute.xlu1 %12025  ;;  %v12023_v49 = vunpack.i.h.bf16 %v12021_v55  ;;  %v12022_v62 = vunpack.i.l.bf16 %v12021_v55  ;;  %v20629_v21 = vcombine.low %v20627_v15, %v20628_v14  ;;  %v20637_v15 = vld [vmem:[#allocation106_spill] sm:$0xff] }
 0x3ff   : > { %v12028_v39 = vunpack.i.h.bf16 %v12026_v53  ;;  %v12027_v12 = vunpack.i.l.bf16 %v12026_v53 }
 0x400   : > { %v6906_v59 = vsel %vm6804_vm12, %v6892_v50, %v12022_v62  ;;  %v6907_v44 = vsel %vm6804_vm12, %v6893_v4, %v12023_v49  ;;  %v6737_v33 = vsel %vm1064_vm7, %v20629_v21, %v11873_v20  ;;  %v6860_v20 = vsel %vm6744_vm8, %v16545_v29, %v11827_v1 }
 0x401   : > { %v12036_v6 = vpop.permute.xlu0 %12035  ;;  %v6807_v63 = vsel %vm6804_vm12, %v6792_v37, %v12027_v12  ;;  %v6808_v31 = vsel %vm6804_vm12, %v6793_v48, %v12028_v39  ;;  %v6752_v39 = vsel %vm6744_vm8, %v6737_v33, %v11898_v40  ;;  %v6751_v12 = vsel %vm6744_vm8, %v6736_v5, %v11897_v35  ;;  %v20636_v5 = vld [vmem:[#allocation125_spill] sm:$0xff] }
 0x402   : > { %v12031_v52 = vpop.permute.xlu1 %12030  ;;  %v12038_v24 = vunpack.i.h.bf16 %v12036_v6  ;;  %v12037_v51 = vunpack.i.l.bf16 %v12036_v6  ;;  %v6766_v2 = vsel %vm6759_vm9, %v6751_v12, %v11922_v3  ;;  %v6767_v8 = vsel %vm6759_vm9, %v6752_v39, %v11923_v60 }
 0x403   : > { %v12033_v46 = vunpack.i.h.bf16 %v12031_v52  ;;  %v12032_v18 = vunpack.i.l.bf16 %v12031_v52  ;;  %v6861_v60 = vsel %vm6744_vm8, %v16539_v42, %v11828_v45  ;;  %v11843_v3 = vunpack.i.h.bf16 %v16425_v54 }
 0x404   : > { %v6822_v22 = vsel %vm6819_vm13, %v6807_v63, %v12037_v51  ;;  %v6823_v28 = vsel %vm6819_vm13, %v6808_v31, %v12038_v24  ;;  %v11848_v50 = vunpack.i.h.bf16 %v16427_v47  ;;  %v20630_v1 = vpack.c.bf16 %v16254_v34, %v16249_v25  ;;  %v20632_v51 = vld [vmem:[#allocation113_spill] sm:$0xff] }
 0x405   : > { %v6920_v57 = vsel %vm6819_vm13, %v6906_v59, %v12032_v18  ;;  %v6921_v0 = vsel %vm6819_vm13, %v6907_v44, %v12033_v46  ;;  %v12046_v55 = vpop.permute.xlu0 %12045  ;;  %v11556_v26 = vpack.c.bf16 %v6823_v28, %v6822_v22  ;;  %v11877_v42 = vunpack.i.l.bf16 %v16437_v41 }
 0x406   : > { %v12041_v53 = vpop.permute.xlu1 %12040  ;;  %v11554_v9 = vpack.c.bf16 %v6921_v0, %v6920_v57  ;;  %v12048_v38 = vunpack.i.h.bf16 %v12046_v55  ;;  %v12047_v27 = vunpack.i.l.bf16 %v12046_v55  ;;  %v11903_v46 = vunpack.i.h.bf16 %v16455_v13  ;;  %v20634_v0 = vld [vmem:[#allocation53_spill] sm:$0xff] }
 0x407   : > { %v12043_v49 = vunpack.i.h.bf16 %v12041_v53  ;;  %v12042_v62 = vunpack.i.l.bf16 %v12041_v53  ;;  %v11902_v18 = vunpack.i.l.bf16 %v16455_v13  ;;  %v20631_v34 = vpack.c.bf16 %v16240_v10, %v16236_v23  ;;  %v20633_v10 = vld [vmem:[#allocation56_spill] sm:$0xff] }
 0x408   : > { %11555 = vmatprep.subr.bf16.mxu0 %v11554_v9  ;;  %v11928_v63 = vunpack.i.h.bf16 %v20632_v51  ;;  %v11927_v41 = vunpack.i.l.bf16 %v20632_v51  ;;  %v11847_v13 = vunpack.i.l.bf16 %v16427_v47  ;;  %v6928_v23 = vsel %vm6819_vm13, %v16550_v61, %v11842_v16 }
 0x409   : > { %v6781_v40 = vsel %vm6774_vm10, %v6766_v2, %v12042_v62  ;;  %v6782_v35 = vsel %vm6774_vm10, %v6767_v8, %v12043_v49  ;;  %11557 = vmatpush1.bf16.msra.mxu0 %v11556_v26  ;;  %v12056_v29 = vpop.permute.xlu0 %12055  ;;  %v20635_v17 = vcombine.low %v20633_v10, %v20634_v0  ;;  %v20638_v14 = vcombine.low %v20636_v5, %v20637_v15  ;;  %v20650_v0 = vld [vmem:[#allocation22_spill] sm:$0xff] }
 0x40a   : > { %v12051_v4 = vpop.permute.xlu1 %12050  ;;  %11559 = vmatprep.subr.bf16.mxu0 %v20630_v1  ;;  %v12058_v52 = vunpack.i.h.bf16 %v12056_v29  ;;  %v12057_v6 = vunpack.i.l.bf16 %v12056_v29  ;;  %v6796_v45 = vsel %vm6789_vm11, %v6781_v40, %v12047_v27  ;;  %v6797_v54 = vsel %vm6789_vm11, %v6782_v35, %v12048_v38  ;;  %v20640_v38 = vld [vmem:[#allocation84_spill] sm:$0xff]  ;;  %v20641_v27 = vld [vmem:[#allocation109_spill] sm:$0xff]  ;;  %v20643_v35 = vld [vmem:[#allocation66_spill] sm:$0xff] }
 0x40b   : > { %v12053_v37 = vunpack.i.h.bf16 %v12051_v4  ;;  %v12052_v48 = vunpack.i.l.bf16 %v12051_v4  ;;  %v6741_v36 = vsel %vm1064_vm7, %v20635_v17, %v11878_v30  ;;  %v6740_v21 = vsel %vm1064_vm7, %v20638_v14, %v11877_v42 }
 0x40c   : > { %v6929_v47 = vsel %vm6819_vm13, %v16572_v43, %v11843_v3  ;;  %v11852_v33 = vunpack.i.l.bf16 %v20639_v56  ;;  %v6756_v61 = vsel %vm6744_vm8, %v6741_v36, %v11903_v46  ;;  %v6755_v53 = vsel %vm6744_vm8, %v6740_v21, %v11902_v18 }
 0x40d   : > { %v6811_v24 = vsel %vm6804_vm12, %v6796_v45, %v12052_v48  ;;  %v6812_v25 = vsel %vm6804_vm12, %v6797_v54, %v12053_v37  ;;  %11561 = vmatpush1.bf16.msra.mxu0 %v20631_v34  ;;  %v12066_v22 = vpop.permute.xlu0 %12065  ;;  %v6770_v55 = vsel %vm6759_vm9, %v6755_v53, %v11927_v41  ;;  %v6771_v9 = vsel %vm6759_vm9, %v6756_v61, %v11928_v63  ;;  %v20644_v48 = vld [vmem:[#allocation65_spill] sm:$0xff] }
 0x40e   : > { %v6826_v31 = vsel %vm6819_vm13, %v6811_v24, %v12057_v6  ;;  %v6827_v59 = vsel %vm6819_vm13, %v6812_v25, %v12058_v52  ;;  %v12061_v44 = vpop.permute.xlu1 %12060  ;;  %11563 = vmatprep.subr.bf16.mxu0 %v11562_v11  ;;  %v11853_v11 = vunpack.i.h.bf16 %v20639_v56  ;;  %v12068_v26 = vunpack.i.h.bf16 %v12066_v22  ;;  %v20645_v52 = vld [vmem:[#allocation133_spill] sm:$0xff] }
 0x40f   : > { %v12063_v28 = vunpack.i.h.bf16 %v12061_v44  ;;  %v12062_v57 = vunpack.i.l.bf16 %v12061_v44  ;;  %v11564_v32 = vpack.c.bf16 %v6827_v59, %v6826_v31  ;;  %v12067_v39 = vunpack.i.l.bf16 %v12066_v22 }
 0x410   : > { %v6874_v62 = vsel %vm6759_vm9, %v6860_v20, %v11837_v19  ;;  %v6875_v43 = vsel %vm6759_vm9, %v6861_v60, %v11838_v58  ;;  %v20642_v40 = vpack.c.bf16 %v20640_v38, %v20641_v27  ;;  %v11858_v3 = vunpack.i.h.bf16 %v20643_v35 }
 0x411   : > { %11565 = vmatpush1.bf16.msra.mxu0 %v11564_v32  ;;  %v12076_v49 = vpop.permute.xlu0 %12075  ;;  %v6785_v2 = vsel %vm6774_vm10, %v6770_v55, %v12062_v57  ;;  %v6786_v8 = vsel %vm6774_vm10, %v6771_v9, %v12063_v28  ;;  %v11857_v16 = vunpack.i.l.bf16 %v20643_v35  ;;  %v6888_v20 = vsel %vm6774_vm10, %v6874_v62, %v11847_v13  ;;  %v20649_v57 = vld [vmem:[#allocation21_spill] sm:$0xff] }
 0x412   : > { %v12071_v12 = vpop.permute.xlu1 %12070  ;;  %11567 = vmatprep.subr.bf16.mxu0 %v20642_v40  ;;  %v6889_v7 = vsel %vm6774_vm10, %v6875_v43, %v11848_v50  ;;  %v11570_v19 = vpack.c.bf16 %v6929_v47, %v6928_v23  ;;  %v6902_v58 = vsel %vm6789_vm11, %v6888_v20, %v11852_v33  ;;  %v6800_v1 = vsel %vm6789_vm11, %v6785_v2, %v12067_v39  ;;  %v20651_v47 = vld [vmem:[#allocation88_spill] sm:$0xff] }
 0x413   : > { %v12073_v4 = vunpack.i.h.bf16 %v12071_v12  ;;  %v12072_v29 = vunpack.i.l.bf16 %v12071_v12  ;;  %v6903_v60 = vsel %vm6789_vm11, %v6889_v7, %v11853_v11  ;;  %v6801_v37 = vsel %vm6789_vm11, %v6786_v8, %v12068_v26  ;;  %v20652_v11 = vld [vmem:[#allocation62_spill] sm:$0xff]  ;;  %v20653_v33 = vld [vmem:[#allocation36_spill] sm:$0xff] }
 0x414   : > { %v20646_v6 = vpack.c.bf16 %v20644_v48, %v20645_v52  ;;  %v6916_v50 = vsel %vm6804_vm12, %v6902_v58, %v11857_v16  ;;  %v6917_v24 = vsel %vm6804_vm12, %v6903_v60, %v11858_v3  ;;  %v11883_v23 = vunpack.i.h.bf16 %v20649_v57 }
 0x415   : > { %v12081_v42 = vpop.permute.xlu0 %12080  ;;  %v6815_v25 = vsel %vm6804_vm12, %v6800_v1, %v12072_v29  ;;  %v6816_v34 = vsel %vm6804_vm12, %v6801_v37, %v12073_v4  ;;  %v11882_v10 = vunpack.i.l.bf16 %v20649_v57  ;;  %v11908_v17 = vunpack.i.h.bf16 %v20650_v0 }
 0x416   : > { %11569 = vmatpush1.bf16.msra.mxu0 %v20646_v6  ;;  %v12086_v30 = vpop.permute.xlu1 %12085  ;;  %v12083_v46 = vunpack.i.h.bf16 %v12081_v42  ;;  %v12082_v18 = vunpack.i.l.bf16 %v12081_v42  ;;  %v11907_v36 = vunpack.i.l.bf16 %v20650_v0  ;;  %v12078_v5 = vunpack.i.h.bf16 %v12076_v49 }
 0x417   : > { %v12088_v45 = vunpack.i.h.bf16 %v12086_v30  ;;  %v12087_v54 = vunpack.i.l.bf16 %v12086_v30  ;;  %11571 = vmatprep.subr.bf16.mxu0 %v11570_v19  ;;  %v12077_v15 = vunpack.i.l.bf16 %v12076_v49  ;;  %v6743_v56 = vsel %vm1064_vm7, %v20651_v47, %v11883_v23  ;;  %v2057_v19 = vld [vmem:[%s19491_s4] sm:$0xff] }
 0x418   : > { %v6930_v41 = vsel %vm6819_vm13, %v6916_v50, %v12082_v18  ;;  %v6931_v31 = vsel %vm6819_vm13, %v6917_v24, %v12083_v46  ;;  %v20654_v61 = vcombine.low %v20652_v11, %v20653_v33  ;;  %v6758_v39 = vsel %vm6744_vm8, %v6743_v56, %v11908_v17 }
 0x419   : > { %v6830_v51 = vsel %vm6819_vm13, %v6815_v25, %v12087_v54  ;;  %v6831_v63 = vsel %vm6819_vm13, %v6816_v34, %v12088_v45  ;;  %v11574_v22 = vpack.c.bf16 %v6931_v31, %v6930_v41  ;;  %v6773_v43 = vsel %vm6759_vm9, %v6758_v39, %v12078_v5  ;;  %v20655_v34 = vld [vmem:[#allocation17_spill] sm:$0xff] }
 0x41a   : > { %v12091_v59 = vpop.permute.xlu1 %12090  ;;  %v11572_v44 = vpack.c.bf16 %v6831_v63, %v6830_v51  ;;  %v6742_v53 = vsel %vm1064_vm7, %v20654_v61, %v11882_v10  ;;  %v20656_v10 = vld [vmem:[#allocation18_spill] sm:$0xff] }
 0x41b   : > { %v12093_v14 = vunpack.i.h.bf16 %v12091_v59  ;;  %v12092_v21 = vunpack.i.l.bf16 %v12091_v59  ;;  %v6757_v26 = vsel %vm6744_vm8, %v6742_v53, %v11907_v36 }
 0x41c   : > { %11573 = vmatpush1.bf16.msra.mxu0 %v11572_v44  ;;  %v6772_v49 = vsel %vm6759_vm9, %v6757_v26, %v12077_v15 }
 0x41d   : > { %11576 = vmatprep.subr.msk.bf16.mxu0 %vm16761_vm0, %v11574_v22  ;;  %v6787_v2 = vsel %vm6774_vm10, %v6772_v49, %v12092_v21  ;;  %v6788_v8 = vsel %vm6774_vm10, %v6773_v43, %v12093_v14 }
 0x41e   : > { %v12096_v28 = vpop.permute.xlu1 %12095 }
 0x41f   : > { %v12098_v55 = vunpack.i.h.bf16 %v12096_v28  ;;  %v12097_v9 = vunpack.i.l.bf16 %v12096_v28 }
 0x421   : > { %v6802_v27 = vsel %vm6789_vm11, %v6787_v2, %v12097_v9  ;;  %v6803_v40 = vsel %vm6789_vm11, %v6788_v8, %v12098_v55 }
 0x422   : > { %v12101_v32 = vpop.permute.xlu1 %12100 }
 0x423   : > { %v12103_v12 = vunpack.i.h.bf16 %v12101_v32  ;;  %v12102_v62 = vunpack.i.l.bf16 %v12101_v32 }
 0x425   : > { %v6817_v16 = vsel %vm6804_vm12, %v6802_v27, %v12102_v62  ;;  %v6818_v4 = vsel %vm6804_vm12, %v6803_v40, %v12103_v12 }
 0x426   : > { %v12106_v38 = vpop.permute.xlu1 %12105  ;;  %v6936_v58 = vpop.permute.xlu0 %6935 }
 0x427   : > { %v12108_v35 = vunpack.i.h.bf16 %v12106_v38  ;;  %v12107_v3 = vunpack.i.l.bf16 %v12106_v38 }
 0x429   : > { %v6832_v29 = vsel %vm6819_vm13, %v6817_v16, %v12107_v3  ;;  %v6833_v20 = vsel %vm6819_vm13, %v6818_v4, %v12108_v35 }
 0x42a   : > { %v11577_v7 = vpack.c.bf16 %v6833_v20, %v6832_v29 }
 0x42c   : > { %11579 = vmatpush1.bf16.msk.msra.mxu0 %vm16761_vm0, %v11577_v7 }
 0x42f   : > { %11498 = vmatmul.mubr.msk.f32.vlgmr.msra.gmra.mrb[4].mxu0 %vm6938_vm1, %v2057_v19 }
 0x502   : > { %v7015_v60 = vpop.f32.mrb[4].mxu0 }
 0x503   : > { %v7016_v1 = vadd.f32 %v7015_v60, %v6936_v58  ;;  %v7017_v37 = vpop.f32.mrb[5].mxu0 }
 0x504   : > { %v7018_v52 = vadd.f32 %v7017_v37, %v6936_v58 }
 0x505   : > { %v7020_v48 = vmax.f32 %v7016_v1, 0.0 }
 0x506   : > { %v16800_v6 = vmax.f32 %v7018_v52, 0.0 }
 0x507   : > { %7029 = vrot.lane.b32.xlu0 %v7020_v48, %s12509_s10  ;;  %7023 = vrot.lane.b32.xlu1 %v7020_v48, %s12510_s11 }
 0x50b   : > { %7035 = vrot.lane.b32.xlu0 %v7020_v48, %s12508_s9  ;;  %7026 = vrot.lane.b32.xlu1 %v7020_v48, %s12507_s30 }
 0x50f   : > { %7041 = vrot.lane.b32.xlu0 %v7020_v48, %s12506_s29  ;;  %7032 = vrot.lane.b32.xlu1 %v7020_v48, %s12505_s26 }
 0x513   : > { %7048 = vrot.lane.b32.xlu0 %v16800_v6, %s12507_s30  ;;  %7038 = vrot.lane.b32.xlu1 %v7020_v48, %s12504_s25 }
 0x517   : > { %7054 = vrot.lane.b32.xlu0 %v16800_v6, %s12505_s26  ;;  %7045 = vrot.lane.b32.xlu1 %v16800_v6, %s12510_s11 }
 0x51b   : > { %7060 = vrot.lane.b32.xlu0 %v16800_v6, %s12504_s25  ;;  %7051 = vrot.lane.b32.xlu1 %v16800_v6, %s12509_s10 }
 0x51f   : > { %7057 = vrot.lane.b32.xlu1 %v16800_v6, %s12508_s9 }
 0x523   : > { %7063 = vrot.lane.b32.xlu1 %v16800_v6, %s12506_s29 }
 0x579   : > { %v7030_v30 = vpop.permute.xlu0 %7029  ;;  %v7024_v42 = vpop.permute.xlu1 %7023 }
 0x57a   : > { %v7082_v24 = vcombine.low %v7024_v42, %v7030_v30  ;;  %v7083_v53 = vcombine.high %v7024_v42, %v7030_v30 }
 0x57c   : > { %v7090_v59 = vrot.slane %v7082_v24, %v20655_v34  ;;  %v7097_v27 = vrot.slane %v7083_v53, %v20655_v34 }
 0x57d   : > { %v7036_v45 = vpop.permute.xlu0 %7035  ;;  %v7027_v54 = vpop.permute.xlu1 %7026 }
 0x57e   : > { %v7066_v46 = vcombine.low %v7020_v48, %v7027_v54  ;;  %v7067_v32 = vcombine.high %v7020_v48, %v7027_v54 }
 0x580   : > { %v7074_v51 = vrot.slane %v7066_v46, %v20655_v34  ;;  %v7081_v62 = vrot.slane %v7067_v32, %v20655_v34 }
 0x581   : > { %v7042_v18 = vpop.permute.xlu0 %7041  ;;  %v7033_v50 = vpop.permute.xlu1 %7032 }
 0x582   : > { %v7114_v25 = vcombine.low %v7036_v45, %v7042_v18  ;;  %v7130_v13 = vcombine.low %v7074_v51, %v7090_v59  ;;  %v7131_v47 = vcombine.high %v7074_v51, %v7090_v59  ;;  %v7115_v56 = vcombine.high %v7036_v45, %v7042_v18 }
 0x583   : > { %v7146_v29 = vcombine.low %v7081_v62, %v7097_v27  ;;  %v7147_v18 = vcombine.high %v7081_v62, %v7097_v27 }
 0x584   : > { %v7122_v44 = vrot.slane %v7114_v25, %v20655_v34  ;;  %v7138_v36 = vrot.slane %v7130_v13, %v20656_v10  ;;  %v7129_v49 = vrot.slane %v7115_v56, %v20655_v34  ;;  %v7145_v2 = vrot.slane %v7131_v47, %v20656_v10 }
 0x585   : > { %v16818_v63 = vpop.permute.xlu0 %7048  ;;  %v7039_v41 = vpop.permute.xlu1 %7038  ;;  %v7154_v1 = vrot.slane %v7146_v29, %v20656_v10 }
 0x586   : > { %v7098_v31 = vcombine.low %v7033_v50, %v7039_v41  ;;  %v7099_v5 = vcombine.high %v7033_v50, %v7039_v41  ;;  %v7202_v61 = vcombine.low %v16800_v6, %v16818_v63  ;;  %v7203_v50 = vcombine.high %v16800_v6, %v16818_v63 }
 0x587   : > { %v7161_v6 = vrot.slane %v7147_v18, %v20656_v10 }
 0x588   : > { %v7106_v22 = vrot.slane %v7098_v31, %v20655_v34  ;;  %v7113_v55 = vrot.slane %v7099_v5, %v20655_v34  ;;  %v7210_v8 = vrot.slane %v7202_v61, %v20655_v34  ;;  %v7217_v63 = vrot.slane %v7203_v50, %v20655_v34 }
 0x589   : > { %v16823_v28 = vpop.permute.xlu1 %7045  ;;  %v7055_v23 = vpop.permute.xlu0 %7054 }
 0x58a   : > { %v7162_v57 = vcombine.low %v7106_v22, %v7122_v44  ;;  %v7163_v15 = vcombine.high %v7106_v22, %v7122_v44  ;;  %v7178_v40 = vcombine.low %v7113_v55, %v7129_v49  ;;  %v7179_v30 = vcombine.high %v7113_v55, %v7129_v49 }
 0x58c   : > { %v7170_v0 = vrot.slane %v7162_v57, %v20656_v10  ;;  %v7177_v26 = vrot.slane %v7163_v15, %v20656_v10  ;;  %v7186_v19 = vrot.slane %v7178_v40, %v20656_v10  ;;  %v7193_v31 = vrot.slane %v7179_v30, %v20656_v10 }
 0x58d   : > { %v7052_v17 = vpop.permute.xlu1 %7051  ;;  %v7061_v11 = vpop.permute.xlu0 %7060 }
 0x58e   : > { %v7194_v14 = vcombine.low %v7138_v36, %v7170_v0  ;;  %v7218_v21 = vcombine.low %v16823_v28, %v7052_v17  ;;  %v7195_v9 = vcombine.high %v7138_v36, %v7170_v0  ;;  %v7234_v39 = vcombine.low %v7055_v23, %v7061_v11 }
 0x58f   : > { %v7196_v35 = vcombine.low %v7145_v2, %v7177_v26  ;;  %v7197_v7 = vcombine.high %v7145_v2, %v7177_v26  ;;  %v7198_v42 = vcombine.low %v7154_v1, %v7186_v19  ;;  %v7235_v45 = vcombine.high %v7055_v23, %v7061_v11 }
 0x590   : > { %7354 = vrot.lane.b32.xlu0 %v7194_v14, %s12499_s18  ;;  %v7226_v12 = vrot.slane %v7218_v21, %v20655_v34  ;;  %v7242_v3 = vrot.slane %v7234_v39, %v20655_v34  ;;  %v7219_v54 = vcombine.high %v16823_v28, %v7052_v17  ;;  %v7199_v41 = vcombine.high %v7154_v1, %v7186_v19 }
 0x591   : > { %v7058_v33 = vpop.permute.xlu1 %7057  ;;  %v7249_v59 = vrot.slane %v7235_v45, %v20655_v34  ;;  %v7200_v57 = vcombine.low %v7161_v6, %v7193_v31  ;;  %v7201_v36 = vcombine.high %v7161_v6, %v7193_v31 }
 0x592   : > { %v7266_v16 = vcombine.low %v7210_v8, %v7226_v12  ;;  %v7267_v46 = vcombine.high %v7210_v8, %v7226_v12  ;;  %v7233_v44 = vrot.slane %v7219_v54, %v20655_v34 }
 0x594   : > { %7358 = vrot.lane.b32.xlu0 %v7195_v9, %s12499_s18  ;;  %v7274_v58 = vrot.slane %v7266_v16, %v20656_v10  ;;  %v7281_v22 = vrot.slane %v7267_v46, %v20656_v10  ;;  %v7282_v23 = vcombine.low %v7217_v63, %v7233_v44  ;;  %v7283_v21 = vcombine.high %v7217_v63, %v7233_v44 }
 0x595   : > { %v7064_v43 = vpop.permute.xlu1 %7063 }
 0x596   : > { %v7250_v38 = vcombine.low %v7058_v33, %v7064_v43  ;;  %v7251_v37 = vcombine.high %v7058_v33, %v7064_v43  ;;  %v7290_v5 = vrot.slane %v7282_v23, %v20656_v10  ;;  %v7297_v56 = vrot.slane %v7283_v21, %v20656_v10 }
 0x598   : > { %v7258_v4 = vrot.slane %v7250_v38, %v20655_v34  ;;  %7362 = vrot.lane.b32.xlu0 %v7196_v35, %s12499_s18  ;;  %v7265_v24 = vrot.slane %v7251_v37, %v20655_v34 }
 0x59a   : > { %v7298_v20 = vcombine.low %v7242_v3, %v7258_v4  ;;  %v7299_v48 = vcombine.high %v7242_v3, %v7258_v4  ;;  %v7314_v13 = vcombine.low %v7249_v59, %v7265_v24  ;;  %v7315_v15 = vcombine.high %v7249_v59, %v7265_v24 }
 0x59c   : > { %v7306_v60 = vrot.slane %v7298_v20, %v20656_v10  ;;  %7366 = vrot.lane.b32.xlu0 %v7197_v7, %s12499_s18  ;;  %v7313_v51 = vrot.slane %v7299_v48, %v20656_v10  ;;  %v7322_v17 = vrot.slane %v7314_v13, %v20656_v10  ;;  %v7329_v47 = vrot.slane %v7315_v15, %v20656_v10 }
 0x59e   : > { %v7330_v52 = vcombine.low %v7274_v58, %v7306_v60  ;;  %v7331_v25 = vcombine.high %v7274_v58, %v7306_v60  ;;  %v7332_v28 = vcombine.low %v7281_v22, %v7313_v51  ;;  %v7333_v0 = vcombine.high %v7281_v22, %v7313_v51 }
 0x59f   : > { %v7334_v14 = vcombine.low %v7290_v5, %v7322_v17  ;;  %v7335_v32 = vcombine.high %v7290_v5, %v7322_v17  ;;  %v7336_v11 = vcombine.low %v7297_v56, %v7329_v47  ;;  %v7337_v33 = vcombine.high %v7297_v56, %v7329_v47 }
 0x5a0   : > { %7356 = vrot.lane.b32.xlu1 %v7330_v52, %s12499_s18  ;;  %7370 = vrot.lane.b32.xlu0 %v7198_v42, %s12499_s18 }
 0x5a4   : > { %7360 = vrot.lane.b32.xlu1 %v7331_v25, %s12499_s18  ;;  %7374 = vrot.lane.b32.xlu0 %v7199_v41, %s12499_s18 }
 0x5a8   : > { %7364 = vrot.lane.b32.xlu1 %v7332_v28, %s12499_s18  ;;  %7378 = vrot.lane.b32.xlu0 %v7200_v57, %s12499_s18 }
 0x5ac   : > { %7368 = vrot.lane.b32.xlu1 %v7333_v0, %s12499_s18  ;;  %7382 = vrot.lane.b32.xlu0 %v7201_v36, %s12499_s18 }
 0x5b0   : > { %7372 = vrot.lane.b32.xlu1 %v7334_v14, %s12499_s18 }
 0x5b4   : > { %7376 = vrot.lane.b32.xlu1 %v7335_v32, %s12499_s18 }
 0x5b8   : > { %7380 = vrot.lane.b32.xlu1 %v7336_v11, %s12499_s18 }
 0x5bc   : > { %7384 = vrot.lane.b32.xlu1 %v7337_v33, %s12499_s18 }
 0x602   : > { %v7355_v61 = vpop.permute.xlu0 %7354 }
 0x603   : > { %7402 = vst.msk [vmem:[#allocation3 + $0x1] sm:$0xff] %vm934_vm6, %v7355_v61 }
 0x606   : > { %v7359_v53 = vpop.permute.xlu0 %7358 }
 0x607   : > { %7404 = vst.msk [vmem:[#allocation3 + $0x19] sm:$0xff] %vm934_vm6, %v7359_v53 }
 0x60a   : > { %v16877_v55 = vld [vmem:[#allocation3] sm:$0xff]  ;;  %v7363_v26 = vpop.permute.xlu0 %7362 }
 0x60b   : > { %v16879_v9 = vld [vmem:[#allocation3 + $0x1] sm:$0xff]  ;;  %7434 = vst.msk [vmem:[#allocation5] sm:$0xff] %vm1064_vm7, %v16877_v55  ;;  %7482 = vrot.lane.b32.xlu0 %v16877_v55, %s12500_s21 }
 0x60c   : > { %7661 = vst.msk [vmem:[#allocation5 + $0x180] sm:$0xff] %vm1064_vm7, %v16879_v9 }
 0x60d   : > { %7406 = vst.msk [vmem:[#allocation3 + $0x31] sm:$0xff] %vm934_vm6, %v7363_v26 }
 0x60e   : > { %v16888_v39 = vld [vmem:[#allocation3 + $0x18] sm:$0xff]  ;;  %v7367_v62 = vpop.permute.xlu0 %7366 }
 0x60f   : > { %v16890_v12 = vld [vmem:[#allocation3 + $0x19] sm:$0xff]  ;;  %7436 = vst.msk [vmem:[#allocation5 + $0x10] sm:$0xff] %vm1064_vm7, %v16888_v39  ;;  %7486 = vrot.lane.b32.xlu0 %v16888_v39, %s12500_s21 }
 0x610   : > { %7663 = vst.msk [vmem:[#allocation5 + $0x190] sm:$0xff] %vm1064_vm7, %v16890_v12 }
 0x611   : > { %7408 = vst.msk [vmem:[#allocation3 + $0x49] sm:$0xff] %vm934_vm6, %v7367_v62 }
 0x612   : > { %v7357_v49 = vpop.permute.xlu1 %7356  ;;  %v7371_v8 = vpop.permute.xlu0 %7370 }
 0x613   : > { %7403 = vst.msk [vmem:[#allocation3 + $0x9] sm:$0xff] %vm934_vm6, %v7357_v49  ;;  %7410 = vst.msk [vmem:[#allocation3 + $0x61] sm:$0xff] %vm934_vm6, %v7371_v8 }
 0x614   : > { %v16899_v43 = vld [vmem:[#allocation3 + $0x30] sm:$0xff] }
 0x615   : > { %v16901_v2 = vld [vmem:[#allocation3 + $0x31] sm:$0xff]  ;;  %7438 = vst.msk [vmem:[#allocation5 + $0x20] sm:$0xff] %vm1064_vm7, %v16899_v43  ;;  %7490 = vrot.lane.b32.xlu0 %v16899_v43, %s12500_s21 }
 0x616   : > { %7665 = vst.msk [vmem:[#allocation5 + $0x1a0] sm:$0xff] %vm1064_vm7, %v16901_v2  ;;  %v7361_v38 = vpop.permute.xlu1 %7360  ;;  %v7375_v35 = vpop.permute.xlu0 %7374 }
 0x617   : > { %7405 = vst.msk [vmem:[#allocation3 + $0x21] sm:$0xff] %vm934_vm6, %v7361_v38  ;;  %7412 = vst.msk [vmem:[#allocation3 + $0x79] sm:$0xff] %vm934_vm6, %v7375_v35 }
 0x618   : > { %v16911_v27 = vld [vmem:[#allocation3 + $0x48] sm:$0xff] }
 0x619   : > { %v16913_v40 = vld [vmem:[#allocation3 + $0x49] sm:$0xff]  ;;  %7440 = vst.msk [vmem:[#allocation5 + $0x30] sm:$0xff] %vm1064_vm7, %v16911_v27  ;;  %7494 = vrot.lane.b32.xlu0 %v16911_v27, %s12500_s21 }
 0x61a   : > { %7667 = vst.msk [vmem:[#allocation5 + $0x1b0] sm:$0xff] %vm1064_vm7, %v16913_v40  ;;  %v16923_v3 = vld [vmem:[#allocation3 + $0x8] sm:$0xff]  ;;  %v7365_v29 = vpop.permute.xlu1 %7364  ;;  %v16929_v20 = vld [vmem:[#allocation3 + $0x60] sm:$0xff]  ;;  %v7379_v58 = vpop.permute.xlu0 %7378 }
 0x61b   : > { %v16925_v16 = vld [vmem:[#allocation3 + $0x9] sm:$0xff]  ;;  %v16931_v7 = vld [vmem:[#allocation3 + $0x61] sm:$0xff]  ;;  %7435 = vst.msk [vmem:[#allocation5 + $0x8] sm:$0xff] %vm1064_vm7, %v16923_v3  ;;  %7442 = vst.msk [vmem:[#allocation5 + $0x40] sm:$0xff] %vm1064_vm7, %v16929_v20 }
 0x61c   : > { %v16927_v4 = vld [vmem:[#allocation3 + $0x2] sm:$0xff]  ;;  %7662 = vst.msk [vmem:[#allocation5 + $0x188] sm:$0xff] %vm1064_vm7, %v16925_v16  ;;  %v16937_v19 = vld [vmem:[#allocation3 + $0xa] sm:$0xff]  ;;  %7669 = vst.msk [vmem:[#allocation5 + $0x1c0] sm:$0xff] %vm1064_vm7, %v16931_v7 }
 0x61d   : > { %7888 = vst.msk [vmem:[#allocation5 + $0x300] sm:$0xff] %vm1064_vm7, %v16927_v4  ;;  %7889 = vst.msk [vmem:[#allocation5 + $0x308] sm:$0xff] %vm1064_vm7, %v16937_v19  ;;  %7498 = vrot.lane.b32.xlu0 %v16929_v20, %s12500_s21  ;;  %v17134_v8 = vld [vmem:[#allocation5 + $0x1a0] sm:$0xff] }
 0x61e   : > { %7407 = vst.msk [vmem:[#allocation3 + $0x39] sm:$0xff] %vm934_vm6, %v7365_v29  ;;  %7414 = vst.msk [vmem:[#allocation3 + $0x91] sm:$0xff] %vm934_vm6, %v7379_v58  ;;  %v16951_v60 = vld [vmem:[#allocation3 + $0x20] sm:$0xff]  ;;  %v7369_v48 = vpop.permute.xlu1 %7368  ;;  %v16957_v52 = vld [vmem:[#allocation3 + $0x78] sm:$0xff]  ;;  %v7383_v45 = vpop.permute.xlu0 %7382 }
 0x61f   : > { %v16953_v1 = vld [vmem:[#allocation3 + $0x21] sm:$0xff]  ;;  %v16959_v30 = vld [vmem:[#allocation3 + $0x79] sm:$0xff]  ;;  %7437 = vst.msk [vmem:[#allocation5 + $0x18] sm:$0xff] %vm1064_vm7, %v16951_v60  ;;  %7444 = vst.msk [vmem:[#allocation5 + $0x50] sm:$0xff] %vm1064_vm7, %v16957_v52 }
 0x620   : > { %v16955_v37 = vld [vmem:[#allocation3 + $0x1a] sm:$0xff]  ;;  %7664 = vst.msk [vmem:[#allocation5 + $0x198] sm:$0xff] %vm1064_vm7, %v16953_v1  ;;  %v16965_v42 = vld [vmem:[#allocation3 + $0x22] sm:$0xff]  ;;  %7671 = vst.msk [vmem:[#allocation5 + $0x1d0] sm:$0xff] %vm1064_vm7, %v16959_v30  ;;  %7729 = vrot.lane.b32.xlu1 %v16959_v30, %s12500_s21 }
 0x621   : > { %20657 = vst [vmem:[#allocation110_spill] sm:$0xff] %v16955_v37  ;;  %20658 = vst [vmem:[#allocation64_spill] sm:$0xff] %v16965_v42  ;;  %7502 = vrot.lane.b32.xlu0 %v16957_v52, %s12500_s21  ;;  %v17120_v26 = vld [vmem:[#allocation5 + $0x1b0] sm:$0xff]  ;;  %v17142_v29 = vld [vmem:[#allocation5 + $0x180] sm:$0xff] }
 0x622   : > { %7890 = vst.msk [vmem:[#allocation5 + $0x310] sm:$0xff] %vm1064_vm7, %v16955_v37  ;;  %7891 = vst.msk [vmem:[#allocation5 + $0x318] sm:$0xff] %vm1064_vm7, %v16965_v42  ;;  %v7373_v50 = vpop.permute.xlu1 %7372 }
 0x623   : > { %7409 = vst.msk [vmem:[#allocation3 + $0x51] sm:$0xff] %vm934_vm6, %v7369_v48  ;;  %7416 = vst.msk [vmem:[#allocation3 + $0xa9] sm:$0xff] %vm934_vm6, %v7383_v45  ;;  %v17136_v38 = vld [vmem:[#allocation5 + $0x1c0] sm:$0xff]  ;;  %v17149_v48 = vld [vmem:[#allocation5 + $0x30] sm:$0xff] }
 0x624   : > { %7411 = vst.msk [vmem:[#allocation3 + $0x69] sm:$0xff] %vm934_vm6, %v7373_v50  ;;  %20668 = vst [vmem:[#allocation40_spill] sm:$0xff] %v17120_v26  ;;  %v17161_v45 = vld [vmem:[#allocation5 + $0x10] sm:$0xff]  ;;  %v17163_v50 = vld [vmem:[#allocation5 + $0x20] sm:$0xff] }
 0x625   : > { %v16981_v54 = vld [vmem:[#allocation3 + $0x38] sm:$0xff]  ;;  %v16987_v24 = vld [vmem:[#allocation3 + $0x90] sm:$0xff]  ;;  %20672 = vst [vmem:[#allocation46_spill] sm:$0xff] %v17134_v8  ;;  %20673 = vst [vmem:[#allocation69_spill] sm:$0xff] %v17136_v38 }
 0x626   : > { %v16983_v46 = vld [vmem:[#allocation3 + $0x39] sm:$0xff]  ;;  %v16989_v25 = vld [vmem:[#allocation3 + $0x91] sm:$0xff]  ;;  %7439 = vst.msk [vmem:[#allocation5 + $0x28] sm:$0xff] %vm1064_vm7, %v16981_v54  ;;  %7446 = vst.msk [vmem:[#allocation5 + $0x60] sm:$0xff] %vm1064_vm7, %v16987_v24  ;;  %7506 = vrot.lane.b32.xlu0 %v16987_v24, %s12500_s21  ;;  %v7377_v44 = vpop.permute.xlu1 %7376 }
 0x627   : > { %v16985_v18 = vld [vmem:[#allocation3 + $0x32] sm:$0xff]  ;;  %7666 = vst.msk [vmem:[#allocation5 + $0x1a8] sm:$0xff] %vm1064_vm7, %v16983_v46  ;;  %v16995_v51 = vld [vmem:[#allocation3 + $0x3a] sm:$0xff]  ;;  %7673 = vst.msk [vmem:[#allocation5 + $0x1e0] sm:$0xff] %vm1064_vm7, %v16989_v25 }
 0x628   : > { %7892 = vst.msk [vmem:[#allocation5 + $0x320] sm:$0xff] %vm1064_vm7, %v16985_v18  ;;  %7893 = vst.msk [vmem:[#allocation5 + $0x328] sm:$0xff] %vm1064_vm7, %v16995_v51 }
 0x629   : > { %7413 = vst.msk [vmem:[#allocation3 + $0x81] sm:$0xff] %vm934_vm6, %v7377_v44  ;;  %20674 = vst [vmem:[#allocation105_spill] sm:$0xff] %v17142_v29  ;;  %v8259_v44 = vcombine.low %v17161_v45, %v17149_v48 }
 0x62a   : > { %v17008_v41 = vld [vmem:[#allocation3 + $0x50] sm:$0xff]  ;;  %v17014_v22 = vld [vmem:[#allocation3 + $0xa8] sm:$0xff]  ;;  %v7381_v23 = vpop.permute.xlu1 %7380  ;;  %20676 = vst [vmem:[#allocation131_spill] sm:$0xff] %v17149_v48  ;;  %20679 = vst [vmem:[#allocation72_spill] sm:$0xff] %v17161_v45 }
 0x62b   : > { %v17010_v31 = vld [vmem:[#allocation3 + $0x51] sm:$0xff]  ;;  %v7658_v6 = vld [vmem:[#allocation3 + $0xa9] sm:$0xff]  ;;  %7441 = vst.msk [vmem:[#allocation5 + $0x38] sm:$0xff] %vm1064_vm7, %v17008_v41  ;;  %7448 = vst.msk [vmem:[#allocation5 + $0x70] sm:$0xff] %vm1064_vm7, %v17014_v22  ;;  %7510 = vrot.lane.b32.xlu0 %v17014_v22, %s12500_s21 }
 0x62c   : > { %v17012_v59 = vld [vmem:[#allocation3 + $0x4a] sm:$0xff]  ;;  %7668 = vst.msk [vmem:[#allocation5 + $0x1b8] sm:$0xff] %vm1064_vm7, %v17010_v31  ;;  %v17020_v63 = vld [vmem:[#allocation3 + $0x52] sm:$0xff]  ;;  %7675 = vst.msk [vmem:[#allocation5 + $0x1f0] sm:$0xff] %vm1064_vm7, %v7658_v6  ;;  %7737 = vrot.lane.b32.xlu1 %v7658_v6, %s12500_s21 }
 0x62d   : > { %20659 = vst [vmem:[#allocation124_spill] sm:$0xff] %v17012_v59  ;;  %20660 = vst [vmem:[#allocation99_spill] sm:$0xff] %v17020_v63  ;;  %v17033_v13 = vld [vmem:[#allocation3 + $0x68] sm:$0xff] }
 0x62e   : > { %7894 = vst.msk [vmem:[#allocation5 + $0x330] sm:$0xff] %vm1064_vm7, %v17012_v59  ;;  %7895 = vst.msk [vmem:[#allocation5 + $0x338] sm:$0xff] %vm1064_vm7, %v17020_v63  ;;  %v17035_v28 = vld [vmem:[#allocation3 + $0x69] sm:$0xff]  ;;  %v7385_v15 = vpop.permute.xlu1 %7384  ;;  %v17124_v62 = vld [vmem:[#allocation5 + $0x1e0] sm:$0xff] }
 0x62f   : > { %v17037_v57 = vld [vmem:[#allocation3 + $0x62] sm:$0xff]  ;;  %7443 = vst.msk [vmem:[#allocation5 + $0x48] sm:$0xff] %vm1064_vm7, %v17033_v13  ;;  %7670 = vst.msk [vmem:[#allocation5 + $0x1c8] sm:$0xff] %vm1064_vm7, %v17035_v28  ;;  %v17043_v0 = vld [vmem:[#allocation3 + $0x6a] sm:$0xff]  ;;  %7579 = vrot.lane.b32.xlu0 %v16877_v55, %s12502_s22  ;;  %v8683_v35 = vcombine.low %v17136_v38, %v17124_v62 }
 0x630   : > { %20661 = vst [vmem:[#allocation132_spill] sm:$0xff] %v17037_v57  ;;  %7896 = vst.msk [vmem:[#allocation5 + $0x340] sm:$0xff] %vm1064_vm7, %v17037_v57  ;;  %7810 = vrot.lane.b32.xlu1 %v16890_v12, %s12502_s22  ;;  %v17054_v17 = vld [vmem:[#allocation3 + $0x80] sm:$0xff]  ;;  %v17221_v59 = vld [vmem:[#allocation5 + $0x188] sm:$0xff] }
 0x631   : > { %7415 = vst.msk [vmem:[#allocation3 + $0x99] sm:$0xff] %vm934_vm6, %v7381_v23  ;;  %v17056_v36 = vld [vmem:[#allocation3 + $0x81] sm:$0xff]  ;;  %7417 = vst.msk [vmem:[#allocation3 + $0xb1] sm:$0xff] %vm934_vm6, %v7385_v15 }
 0x632   : > { %7897 = vst.msk [vmem:[#allocation5 + $0x348] sm:$0xff] %vm1064_vm7, %v17043_v0  ;;  %v17058_v5 = vld [vmem:[#allocation3 + $0x7a] sm:$0xff]  ;;  %7445 = vst.msk [vmem:[#allocation5 + $0x58] sm:$0xff] %vm1064_vm7, %v17054_v17  ;;  %v17064_v14 = vld [vmem:[#allocation3 + $0x82] sm:$0xff] }
 0x633   : > { %20662 = vst [vmem:[#allocation73_spill] sm:$0xff] %v17058_v5  ;;  %7672 = vst.msk [vmem:[#allocation5 + $0x1d8] sm:$0xff] %vm1064_vm7, %v17056_v36  ;;  %7583 = vrot.lane.b32.xlu0 %v16888_v39, %s12502_s22  ;;  %v17118_v55 = vld [vmem:[#allocation5 + $0x1f0] sm:$0xff]  ;;  %v17172_v23 = vld [vmem:[#allocation5] sm:$0xff] }
 0x634   : > { %20663 = vst [vmem:[#allocation80_spill] sm:$0xff] %v17064_v14  ;;  %7898 = vst.msk [vmem:[#allocation5 + $0x350] sm:$0xff] %vm1064_vm7, %v17058_v5  ;;  %7818 = vrot.lane.b32.xlu1 %v16913_v40, %s12502_s22  ;;  %v17122_v39 = vld [vmem:[#allocation5 + $0x1d0] sm:$0xff]  ;;  %v8243_v15 = vcombine.low %v17172_v23, %v17163_v50  ;;  %v17206_v5 = vld [vmem:[#allocation5 + $0x1b8] sm:$0xff] }
 0x635   : > { %7899 = vst.msk [vmem:[#allocation5 + $0x358] sm:$0xff] %vm1064_vm7, %v17064_v14  ;;  %20667 = vst [vmem:[#allocation41_spill] sm:$0xff] %v17118_v55  ;;  %v8699_v49 = vcombine.low %v17122_v39, %v17118_v55  ;;  %v17204_v55 = vld [vmem:[#allocation5 + $0x198] sm:$0xff]  ;;  %v8197_v14 = vld [vmem:[#allocation5 + $0x310] sm:$0xff] }
 0x636   : > { %20669 = vst [vmem:[#allocation48_spill] sm:$0xff] %v17122_v39  ;;  %20670 = vst [vmem:[#allocation42_spill] sm:$0xff] %v17124_v62  ;;  %v17200_v62 = vld [vmem:[#allocation5 + $0x18] sm:$0xff]  ;;  %v8201_v63 = vld [vmem:[#allocation5 + $0x330] sm:$0xff] }
 0x637   : > { %7587 = vrot.lane.b32.xlu0 %v16899_v43, %s12502_s22  ;;  %v17132_v43 = vld [vmem:[#allocation5 + $0x190] sm:$0xff]  ;;  %v17147_v58 = vrot.slane %v8699_v49, %v20655_v34  ;;  %20680 = vst [vmem:[#allocation8_spill] sm:$0xff] %v17163_v50  ;;  %20682 = vst [vmem:[#allocation90_spill] sm:$0xff] %v17172_v23  ;;  %v17202_v39 = vld [vmem:[#allocation5 + $0x38] sm:$0xff]  ;;  %v9075_v42 = vcombine.low %v8197_v14, %v8201_v63 }
 0x638   : > { %v17075_v21 = vld [vmem:[#allocation3 + $0x98] sm:$0xff]  ;;  %7826 = vrot.lane.b32.xlu1 %v16959_v30, %s12502_s22  ;;  %v17095_v11 = vld [vmem:[#allocation3 + $0xb0] sm:$0xff]  ;;  %20671 = vst [vmem:[#allocation126_spill] sm:$0xff] %v17132_v43  ;;  %v17159_v30 = vrot.slane %v8683_v35, %v20655_v34  ;;  %v17184_v35 = vld [vmem:[#allocation5 + $0x60] sm:$0xff] }
 0x639   : > { %v17077_v32 = vld [vmem:[#allocation3 + $0x99] sm:$0xff]  ;;  %7447 = vst.msk [vmem:[#allocation5 + $0x68] sm:$0xff] %vm1064_vm7, %v17075_v21  ;;  %v17097_v33 = vld [vmem:[#allocation3 + $0xb1] sm:$0xff]  ;;  %7449 = vst.msk [vmem:[#allocation5 + $0x78] sm:$0xff] %vm1064_vm7, %v17095_v11 }
 0x63a   : > { %v17079_v47 = vld [vmem:[#allocation3 + $0x92] sm:$0xff]  ;;  %7674 = vst.msk [vmem:[#allocation5 + $0x1e8] sm:$0xff] %vm1064_vm7, %v17077_v32  ;;  %v17085_v56 = vld [vmem:[#allocation3 + $0x9a] sm:$0xff]  ;;  %v17099_v61 = vld [vmem:[#allocation3 + $0xaa] sm:$0xff] }
 0x63b   : > { %20664 = vst [vmem:[#allocation100_spill] sm:$0xff] %v17079_v47  ;;  %7900 = vst.msk [vmem:[#allocation5 + $0x360] sm:$0xff] %vm1064_vm7, %v17079_v47  ;;  %v17105_v53 = vld [vmem:[#allocation3 + $0xb2] sm:$0xff]  ;;  %7591 = vrot.lane.b32.xlu0 %v16911_v27, %s12502_s22  ;;  %v8667_v27 = vcombine.low %v17132_v43, %v17120_v26 }
 0x63c   : > { %7901 = vst.msk [vmem:[#allocation5 + $0x368] sm:$0xff] %vm1064_vm7, %v17085_v56  ;;  %20665 = vst [vmem:[#allocation111_spill] sm:$0xff] %v17099_v61  ;;  %7834 = vrot.lane.b32.xlu1 %v7658_v6, %s12502_s22  ;;  %v17232_v26 = vld [vmem:[#allocation5 + $0x58] sm:$0xff] }
 0x63d   : > { %7676 = vst.msk [vmem:[#allocation5 + $0x1f8] sm:$0xff] %vm1064_vm7, %v17097_v33  ;;  %20666 = vst [vmem:[#allocation114_spill] sm:$0xff] %v17105_v53  ;;  %v17240_v50 = vld [vmem:[#allocation5 + $0x1d8] sm:$0xff] }
 0x63e   : > { %7902 = vst.msk [vmem:[#allocation5 + $0x370] sm:$0xff] %vm1064_vm7, %v17099_v61  ;;  %7903 = vst.msk [vmem:[#allocation5 + $0x378] sm:$0xff] %vm1064_vm7, %v17105_v53  ;;  %v17195_v61 = vld [vmem:[#allocation5 + $0x8] sm:$0xff]  ;;  %v8206_v53 = vld [vmem:[#allocation5 + $0x358] sm:$0xff] }
 0x63f   : > { %7595 = vrot.lane.b32.xlu0 %v16929_v20, %s12502_s22  ;;  %v8651_v20 = vcombine.low %v17142_v29, %v17134_v8  ;;  %20675 = vst [vmem:[#allocation101_spill] sm:$0xff] %v17147_v58  ;;  %20678 = vst [vmem:[#allocation10_spill] sm:$0xff] %v17159_v30  ;;  %v17223_v29 = vld [vmem:[#allocation5 + $0x1a8] sm:$0xff] }
 0x640   : > { %7484 = vrot.lane.b32.xlu1 %v16923_v3, %s12500_s21  ;;  %20684 = vst [vmem:[#allocation120_spill] sm:$0xff] %v17184_v35  ;;  %20688 = vst [vmem:[#allocation26_spill] sm:$0xff] %v17195_v61  ;;  %v9875_v23 = vcombine.low %v17221_v59, %v17223_v29 }
 0x641   : > { %v17168_v6 = vrot.slane %v8651_v20, %v20655_v34  ;;  %v17186_v20 = vld [vmem:[#allocation5 + $0x28] sm:$0xff]  ;;  %20690 = vst [vmem:[#allocation47_spill] sm:$0xff] %v17200_v62  ;;  %20691 = vst [vmem:[#allocation7_spill] sm:$0xff] %v17202_v39 }
 0x642   : > { %20685 = vst [vmem:[#allocation122_spill] sm:$0xff] %v17186_v20  ;;  %20692 = vst [vmem:[#allocation63_spill] sm:$0xff] %v17204_v55  ;;  %v17242_v37 = vld [vmem:[#allocation5 + $0x1e8] sm:$0xff] }
 0x643   : > { %7599 = vrot.lane.b32.xlu0 %v16957_v52, %s12502_s22  ;;  %v17156_v52 = vrot.slane %v8667_v27, %v20655_v34  ;;  %20681 = vst [vmem:[#allocation31_spill] sm:$0xff] %v17168_v6  ;;  %v17182_v27 = vld [vmem:[#allocation5 + $0x40] sm:$0xff]  ;;  %20693 = vst [vmem:[#allocation30_spill] sm:$0xff] %v17206_v5 }
 0x644   : > { %7488 = vrot.lane.b32.xlu1 %v16951_v60, %s12500_s21  ;;  %20683 = vst [vmem:[#allocation130_spill] sm:$0xff] %v17182_v27  ;;  %20695 = vst [vmem:[#allocation68_spill] sm:$0xff] %v17221_v59  ;;  %v17225_v8 = vld [vmem:[#allocation5 + $0x1f8] sm:$0xff]  ;;  %v8199_v59 = vld [vmem:[#allocation5 + $0x320] sm:$0xff] }
 0x645   : > { %20677 = vst [vmem:[#allocation25_spill] sm:$0xff] %v17156_v52  ;;  %v8715_v49 = vcombine.low %v17168_v6, %v17156_v52  ;;  %v17217_v6 = vld [vmem:[#allocation5 + $0x78] sm:$0xff]  ;;  %v9467_v52 = vcombine.low %v17195_v61, %v17186_v20  ;;  %20696 = vst [vmem:[#allocation44_spill] sm:$0xff] %v17223_v29  ;;  %v17236_v61 = vld [vmem:[#allocation5 + $0x68] sm:$0xff]  ;;  %v9483_v20 = vcombine.low %v17200_v62, %v17202_v39 }
 0x646   : > { %20694 = vst [vmem:[#allocation45_spill] sm:$0xff] %v17217_v6  ;;  %20697 = vst [vmem:[#allocation67_spill] sm:$0xff] %v17225_v8  ;;  %v9515_v45 = vcombine.low %v17232_v26, %v17217_v6  ;;  %v9923_v48 = vcombine.low %v17240_v50, %v17225_v8  ;;  %v8208_v62 = vld [vmem:[#allocation5 + $0x368] sm:$0xff]  ;;  %v8207_v39 = vld [vmem:[#allocation5 + $0x360] sm:$0xff] }
 0x647   : > { %7603 = vrot.lane.b32.xlu0 %v16987_v24, %s12502_s22  ;;  %v8747_v24 = vcombine.low %v17159_v30, %v17147_v58  ;;  %v17188_v30 = vld [vmem:[#allocation5 + $0x50] sm:$0xff]  ;;  %v17228_v43 = vrot.slane %v8715_v49, %v20656_v10  ;;  %20699 = vst [vmem:[#allocation81_spill] sm:$0xff] %v17232_v26  ;;  %20700 = vst [vmem:[#allocation58_spill] sm:$0xff] %v17240_v50  ;;  %v9891_v49 = vcombine.low %v17204_v55, %v17206_v5  ;;  %v17261_v5 = vld [vmem:[#allocation5 + $0x48] sm:$0xff] }
 0x648   : > { %7492 = vrot.lane.b32.xlu1 %v16981_v54, %s12500_s21  ;;  %20686 = vst [vmem:[#allocation134_spill] sm:$0xff] %v17188_v30  ;;  %v17190_v58 = vld [vmem:[#allocation5 + $0x70] sm:$0xff]  ;;  %20701 = vst [vmem:[#allocation43_spill] sm:$0xff] %v17242_v37  ;;  %v17264_v50 = vrot.slane %v9467_v52, %v20655_v34  ;;  %v17266_v8 = vld [vmem:[#allocation5 + $0x1c8] sm:$0xff]  ;;  %v17276_v52 = vrot.slane %v9483_v20, %v20655_v34  ;;  %v17282_v57 = vrot.slane %v9515_v45, %v20655_v34 }
 0x649   : > { %20687 = vst [vmem:[#allocation71_spill] sm:$0xff] %v17190_v58  ;;  %v17198_v38 = vrot.slane %v8747_v24, %v20656_v10  ;;  %v8275_v24 = vcombine.low %v17182_v27, %v17184_v35  ;;  %20698 = vst [vmem:[#allocation9_spill] sm:$0xff] %v17228_v43  ;;  %v8202_v27 = vld [vmem:[#allocation5 + $0x338] sm:$0xff]  ;;  %v9907_v43 = vcombine.low %v17266_v8, %v17242_v37  ;;  %v8209_v29 = vld [vmem:[#allocation5 + $0x370] sm:$0xff] }
 0x64a   : > { %v8210_v35 = vld [vmem:[#allocation5 + $0x378] sm:$0xff]  ;;  %20702 = vst [vmem:[#allocation107_spill] sm:$0xff] %v17261_v5  ;;  %20703 = vst [vmem:[#allocation29_spill] sm:$0xff] %v17266_v8  ;;  %v17279_v47 = vrot.slane %v9891_v49, %v20655_v34 }
 0x64b   : > { %7607 = vrot.lane.b32.xlu0 %v17014_v22, %s12502_s22  ;;  %v17193_v22 = vrot.slane %v8259_v44, %v20655_v34  ;;  %20689 = vst [vmem:[#allocation27_spill] sm:$0xff] %v17198_v38  ;;  %v17213_v44 = vrot.slane %v8243_v15, %v20655_v34  ;;  %v8291_v15 = vcombine.low %v17188_v30, %v17190_v58  ;;  %v8198_v30 = vld [vmem:[#allocation5 + $0x318] sm:$0xff]  ;;  %v8200_v58 = vld [vmem:[#allocation5 + $0x328] sm:$0xff] }
 0x64c   : > { %7496 = vrot.lane.b32.xlu1 %v17008_v41, %s12500_s21  ;;  %v17259_v55 = vrot.slane %v8275_v24, %v20655_v34  ;;  %v10331_v26 = vcombine.low %v8206_v53, %v8210_v35  ;;  %v8204_v24 = vld [vmem:[#allocation5 + $0x348] sm:$0xff]  ;;  %v10299_v38 = vcombine.low %v8198_v30, %v8202_v27  ;;  %v8195_v30 = vld [vmem:[#allocation5 + $0x300] sm:$0xff]  ;;  %v8205_v27 = vld [vmem:[#allocation5 + $0x350] sm:$0xff] }
 0x64d   : > { %v17269_v6 = vrot.slane %v8291_v15, %v20655_v34  ;;  %v8196_v53 = vld [vmem:[#allocation5 + $0x308] sm:$0xff]  ;;  %v10315_v35 = vcombine.low %v8204_v24, %v8208_v62  ;;  %v8203_v15 = vld [vmem:[#allocation5 + $0x340] sm:$0xff]  ;;  %v9059_v63 = vcombine.low %v8195_v30, %v8199_v59  ;;  %v9107_v14 = vcombine.low %v8205_v27, %v8209_v29 }
 0x64e   : > { %v10283_v8 = vcombine.low %v8196_v53, %v8200_v58  ;;  %v9091_v37 = vcombine.low %v8203_v15, %v8207_v39  ;;  %v17292_v62 = vrot.slane %v10331_v26, %v20655_v34  ;;  %v17300_v58 = vrot.slane %v9907_v43, %v20655_v34 }
 0x64f   : > { %7709 = vrot.lane.b32.xlu0 %v16879_v9, %s12500_s21  ;;  %v8339_v45 = vcombine.low %v17259_v55, %v17269_v6  ;;  %v17303_v39 = vrot.slane %v10299_v38, %v20655_v34  ;;  %v17306_v20 = vrot.slane %v10315_v35, %v20655_v34  ;;  %v17309_v26 = vrot.slane %v9075_v42, %v20655_v34 }
 0x650   : > { %7500 = vrot.lane.b32.xlu1 %v17033_v13, %s12500_s21  ;;  %20704 = vst [vmem:[#allocation86_spill] sm:$0xff] %v17292_v62  ;;  %v17312_v59 = vrot.slane %v9091_v37, %v20655_v34  ;;  %v17315_v29 = vrot.slane %v9107_v14, %v20655_v34  ;;  %v17320_v43 = vrot.slane %v9875_v23, %v20655_v34 }
 0x651   : > { %20705 = vst [vmem:[#allocation37_spill] sm:$0xff] %v17303_v39  ;;  %20706 = vst [vmem:[#allocation33_spill] sm:$0xff] %v17306_v20  ;;  %v10379_v37 = vcombine.low %v17306_v20, %v17292_v62  ;;  %v17334_v42 = vrot.slane %v9059_v63, %v20655_v34  ;;  %v9531_v24 = vcombine.low %v17264_v50, %v17276_v52 }
 0x652   : > { %20707 = vst [vmem:[#allocation92_spill] sm:$0xff] %v17309_v26  ;;  %20708 = vst [vmem:[#allocation79_spill] sm:$0xff] %v17312_v59  ;;  %v9155_v23 = vcombine.low %v17312_v59, %v17315_v29  ;;  %v20713_v15 = vcombine.low %v17213_v44, %v17193_v22 }
 0x653   : > { %7713 = vrot.lane.b32.xlu0 %v16890_v12, %s12500_s21  ;;  %v9499_v12 = vcombine.low %v17261_v5, %v17236_v61  ;;  %v17285_v5 = vrot.slane %v9923_v48, %v20655_v34  ;;  %20709 = vst [vmem:[#allocation85_spill] sm:$0xff] %v17315_v29  ;;  %20711 = vst [vmem:[#allocation75_spill] sm:$0xff] %v17334_v42  ;;  %v9123_v35 = vcombine.low %v17334_v42, %v17309_v26  ;;  %v20739_v42 = vld [vmem:[#allocation40_spill] sm:$0xff]  ;;  %v20740_v26 = vld [vmem:[#allocation126_spill] sm:$0xff] }
 0x654   : > { %7504 = vrot.lane.b32.xlu1 %v17054_v17, %s12500_s21  ;;  %v17353_v30 = vrot.slane %v20713_v15, %v20656_v10  ;;  %v17366_v14 = vrot.slane %v10379_v37, %v20656_v10  ;;  %v17372_v15 = vrot.slane %v9531_v24, %v20656_v10  ;;  %v8668_v20 = vcombine.high %v20740_v26, %v20739_v42 }
 0x655   : > { %v17297_v48 = vrot.slane %v9499_v12, %v20655_v34  ;;  %v9971_v38 = vcombine.low %v17300_v58, %v17285_v5  ;;  %v17325_v12 = vrot.slane %v10283_v8, %v20655_v34  ;;  %v17341_v8 = vrot.slane %v8339_v45, %v20656_v10 }
 0x656   : > { %20714 = vst [vmem:[#allocation108_spill] sm:$0xff] %v17353_v30  ;;  %20717 = vst [vmem:[#allocation23_spill] sm:$0xff] %v17366_v14  ;;  %v17369_v45 = vrot.slane %v9155_v23, %v20656_v10  ;;  %v8682_v42 = vrot.slane %v8668_v20, %v20655_v34  ;;  %v20755_v14 = vld [vmem:[#allocation130_spill] sm:$0xff] }
 0x657   : > { %7717 = vrot.lane.b32.xlu0 %v16901_v2, %s12500_s21  ;;  %v9563_v49 = vcombine.low %v17297_v48, %v17282_v57  ;;  %20710 = vst [vmem:[#allocation95_spill] sm:$0xff] %v17325_v12  ;;  %20712 = vst [vmem:[#allocation129_spill] sm:$0xff] %v17341_v8  ;;  %v10347_v53 = vcombine.low %v17325_v12, %v17303_v39  ;;  %v17363_v63 = vrot.slane %v9971_v38, %v20656_v10  ;;  %v20735_v38 = vld [vmem:[#allocation72_spill] sm:$0xff]  ;;  %v20751_v12 = vld [vmem:[#allocation134_spill] sm:$0xff] }
 0x658   : > { %7508 = vrot.lane.b32.xlu1 %v17075_v21, %s12500_s21  ;;  %20718 = vst [vmem:[#allocation24_spill] sm:$0xff] %v17369_v45  ;;  %20719 = vst [vmem:[#allocation115_spill] sm:$0xff] %v17372_v15 }
 0x659   : > { %v17356_v27 = vrot.slane %v9563_v49, %v20656_v10  ;;  %20716 = vst [vmem:[#allocation123_spill] sm:$0xff] %v17363_v63  ;;  %v17378_v59 = vrot.slane %v10347_v53, %v20656_v10 }
 0x65b   : > { %7721 = vrot.lane.b32.xlu0 %v16913_v40, %s12500_s21  ;;  %v9939_v40 = vcombine.low %v17320_v43, %v17279_v47  ;;  %20715 = vst [vmem:[#allocation19_spill] sm:$0xff] %v17356_v27  ;;  %20721 = vst [vmem:[#allocation51_spill] sm:$0xff] %v17378_v59  ;;  %v20753_v59 = vld [vmem:[#allocation48_spill] sm:$0xff] }
 0x65c   : > { %7512 = vrot.lane.b32.xlu1 %v17095_v11, %s12500_s21 }
 0x65d   : > { %v17375_v49 = vrot.slane %v9939_v40, %v20656_v10 }
 0x65f   : > { %7725 = vrot.lane.b32.xlu0 %v16931_v7, %s12500_s21  ;;  %20720 = vst [vmem:[#allocation50_spill] sm:$0xff] %v17375_v49 }
 0x660   : > { %7581 = vrot.lane.b32.xlu1 %v16923_v3, %s12502_s22  ;;  %v17381_v3 = vrot.slane %v9123_v35, %v20656_v10 }
 0x662   : > { %20722 = vst [vmem:[#allocation57_spill] sm:$0xff] %v17381_v3 }
 0x663   : > { %7733 = vrot.lane.b32.xlu0 %v16989_v25, %s12500_s21 }
 0x664   : > { %7585 = vrot.lane.b32.xlu1 %v16951_v60, %s12502_s22 }
 0x667   : > { %7806 = vrot.lane.b32.xlu0 %v16879_v9, %s12502_s22 }
 0x668   : > { %7589 = vrot.lane.b32.xlu1 %v16981_v54, %s12502_s22 }
 0x66b   : > { %7814 = vrot.lane.b32.xlu0 %v16901_v2, %s12502_s22 }
 0x66c   : > { %7593 = vrot.lane.b32.xlu1 %v17008_v41, %s12502_s22 }
 0x66f   : > { %7822 = vrot.lane.b32.xlu0 %v16931_v7, %s12502_s22 }
 0x670   : > { %7597 = vrot.lane.b32.xlu1 %v17033_v13, %s12502_s22 }
 0x673   : > { %7830 = vrot.lane.b32.xlu0 %v16989_v25, %s12502_s22 }
 0x674   : > { %7601 = vrot.lane.b32.xlu1 %v17054_v17, %s12502_s22 }
 0x677   : > { %7727 = vrot.lane.b32.xlu0 %v17035_v28, %s12500_s21 }
 0x678   : > { %7605 = vrot.lane.b32.xlu1 %v17075_v21, %s12502_s22 }
 0x67b   : > { %7735 = vrot.lane.b32.xlu0 %v17077_v32, %s12500_s21 }
 0x67c   : > { %7609 = vrot.lane.b32.xlu1 %v17095_v11, %s12502_s22 }
 0x67d   : > { %v7483_v9 = vpop.permute.xlu0 %7482 }
 0x67e   : > { %7531 = vst.msk [vmem:[#allocation5 + $0x80] sm:$0xff] %vm1064_vm7, %v7483_v9 }
 0x67f   : > { %7808 = vrot.lane.b32.xlu0 %v16925_v16, %s12502_s22 }
 0x680   : > { %7711 = vrot.lane.b32.xlu1 %v16925_v16, %s12500_s21 }
 0x681   : > { %v7487_v2 = vpop.permute.xlu0 %7486 }
 0x682   : > { %7533 = vst.msk [vmem:[#allocation5 + $0x90] sm:$0xff] %vm1064_vm7, %v7487_v2 }
 0x683   : > { %7816 = vrot.lane.b32.xlu0 %v16983_v46, %s12502_s22 }
 0x684   : > { %7715 = vrot.lane.b32.xlu1 %v16953_v1, %s12500_s21 }
 0x685   : > { %v17487_v2 = vld [vmem:[#allocation5 + $0x80] sm:$0xff] }
 0x686   : > { %20723 = vst [vmem:[#allocation54_spill] sm:$0xff] %v17487_v2 }
 0x687   : > { %7824 = vrot.lane.b32.xlu0 %v17035_v28, %s12502_s22  ;;  %v7491_v7 = vpop.permute.xlu0 %7490 }
 0x688   : > { %7719 = vrot.lane.b32.xlu1 %v16983_v46, %s12500_s21  ;;  %7535 = vst.msk [vmem:[#allocation5 + $0xa0] sm:$0xff] %vm1064_vm7, %v7491_v7 }
 0x68b   : > { %7832 = vrot.lane.b32.xlu0 %v17077_v32, %s12502_s22  ;;  %v7495_v16 = vpop.permute.xlu0 %7494 }
 0x68c   : > { %7723 = vrot.lane.b32.xlu1 %v17010_v31, %s12500_s21  ;;  %7537 = vst.msk [vmem:[#allocation5 + $0xb0] sm:$0xff] %vm1064_vm7, %v7495_v16 }
 0x68f   : > { %7938 = vrot.lane.b32.xlu0 %v16937_v19, %s12500_s21  ;;  %v7499_v60 = vpop.permute.xlu0 %7498  ;;  %v17479_v32 = vld [vmem:[#allocation5 + $0xa0] sm:$0xff] }
 0x690   : > { %7731 = vrot.lane.b32.xlu1 %v17056_v36, %s12500_s21  ;;  %7539 = vst.msk [vmem:[#allocation5 + $0xc0] sm:$0xff] %vm1064_vm7, %v7499_v60 }
 0x692   : > { %v7730_v46 = vpop.permute.xlu1 %7729 }
 0x693   : > { %7946 = vrot.lane.b32.xlu0 %v16995_v51, %s12500_s21  ;;  %v7503_v54 = vpop.permute.xlu0 %7502  ;;  %7768 = vst.msk [vmem:[#allocation5 + $0x250] sm:$0xff] %vm1064_vm7, %v7730_v46  ;;  %v17467_v17 = vld [vmem:[#allocation5 + $0xb0] sm:$0xff] }
 0x694   : > { %7739 = vrot.lane.b32.xlu1 %v17097_v33, %s12500_s21  ;;  %7541 = vst.msk [vmem:[#allocation5 + $0xd0] sm:$0xff] %vm1064_vm7, %v7503_v54  ;;  %v20724_v54 = vld [vmem:[#allocation132_spill] sm:$0xff] }
 0x695   : > { %v20725_v46 = vld [vmem:[#allocation64_spill] sm:$0xff] }
 0x697   : > { %7954 = vrot.lane.b32.xlu0 %v17043_v0, %s12500_s21 }
 0x698   : > { %7812 = vrot.lane.b32.xlu1 %v16953_v1, %s12502_s22  ;;  %v7507_v25 = vpop.permute.xlu0 %7506 }
 0x699   : > { %7543 = vst.msk [vmem:[#allocation5 + $0xe0] sm:$0xff] %vm1064_vm7, %v7507_v25 }
 0x69b   : > { %7962 = vrot.lane.b32.xlu0 %v17085_v56, %s12500_s21  ;;  %v17489_v7 = vld [vmem:[#allocation5 + $0xd0] sm:$0xff] }
 0x69c   : > { %7820 = vrot.lane.b32.xlu1 %v17010_v31, %s12502_s22  ;;  %v17477_v31 = vld [vmem:[#allocation5 + $0x90] sm:$0xff] }
 0x69d   : > { %v7511_v41 = vpop.permute.xlu0 %7510  ;;  %v8395_v11 = vcombine.low %v17477_v31, %v17467_v17 }
 0x69e   : > { %v7738_v13 = vpop.permute.xlu1 %7737  ;;  %7545 = vst.msk [vmem:[#allocation5 + $0xf0] sm:$0xff] %vm1064_vm7, %v7511_v41 }
 0x69f   : > { %7772 = vst.msk [vmem:[#allocation5 + $0x270] sm:$0xff] %vm1064_vm7, %v7738_v13  ;;  %7936 = vrot.lane.b32.xlu0 %v16927_v4, %s12500_s21  ;;  %v17504_v25 = vrot.slane %v8395_v11, %v20655_v34  ;;  %v20728_v11 = vld [vmem:[#allocation100_spill] sm:$0xff] }
 0x6a0   : > { %7828 = vrot.lane.b32.xlu1 %v17056_v36, %s12502_s22  ;;  %v17469_v21 = vld [vmem:[#allocation5 + $0xe0] sm:$0xff] }
 0x6a1   : > { %v7580_v1 = vpop.permute.xlu0 %7579  ;;  %v17481_v36 = vld [vmem:[#allocation5 + $0xc0] sm:$0xff]  ;;  %20726 = vst [vmem:[#allocation116_spill] sm:$0xff] %v17504_v25 }
 0x6a2   : > { %v7811_v28 = vpop.permute.xlu1 %7810  ;;  %7628 = vst.msk [vmem:[#allocation5 + $0x100] sm:$0xff] %vm1064_vm7, %v7580_v1  ;;  %v8411_v53 = vcombine.low %v17481_v36, %v17469_v21 }
 0x6a3   : > { %7857 = vst.msk [vmem:[#allocation5 + $0x290] sm:$0xff] %vm1064_vm7, %v7811_v28  ;;  %7944 = vrot.lane.b32.xlu0 %v16985_v18, %s12500_s21 }
 0x6a4   : > { %7836 = vrot.lane.b32.xlu1 %v17097_v33, %s12502_s22  ;;  %v8379_v33 = vcombine.low %v17487_v2, %v17479_v32  ;;  %v17507_v41 = vrot.slane %v8411_v53, %v20655_v34  ;;  %v20729_v53 = vld [vmem:[#allocation99_spill] sm:$0xff] }
 0x6a5   : > { %v7584_v35 = vpop.permute.xlu0 %7583  ;;  %v17491_v16 = vld [vmem:[#allocation5 + $0xf0] sm:$0xff] }
 0x6a6   : > { %v7819_v9 = vpop.permute.xlu1 %7818  ;;  %7630 = vst.msk [vmem:[#allocation5 + $0x110] sm:$0xff] %vm1064_vm7, %v7584_v35  ;;  %v8427_v60 = vcombine.low %v17489_v7, %v17491_v16  ;;  %v17515_v35 = vrot.slane %v8379_v33, %v20655_v34 }
 0x6a7   : > { %7861 = vst.msk [vmem:[#allocation5 + $0x2b0] sm:$0xff] %vm1064_vm7, %v7819_v9  ;;  %7952 = vrot.lane.b32.xlu0 %v20724_v54, %s12500_s21 }
 0x6a8   : > { %7942 = vrot.lane.b32.xlu1 %v20725_v46, %s12500_s21  ;;  %v17510_v13 = vrot.slane %v8427_v60, %v20655_v34  ;;  %20727 = vst [vmem:[#allocation60_spill] sm:$0xff] %v17515_v35  ;;  %v8443_v60 = vcombine.low %v17515_v35, %v17504_v25  ;;  %v20758_v35 = vld [vmem:[#allocation42_spill] sm:$0xff]  ;;  %v20759_v25 = vld [vmem:[#allocation69_spill] sm:$0xff] }
 0x6a9   : > { %v7588_v1 = vpop.permute.xlu0 %7587 }
 0x6aa   : > { %v7827_v28 = vpop.permute.xlu1 %7826  ;;  %7632 = vst.msk [vmem:[#allocation5 + $0x120] sm:$0xff] %vm1064_vm7, %v7588_v1  ;;  %v8475_v9 = vcombine.low %v17507_v41, %v17510_v13  ;;  %v20731_v1 = vld [vmem:[#allocation80_spill] sm:$0xff] }
 0x6ab   : > { %7865 = vst.msk [vmem:[#allocation5 + $0x2d0] sm:$0xff] %vm1064_vm7, %v7827_v28  ;;  %7960 = vrot.lane.b32.xlu0 %v20728_v11, %s12500_s21  ;;  %v17535_v28 = vrot.slane %v8443_v60, %v20656_v10  ;;  %v20734_v60 = vld [vmem:[#allocation131_spill] sm:$0xff] }
 0x6ac   : > { %7950 = vrot.lane.b32.xlu1 %v20729_v53, %s12500_s21  ;;  %v17528_v33 = vrot.slane %v8475_v9, %v20656_v10 }
 0x6ad   : > { %v7592_v24 = vpop.permute.xlu0 %7591  ;;  %20732 = vst [vmem:[#allocation35_spill] sm:$0xff] %v17535_v28  ;;  %v17581_v20 = vld [vmem:[#allocation5 + $0x110] sm:$0xff]  ;;  %v17593_v28 = vld [vmem:[#allocation5 + $0x100] sm:$0xff] }
 0x6ae   : > { %v7835_v40 = vpop.permute.xlu1 %7834  ;;  %7634 = vst.msk [vmem:[#allocation5 + $0x130] sm:$0xff] %vm1064_vm7, %v7592_v24  ;;  %20730 = vst [vmem:[#allocation61_spill] sm:$0xff] %v17528_v33  ;;  %v20737_v24 = vld [vmem:[#allocation8_spill] sm:$0xff] }
 0x6af   : > { %7869 = vst.msk [vmem:[#allocation5 + $0x2f0] sm:$0xff] %vm1064_vm7, %v7835_v40  ;;  %8035 = vrot.lane.b32.xlu0 %v16937_v19, %s12502_s22  ;;  %v20733_v19 = vld [vmem:[#allocation114_spill] sm:$0xff]  ;;  %20748 = vst [vmem:[#allocation117_spill] sm:$0xff] %v17581_v20 }
 0x6b0   : > { %7958 = vrot.lane.b32.xlu1 %v20731_v1, %s12500_s21  ;;  %20756 = vst [vmem:[#allocation38_spill] sm:$0xff] %v17593_v28 }
 0x6b1   : > { %v7596_v23 = vpop.permute.xlu0 %7595 }
 0x6b2   : > { %v7485_v37 = vpop.permute.xlu1 %7484  ;;  %7636 = vst.msk [vmem:[#allocation5 + $0x140] sm:$0xff] %vm1064_vm7, %v7596_v23  ;;  %v8260_v23 = vcombine.high %v20735_v38, %v20734_v60  ;;  %v20743_v60 = vld [vmem:[#allocation124_spill] sm:$0xff] }
 0x6b3   : > { %7532 = vst.msk [vmem:[#allocation5 + $0x88] sm:$0xff] %vm1064_vm7, %v7485_v37  ;;  %8043 = vrot.lane.b32.xlu0 %v16995_v51, %s12502_s22  ;;  %v20736_v37 = vld [vmem:[#allocation110_spill] sm:$0xff] }
 0x6b4   : > { %7966 = vrot.lane.b32.xlu1 %v20733_v19, %s12500_s21  ;;  %v20738_v51 = vld [vmem:[#allocation90_spill] sm:$0xff]  ;;  %v8274_v38 = vrot.slane %v8260_v23, %v20655_v34 }
 0x6b5   : > { %v7600_v40 = vpop.permute.xlu0 %7599  ;;  %v8244_v29 = vcombine.high %v20738_v51, %v20737_v24  ;;  %v17567_v26 = vld [vmem:[#allocation5 + $0x130] sm:$0xff] }
 0x6b6   : > { %v7489_v9 = vpop.permute.xlu1 %7488  ;;  %7638 = vst.msk [vmem:[#allocation5 + $0x150] sm:$0xff] %vm1064_vm7, %v7600_v40  ;;  %v20741_v40 = vld [vmem:[#allocation46_spill] sm:$0xff]  ;;  %20744 = vst [vmem:[#allocation89_spill] sm:$0xff] %v17567_v26 }
 0x6b7   : > { %7534 = vst.msk [vmem:[#allocation5 + $0x98] sm:$0xff] %vm1064_vm7, %v7489_v9  ;;  %8051 = vrot.lane.b32.xlu0 %v17043_v0, %s12502_s22  ;;  %v20742_v9 = vld [vmem:[#allocation105_spill] sm:$0xff]  ;;  %v8258_v24 = vrot.slane %v8244_v29, %v20655_v34 }
 0x6b8   : > { %7940 = vrot.lane.b32.xlu1 %v20736_v37, %s12500_s21  ;;  %v8652_v0 = vcombine.high %v20742_v9, %v20741_v40  ;;  %v20747_v29 = vld [vmem:[#allocation73_spill] sm:$0xff] }
 0x6b9   : > { %v7604_v3 = vpop.permute.xlu0 %7603  ;;  %v8323_v40 = vcombine.low %v8258_v24, %v8274_v38 }
 0x6ba   : > { %v7493_v45 = vpop.permute.xlu1 %7492  ;;  %7640 = vst.msk [vmem:[#allocation5 + $0x160] sm:$0xff] %vm1064_vm7, %v7604_v3  ;;  %v20746_v3 = vld [vmem:[#allocation31_spill] sm:$0xff]  ;;  %v8666_v9 = vrot.slane %v8652_v0, %v20655_v34  ;;  %v20754_v0 = vld [vmem:[#allocation120_spill] sm:$0xff] }
 0x6bb   : > { %7536 = vst.msk [vmem:[#allocation5 + $0xa8] sm:$0xff] %vm1064_vm7, %v7493_v45  ;;  %8059 = vrot.lane.b32.xlu0 %v17085_v56, %s12502_s22  ;;  %v20745_v45 = vld [vmem:[#allocation25_spill] sm:$0xff]  ;;  %v8308_v56 = vcombine.high %v17213_v44, %v17193_v22  ;;  %v8531_v44 = vcombine.low %v17581_v20, %v17567_v26  ;;  %v20765_v20 = vld [vmem:[#allocation10_spill] sm:$0xff] }
 0x6bc   : > { %7948 = vrot.lane.b32.xlu1 %v20743_v60, %s12500_s21  ;;  %v8716_v23 = vcombine.high %v20746_v3, %v20745_v45  ;;  %v8324_v45 = vcombine.high %v8258_v24, %v8274_v38  ;;  %v20752_v3 = vld [vmem:[#allocation41_spill] sm:$0xff]  ;;  %v8732_v38 = vcombine.high %v8666_v9, %v8682_v42 }
 0x6bd   : > { %v7608_v51 = vpop.permute.xlu0 %7607  ;;  %v8700_v22 = vcombine.high %v20753_v59, %v20752_v3  ;;  %v17607_v24 = vrot.slane %v8308_v56, %v20656_v10 }
 0x6be   : > { %v7497_v62 = vpop.permute.xlu1 %7496  ;;  %7642 = vst.msk [vmem:[#allocation5 + $0x170] sm:$0xff] %vm1064_vm7, %v7608_v51  ;;  %v17583_v51 = vld [vmem:[#allocation5 + $0x120] sm:$0xff] }
 0x6bf   : > { %7538 = vst.msk [vmem:[#allocation5 + $0xb8] sm:$0xff] %vm1064_vm7, %v7497_v62  ;;  %8033 = vrot.lane.b32.xlu0 %v16927_v4, %s12502_s22  ;;  %20749 = vst [vmem:[#allocation127_spill] sm:$0xff] %v17583_v51  ;;  %v20750_v62 = vld [vmem:[#allocation71_spill] sm:$0xff]  ;;  %v8276_v4 = vcombine.high %v20755_v14, %v20754_v0  ;;  %v8515_v59 = vcombine.low %v17593_v28, %v17583_v51  ;;  %v17604_v14 = vrot.slane %v8716_v23, %v20656_v10  ;;  %v17631_v51 = vld [vmem:[#allocation5 + $0x150] sm:$0xff] }
 0x6c0   : > { %7956 = vrot.lane.b32.xlu1 %v20747_v29, %s12500_s21  ;;  %v8292_v39 = vcombine.high %v20751_v12, %v20750_v62  ;;  %v8684_v29 = vcombine.high %v20759_v25, %v20758_v35  ;;  %v8731_v12 = vcombine.low %v8666_v9, %v8682_v42  ;;  %v17610_v62 = vrot.slane %v8323_v40, %v20656_v10  ;;  %v20760_v25 = vld [vmem:[#allocation111_spill] sm:$0xff]  ;;  %v20762_v40 = vld [vmem:[#allocation122_spill] sm:$0xff] }
 0x6c1   : > { %v7710_v49 = vpop.permute.xlu0 %7709  ;;  %v17595_v33 = vld [vmem:[#allocation5 + $0x160] sm:$0xff]  ;;  %v17620_v35 = vrot.slane %v8324_v45, %v20656_v10  ;;  %v17623_v42 = vrot.slane %v8700_v22, %v20655_v34  ;;  %v8539_v23 = vrot.slane %v8531_v44, %v20655_v34  ;;  %v20764_v45 = vld [vmem:[#allocation101_spill] sm:$0xff]  ;;  %v20766_v44 = vld [vmem:[#allocation7_spill] sm:$0xff] }
 0x6c2   : > { %v7501_v63 = vpop.permute.xlu1 %7500  ;;  %20757 = vst [vmem:[#allocation96_spill] sm:$0xff] %v17595_v33  ;;  %7758 = vst.msk [vmem:[#allocation5 + $0x200] sm:$0xff] %vm1064_vm7, %v7710_v49  ;;  %v17616_v49 = vld [vmem:[#allocation5 + $0x140] sm:$0xff]  ;;  %v8748_v22 = vcombine.high %v20765_v20, %v20764_v45  ;;  %v17638_v26 = vrot.slane %v8684_v29, %v20655_v34  ;;  %v8340_v20 = vcombine.high %v17259_v55, %v17269_v6 }
 0x6c3   : > { %7540 = vst.msk [vmem:[#allocation5 + $0xc8] sm:$0xff] %vm1064_vm7, %v7501_v63  ;;  %8041 = vrot.lane.b32.xlu0 %v16985_v18, %s12502_s22  ;;  %20761 = vst [vmem:[#allocation12_spill] sm:$0xff] %v17616_v49  ;;  %v8306_v63 = vrot.slane %v8292_v39, %v20655_v34  ;;  %v8547_v56 = vcombine.low %v17616_v49, %v17595_v33  ;;  %v8290_v18 = vrot.slane %v8276_v4, %v20655_v34  ;;  %v20763_v9 = vld [vmem:[#allocation26_spill] sm:$0xff]  ;;  %v20768_v33 = vld [vmem:[#allocation44_spill] sm:$0xff] }
 0x6c4   : > { %7964 = vrot.lane.b32.xlu1 %v20760_v25, %s12500_s21  ;;  %v9468_v3 = vcombine.high %v20763_v9, %v20762_v40  ;;  %v20767_v25 = vld [vmem:[#allocation47_spill] sm:$0xff]  ;;  %v20769_v4 = vld [vmem:[#allocation68_spill] sm:$0xff]  ;;  %v8523_v40 = vrot.slane %v8515_v59, %v20655_v34  ;;  %v17652_v29 = vrot.slane %v8731_v12, %v20656_v10  ;;  %v17663_v55 = vrot.slane %v8732_v38, %v20656_v10 }
 0x6c5   : > { %v7714_v0 = vpop.permute.xlu0 %7713  ;;  %v17633_v39 = vld [vmem:[#allocation5 + $0x170] sm:$0xff]  ;;  %v9484_v49 = vcombine.high %v20767_v25, %v20766_v44  ;;  %v9876_v2 = vcombine.high %v20769_v4, %v20768_v33  ;;  %v8355_v33 = vcombine.low %v8290_v18, %v8306_v63  ;;  %v8356_v25 = vcombine.high %v8290_v18, %v8306_v63 }
 0x6c6   : > { %v7505_v28 = vpop.permute.xlu1 %7504  ;;  %7760 = vst.msk [vmem:[#allocation5 + $0x210] sm:$0xff] %vm1064_vm7, %v7714_v0  ;;  %v8563_v9 = vcombine.low %v17631_v51, %v17633_v39  ;;  %20770 = vst [vmem:[#allocation97_spill] sm:$0xff] %v17652_v29  ;;  %v8555_v59 = vrot.slane %v8547_v56, %v20655_v34  ;;  %v8579_v45 = vcombine.low %v8523_v40, %v8539_v23  ;;  %v20802_v29 = vld [vmem:[#allocation73_spill] sm:$0xff] }
 0x6c7   : > { %7542 = vst.msk [vmem:[#allocation5 + $0xd8] sm:$0xff] %vm1064_vm7, %v7505_v28  ;;  %8049 = vrot.lane.b32.xlu0 %v20724_v54, %s12502_s22  ;;  %v8763_v28 = vcombine.low %v17638_v26, %v17623_v42  ;;  %20771 = vst [vmem:[#allocation15_spill] sm:$0xff] %v17663_v55  ;;  %v17666_v54 = vrot.slane %v8748_v22, %v20656_v10  ;;  %v17672_v63 = vrot.slane %v9484_v49, %v20655_v34 }
 0x6c8   : > { %8039 = vrot.lane.b32.xlu1 %v20725_v46, %s12502_s22  ;;  %v8571_v0 = vrot.slane %v8563_v9, %v20655_v34  ;;  %v17669_v46 = vrot.slane %v9468_v3, %v20655_v34  ;;  %v17675_v18 = vrot.slane %v9876_v2, %v20655_v34  ;;  %v8580_v56 = vcombine.high %v8523_v40, %v8539_v23  ;;  %v20775_v40 = vld [vmem:[#allocation27_spill] sm:$0xff] }
 0x6c9   : > { %v7718_v6 = vpop.permute.xlu0 %7717  ;;  %v17680_v4 = vrot.slane %v8340_v20, %v20656_v10  ;;  %v17687_v49 = vrot.slane %v8355_v33, %v20656_v10  ;;  %v17690_v2 = vrot.slane %v8356_v25, %v20656_v10  ;;  %v17693_v3 = vrot.slane %v8763_v28, %v20656_v10 }
 0x6ca   : > { %v7509_v12 = vpop.permute.xlu1 %7508  ;;  %7762 = vst.msk [vmem:[#allocation5 + $0x220] sm:$0xff] %vm1064_vm7, %v7718_v6  ;;  %v8611_v38 = vcombine.low %v8555_v59, %v8571_v0  ;;  %v8612_v44 = vcombine.high %v8555_v59, %v8571_v0  ;;  %v17696_v23 = vrot.slane %v8579_v45, %v20656_v10  ;;  %v8781_v25 = vcombine.low %v17604_v14, %v17666_v54  ;;  %v20777_v0 = vld [vmem:[#allocation45_spill] sm:$0xff] }
 0x6cb   : > { %7544 = vst.msk [vmem:[#allocation5 + $0xe8] sm:$0xff] %vm1064_vm7, %v7509_v12  ;;  %8057 = vrot.lane.b32.xlu0 %v20728_v11, %s12502_s22  ;;  %20772 = vst [vmem:[#allocation39_spill] sm:$0xff] %v17693_v3  ;;  %v20776_v11 = vld [vmem:[#allocation9_spill] sm:$0xff]  ;;  %v9532_v28 = vcombine.high %v17264_v50, %v17276_v52  ;;  %v20782_v52 = vld [vmem:[#allocation63_spill] sm:$0xff] }
 0x6cc   : > { %8047 = vrot.lane.b32.xlu1 %v20729_v53, %s12502_s22  ;;  %20773 = vst [vmem:[#allocation74_spill] sm:$0xff] %v17696_v23  ;;  %v17699_v22 = vrot.slane %v8611_v38, %v20656_v10  ;;  %v8780_v9 = vcombine.high %v20776_v11, %v20775_v40  ;;  %v17704_v53 = vrot.slane %v8612_v44, %v20656_v10  ;;  %v20778_v45 = vld [vmem:[#allocation81_spill] sm:$0xff] }
 0x6cd   : > { %v7722_v20 = vpop.permute.xlu0 %7721  ;;  %v9516_v6 = vcombine.high %v20778_v45, %v20777_v0  ;;  %v8594_v38 = vrot.slane %v8580_v56, %v20656_v10  ;;  %v9547_v56 = vcombine.low %v17669_v46, %v17672_v63 }
 0x6ce   : > { %20774 = vst [vmem:[#allocation112_spill] sm:$0xff] %v17699_v22  ;;  %v7513_v33 = vpop.permute.xlu1 %7512  ;;  %7764 = vst.msk [vmem:[#allocation5 + $0x230] sm:$0xff] %vm1064_vm7, %v7722_v20  ;;  %v8644_v12 = vcombine.high %v17696_v23, %v17699_v22  ;;  %v8764_v20 = vcombine.high %v17638_v26, %v17623_v42  ;;  %v17777_v22 = vld [vmem:[#allocation5 + $0x98] sm:$0xff] }
 0x6cf   : > { %7546 = vst.msk [vmem:[#allocation5 + $0xf8] sm:$0xff] %vm1064_vm7, %v7513_v33  ;;  %v20779_v33 = vld [vmem:[#allocation107_spill] sm:$0xff]  ;;  %v8645_v44 = vcombine.low %v8594_v38, %v17704_v53  ;;  %v17743_v42 = vrot.slane %v9516_v6, %v20655_v34  ;;  %v9940_v6 = vcombine.high %v17320_v43, %v17279_v47  ;;  %v8646_v50 = vcombine.high %v8594_v38, %v17704_v53  ;;  %v17787_v11 = vld [vmem:[#allocation5 + $0xd8] sm:$0xff] }
 0x6d0   : > { %8055 = vrot.lane.b32.xlu1 %v20731_v1, %s12502_s22  ;;  %v9500_v45 = vcombine.high %v20779_v33, %v17236_v61  ;;  %v12130_v59 = vpack.i.bf16 %v8780_v9, %v8644_v12  ;;  %v17752_v33 = vld [vmem:[#allocation5 + $0xb8] sm:$0xff]  ;;  %v17759_v61 = vrot.slane %v9532_v28, %v20656_v10  ;;  %v20781_v9 = vld [vmem:[#allocation30_spill] sm:$0xff]  ;;  %v17772_v12 = vrot.slane %v9547_v56, %v20656_v10 }
 0x6d1   : > { %v7726_v1 = vpop.permute.xlu0 %7725  ;;  %v12140_v28 = vpack.i.bf16 %v8781_v25, %v8645_v44  ;;  %v9619_v43 = vcombine.low %v17777_v22, %v17752_v33 }
 0x6d2   : > { %v7582_v0 = vpop.permute.xlu1 %7581  ;;  %7766 = vst.msk [vmem:[#allocation5 + $0x240] sm:$0xff] %vm1064_vm7, %v7726_v1  ;;  %12131 = vrot.lane.b32.xlu0 %v12130_v59, %s12506_s29  ;;  %v17754_v26 = vld [vmem:[#allocation5 + $0xe8] sm:$0xff]  ;;  %20780 = vst [vmem:[#allocation14_spill] sm:$0xff] %v17759_v61  ;;  %v9892_v1 = vcombine.high %v20782_v52, %v20781_v9  ;;  %v17766_v59 = vrot.slane %v8764_v20, %v20656_v10  ;;  %v9564_v20 = vcombine.high %v17297_v48, %v17282_v57  ;;  %v20785_v9 = vld [vmem:[#allocation29_spill] sm:$0xff] }
 0x6d3   : > { %7629 = vst.msk [vmem:[#allocation5 + $0x108] sm:$0xff] %vm1064_vm7, %v7582_v0  ;;  %v17769_v0 = vrot.slane %v9500_v45, %v20655_v34  ;;  %v17779_v52 = vld [vmem:[#allocation5 + $0xa8] sm:$0xff]  ;;  %v9972_v57 = vcombine.high %v17300_v58, %v17285_v5  ;;  %v9548_v5 = vcombine.high %v17669_v46, %v17672_v63 }
 0x6d4   : > { %8063 = vrot.lane.b32.xlu1 %v20733_v19, %s12502_s22  ;;  %20783 = vst [vmem:[#allocation11_spill] sm:$0xff] %v17766_v59  ;;  %v17781_v19 = vld [vmem:[#allocation5 + $0xc8] sm:$0xff]  ;;  %v17807_v44 = vrot.slane %v9892_v1, %v20655_v34  ;;  %v17822_v1 = vrot.slane %v9940_v6, %v20656_v10  ;;  %v17833_v63 = vrot.slane %v9564_v20, %v20656_v10  ;;  %v17838_v59 = vld [vmem:[#allocation5 + $0x270] sm:$0xff] }
 0x6d5   : > { %v20784_v45 = vld [vmem:[#allocation43_spill] sm:$0xff]  ;;  %v7734_v56 = vpop.permute.xlu0 %7733  ;;  %v9635_v53 = vcombine.low %v17781_v19, %v17754_v26  ;;  %v9579_v25 = vcombine.low %v17769_v0, %v17743_v42  ;;  %v17827_v46 = vld [vmem:[#allocation5 + $0x230] sm:$0xff]  ;;  %v17841_v6 = vrot.slane %v9619_v43, %v20655_v34  ;;  %v17859_v43 = vld [vmem:[#allocation5 + $0x220] sm:$0xff] }
 0x6d6   : > { %v9908_v23 = vcombine.high %v20785_v9, %v20784_v45  ;;  %v7586_v40 = vpop.permute.xlu1 %7585  ;;  %v17789_v47 = vld [vmem:[#allocation5 + $0xf8] sm:$0xff]  ;;  %7770 = vst.msk [vmem:[#allocation5 + $0x260] sm:$0xff] %vm1064_vm7, %v7734_v56  ;;  %12141 = vrot.lane.b32.xlu0 %v12140_v28, %s12504_s25  ;;  %v17802_v48 = vld [vmem:[#allocation5 + $0x88] sm:$0xff]  ;;  %v20787_v9 = vld [vmem:[#allocation58_spill] sm:$0xff]  ;;  %v20789_v56 = vcombine.high %v17604_v14, %v17666_v54 }
 0x6d7   : > { %7631 = vst.msk [vmem:[#allocation5 + $0x118] sm:$0xff] %vm1064_vm7, %v7586_v40  ;;  %v9651_v38 = vcombine.low %v17787_v11, %v17789_v47  ;;  %v20786_v45 = vld [vmem:[#allocation67_spill] sm:$0xff]  ;;  %v9603_v58 = vcombine.low %v17802_v48, %v17779_v52  ;;  %20788 = vst [vmem:[#allocation91_spill] sm:$0xff] %v17822_v1  ;;  %v17844_v14 = vrot.slane %v9635_v53, %v20655_v34  ;;  %v17857_v20 = vld [vmem:[#allocation5 + $0x210] sm:$0xff] }
 0x6d8   : > { %v9924_v3 = vcombine.high %v20787_v9, %v20786_v45  ;;  %8037 = vrot.lane.b32.xlu1 %v20736_v37, %s12502_s22  ;;  %v12150_v45 = vpack.i.bf16 %v20789_v56, %v8646_v50  ;;  %20790 = vst [vmem:[#allocation94_spill] sm:$0xff] %v17827_v46  ;;  %20791 = vst [vmem:[#allocation98_spill] sm:$0xff] %v17833_v63  ;;  %v17836_v9 = vrot.slane %v9908_v23, %v20655_v34  ;;  %v20807_v61 = vld [vmem:[#allocation35_spill] sm:$0xff] }
 0x6d9   : > { %v17830_v37 = vrot.slane %v9651_v38, %v20655_v34  ;;  %v7807_v40 = vpop.permute.xlu0 %7806  ;;  %20792 = vst [vmem:[#allocation102_spill] sm:$0xff] %v17844_v14  ;;  %v17847_v54 = vrot.slane %v9579_v25, %v20656_v10  ;;  %v17850_v50 = vrot.slane %v9972_v57, %v20656_v10  ;;  %v8428_v23 = vcombine.high %v17489_v7, %v17491_v16  ;;  %v17871_v38 = vld [vmem:[#allocation5 + $0x250] sm:$0xff]  ;;  %v17894_v55 = vld [vmem:[#allocation5 + $0x240] sm:$0xff] }
 0x6da   : > { %v7590_v28 = vpop.permute.xlu1 %7589  ;;  %7855 = vst.msk [vmem:[#allocation5 + $0x280] sm:$0xff] %vm1064_vm7, %v7807_v40  ;;  %12151 = vrot.lane.b32.xlu0 %v12150_v45, %s12508_s9  ;;  %20795 = vst [vmem:[#allocation87_spill] sm:$0xff] %v17857_v20  ;;  %v17862_v53 = vrot.slane %v9924_v3, %v20655_v34  ;;  %v17867_v57 = vrot.slane %v9548_v5, %v20656_v10  ;;  %v8803_v7 = vcombine.low %v17857_v20, %v17827_v46 }
 0x6db   : > { %20793 = vst [vmem:[#allocation78_spill] sm:$0xff] %v17847_v54  ;;  %20794 = vst [vmem:[#allocation77_spill] sm:$0xff] %v17850_v50  ;;  %v17878_v3 = vrot.slane %v9603_v58, %v20655_v34  ;;  %v9699_v40 = vcombine.low %v17844_v14, %v17830_v37  ;;  %v8396_v5 = vcombine.high %v17477_v31, %v17467_v17  ;;  %v20804_v31 = vld [vmem:[#allocation60_spill] sm:$0xff] }
 0x6dc   : > { %7633 = vst.msk [vmem:[#allocation5 + $0x128] sm:$0xff] %vm1064_vm7, %v7590_v28  ;;  %20796 = vst [vmem:[#allocation76_spill] sm:$0xff] %v17859_v43  ;;  %8045 = vrot.lane.b32.xlu1 %v20743_v60, %s12502_s22  ;;  %v8412_v60 = vcombine.high %v17481_v36, %v17469_v21  ;;  %v17886_v28 = vld [vmem:[#allocation5 + $0x200] sm:$0xff]  ;;  %v8835_v56 = vcombine.low %v17871_v38, %v17838_v59  ;;  %v8476_v25 = vcombine.high %v17507_v41, %v17510_v13 }
 0x6dd   : > { %20797 = vst [vmem:[#allocation70_spill] sm:$0xff] %v17867_v57  ;;  %20798 = vst [vmem:[#allocation6_spill] sm:$0xff] %v17886_v28  ;;  %v7815_v16 = vpop.permute.xlu0 %7814  ;;  %v17896_v27 = vld [vmem:[#allocation5 + $0x260] sm:$0xff]  ;;  %v8787_v17 = vcombine.low %v17886_v28, %v17859_v43  ;;  %v9667_v21 = vcombine.low %v17878_v3, %v17841_v6  ;;  %v8442_v13 = vrot.slane %v8428_v23, %v20655_v34  ;;  %v20803_v28 = vld [vmem:[#allocation116_spill] sm:$0xff] }
 0x6de   : > { %v7594_v58 = vpop.permute.xlu1 %7593  ;;  %20799 = vst [vmem:[#allocation104_spill] sm:$0xff] %v17894_v55  ;;  %20800 = vst [vmem:[#allocation49_spill] sm:$0xff] %v17896_v27  ;;  %v20801_v36 = vld [vmem:[#allocation54_spill] sm:$0xff]  ;;  %v8819_v45 = vcombine.low %v17894_v55, %v17896_v27  ;;  %v8444_v63 = vcombine.high %v20804_v31, %v20803_v28  ;;  %v8410_v23 = vrot.slane %v8396_v5, %v20655_v34 }
 0x6df   : > { %7859 = vst.msk [vmem:[#allocation5 + $0x2a0] sm:$0xff] %vm1064_vm7, %v7815_v16  ;;  %7635 = vst.msk [vmem:[#allocation5 + $0x138] sm:$0xff] %vm1064_vm7, %v7594_v58  ;;  %v8380_v41 = vcombine.high %v20801_v36, %v17479_v32  ;;  %v17918_v16 = vrot.slane %v8803_v7, %v20655_v34  ;;  %v17921_v58 = vrot.slane %v9699_v40, %v20656_v10  ;;  %v20806_v7 = vld [vmem:[#allocation61_spill] sm:$0xff] }
 0x6e0   : > { %8053 = vrot.lane.b32.xlu1 %v20802_v29, %s12502_s22  ;;  %v9987_v32 = vcombine.low %v17836_v9, %v17862_v53  ;;  %v8426_v36 = vrot.slane %v8412_v60, %v20655_v34  ;;  %v17928_v15 = vrot.slane %v8819_v45, %v20655_v34  ;;  %v17931_v29 = vrot.slane %v8835_v56, %v20655_v34 }
 0x6e1   : > { %20805 = vst [vmem:[#allocation28_spill] sm:$0xff] %v17921_v58  ;;  %v7823_v28 = vpop.permute.xlu0 %7822  ;;  %v8508_v43 = vcombine.high %v20807_v61, %v20806_v7  ;;  %v17936_v40 = vrot.slane %v8476_v25, %v20656_v10  ;;  %v17939_v55 = vrot.slane %v8787_v17, %v20655_v34  ;;  %v17942_v5 = vrot.slane %v9667_v21, %v20656_v10  ;;  %v20809_v7 = vld [vmem:[#allocation111_spill] sm:$0xff]  ;;  %v18013_v61 = vld [vmem:[#allocation5 + $0x290] sm:$0xff] }
 0x6e2   : > { %v7598_v31 = vpop.permute.xlu1 %7597  ;;  %7863 = vst.msk [vmem:[#allocation5 + $0x2c0] sm:$0xff] %vm1064_vm7, %v7823_v28  ;;  %v8394_v60 = vrot.slane %v8380_v41, %v20655_v34  ;;  %v8491_v56 = vcombine.low %v8426_v36, %v8442_v13  ;;  %v8883_v45 = vcombine.low %v17928_v15, %v17931_v29  ;;  %v9580_v25 = vcombine.high %v17769_v0, %v17743_v42 }
 0x6e3   : > { %20808 = vst [vmem:[#allocation83_spill] sm:$0xff] %v17942_v5  ;;  %7637 = vst.msk [vmem:[#allocation5 + $0x148] sm:$0xff] %vm1064_vm7, %v7598_v31  ;;  %v8458_v17 = vrot.slane %v8444_v63, %v20656_v10  ;;  %v8851_v21 = vcombine.low %v17939_v55, %v17918_v16  ;;  %v8492_v28 = vcombine.high %v8426_v36, %v8442_v13 }
 0x6e4   : > { %8061 = vrot.lane.b32.xlu1 %v20809_v7, %s12502_s22  ;;  %v8459_v41 = vcombine.low %v8394_v60, %v8410_v23  ;;  %v9956_v42 = vcombine.high %v17675_v18, %v17807_v44  ;;  %v20812_v63 = vcombine.high %v17353_v30, %v17341_v8  ;;  %v17971_v31 = vrot.slane %v8883_v45, %v20656_v10 }
 0x6e5   : > { %v7831_v0 = vpop.permute.xlu0 %7830  ;;  %v8509_v13 = vcombine.low %v8458_v17, %v17936_v40  ;;  %v8460_v20 = vcombine.high %v8394_v60, %v8410_v23  ;;  %v8499_v46 = vrot.slane %v8491_v56, %v20656_v10  ;;  %v9988_v45 = vcombine.high %v17836_v9, %v17862_v53  ;;  %v17987_v23 = vld [vmem:[#allocation5 + $0x280] sm:$0xff]  ;;  %v17989_v60 = vld [vmem:[#allocation5 + $0x2b0] sm:$0xff] }
 0x6e6   : > { %v7602_v7 = vpop.permute.xlu1 %7601  ;;  %v12110_v14 = vpack.i.bf16 %v8508_v43, %v20812_v63  ;;  %v17968_v36 = vld [vmem:[#allocation5 + $0x2a0] sm:$0xff]  ;;  %20813 = vst [vmem:[#allocation59_spill] sm:$0xff] %v17971_v31  ;;  %7867 = vst.msk [vmem:[#allocation5 + $0x2e0] sm:$0xff] %vm1064_vm7, %v7831_v0  ;;  %v20814_v43 = vcombine.low %v17675_v18, %v17807_v44  ;;  %v17992_v56 = vrot.slane %v8851_v21, %v20656_v10 }
 0x6e7   : > { %7639 = vst.msk [vmem:[#allocation5 + $0x158] sm:$0xff] %vm1064_vm7, %v7602_v7  ;;  %v8506_v0 = vrot.slane %v8492_v28, %v20656_v10  ;;  %v17996_v7 = vrot.slane %v9987_v32, %v20656_v10  ;;  %v17999_v18 = vrot.slane %v9580_v25, %v20656_v10  ;;  %v8467_v44 = vrot.slane %v8459_v41, %v20656_v10  ;;  %v18015_v41 = vld [vmem:[#allocation5 + $0x2f0] sm:$0xff] }
 0x6e8   : > { %v17982_v63 = vrot.slane %v20814_v43, %v20656_v10  ;;  %12111 = vrot.lane.b32.xlu1 %v12110_v14, %s12506_s29  ;;  %20815 = vst [vmem:[#allocation128_spill] sm:$0xff] %v17992_v56  ;;  %v8923_v9 = vcombine.low %v17987_v23, %v17968_v36  ;;  %v18007_v53 = vrot.slane %v9956_v42, %v20656_v10 }
 0x6e9   : > { %20816 = vst [vmem:[#allocation55_spill] sm:$0xff] %v17999_v18  ;;  %v7728_v21 = vpop.permute.xlu0 %7727  ;;  %v20818_v32 = vcombine.low %v17607_v24, %v17680_v4  ;;  %v8510_v25 = vcombine.high %v8458_v17, %v17936_v40  ;;  %v8474_v8 = vrot.slane %v8460_v20, %v20656_v10  ;;  %v8511_v42 = vcombine.low %v8467_v44, %v8499_v46  ;;  %v18028_v17 = vld [vmem:[#allocation5 + $0x2d0] sm:$0xff] }
 0x6ea   : > { %20817 = vst [vmem:[#allocation52_spill] sm:$0xff] %v18007_v53  ;;  %v7606_v43 = vpop.permute.xlu1 %7605  ;;  %7767 = vst.msk [vmem:[#allocation5 + $0x248] sm:$0xff] %vm1064_vm7, %v7728_v21  ;;  %v8512_v30 = vcombine.high %v8467_v44, %v8499_v46  ;;  %v18025_v40 = vrot.slane %v9988_v45, %v20656_v10  ;;  %v20821_v53 = vld [vmem:[#allocation117_spill] sm:$0xff]  ;;  %v18037_v44 = vrot.slane %v8923_v9, %v20655_v34  ;;  %v18046_v21 = vld [vmem:[#allocation5 + $0x2c0] sm:$0xff] }
 0x6eb   : > { %v12115_v28 = vpack.i.bf16 %v8509_v13, %v20818_v32  ;;  %7641 = vst.msk [vmem:[#allocation5 + $0x168] sm:$0xff] %vm1064_vm7, %v7606_v43  ;;  %v8939_v13 = vcombine.low %v18013_v61, %v17989_v60  ;;  %v8513_v20 = vcombine.low %v8474_v8, %v8506_v0  ;;  %v20820_v32 = vld [vmem:[#allocation89_spill] sm:$0xff]  ;;  %v8971_v45 = vcombine.low %v18028_v17, %v18015_v41  ;;  %v20823_v46 = vld [vmem:[#allocation127_spill] sm:$0xff]  ;;  %v20824_v9 = vld [vmem:[#allocation38_spill] sm:$0xff] }
 0x6ec   : > { %20819 = vst [vmem:[#allocation34_spill] sm:$0xff] %v18025_v40  ;;  %v8532_v14 = vcombine.high %v20821_v53, %v20820_v32  ;;  %v8514_v43 = vcombine.high %v8474_v8, %v8506_v0  ;;  %v20822_v53 = vcombine.high %v17607_v24, %v17680_v4  ;;  %v8516_v27 = vcombine.high %v20824_v9, %v20823_v46 }
 0x6ed   : > { %12116 = vrot.lane.b32.xlu1 %v12115_v28, %s12504_s25  ;;  %v7736_v40 = vpop.permute.xlu0 %7735  ;;  %v18048_v1 = vld [vmem:[#allocation5 + $0x2e0] sm:$0xff]  ;;  %v8564_v54 = vcombine.high %v17631_v51, %v17633_v39  ;;  %v20825_v24 = vcombine.low %v17610_v62, %v17687_v49  ;;  %v20826_v0 = vcombine.high %v17610_v62, %v17687_v49  ;;  %v8947_v46 = vrot.slane %v8939_v13, %v20655_v34  ;;  %v18067_v39 = vld [vmem:[#allocation5 + $0x138] sm:$0xff]  ;;  %v20829_v62 = vld [vmem:[#allocation12_spill] sm:$0xff] }
 0x6ee   : > { %v7610_v50 = vpop.permute.xlu1 %7609  ;;  %v12120_v32 = vpack.i.bf16 %v8510_v25, %v20822_v53  ;;  %7771 = vst.msk [vmem:[#allocation5 + $0x268] sm:$0xff] %vm1064_vm7, %v7736_v40  ;;  %v8955_v51 = vcombine.low %v18046_v21, %v18048_v1  ;;  %v20828_v53 = vld [vmem:[#allocation96_spill] sm:$0xff]  ;;  %v8979_v9 = vrot.slane %v8971_v45, %v20655_v34  ;;  %v18109_v28 = vld [vmem:[#allocation5 + $0x108] sm:$0xff] }
 0x6ef   : > { %7643 = vst.msk [vmem:[#allocation5 + $0x178] sm:$0xff] %vm1064_vm7, %v7610_v50  ;;  %v12125_v4 = vpack.i.bf16 %v8511_v42, %v20825_v24  ;;  %v12135_v25 = vpack.i.bf16 %v8512_v30, %v20826_v0  ;;  %v20827_v50 = vcombine.low %v17620_v35, %v17690_v2  ;;  %v18076_v42 = vrot.slane %v8532_v14, %v20655_v34  ;;  %v18090_v0 = vld [vmem:[#allocation5 + $0x118] sm:$0xff]  ;;  %v18092_v14 = vld [vmem:[#allocation5 + $0x128] sm:$0xff] }
 0x6f0   : > { %v8548_v30 = vcombine.high %v20829_v62, %v20828_v53  ;;  %v8963_v13 = vrot.slane %v8955_v51, %v20655_v34  ;;  %v20830_v24 = vcombine.high %v17620_v35, %v17690_v2  ;;  %v18095_v62 = vrot.slane %v8516_v27, %v20655_v34 }
 0x6f1   : > { %12121 = vrot.lane.b32.xlu1 %v12120_v32, %s12508_s9  ;;  %v18073_v40 = vpack.i.bf16 %v8513_v20, %v20827_v50  ;;  %v8987_v32 = vcombine.low %v18037_v44, %v8947_v46  ;;  %v7809_v50 = vpop.permute.xlu0 %7808  ;;  %v18098_v51 = vrot.slane %v8564_v54, %v20655_v34  ;;  %v9755_v35 = vcombine.low %v18090_v0, %v18067_v39 }
 0x6f2   : > { %v18088_v20 = vpack.i.bf16 %v8514_v43, %v20830_v24  ;;  %v7712_v53 = vpop.permute.xlu1 %7711  ;;  %7856 = vst.msk [vmem:[#allocation5 + $0x288] sm:$0xff] %vm1064_vm7, %v7809_v50  ;;  %v9019_v2 = vcombine.low %v8963_v13, %v8979_v9  ;;  %v8884_v43 = vcombine.high %v17928_v15, %v17931_v29  ;;  %v8988_v27 = vcombine.high %v18037_v44, %v8947_v46  ;;  %v18111_v54 = vld [vmem:[#allocation5 + $0x168] sm:$0xff] }
 0x6f3   : > { %7759 = vst.msk [vmem:[#allocation5 + $0x208] sm:$0xff] %vm1064_vm7, %v7712_v53  ;;  %v9020_v24 = vcombine.high %v8963_v13, %v8979_v9  ;;  %v18115_v49 = vrot.slane %v8548_v30, %v20655_v34  ;;  %v8595_v50 = vcombine.low %v18095_v62, %v18076_v42  ;;  %v9739_v15 = vcombine.low %v18109_v28, %v18092_v14  ;;  %v18134_v30 = vld [vmem:[#allocation5 + $0x148] sm:$0xff]  ;;  %v18155_v53 = vld [vmem:[#allocation5 + $0x158] sm:$0xff] }
 0x6f4   : > { %v18124_v29 = vrot.slane %v8987_v32, %v20656_v10  ;;  %v18127_v44 = vrot.slane %v9019_v2, %v20656_v10  ;;  %v9604_v32 = vcombine.high %v17802_v48, %v17779_v52  ;;  %v18143_v2 = vrot.slane %v9755_v35, %v20655_v34 }
 0x6f5   : > { %12126 = vrot.lane.b32.xlu1 %v12125_v4, %s12505_s26  ;;  %v8852_v4 = vcombine.high %v17939_v55, %v17918_v16  ;;  %v18132_v46 = vrot.slane %v9020_v24, %v20656_v10  ;;  %v7817_v13 = vpop.permute.xlu0 %7816  ;;  %v8627_v45 = vcombine.low %v18115_v49, %v18098_v51  ;;  %v9771_v55 = vcombine.low %v18134_v30, %v18111_v54 }
 0x6f6   : > { %20831 = vst [vmem:[#allocation118_spill] sm:$0xff] %v18124_v29  ;;  %20832 = vst [vmem:[#allocation93_spill] sm:$0xff] %v18127_v44  ;;  %v7716_v9 = vpop.permute.xlu1 %7715  ;;  %v18140_v8 = vld [vmem:[#allocation5 + $0x178] sm:$0xff]  ;;  %v8916_v16 = vcombine.high %v17992_v56, %v17971_v31  ;;  %v9052_v24 = vcombine.high %v18124_v29, %v18127_v44  ;;  %v8898_v52 = vrot.slane %v8884_v43, %v20656_v10  ;;  %v20880_v29 = vld [vmem:[#allocation70_spill] sm:$0xff] }
 0x6f7   : > { %7860 = vst.msk [vmem:[#allocation5 + $0x2a8] sm:$0xff] %vm1064_vm7, %v7817_v13  ;;  %7761 = vst.msk [vmem:[#allocation5 + $0x218] sm:$0xff] %vm1064_vm7, %v7716_v9  ;;  %v9002_v48 = vrot.slane %v8988_v27, %v20656_v10  ;;  %v18159_v35 = vrot.slane %v8595_v50, %v20656_v10  ;;  %v9620_v13 = vcombine.high %v17777_v22, %v17752_v33 }
 0x6f8   : > { %v18164_v9 = vrot.slane %v9739_v15, %v20655_v34  ;;  %v9787_v31 = vcombine.low %v18155_v53, %v18140_v8  ;;  %v12165_v56 = vpack.i.bf16 %v9052_v24, %v8916_v16  ;;  %v8866_v43 = vrot.slane %v8852_v4, %v20656_v10 }
 0x6f9   : > { %12136 = vrot.lane.b32.xlu1 %v12135_v25, %s12509_s10  ;;  %v9053_v27 = vcombine.low %v9002_v48, %v18132_v46  ;;  %v9652_v25 = vcombine.high %v17787_v11, %v17789_v47  ;;  %v7825_v18 = vpop.permute.xlu0 %7824  ;;  %v18173_v57 = vrot.slane %v8627_v45, %v20656_v10  ;;  %v18176_v22 = vrot.slane %v9771_v55, %v20655_v34 }
 0x6fa   : > { %v7720_v50 = vpop.permute.xlu1 %7719  ;;  %v18179_v33 = vrot.slane %v9787_v31, %v20655_v34  ;;  %v9803_v15 = vcombine.low %v18164_v9, %v18143_v2  ;;  %7864 = vst.msk [vmem:[#allocation5 + $0x2c8] sm:$0xff] %vm1064_vm7, %v7825_v18  ;;  %12166 = vrot.lane.b32.xlu0 %v12165_v56, %s12506_s29  ;;  %v8917_v11 = vcombine.low %v8866_v43, %v8898_v52 }
 0x6fb   : > { %7763 = vst.msk [vmem:[#allocation5 + $0x228] sm:$0xff] %vm1064_vm7, %v7720_v50  ;;  %v18187_v47 = vrot.slane %v9604_v32, %v20655_v34  ;;  %v9636_v45 = vcombine.high %v17781_v19, %v17754_v26  ;;  %v9668_v18 = vcombine.high %v17878_v3, %v17841_v6  ;;  %v8628_v4 = vcombine.high %v18115_v49, %v18098_v51  ;;  %v20833_v19 = vld [vmem:[#allocation102_spill] sm:$0xff] }
 0x6fc   : > { %v18200_v56 = vrot.slane %v9620_v13, %v20655_v34  ;;  %v9835_v32 = vcombine.low %v18176_v22, %v18179_v33  ;;  %v12175_v55 = vpack.i.bf16 %v9053_v27, %v8917_v11  ;;  %v9054_v26 = vcombine.high %v9002_v48, %v18132_v46  ;;  %v20836_v48 = vld [vmem:[#allocation94_spill] sm:$0xff]  ;;  %v20837_v27 = vld [vmem:[#allocation87_spill] sm:$0xff]  ;;  %v20840_v11 = vld [vmem:[#allocation76_spill] sm:$0xff] }
 0x6fd   : > { %12146 = vrot.lane.b32.xlu1 %v18073_v40, %s12507_s30  ;;  %v9700_v16 = vcombine.high %v20833_v19, %v17830_v37  ;;  %v18208_v40 = vrot.slane %v9652_v25, %v20655_v34  ;;  %v7833_v24 = vpop.permute.xlu0 %7832  ;;  %v8647_v3 = vcombine.low %v18159_v35, %v18173_v57  ;;  %v8956_v49 = vcombine.high %v18046_v21, %v18048_v1  ;;  %v20838_v1 = vld [vmem:[#allocation49_spill] sm:$0xff]  ;;  %v20839_v21 = vld [vmem:[#allocation104_spill] sm:$0xff] }
 0x6fe   : > { %v7724_v6 = vpop.permute.xlu1 %7723  ;;  %v18215_v51 = vrot.slane %v9803_v15, %v20656_v10  ;;  %v18218_v13 = vrot.slane %v9835_v32, %v20656_v10  ;;  %7868 = vst.msk [vmem:[#allocation5 + $0x2e8] sm:$0xff] %vm1064_vm7, %v7833_v24  ;;  %12176 = vrot.lane.b32.xlu0 %v12175_v55, %s12504_s25  ;;  %v8918_v37 = vcombine.high %v8866_v43, %v8898_v52  ;;  %v20841_v32 = vld [vmem:[#allocation6_spill] sm:$0xff] }
 0x6ff   : > { %7765 = vst.msk [vmem:[#allocation5 + $0x238] sm:$0xff] %vm1064_vm7, %v7724_v6  ;;  %v18224_v46 = vrot.slane %v9636_v45, %v20655_v34  ;;  %v8804_v25 = vcombine.high %v20837_v27, %v20836_v48  ;;  %v8820_v50 = vcombine.high %v20839_v21, %v20838_v1  ;;  %v8642_v15 = vrot.slane %v8628_v4, %v20656_v10  ;;  %v20842_v48 = vld [vmem:[#allocation97_spill] sm:$0xff]  ;;  %v20843_v27 = vld [vmem:[#allocation39_spill] sm:$0xff] }
 0x700   : > { %20834 = vst [vmem:[#allocation119_spill] sm:$0xff] %v18215_v51  ;;  %20835 = vst [vmem:[#allocation121_spill] sm:$0xff] %v18218_v13  ;;  %v8788_v19 = vcombine.high %v20841_v32, %v20840_v11  ;;  %v8924_v52 = vcombine.high %v17987_v23, %v17968_v36  ;;  %v12185_v45 = vpack.i.bf16 %v9054_v26, %v8918_v37  ;;  %v20849_v32 = vld [vmem:[#allocation19_spill] sm:$0xff] }
 0x701   : > { %12156 = vrot.lane.b32.xlu1 %v18088_v20, %s12510_s11  ;;  %v9732_v55 = vcombine.high %v17942_v5, %v17921_v58  ;;  %v18242_v24 = vrot.slane %v9700_v16, %v20656_v10  ;;  %v9715_v20 = vcombine.low %v18224_v46, %v18208_v40  ;;  %v7939_v4 = vpop.permute.xlu0 %7938  ;;  %v20844_v1 = vcombine.low %v20842_v48, %v20843_v27 }
 0x702   : > { %v7732_v6 = vpop.permute.xlu1 %7731  ;;  %v8648_v36 = vcombine.high %v18159_v35, %v18173_v57  ;;  %v20845_v23 = vcombine.high %v18095_v62, %v18076_v42  ;;  %v18256_v16 = vrot.slane %v8956_v49, %v20655_v34  ;;  %7986 = vst.msk [vmem:[#allocation5 + $0x388] sm:$0xff] %vm1064_vm7, %v7939_v4  ;;  %12186 = vrot.lane.b32.xlu0 %v12185_v45, %s12508_s9 }
 0x703   : > { %v12160_v21 = vpack.i.bf16 %v20844_v1, %v8647_v3  ;;  %7769 = vst.msk [vmem:[#allocation5 + $0x258] sm:$0xff] %vm1064_vm7, %v7732_v6  ;;  %v9682_v37 = vrot.slane %v9668_v18, %v20656_v10  ;;  %v9683_v3 = vcombine.low %v18187_v47, %v18200_v56  ;;  %v18265_v57 = vrot.slane %v8804_v25, %v20655_v34 }
 0x704   : > { %v8610_v26 = vrot.slane %v20845_v23, %v20656_v10  ;;  %v18268_v42 = vrot.slane %v8820_v50, %v20655_v34  ;;  %v20846_v35 = vcombine.high %v17871_v38, %v17838_v59  ;;  %v18278_v18 = vrot.slane %v8924_v52, %v20655_v34  ;;  %v20848_v50 = vld [vmem:[#allocation115_spill] sm:$0xff] }
 0x705   : > { %12161 = vrot.lane.b32.xlu1 %v12160_v21, %s12505_s26  ;;  %v20847_v25 = vcombine.high %v18028_v17, %v18015_v41  ;;  %v20850_v45 = vcombine.high %v20848_v50, %v20849_v32  ;;  %v9733_v6 = vcombine.low %v9682_v37, %v18242_v24  ;;  %v18291_v1 = vrot.slane %v9715_v20, %v20656_v10  ;;  %v7947_v38 = vpop.permute.xlu0 %7946  ;;  %v18361_v50 = vld [vmem:[#allocation5 + $0x268] sm:$0xff]  ;;  %v18377_v32 = vld [vmem:[#allocation5 + $0x218] sm:$0xff] }
 0x706   : > { %v8649_v62 = vcombine.low %v8610_v26, %v8642_v15  ;;  %v18275_v49 = vrot.slane %v20846_v35, %v20655_v34  ;;  %v18294_v59 = vrot.slane %v8788_v19, %v20655_v34  ;;  %v7740_v52 = vpop.permute.xlu1 %7739  ;;  %v20851_v21 = vcombine.high %v20842_v48, %v20843_v27  ;;  %7990 = vst.msk [vmem:[#allocation5 + $0x3a8] sm:$0xff] %vm1064_vm7, %v7947_v38  ;;  %v18343_v31 = vld [vmem:[#allocation5 + $0x238] sm:$0xff]  ;;  %v18345_v27 = vld [vmem:[#allocation5 + $0x370] sm:$0xff] }
 0x707   : > { %v18284_v11 = vrot.slane %v20847_v25, %v20655_v34  ;;  %v12215_v4 = vpack.i.bf16 %v9732_v55, %v20850_v45  ;;  %v8650_v17 = vcombine.high %v8610_v26, %v8642_v15  ;;  %v20852_v23 = vcombine.high %v18013_v61, %v17989_v60  ;;  %7773 = vst.msk [vmem:[#allocation5 + $0x278] sm:$0xff] %vm1064_vm7, %v7740_v52  ;;  %v20853_v25 = vld [vmem:[#allocation14_spill] sm:$0xff]  ;;  %v20856_v52 = vld [vmem:[#allocation15_spill] sm:$0xff]  ;;  %v18347_v26 = vld [vmem:[#allocation5 + $0x350] sm:$0xff] }
 0x708   : > { %v12170_v41 = vpack.i.bf16 %v20851_v21, %v8648_v36  ;;  %v9734_v19 = vcombine.high %v9682_v37, %v18242_v24  ;;  %v18312_v48 = vrot.slane %v9683_v3, %v20656_v10  ;;  %v8867_v15 = vcombine.low %v18294_v59, %v18265_v57  ;;  %v18323_v36 = vld [vmem:[#allocation5 + $0x320] sm:$0xff]  ;;  %v18329_v37 = vld [vmem:[#allocation5 + $0x310] sm:$0xff]  ;;  %v20857_v21 = vld [vmem:[#allocation11_spill] sm:$0xff] }
 0x709   : > { %v18303_v55 = vrot.slane %v20852_v23, %v20655_v34  ;;  %v9035_v20 = vcombine.low %v18256_v16, %v18284_v11  ;;  %12216 = vrot.lane.b32.xlu0 %v12215_v4, %s12506_s29  ;;  %v8899_v61 = vcombine.low %v18268_v42, %v18275_v49  ;;  %v18325_v24 = vld [vmem:[#allocation5 + $0x300] sm:$0xff]  ;;  %v18331_v3 = vld [vmem:[#allocation5 + $0x330] sm:$0xff]  ;;  %v7955_v58 = vpop.permute.xlu0 %7954 }
 0x70a   : > { %12171 = vrot.lane.b32.xlu1 %v12170_v41, %s12509_s10  ;;  %v20854_v45 = vld [vmem:[#allocation98_spill] sm:$0xff]  ;;  %v20858_v41 = vcombine.low %v20856_v52, %v20857_v21  ;;  %v9735_v43 = vcombine.low %v18312_v48, %v18291_v1  ;;  %v7813_v5 = vpop.permute.xlu1 %7812  ;;  %7994 = vst.msk [vmem:[#allocation5 + $0x3c8] sm:$0xff] %vm1064_vm7, %v7955_v58  ;;  %v18379_v58 = vld [vmem:[#allocation5 + $0x228] sm:$0xff] }
 0x70b   : > { %v9003_v60 = vcombine.low %v18278_v18, %v18303_v55  ;;  %v20855_v4 = vcombine.low %v20853_v25, %v20854_v45  ;;  %7858 = vst.msk [vmem:[#allocation5 + $0x298] sm:$0xff] %vm1064_vm7, %v7813_v5 }
 0x70c   : > { %v12180_v23 = vpack.i.bf16 %v20858_v41, %v8649_v62  ;;  %v18355_v62 = vrot.slane %v9035_v20, %v20656_v10  ;;  %v8868_v41 = vcombine.high %v18294_v59, %v18265_v57  ;;  %v18370_v20 = vrot.slane %v8867_v15, %v20656_v10 }
 0x70d   : > { %v12220_v38 = vpack.i.bf16 %v9733_v6, %v20855_v4  ;;  %v20859_v6 = vcombine.high %v20856_v52, %v20857_v21  ;;  %v18373_v21 = vrot.slane %v8899_v61, %v20656_v10  ;;  %v9011_v5 = vrot.slane %v9003_v60, %v20656_v10 }
 0x70e   : > { %12181 = vrot.lane.b32.xlu1 %v12180_v23, %s12507_s30  ;;  %v9788_v15 = vcombine.high %v18155_v53, %v18140_v8  ;;  %v10027_v61 = vcombine.low %v18377_v32, %v18343_v31  ;;  %v9740_v60 = vcombine.high %v18109_v28, %v18092_v14  ;;  %v18398_v23 = vld [vmem:[#allocation5 + $0x208] sm:$0xff]  ;;  %v7963_v53 = vpop.permute.xlu0 %7962  ;;  %v20867_v57 = vcombine.high %v18329_v37, %v18331_v3 }
 0x70f   : > { %v12190_v4 = vpack.i.bf16 %v20859_v6, %v8650_v17  ;;  %12221 = vrot.lane.b32.xlu0 %v12220_v38, %s12504_s25  ;;  %v20860_v17 = vcombine.high %v20853_v25, %v20854_v45  ;;  %v9756_v6 = vcombine.high %v18090_v0, %v18067_v39  ;;  %v18387_v25 = vld [vmem:[#allocation5 + $0x248] sm:$0xff]  ;;  %v20861_v39 = vld [vmem:[#allocation78_spill] sm:$0xff]  ;;  %v9836_v38 = vcombine.high %v18176_v22, %v18179_v33  ;;  %v18409_v22 = vld [vmem:[#allocation5 + $0x278] sm:$0xff] }
 0x710   : > { %v20862_v0 = vcombine.low %v17772_v12, %v20861_v39  ;;  %v10043_v8 = vcombine.low %v18387_v25, %v18361_v50  ;;  %v10011_v28 = vcombine.low %v18398_v23, %v18379_v58  ;;  %7998 = vst.msk [vmem:[#allocation5 + $0x3e8] sm:$0xff] %vm1064_vm7, %v7963_v53  ;;  %v8919_v14 = vcombine.low %v18370_v20, %v18373_v21 }
 0x711   : > { %v12225_v52 = vpack.i.bf16 %v9734_v19, %v20860_v17  ;;  %v9036_v19 = vcombine.high %v18256_v16, %v18284_v11  ;;  %v7821_v16 = vpop.permute.xlu1 %7820  ;;  %v9055_v11 = vcombine.low %v9011_v5, %v18355_v62  ;;  %v8900_v17 = vcombine.high %v18268_v42, %v18275_v49 }
 0x712   : > { %v12230_v45 = vpack.i.bf16 %v9735_v43, %v20862_v0  ;;  %v9772_v43 = vcombine.high %v18134_v30, %v18111_v54  ;;  %v18407_v0 = vld [vmem:[#allocation5 + $0x258] sm:$0xff]  ;;  %7862 = vst.msk [vmem:[#allocation5 + $0x2b8] sm:$0xff] %vm1064_vm7, %v7821_v16  ;;  %v9804_v33 = vcombine.high %v18164_v9, %v18143_v2  ;;  %v18421_v54 = vrot.slane %v9756_v6, %v20655_v34 }
 0x713   : > { %12226 = vrot.lane.b32.xlu0 %v12225_v52, %s12508_s9  ;;  %v10059_v30 = vcombine.low %v18407_v0, %v18409_v22  ;;  %12191 = vrot.lane.b32.xlu1 %v12190_v4, %s12510_s11  ;;  %v9004_v42 = vcombine.high %v18278_v18, %v18303_v55  ;;  %v18429_v49 = vrot.slane %v9036_v19, %v20656_v10  ;;  %v7937_v55 = vpop.permute.xlu0 %7936 }
 0x714   : > { %v18432_v52 = vrot.slane %v9788_v15, %v20655_v34  ;;  %v18435_v53 = vrot.slane %v10027_v61, %v20655_v34  ;;  %v9868_v2 = vcombine.high %v18215_v51, %v18218_v13  ;;  %v18440_v9 = vrot.slane %v9836_v38, %v20656_v10  ;;  %7985 = vst.msk [vmem:[#allocation5 + $0x380] sm:$0xff] %vm1064_vm7, %v7937_v55  ;;  %v18543_v51 = vld [vmem:[#allocation5 + $0x2e8] sm:$0xff] }
 0x715   : > { %v18443_v4 = vrot.slane %v10043_v8, %v20655_v34  ;;  %v18446_v18 = vrot.slane %v10059_v30, %v20655_v34  ;;  %v7829_v6 = vpop.permute.xlu1 %7828  ;;  %v12195_v19 = vpack.i.bf16 %v9055_v11, %v8919_v14  ;;  %v9056_v15 = vcombine.high %v9011_v5, %v18355_v62  ;;  %v20864_v14 = vld [vmem:[#allocation123_spill] sm:$0xff] }
 0x716   : > { %v18450_v61 = vrot.slane %v9772_v43, %v20655_v34  ;;  %v18453_v16 = vrot.slane %v10011_v28, %v20655_v34  ;;  %7866 = vst.msk [vmem:[#allocation5 + $0x2d8] sm:$0xff] %vm1064_vm7, %v7829_v6  ;;  %v9818_v38 = vrot.slane %v9804_v33, %v20656_v10  ;;  %v18460_v8 = vrot.slane %v8900_v17, %v20656_v10  ;;  %v20863_v28 = vld [vmem:[#allocation50_spill] sm:$0xff] }
 0x717   : > { %12231 = vrot.lane.b32.xlu0 %v12230_v45, %s12505_s26  ;;  %v18463_v11 = vrot.slane %v9740_v60, %v20655_v34  ;;  %v10107_v62 = vcombine.low %v18443_v4, %v18446_v18  ;;  %12196 = vrot.lane.b32.xlu1 %v12195_v19, %s12505_s26  ;;  %v8920_v5 = vcombine.high %v18370_v20, %v18373_v21  ;;  %v7945_v21 = vpop.permute.xlu0 %7944 }
 0x718   : > { %v9018_v43 = vrot.slane %v9004_v42, %v20656_v10  ;;  %v9851_v45 = vcombine.low %v18450_v61, %v18432_v52  ;;  %v10075_v17 = vcombine.low %v18453_v16, %v18435_v53  ;;  %v20865_v60 = vcombine.high %v20863_v28, %v20864_v14  ;;  %7989 = vst.msk [vmem:[#allocation5 + $0x3a0] sm:$0xff] %vm1064_vm7, %v7945_v21  ;;  %v18525_v21 = vld [vmem:[#allocation5 + $0x2a8] sm:$0xff] }
 0x719   : > { %v9869_v30 = vcombine.low %v9818_v38, %v18440_v9  ;;  %v8882_v55 = vrot.slane %v8868_v41, %v20656_v10  ;;  %v9684_v20 = vcombine.high %v18187_v47, %v18200_v56  ;;  %v7837_v42 = vpop.permute.xlu1 %7836  ;;  %v12200_v6 = vpack.i.bf16 %v9056_v15, %v8920_v5  ;;  %v18488_v13 = vld [vmem:[#allocation5 + $0x2b8] sm:$0xff]  ;;  %v12480_v41 = vld [vmem:[#allocation5 + $0x360] sm:$0xff] }
 0x71a   : > { %v12235_v33 = vpack.i.bf16 %v20865_v60, %v9868_v2  ;;  %v9057_v19 = vcombine.low %v9018_v43, %v18429_v49  ;;  %v9819_v35 = vcombine.low %v18463_v11, %v18421_v54  ;;  %v18491_v2 = vrot.slane %v10107_v62, %v20656_v10  ;;  %7870 = vst.msk [vmem:[#allocation5 + $0x2f8] sm:$0xff] %vm1064_vm7, %v7837_v42  ;;  %v12481_v15 = vld [vmem:[#allocation5 + $0x340] sm:$0xff]  ;;  %v20871_v42 = vld [vmem:[#allocation77_spill] sm:$0xff] }
 0x71b   : > { %v20866_v47 = vcombine.high %v18325_v24, %v18323_v36  ;;  %v18506_v59 = vrot.slane %v20867_v57, %v20655_v34  ;;  %v9092_v62 = vcombine.high %v12481_v15, %v12480_v41  ;;  %v20868_v5 = vcombine.high %v18347_v26, %v18345_v27  ;;  %12201 = vrot.lane.b32.xlu1 %v12200_v6, %s12509_s10  ;;  %v20870_v26 = vld [vmem:[#allocation91_spill] sm:$0xff] }
 0x71c   : > { %12236 = vrot.lane.b32.xlu0 %v12235_v33, %s12506_s29  ;;  %v8921_v36 = vcombine.low %v8882_v55, %v18460_v8  ;;  %v18517_v24 = vrot.slane %v9851_v45, %v20656_v10  ;;  %v20869_v37 = vcombine.high %v18224_v46, %v18208_v40  ;;  %v18523_v33 = vld [vmem:[#allocation5 + $0x298] sm:$0xff]  ;;  %v18528_v27 = vrot.slane %v10075_v17, %v20656_v10  ;;  %v7953_v40 = vpop.permute.xlu0 %7952  ;;  %v18541_v17 = vld [vmem:[#allocation5 + $0x288] sm:$0xff] }
 0x71d   : > { %v18500_v56 = vrot.slane %v20866_v47, %v20655_v34  ;;  %v18512_v60 = vrot.slane %v20868_v5, %v20655_v34  ;;  %v20872_v6 = vcombine.low %v20870_v26, %v20871_v42  ;;  %v9870_v57 = vcombine.high %v9818_v38, %v18440_v9  ;;  %v7943_v46 = vpop.permute.xlu1 %7942  ;;  %7993 = vst.msk [vmem:[#allocation5 + $0x3c0] sm:$0xff] %vm1064_vm7, %v7953_v40  ;;  %v20874_v40 = vld [vmem:[#allocation34_spill] sm:$0xff] }
 0x71e   : > { %v9730_v3 = vrot.slane %v20869_v37, %v20656_v10  ;;  %v9698_v45 = vrot.slane %v9684_v20, %v20656_v10  ;;  %v10163_v41 = vcombine.low %v18523_v33, %v18488_v13  ;;  %v12205_v15 = vpack.i.bf16 %v9057_v19, %v8921_v36  ;;  %7988 = vst.msk [vmem:[#allocation5 + $0x398] sm:$0xff] %vm1064_vm7, %v7943_v46  ;;  %v8188_v36 = vld [vmem:[#allocation5 + $0x2c8] sm:$0xff]  ;;  %v20875_v46 = vld [vmem:[#allocation52_spill] sm:$0xff] }
 0x71f   : > { %v12245_v47 = vpack.i.bf16 %v20872_v6, %v9869_v30  ;;  %v9058_v5 = vcombine.high %v9018_v43, %v18429_v49  ;;  %v18539_v37 = vrot.slane %v9819_v35, %v20656_v10  ;;  %v9736_v38 = vcombine.high %v18312_v48, %v18291_v1 }
 0x720   : > { %v10147_v35 = vcombine.low %v18541_v17, %v18525_v21  ;;  %v18555_v49 = vrot.slane %v9092_v62, %v20655_v34  ;;  %v9139_v43 = vcombine.low %v18500_v56, %v18506_v59  ;;  %12206 = vrot.lane.b32.xlu1 %v12205_v15, %s12507_s30  ;;  %v8922_v30 = vcombine.high %v8882_v55, %v18460_v8  ;;  %v7961_v15 = vpop.permute.xlu0 %7960  ;;  %v8190_v55 = vld [vmem:[#allocation5 + $0x2d8] sm:$0xff] }
 0x721   : > { %12246 = vrot.lane.b32.xlu0 %v12245_v47, %s12504_s25  ;;  %v9871_v20 = vcombine.low %v18539_v37, %v18517_v24  ;;  %v9737_v19 = vcombine.low %v9698_v45, %v9730_v3  ;;  %v9738_v6 = vcombine.high %v9698_v45, %v9730_v3  ;;  %v20873_v1 = vcombine.high %v20870_v26, %v20871_v42  ;;  %v7951_v14 = vpop.permute.xlu1 %7950  ;;  %v8194_v28 = vld [vmem:[#allocation5 + $0x2f8] sm:$0xff]  ;;  %v20876_v3 = vld [vmem:[#allocation23_spill] sm:$0xff] }
 0x722   : > { %v10171_v62 = vrot.slane %v10163_v41, %v20655_v34  ;;  %v10179_v47 = vcombine.low %v8188_v36, %v18543_v51  ;;  %v12210_v8 = vpack.i.bf16 %v9058_v5, %v8922_v30  ;;  %v20877_v45 = vld [vmem:[#allocation51_spill] sm:$0xff]  ;;  %v9171_v26 = vcombine.low %v18555_v49, %v18512_v60  ;;  %7997 = vst.msk [vmem:[#allocation5 + $0x3e0] sm:$0xff] %vm1064_vm7, %v7961_v15 }
 0x723   : > { %v12255_v48 = vpack.i.bf16 %v20873_v1, %v9870_v57  ;;  %7992 = vst.msk [vmem:[#allocation5 + $0x3b8] sm:$0xff] %vm1064_vm7, %v7951_v14  ;;  %v20878_v42 = vcombine.high %v17772_v12, %v20861_v39  ;;  %v10155_v41 = vrot.slane %v10147_v35, %v20655_v34  ;;  %v10195_v5 = vcombine.low %v8190_v55, %v8194_v28  ;;  %v20881_v14 = vld [vmem:[#allocation55_spill] sm:$0xff] }
 0x724   : > { %v18584_v30 = vrot.slane %v9139_v43, %v20656_v10  ;;  %12211 = vrot.lane.b32.xlu1 %v12210_v8, %s12510_s11  ;;  %v20879_v1 = vcombine.low %v17982_v63, %v17996_v7  ;;  %v20882_v44 = vcombine.low %v20880_v29, %v20881_v14  ;;  %v20883_v12 = vcombine.high %v20880_v29, %v20881_v14  ;;  %v8036_v9 = vpop.permute.xlu0 %8035 }
 0x725   : > { %12256 = vrot.lane.b32.xlu0 %v12255_v48, %s12508_s9  ;;  %v12240_v57 = vpack.i.bf16 %v9736_v38, %v20878_v42  ;;  %v9820_v38 = vcombine.high %v18463_v11, %v18421_v54  ;;  %v10187_v35 = vrot.slane %v10179_v47, %v20655_v34  ;;  %v10203_v43 = vrot.slane %v10195_v5, %v20655_v34  ;;  %v18671_v5 = vld [vmem:[#allocation5 + $0x398] sm:$0xff] }
 0x726   : > { %v12265_v15 = vpack.i.bf16 %v20879_v1, %v9871_v20  ;;  %v12250_v48 = vpack.i.bf16 %v9737_v19, %v20882_v44  ;;  %v18596_v39 = vpack.i.bf16 %v9738_v6, %v20883_v12  ;;  %v10211_v8 = vcombine.low %v10155_v41, %v10171_v62  ;;  %v7959_v20 = vpop.permute.xlu1 %7958  ;;  %8083 = vst.msk [vmem:[#allocation5 + $0x408] sm:$0xff] %vm1064_vm7, %v8036_v9 }
 0x727   : > { %v10196_v42 = vcombine.high %v8190_v55, %v8194_v28  ;;  %v10108_v1 = vcombine.high %v18443_v4, %v18446_v18  ;;  %v10044_v44 = vcombine.high %v18387_v25, %v18361_v50  ;;  %v10060_v29 = vcombine.high %v18407_v0, %v18409_v22  ;;  %7996 = vst.msk [vmem:[#allocation5 + $0x3d8] sm:$0xff] %vm1064_vm7, %v7959_v20 }
 0x728   : > { %v10180_v19 = vcombine.high %v8188_v36, %v18543_v51  ;;  %v10243_v28 = vcombine.low %v10187_v35, %v10203_v43  ;;  %v10212_v6 = vcombine.high %v10155_v41, %v10171_v62  ;;  %v10244_v47 = vcombine.high %v10187_v35, %v10203_v43  ;;  %12241 = vrot.lane.b32.xlu1 %v12240_v57, %s12509_s10  ;;  %v18658_v36 = vld [vmem:[#allocation5 + $0x3a8] sm:$0xff] }
 0x729   : > { %12266 = vrot.lane.b32.xlu0 %v12265_v15, %s12505_s26  ;;  %v10164_v4 = vcombine.high %v18523_v33, %v18488_v13  ;;  %v10076_v50 = vcombine.high %v18453_v16, %v18435_v53  ;;  %v9852_v51 = vcombine.high %v18450_v61, %v18432_v52  ;;  %v10028_v25 = vcombine.high %v18377_v32, %v18343_v31  ;;  %v8044_v16 = vpop.permute.xlu0 %8043  ;;  %v18678_v35 = vld [vmem:[#allocation5 + $0x3e8] sm:$0xff] }
 0x72a   : > { %v10148_v0 = vcombine.high %v18541_v17, %v18525_v21  ;;  %v18624_v22 = vrot.slane %v10211_v8, %v20656_v10  ;;  %v18627_v18 = vrot.slane %v10243_v28, %v20656_v10  ;;  %v18630_v13 = vrot.slane %v10244_v47, %v20656_v10  ;;  %v7967_v52 = vpop.permute.xlu1 %7966  ;;  %v18646_v21 = vld [vmem:[#allocation5 + $0x3b8] sm:$0xff]  ;;  %8087 = vst.msk [vmem:[#allocation5 + $0x428] sm:$0xff] %vm1064_vm7, %v8044_v16  ;;  %v18700_v28 = vld [vmem:[#allocation5 + $0x3c8] sm:$0xff] }
 0x72b   : > { %v18633_v53 = vrot.slane %v10196_v42, %v20655_v34  ;;  %v18636_v61 = vrot.slane %v10108_v1, %v20656_v10  ;;  %v10012_v31 = vcombine.high %v18398_v23, %v18379_v58  ;;  %v18641_v32 = vrot.slane %v10060_v29, %v20655_v34  ;;  %8000 = vst.msk [vmem:[#allocation5 + $0x3f8] sm:$0xff] %vm1064_vm7, %v7967_v52 }
 0x72c   : > { %v18644_v33 = vrot.slane %v10180_v19, %v20655_v34  ;;  %v10140_v17 = vcombine.high %v18528_v27, %v18491_v2  ;;  %v10276_v9 = vcombine.high %v18624_v22, %v18627_v18  ;;  %v10226_v58 = vrot.slane %v10212_v6, %v20656_v10  ;;  %12251 = vrot.lane.b32.xlu1 %v12250_v48, %s12507_s30  ;;  %v18676_v48 = vld [vmem:[#allocation5 + $0x388] sm:$0xff] }
 0x72d   : > { %v18656_v23 = vrot.slane %v10164_v4, %v20655_v34  ;;  %v10090_v62 = vrot.slane %v10076_v50, %v20656_v10  ;;  %v18663_v55 = vrot.slane %v10028_v25, %v20655_v34  ;;  %v18666_v57 = vrot.slane %v10044_v44, %v20655_v34  ;;  %v8052_v8 = vpop.permute.xlu0 %8051  ;;  %v20885_v25 = vld [vmem:[#allocation95_spill] sm:$0xff] }
 0x72e   : > { %v18669_v41 = vrot.slane %v10148_v0, %v20655_v34  ;;  %v12270_v15 = vpack.i.bf16 %v10276_v9, %v10140_v17  ;;  %v10277_v14 = vcombine.low %v10226_v58, %v18630_v13  ;;  %v10259_v12 = vcombine.low %v18644_v33, %v18633_v53  ;;  %v7941_v42 = vpop.permute.xlu1 %7940  ;;  %8091 = vst.msk [vmem:[#allocation5 + $0x448] sm:$0xff] %vm1064_vm7, %v8052_v8 }
 0x72f   : > { %v10435_v43 = vcombine.low %v18671_v5, %v18646_v21  ;;  %v9872_v20 = vcombine.high %v18539_v37, %v18517_v24  ;;  %v18685_v1 = vrot.slane %v9852_v51, %v20656_v10  ;;  %v18688_v44 = vrot.slane %v10012_v31, %v20655_v34  ;;  %7987 = vst.msk [vmem:[#allocation5 + $0x390] sm:$0xff] %vm1064_vm7, %v7941_v42  ;;  %v20884_v51 = vld [vmem:[#allocation37_spill] sm:$0xff] }
 0x730   : > { %v10419_v29 = vcombine.low %v18676_v48, %v18658_v36  ;;  %12271 = vrot.lane.b32.xlu0 %v12270_v15, %s12506_s29  ;;  %v10141_v19 = vcombine.low %v10090_v62, %v18636_v61  ;;  %v10123_v24 = vcombine.low %v18666_v57, %v18641_v32  ;;  %v10227_v37 = vcombine.low %v18669_v41, %v18656_v23  ;;  %v18727_v15 = vld [vmem:[#allocation5 + $0x3d8] sm:$0xff] }
 0x731   : > { %12261 = vrot.lane.b32.xlu1 %v18596_v39, %s12510_s11  ;;  %v9834_v47 = vrot.slane %v9820_v38, %v20656_v10  ;;  %v10091_v4 = vcombine.low %v18688_v44, %v18663_v55  ;;  %v10451_v50 = vcombine.low %v18700_v28, %v18678_v35  ;;  %v10348_v0 = vcombine.high %v20885_v25, %v20884_v51  ;;  %v8060_v54 = vpop.permute.xlu0 %8059 }
 0x732   : > { %v12280_v16 = vpack.i.bf16 %v10277_v14, %v10141_v19  ;;  %v10278_v52 = vcombine.high %v10226_v58, %v18630_v13  ;;  %v18718_v31 = vrot.slane %v10259_v12, %v20656_v10  ;;  %v18721_v39 = vrot.slane %v10435_v43, %v20655_v34  ;;  %v7949_v11 = vpop.permute.xlu1 %7948  ;;  %v18729_v8 = vld [vmem:[#allocation5 + $0x3f8] sm:$0xff]  ;;  %8095 = vst.msk [vmem:[#allocation5 + $0x468] sm:$0xff] %vm1064_vm7, %v8060_v54 }
 0x733   : > { %v20886_v38 = vcombine.high %v17982_v63, %v17996_v7  ;;  %v9873_v9 = vcombine.low %v9834_v47, %v18685_v1  ;;  %v18732_v13 = vrot.slane %v10419_v29, %v20655_v34  ;;  %v18738_v58 = vrot.slane %v9171_v26, %v20656_v10  ;;  %7991 = vst.msk [vmem:[#allocation5 + $0x3b0] sm:$0xff] %vm1064_vm7, %v7949_v11 }
 0x734   : > { %12281 = vrot.lane.b32.xlu0 %v12280_v16, %s12504_s25  ;;  %v10142_v63 = vcombine.high %v10090_v62, %v18636_v61  ;;  %v18745_v7 = vrot.slane %v10123_v24, %v20656_v10  ;;  %v18748_v14 = vrot.slane %v10227_v37, %v20656_v10  ;;  %v10467_v12 = vcombine.low %v18727_v15, %v18729_v8  ;;  %v20887_v61 = vld [vmem:[#allocation86_spill] sm:$0xff]  ;;  %v20888_v62 = vld [vmem:[#allocation33_spill] sm:$0xff] }
 0x735   : > { %v12275_v17 = vpack.i.bf16 %v20886_v38, %v9872_v20  ;;  %v18754_v26 = vrot.slane %v10091_v4, %v20656_v10  ;;  %v18757_v43 = vrot.slane %v10451_v50, %v20655_v34  ;;  %v18760_v42 = vrot.slane %v10348_v0, %v20656_v10  ;;  %v8034_v4 = vpop.permute.xlu0 %8033 }
 0x736   : > { %v10380_v20 = vcombine.high %v20888_v62, %v20887_v61  ;;  %v12290_v29 = vpack.i.bf16 %v10278_v52, %v10142_v63  ;;  %v10279_v19 = vcombine.low %v18748_v14, %v18718_v31  ;;  %v18767_v24 = vrot.slane %v10467_v12, %v20655_v34  ;;  %v7957_v51 = vpop.permute.xlu1 %7956  ;;  %8082 = vst.msk [vmem:[#allocation5 + $0x400] sm:$0xff] %vm1064_vm7, %v8034_v4 }
 0x737   : > { %12276 = vrot.lane.b32.xlu1 %v12275_v17, %s12509_s10  ;;  %v10483_v37 = vcombine.low %v18732_v13, %v18721_v39  ;;  %v20889_v50 = vcombine.low %v20875_v46, %v20874_v40  ;;  %v9874_v0 = vcombine.high %v9834_v47, %v18685_v1  ;;  %v10260_v16 = vcombine.high %v18644_v33, %v18633_v53  ;;  %v20890_v47 = vld [vmem:[#allocation92_spill] sm:$0xff]  ;;  %v20891_v53 = vld [vmem:[#allocation75_spill] sm:$0xff]  ;;  %v12489_v17 = vld [vmem:[#allocation5 + $0x358] sm:$0xff] }
 0x738   : > { %v9140_v52 = vcombine.high %v18500_v56, %v18506_v59  ;;  %7995 = vst.msk [vmem:[#allocation5 + $0x3d0] sm:$0xff] %vm1064_vm7, %v7957_v51  ;;  %12291 = vrot.lane.b32.xlu0 %v12290_v29, %s12508_s9  ;;  %v10143_v54 = vcombine.low %v18754_v26, %v18745_v7  ;;  %v10515_v11 = vcombine.low %v18757_v43, %v18767_v24 }
 0x739   : > { %v12285_v25 = vpack.i.bf16 %v20889_v50, %v9873_v9  ;;  %v9172_v1 = vcombine.high %v18555_v49, %v18512_v60  ;;  %v9124_v33 = vcombine.high %v20891_v53, %v20890_v47  ;;  %v10124_v56 = vcombine.high %v18666_v57, %v18641_v32  ;;  %v8042_v32 = vpop.permute.xlu0 %8041  ;;  %v12485_v47 = vld [vmem:[#allocation5 + $0x318] sm:$0xff] }
 0x73a   : > { %v10228_v59 = vcombine.high %v18669_v41, %v18656_v23  ;;  %v9191_v38 = vcombine.low %v18584_v30, %v18738_v58  ;;  %v12300_v9 = vpack.i.bf16 %v10279_v19, %v10143_v54  ;;  %v18800_v60 = vrot.slane %v10483_v37, %v20656_v10  ;;  %v7965_v57 = vpop.permute.xlu1 %7964  ;;  %v8217_v29 = vld [vmem:[#allocation5 + $0x3b0] sm:$0xff]  ;;  %8086 = vst.msk [vmem:[#allocation5 + $0x420] sm:$0xff] %vm1064_vm7, %v8042_v32  ;;  %v12483_v54 = vld [vmem:[#allocation5 + $0x308] sm:$0xff]  ;;  %v8219_v32 = vld [vmem:[#allocation5 + $0x3c0] sm:$0xff] }
 0x73b   : > { %12286 = vrot.lane.b32.xlu1 %v12285_v25, %s12507_s30  ;;  %v18803_v49 = vrot.slane %v10515_v11, %v20656_v10  ;;  %v18806_v63 = vrot.slane %v10380_v20, %v20656_v10  ;;  %v20892_v23 = vcombine.high %v20875_v46, %v20874_v40  ;;  %v10280_v12 = vcombine.high %v18748_v14, %v18718_v31  ;;  %v8213_v46 = vld [vmem:[#allocation5 + $0x390] sm:$0xff]  ;;  %v8215_v20 = vld [vmem:[#allocation5 + $0x3a0] sm:$0xff] }
 0x73c   : > { %v10092_v61 = vcombine.high %v18688_v44, %v18663_v55  ;;  %v18816_v62 = vrot.slane %v10260_v16, %v20656_v10  ;;  %7999 = vst.msk [vmem:[#allocation5 + $0x3f0] sm:$0xff] %vm1064_vm7, %v7965_v57  ;;  %12301 = vrot.lane.b32.xlu0 %v12300_v9, %s12505_s26  ;;  %v18824_v31 = vrot.slane %v9140_v52, %v20656_v10  ;;  %v8211_v25 = vld [vmem:[#allocation5 + $0x380] sm:$0xff]  ;;  %v12482_v52 = vld [vmem:[#allocation5 + $0x328] sm:$0xff]  ;;  %v20894_v57 = vld [vmem:[#allocation24_spill] sm:$0xff] }
 0x73d   : > { %v12295_v41 = vpack.i.bf16 %v20892_v23, %v9874_v0  ;;  %v10548_v40 = vcombine.high %v18800_v60, %v18803_v49  ;;  %v18827_v55 = vrot.slane %v9172_v1, %v20656_v10  ;;  %v18830_v44 = vrot.slane %v9124_v33, %v20656_v10  ;;  %v8223_v0 = vld [vmem:[#allocation5 + $0x3e0] sm:$0xff]  ;;  %v12484_v1 = vld [vmem:[#allocation5 + $0x338] sm:$0xff] }
 0x73e   : > { %v10144_v14 = vcombine.high %v18754_v26, %v18745_v7  ;;  %v18836_v19 = vrot.slane %v10124_v56, %v20656_v10  ;;  %v18839_v37 = vrot.slane %v10228_v59, %v20656_v10  ;;  %v9212_v4 = vcombine.high %v8213_v46, %v8217_v29  ;;  %v8050_v26 = vpop.permute.xlu0 %8049  ;;  %v8040_v53 = vpop.permute.xlu1 %8039  ;;  %v20895_v23 = vld [vmem:[#allocation57_spill] sm:$0xff] }
 0x73f   : > { %12296 = vrot.lane.b32.xlu1 %v12295_v41, %s12510_s11  ;;  %v20893_v51 = vcombine.high %v20877_v45, %v20876_v3  ;;  %v9211_v16 = vcombine.low %v8213_v46, %v8217_v29  ;;  %v10284_v11 = vcombine.high %v12483_v54, %v12482_v52  ;;  %v10300_v7 = vcombine.high %v12485_v47, %v12484_v1  ;;  %v20897_v46 = vld [vmem:[#allocation79_spill] sm:$0xff] }
 0x740   : > { %v12310_v33 = vpack.i.bf16 %v10280_v12, %v10144_v14  ;;  %v10106_v56 = vrot.slane %v10092_v61, %v20656_v10  ;;  %v10281_v59 = vcombine.low %v18839_v37, %v18816_v62  ;;  %v9196_v9 = vcombine.high %v8211_v25, %v8215_v20  ;;  %8090 = vst.msk [vmem:[#allocation5 + $0x440] sm:$0xff] %vm1064_vm7, %v8050_v26  ;;  %v12486_v14 = vld [vmem:[#allocation5 + $0x368] sm:$0xff] }
 0x741   : > { %v12305_v50 = vpack.i.bf16 %v10548_v40, %v20893_v51  ;;  %8085 = vst.msk [vmem:[#allocation5 + $0x418] sm:$0xff] %vm1064_vm7, %v8040_v53  ;;  %v9188_v41 = vcombine.high %v20895_v23, %v20894_v57  ;;  %v9195_v29 = vcombine.low %v8211_v25, %v8215_v20  ;;  %v20896_v40 = vld [vmem:[#allocation85_spill] sm:$0xff]  ;;  %v12487_v61 = vld [vmem:[#allocation5 + $0x348] sm:$0xff]  ;;  %v18857_v54 = vrot.slane %v9212_v4, %v20655_v34 }
 0x742   : > { %v9156_v12 = vcombine.high %v20897_v46, %v20896_v40  ;;  %v10316_v51 = vcombine.high %v12487_v61, %v12486_v14  ;;  %v10145_v52 = vcombine.low %v10106_v56, %v18836_v19  ;;  %v9228_v1 = vcombine.high %v8219_v32, %v8223_v0  ;;  %v8058_v53 = vpop.permute.xlu0 %8057  ;;  %v8221_v61 = vld [vmem:[#allocation5 + $0x3d0] sm:$0xff] }
 0x743   : > { %12306 = vrot.lane.b32.xlu0 %v12305_v50, %s12506_s29  ;;  %12311 = vrot.lane.b32.xlu1 %v12310_v33, %s12509_s10  ;;  %v18862_v47 = vrot.slane %v9211_v16, %v20655_v34  ;;  %v9227_v20 = vcombine.low %v8219_v32, %v8223_v0  ;;  %v18865_v25 = vrot.slane %v10284_v11, %v20655_v34  ;;  %v8048_v33 = vpop.permute.xlu1 %8047  ;;  %v8225_v6 = vld [vmem:[#allocation5 + $0x3f0] sm:$0xff]  ;;  %v12488_v16 = vld [vmem:[#allocation5 + $0x378] sm:$0xff] }
 0x744   : > { %v18868_v26 = vrot.slane %v10300_v7, %v20655_v34  ;;  %v12325_v14 = vpack.i.bf16 %v10281_v59, %v10145_v52  ;;  %v10282_v4 = vcombine.high %v18839_v37, %v18816_v62  ;;  %v18873_v50 = vrot.slane %v9196_v9, %v20655_v34  ;;  %8094 = vst.msk [vmem:[#allocation5 + $0x460] sm:$0xff] %vm1064_vm7, %v8058_v53 }
 0x745   : > { %v10332_v0 = vcombine.high %v12489_v17, %v12488_v16  ;;  %8089 = vst.msk [vmem:[#allocation5 + $0x438] sm:$0xff] %vm1064_vm7, %v8048_v33  ;;  %v10146_v11 = vcombine.high %v10106_v56, %v18836_v19  ;;  %v9244_v7 = vcombine.high %v8221_v61, %v8225_v6  ;;  %v9203_v59 = vrot.slane %v9195_v29, %v20655_v34 }
 0x746   : > { %v9243_v32 = vcombine.low %v8221_v61, %v8225_v6  ;;  %v9242_v62 = vrot.slane %v9228_v1, %v20655_v34  ;;  %v9275_v37 = vcombine.low %v18873_v50, %v18857_v54  ;;  %v10516_v17 = vcombine.high %v18757_v43, %v18767_v24 }
 0x747   : > { %12326 = vrot.lane.b32.xlu1 %v12325_v14, %s12507_s30  ;;  %v10468_v9 = vcombine.high %v18727_v15, %v18729_v8  ;;  %v9258_v52 = vrot.slane %v9244_v7, %v20655_v34  ;;  %v9235_v19 = vrot.slane %v9227_v20, %v20655_v34  ;;  %v9259_v6 = vcombine.low %v9203_v59, %v18862_v47  ;;  %v8056_v29 = vpop.permute.xlu1 %8055 }
 0x748   : > { %v9251_v56 = vrot.slane %v9243_v32, %v20655_v34  ;;  %v12340_v53 = vpack.i.bf16 %v10282_v4, %v10146_v11  ;;  %v10484_v1 = vcombine.high %v18732_v13, %v18721_v39  ;;  %v10436_v33 = vcombine.high %v18671_v5, %v18646_v21  ;;  %8093 = vst.msk [vmem:[#allocation5 + $0x458] sm:$0xff] %vm1064_vm7, %v8056_v29  ;;  %v18982_v46 = vld [vmem:[#allocation5 + $0x418] sm:$0xff] }
 0x749   : > { %v10452_v43 = vcombine.high %v18700_v28, %v18678_v35  ;;  %v9307_v15 = vcombine.low %v9242_v62, %v9258_v52  ;;  %v18899_v24 = vrot.slane %v10316_v51, %v20655_v34  ;;  %v10420_v20 = vcombine.high %v18676_v48, %v18658_v36 }
 0x74a   : > { %v9291_v8 = vcombine.low %v9235_v19, %v9251_v56  ;;  %v9283_v39 = vrot.slane %v9275_v37, %v20656_v10  ;;  %v18906_v13 = vrot.slane %v10516_v17, %v20656_v10  ;;  %v9308_v21 = vcombine.high %v9242_v62, %v9258_v52 }
 0x74b   : > { %12341 = vrot.lane.b32.xlu1 %v12340_v53, %s12510_s11  ;;  %v18909_v5 = vrot.slane %v10468_v9, %v20655_v34  ;;  %v9315_v35 = vrot.slane %v9307_v15, %v20656_v10  ;;  %v18913_v28 = vrot.slane %v9259_v6, %v20656_v10  ;;  %v9292_v36 = vcombine.high %v9235_v19, %v9251_v56  ;;  %v8064_v48 = vpop.permute.xlu1 %8063  ;;  %v18957_v19 = vld [vmem:[#allocation5 + $0x468] sm:$0xff] }
 0x74c   : > { %v18916_v51 = vrot.slane %v9291_v8, %v20656_v10  ;;  %v18919_v14 = vrot.slane %v10484_v1, %v20656_v10  ;;  %v18922_v4 = vrot.slane %v10332_v0, %v20655_v34  ;;  %v18925_v61 = vrot.slane %v10436_v33, %v20655_v34  ;;  %8097 = vst.msk [vmem:[#allocation5 + $0x478] sm:$0xff] %vm1064_vm7, %v8064_v48  ;;  %v18986_v33 = vld [vmem:[#allocation5 + $0x448] sm:$0xff] }
 0x74d   : > { %v18928_v16 = vrot.slane %v10452_v43, %v20655_v34  ;;  %v9327_v11 = vcombine.low %v9283_v39, %v9315_v35  ;;  %v9276_v32 = vcombine.high %v18873_v50, %v18857_v54  ;;  %v9260_v62 = vcombine.high %v9203_v59, %v18862_v47  ;;  %v18955_v59 = vld [vmem:[#allocation5 + $0x438] sm:$0xff]  ;;  %v19002_v48 = vld [vmem:[#allocation5 + $0x408] sm:$0xff] }
 0x74e   : > { %v9324_v7 = vcombine.high %v18913_v28, %v18916_v51  ;;  %v10549_v0 = vcombine.low %v18919_v14, %v18906_v13  ;;  %v18939_v37 = vrot.slane %v9308_v21, %v20656_v10  ;;  %v18942_v17 = vrot.slane %v10420_v20, %v20655_v34 }
 0x74f   : > { %v10532_v9 = vcombine.high %v18928_v16, %v18909_v5  ;;  %v12355_v52 = vpack.i.bf16 %v9327_v11, %v9191_v38  ;;  %v9328_v50 = vcombine.high %v9283_v39, %v9315_v35  ;;  %v18953_v47 = vrot.slane %v9292_v36, %v20656_v10  ;;  %v8038_v56 = vpop.permute.xlu1 %8037 }
 0x750   : > { %v12315_v54 = vpack.i.bf16 %v9324_v7, %v9188_v41  ;;  %v10413_v6 = vcombine.low %v18760_v42, %v18806_v63  ;;  %v18965_v38 = vrot.slane %v9156_v12, %v20656_v10  ;;  %v10364_v41 = vcombine.high %v18865_v25, %v18868_v26  ;;  %8084 = vst.msk [vmem:[#allocation5 + $0x410] sm:$0xff] %vm1064_vm7, %v8038_v56  ;;  %v18984_v12 = vld [vmem:[#allocation5 + $0x428] sm:$0xff] }
 0x751   : > { %v10500_v29 = vcombine.high %v18942_v17, %v18925_v61  ;;  %12356 = vrot.lane.b32.xlu1 %v12355_v52, %s12505_s26  ;;  %v18975_v53 = vrot.slane %v9276_v32, %v20656_v10  ;;  %v18978_v1 = vrot.slane %v9260_v62, %v20656_v10  ;;  %v10396_v40 = vcombine.high %v18899_v24, %v18922_v4 }
 0x752   : > { %12316 = vrot.lane.b32.xlu0 %v12315_v54, %s12506_s29  ;;  %v12320_v43 = vpack.i.bf16 %v10549_v0, %v10413_v6  ;;  %v18989_v15 = vrot.slane %v10532_v9, %v20656_v10  ;;  %v10571_v8 = vcombine.low %v18982_v46, %v18955_v59  ;;  %v10587_v20 = vcombine.low %v18986_v33, %v18957_v19 }
 0x753   : > { %v20898_v39 = vcombine.high %v18584_v30, %v18738_v58  ;;  %v9329_v35 = vcombine.low %v18975_v53, %v18939_v37  ;;  %v9325_v36 = vcombine.low %v18978_v1, %v18953_v47  ;;  %v8046_v7 = vpop.permute.xlu1 %8045  ;;  %v9193_v32 = vcombine.low %v18824_v31, %v18827_v55  ;;  %v19013_v58 = vld [vmem:[#allocation5 + $0x458] sm:$0xff] }
 0x754   : > { %v9189_v62 = vcombine.low %v18830_v44, %v18965_v38  ;;  %v19011_v30 = vrot.slane %v10500_v29, %v20656_v10  ;;  %v19015_v0 = vld [vmem:[#allocation5 + $0x478] sm:$0xff]  ;;  %v10555_v9 = vcombine.low %v19002_v48, %v18984_v12  ;;  %8088 = vst.msk [vmem:[#allocation5 + $0x430] sm:$0xff] %vm1064_vm7, %v8046_v7  ;;  %v19023_v52 = vrot.slane %v10364_v41, %v20656_v10 }
 0x755   : > { %v12365_v21 = vpack.i.bf16 %v9328_v50, %v20898_v39  ;;  %v19026_v54 = vrot.slane %v10396_v40, %v20656_v10  ;;  %v10603_v50 = vcombine.low %v19013_v58, %v19015_v0  ;;  %v10550_v6 = vcombine.high %v18919_v14, %v18906_v13 }
 0x756   : > { %12321 = vrot.lane.b32.xlu0 %v12320_v43, %s12504_s25  ;;  %v10554_v56 = vcombine.high %v19011_v30, %v18989_v15  ;;  %v10531_v29 = vcombine.low %v18928_v16, %v18909_v5  ;;  %v19037_v43 = vrot.slane %v10571_v8, %v20655_v34  ;;  %v12375_v41 = vpack.i.bf16 %v9329_v35, %v9193_v32 }
 0x757   : > { %12366 = vrot.lane.b32.xlu1 %v12365_v21, %s12509_s10  ;;  %v12330_v39 = vpack.i.bf16 %v9325_v36, %v9189_v62  ;;  %v19040_v40 = vrot.slane %v10587_v20, %v20655_v34  ;;  %v19043_v21 = vrot.slane %v10603_v50, %v20655_v34  ;;  %v8054_v7 = vpop.permute.xlu1 %8053  ;;  %v10414_v11 = vcombine.high %v18760_v42, %v18806_v63 }
 0x758   : > { %v10395_v13 = vcombine.low %v18899_v24, %v18922_v4  ;;  %v19050_v5 = vrot.slane %v10555_v9, %v20655_v34  ;;  %8092 = vst.msk [vmem:[#allocation5 + $0x450] sm:$0xff] %vm1064_vm7, %v8054_v7  ;;  %v10418_v14 = vcombine.high %v19023_v52, %v19026_v54  ;;  %v10499_v16 = vcombine.low %v18942_v17, %v18925_v61  ;;  %v8235_v7 = vld [vmem:[#allocation5 + $0x440] sm:$0xff] }
 0x759   : > { %v10651_v42 = vcombine.low %v19040_v40, %v19043_v21  ;;  %v10363_v63 = vcombine.low %v18865_v25, %v18868_v26  ;;  %v10539_v24 = vrot.slane %v10531_v29, %v20656_v10  ;;  %v12335_v20 = vpack.i.bf16 %v10550_v6, %v10414_v11  ;;  %v8227_v6 = vld [vmem:[#allocation5 + $0x400] sm:$0xff] }
 0x75a   : > { %12331 = vrot.lane.b32.xlu0 %v12330_v39, %s12504_s25  ;;  %v10619_v4 = vcombine.low %v19050_v5, %v19037_v43  ;;  %v12380_v8 = vpack.i.bf16 %v10554_v56, %v10418_v14  ;;  %v9330_v35 = vcombine.high %v18975_v53, %v18939_v37  ;;  %v9326_v36 = vcombine.high %v18978_v1, %v18953_v47  ;;  %v8231_v53 = vld [vmem:[#allocation5 + $0x420] sm:$0xff] }
 0x75b   : > { %12376 = vrot.lane.b32.xlu1 %v12375_v41, %s12507_s30  ;;  %v8062_v61 = vpop.permute.xlu1 %8061  ;;  %v9194_v17 = vcombine.high %v18824_v31, %v18827_v55  ;;  %v19072_v32 = vld [vmem:[#allocation5 + $0x430] sm:$0xff]  ;;  %v19075_v25 = vrot.slane %v10651_v42, %v20656_v10  ;;  %v9190_v26 = vcombine.high %v18830_v44, %v18965_v38  ;;  %v10403_v37 = vrot.slane %v10395_v13, %v20656_v10  ;;  %v8239_v44 = vld [vmem:[#allocation5 + $0x460] sm:$0xff]  ;;  %v19095_v13 = vpop.permute.xlu0 %12131 }
 0x75c   : > { %8096 = vst.msk [vmem:[#allocation5 + $0x470] sm:$0xff] %vm1064_vm7, %v8062_v61  ;;  %v10507_v47 = vrot.slane %v10499_v16, %v20656_v10  ;;  %v10371_v31 = vrot.slane %v10363_v63, %v20656_v10  ;;  %v8229_v55 = vld [vmem:[#allocation5 + $0x410] sm:$0xff]  ;;  %v19086_v1 = vrot.slane %v10619_v4, %v20656_v10  ;;  %v9331_v41 = vcombine.low %v8227_v6, %v8231_v53 }
 0x75d   : > { %v12385_v11 = vpack.i.bf16 %v9330_v35, %v9194_v17  ;;  %v12345_v62 = vpack.i.bf16 %v9326_v36, %v9190_v26  ;;  %v9347_v50 = vcombine.low %v8229_v55, %v19072_v32  ;;  %v9363_v42 = vcombine.low %v8235_v7, %v8239_v44 }
 0x75e   : > { %12336 = vrot.lane.b32.xlu0 %v12335_v20, %s12508_s9  ;;  %v10551_v9 = vcombine.low %v10507_v47, %v10539_v24  ;;  %v10683_v38 = vcombine.low %v19086_v1, %v19075_v25  ;;  %v10415_v29 = vcombine.low %v10371_v31, %v10403_v37  ;;  %v10552_v39 = vcombine.high %v10507_v47, %v10539_v24 }
 0x75f   : > { %12381 = vrot.lane.b32.xlu1 %v12380_v8, %s12510_s11  ;;  %v19089_v56 = vpop.permute.xlu1 %12111  ;;  %v9355_v16 = vrot.slane %v9347_v50, %v20655_v34  ;;  %v10416_v4 = vcombine.high %v10371_v31, %v10403_v37  ;;  %v8237_v8 = vld [vmem:[#allocation5 + $0x450] sm:$0xff]  ;;  %v9339_v35 = vrot.slane %v9331_v41, %v20655_v34  ;;  %v10553_v24 = vcombine.low %v19011_v30, %v18989_v15  ;;  %v19113_v41 = vpop.permute.xlu0 %12141 }
 0x760   : > { %v12350_v14 = vpack.i.bf16 %v10551_v9, %v10415_v29  ;;  %v9364_v26 = vcombine.high %v8235_v7, %v8239_v44  ;;  %v9371_v47 = vrot.slane %v9363_v42, %v20655_v34  ;;  %v9348_v37 = vcombine.high %v8229_v55, %v19072_v32 }
 0x761   : > { %v12360_v17 = vpack.i.bf16 %v10552_v39, %v10416_v4  ;;  %v10417_v9 = vcombine.low %v19023_v52, %v19026_v54  ;;  %v9332_v50 = vcombine.high %v8227_v6, %v8231_v53  ;;  %v10572_v29 = vcombine.high %v18982_v46, %v18955_v59 }
 0x762   : > { %12346 = vrot.lane.b32.xlu0 %v12345_v62, %s12508_s9  ;;  %v9396_v62 = vcombine.high %v9339_v35, %v9355_v16  ;;  %v9395_v30 = vcombine.low %v9339_v35, %v9355_v16  ;;  %v19120_v55 = vrot.slane %v9364_v26, %v20655_v34  ;;  %v10556_v52 = vcombine.high %v19002_v48, %v18984_v12 }
 0x763   : > { %12386 = vrot.lane.b32.xlu1 %v12385_v11, %s12510_s11  ;;  %v19098_v63 = vpop.permute.xlu1 %12116  ;;  %v8241_v20 = vld [vmem:[#allocation5 + $0x470] sm:$0xff]  ;;  %v12370_v32 = vpack.i.bf16 %v10553_v24, %v10417_v9  ;;  %v10604_v59 = vcombine.high %v19013_v58, %v19015_v0  ;;  %v19132_v6 = vrot.slane %v9348_v37, %v20655_v34  ;;  %v19138_v16 = vrot.slane %v10572_v29, %v20655_v34 }
 0x764   : > { %v9379_v36 = vcombine.low %v8237_v8, %v8241_v20  ;;  %v9380_v61 = vcombine.high %v8237_v8, %v8241_v20  ;;  %v9410_v46 = vrot.slane %v9396_v62, %v20656_v10  ;;  %v10588_v12 = vcombine.high %v18986_v33, %v18957_v19  ;;  %v19158_v33 = vpop.permute.xlu0 %12151 }
 0x765   : > { %v19144_v58 = vrot.slane %v9395_v30, %v20656_v10  ;;  %v10620_v42 = vcombine.high %v19050_v5, %v19037_v43  ;;  %v10652_v4 = vcombine.high %v19040_v40, %v19043_v21  ;;  %v19153_v8 = vrot.slane %v10556_v52, %v20655_v34 }
 0x766   : > { %12351 = vrot.lane.b32.xlu0 %v12350_v14, %s12505_s26  ;;  %v9387_v11 = vrot.slane %v9379_v36, %v20655_v34  ;;  %v19117_v39 = vrot.slane %v9380_v61, %v20655_v34  ;;  %v19135_v14 = vrot.slane %v9332_v50, %v20655_v34  ;;  %v19156_v19 = vrot.slane %v10604_v59, %v20655_v34 }
 0x767   : > { %v19107_v31 = vpop.permute.xlu1 %12121  ;;  %v10684_v20 = vcombine.high %v19086_v1, %v19075_v25  ;;  %v12114_v40 = vunpack.i.h.bf16 %v19089_v56  ;;  %v19169_v5 = vrot.slane %v10588_v12, %v20655_v34  ;;  %v10635_v36 = vcombine.low %v19153_v8, %v19138_v16 }
 0x768   : > { %v9428_v15 = vcombine.high %v9371_v47, %v9387_v11  ;;  %v9427_v44 = vcombine.low %v9371_v47, %v9387_v11  ;;  %v9443_v0 = vcombine.low %v19120_v55, %v19117_v39  ;;  %v9411_v35 = vcombine.low %v19135_v14, %v19132_v6 }
 0x769   : > { %v12113_v61 = vunpack.i.l.bf16 %v19089_v56  ;;  %v10634_v26 = vrot.slane %v10620_v42, %v20656_v10  ;;  %v12119_v47 = vunpack.i.h.bf16 %v19098_v63  ;;  %v12118_v11 = vunpack.i.l.bf16 %v19098_v63  ;;  %v20900_v63 = vld [vmem:[#allocation61_spill] sm:$0xff] }
 0x76a   : > { %12361 = vrot.lane.b32.xlu0 %v12360_v17, %s12509_s10  ;;  %v9442_v54 = vrot.slane %v9428_v15, %v20656_v10  ;;  %v19129_v53 = vrot.slane %v9427_v44, %v20656_v10  ;;  %v9451_v24 = vrot.slane %v9443_v0, %v20656_v10  ;;  %v10666_v62 = vrot.slane %v10652_v4, %v20656_v10  ;;  %v20899_v15 = vld [vmem:[#allocation35_spill] sm:$0xff] }
 0x76b   : > { %v12127_v7 = vpop.permute.xlu1 %12126  ;;  %v10667_v34 = vcombine.low %v19169_v5, %v19156_v19  ;;  %v12124_v37 = vunpack.i.h.bf16 %v19107_v31  ;;  %v12123_v56 = vunpack.i.l.bf16 %v19107_v31  ;;  %v9419_v29 = vrot.slane %v9411_v35, %v20656_v10 }
 0x76c   : > { %v9461_v48 = vcombine.low %v9410_v46, %v9442_v54  ;;  %v9459_v43 = vcombine.low %v19144_v58, %v19129_v53  ;;  %v9462_v17 = vcombine.high %v9410_v46, %v9442_v54  ;;  %v19184_v9 = vpop.permute.xlu0 %12166  ;;  %v9460_v50 = vcombine.high %v19144_v58, %v19129_v53  ;;  %v20902_v46 = vld [vmem:[#allocation108_spill] sm:$0xff]  ;;  %v20903_v54 = vld [vmem:[#allocation129_spill] sm:$0xff] }
 0x76d   : > { %v20901_v30 = vcombine.low %v20899_v15, %v20900_v63  ;;  %v12128_v52 = vunpack.i.l.bf16 %v12127_v7  ;;  %v9444_v31 = vcombine.high %v19120_v55, %v19117_v39  ;;  %v20904_v12 = vcombine.low %v20902_v46, %v20903_v54 }
 0x76e   : > { %12371 = vrot.lane.b32.xlu0 %v12370_v32, %s12507_s30  ;;  %10752 = vrot.lane.b32.xlu1 %v9461_v48, %s12504_s25  ;;  %v12129_v32 = vunpack.i.h.bf16 %v12127_v7  ;;  %v9463_v4 = vcombine.low %v9419_v29, %v9451_v24 }
 0x76f   : > { %v12137_v21 = vpop.permute.xlu1 %12136  ;;  %v11196_v44 = vsel %vm1064_vm7, %v20901_v30, %v12114_v40  ;;  %v11195_v48 = vsel %vm1064_vm7, %v20904_v12, %v12113_v61  ;;  %v10685_v61 = vcombine.low %v10634_v26, %v10666_v62  ;;  %v9458_v63 = vrot.slane %v9444_v31, %v20656_v10 }
 0x770   : > { %v12139_v0 = vunpack.i.h.bf16 %v12137_v21  ;;  %v12138_v42 = vunpack.i.l.bf16 %v12137_v21  ;;  %v11205_v35 = vsel %vm6744_vm8, %v11196_v44, %v12119_v47  ;;  %v19205_v55 = vpop.permute.xlu0 %12176  ;;  %v9412_v21 = vcombine.high %v19135_v14, %v19132_v6 }
 0x771   : > { %v11214_v39 = vsel %vm6759_vm9, %v11205_v35, %v12124_v37  ;;  %v9464_v47 = vcombine.high %v9419_v29, %v9451_v24  ;;  %v10675_v14 = vrot.slane %v10667_v34, %v20656_v10  ;;  %v10643_v12 = vrot.slane %v10635_v36, %v20656_v10 }
 0x772   : > { %10968 = vrot.lane.b32.xlu0 %v10684_v20, %s12506_s29  ;;  %10788 = vrot.lane.b32.xlu1 %v9462_v17, %s12508_s9  ;;  %v11204_v20 = vsel %vm6744_vm8, %v11195_v48, %v12118_v11  ;;  %v11223_v11 = vsel %vm6774_vm10, %v11214_v39, %v12129_v32  ;;  %v9426_v31 = vrot.slane %v9412_v21, %v20656_v10  ;;  %v12144_v36 = vunpack.i.h.bf16 %v19113_v41  ;;  %v20905_v39 = vld [vmem:[#allocation9_spill] sm:$0xff] }
 0x773   : > { %v12147_v59 = vpop.permute.xlu1 %12146  ;;  %v11213_v17 = vsel %vm6759_vm9, %v11204_v20, %v12123_v56  ;;  %v11232_v37 = vsel %vm6789_vm11, %v11223_v11, %v12139_v0  ;;  %v10687_v0 = vcombine.low %v10643_v12, %v10675_v14  ;;  %v10636_v35 = vcombine.high %v19153_v8, %v19138_v16 }
 0x774   : > { %v12149_v40 = vunpack.i.h.bf16 %v12147_v59  ;;  %v12148_v7 = vunpack.i.l.bf16 %v12147_v59  ;;  %v19225_v29 = vpop.permute.xlu0 %12186  ;;  %v9465_v34 = vcombine.low %v9426_v31, %v9458_v63  ;;  %v9466_v20 = vcombine.high %v9426_v31, %v9458_v63 }
 0x776   : > { %10716 = vrot.lane.b32.xlu0 %v9460_v50, %s12506_s29  ;;  %10824 = vrot.lane.b32.xlu1 %v9463_v4, %s12505_s26  ;;  %v11222_v50 = vsel %vm6774_vm10, %v11213_v17, %v12128_v52  ;;  %v11241_v6 = vsel %vm6804_vm12, %v11232_v37, %v12149_v40  ;;  %v10686_v52 = vcombine.high %v10634_v26, %v10666_v62  ;;  %v12134_v26 = vunpack.i.h.bf16 %v19095_v13 }
 0x777   : > { %v12157_v15 = vpop.permute.xlu1 %12156  ;;  %v11231_v56 = vsel %vm6789_vm11, %v11222_v50, %v12138_v42  ;;  %v10668_v42 = vcombine.high %v19169_v5, %v19156_v19  ;;  %v12133_v4 = vunpack.i.l.bf16 %v19095_v13  ;;  %v12143_v40 = vunpack.i.l.bf16 %v19113_v41  ;;  %v20908_v41 = vld [vmem:[#allocation74_spill] sm:$0xff] }
 0x778   : > { %v12159_v30 = vunpack.i.h.bf16 %v12157_v15  ;;  %v12158_v44 = vunpack.i.l.bf16 %v12157_v15  ;;  %v11240_v59 = vsel %vm6804_vm12, %v11231_v56, %v12148_v7  ;;  %v12154_v7 = vunpack.i.h.bf16 %v19158_v33  ;;  %v20909_v15 = vld [vmem:[#allocation112_spill] sm:$0xff] }
 0x779   : > { %v12153_v17 = vunpack.i.l.bf16 %v19158_v33  ;;  %v10688_v5 = vcombine.high %v10643_v12, %v10675_v14  ;;  %v10682_v13 = vrot.slane %v10668_v42, %v20656_v10  ;;  %v10650_v37 = vrot.slane %v10636_v35, %v20656_v10 }
 0x77a   : > { %11004 = vrot.lane.b32.xlu0 %v10685_v61, %s12504_s25  ;;  %v19220_v32 = vsel %vm6819_vm13, %v11240_v59, %v12158_v44  ;;  %v19223_v24 = vsel %vm6819_vm13, %v11241_v6, %v12159_v30  ;;  %10860 = vrot.lane.b32.xlu1 %v9464_v47, %s12509_s10  ;;  %v20906_v61 = vld [vmem:[#allocation27_spill] sm:$0xff]  ;;  %v20910_v47 = vcombine.low %v20908_v41, %v20909_v15  ;;  %v12188_v41 = vunpack.i.l.bf16 %v19225_v29 }
 0x77b   : > { %v11582_v46 = vpack.c.bf16 %v19223_v24, %v19220_v32  ;;  %v12162_v54 = vpop.permute.xlu1 %12161  ;;  %v19233_v48 = vpop.permute.xlu0 %12216  ;;  %v20907_v21 = vcombine.low %v20905_v39, %v20906_v61  ;;  %v11321_v39 = vld [vmem:[%s19494_s7] sm:$0xff] }
 0x77c   : > { %v12164_v8 = vunpack.i.h.bf16 %v12162_v54  ;;  %v12163_v50 = vunpack.i.l.bf16 %v12162_v54  ;;  %v11197_v33 = vsel %vm1064_vm7, %v20910_v47, %v12133_v4  ;;  %v10689_v54 = vcombine.low %v10650_v37, %v10682_v13 }
 0x77d   : > { %v11198_v16 = vsel %vm1064_vm7, %v20907_v21, %v12134_v26  ;;  %v11206_v30 = vsel %vm6744_vm8, %v11197_v33, %v12143_v40 }
 0x77e   : > { %11040 = vrot.lane.b32.xlu0 %v10686_v52, %s12508_s9  ;;  %10896 = vrot.lane.b32.xlu1 %v9465_v34, %s12507_s30  ;;  %v11207_v44 = vsel %vm6744_vm8, %v11198_v16, %v12144_v36  ;;  %v11215_v14 = vsel %vm6759_vm9, %v11206_v30, %v12153_v17  ;;  %v12169_v16 = vunpack.i.h.bf16 %v19184_v9 }
 0x77f   : > { %v12172_v62 = vpop.permute.xlu1 %12171  ;;  %v11216_v52 = vsel %vm6759_vm9, %v11207_v44, %v12154_v7  ;;  %v11224_v12 = vsel %vm6774_vm10, %v11215_v14, %v12163_v50  ;;  %v10690_v7 = vcombine.high %v10650_v37, %v10682_v13  ;;  %v12179_v13 = vunpack.i.h.bf16 %v19205_v55  ;;  %v20912_v37 = vld [vmem:[#allocation59_spill] sm:$0xff] }
 0x780   : > { %v12174_v63 = vunpack.i.h.bf16 %v12172_v62  ;;  %v12173_v56 = vunpack.i.l.bf16 %v12172_v62  ;;  %v11225_v34 = vsel %vm6774_vm10, %v11216_v52, %v12164_v8  ;;  %v12168_v8 = vunpack.i.l.bf16 %v19184_v9  ;;  %v20914_v9 = vld [vmem:[#allocation118_spill] sm:$0xff] }
 0x781   : > { %v19247_v19 = vpop.permute.xlu0 %12221  ;;  %v12178_v50 = vunpack.i.l.bf16 %v19205_v55 }
 0x782   : > { %11076 = vrot.lane.b32.xlu0 %v10687_v0, %s12505_s26  ;;  %10932 = vrot.lane.b32.xlu1 %v9466_v20, %s12510_s11  ;;  %v11233_v10 = vsel %vm6789_vm11, %v11224_v12, %v12173_v56  ;;  %v11234_v42 = vsel %vm6789_vm11, %v11225_v34, %v12174_v63  ;;  %v20911_v56 = vld [vmem:[#allocation128_spill] sm:$0xff] }
 0x783   : > { %v12182_v11 = vpop.permute.xlu1 %12181  ;;  %v20913_v30 = vcombine.low %v20911_v56, %v20912_v37 }
 0x784   : > { %v12184_v59 = vunpack.i.h.bf16 %v12182_v11  ;;  %v12183_v6 = vunpack.i.l.bf16 %v12182_v11  ;;  %v12189_v11 = vunpack.i.h.bf16 %v19225_v29 }
 0x785   : > { %v19265_v31 = vpop.permute.xlu0 %12226  ;;  %v11199_v44 = vsel %vm1064_vm7, %v20913_v30, %v12168_v8 }
 0x786   : > { %11112 = vrot.lane.b32.xlu0 %v10688_v5, %s12509_s10  ;;  %v11242_v4 = vsel %vm6804_vm12, %v11233_v10, %v12183_v6  ;;  %v11243_v20 = vsel %vm6804_vm12, %v11234_v42, %v12184_v59  ;;  %v20915_v59 = vld [vmem:[#allocation93_spill] sm:$0xff]  ;;  %v12229_v56 = vunpack.i.h.bf16 %v19265_v31  ;;  %v12228_v37 = vunpack.i.l.bf16 %v19265_v31 }
 0x787   : > { %v12192_v0 = vpop.permute.xlu1 %12191  ;;  %v20916_v6 = vcombine.low %v20914_v9, %v20915_v59 }
 0x788   : > { %v12194_v26 = vunpack.i.h.bf16 %v12192_v0  ;;  %v12193_v62 = vunpack.i.l.bf16 %v12192_v0 }
 0x789   : > { %v19280_v40 = vpop.permute.xlu0 %12231  ;;  %v11200_v14 = vsel %vm1064_vm7, %v20916_v6, %v12169_v16  ;;  %v20917_v6 = vld [vmem:[#allocation115_spill] sm:$0xff] }
 0x78a   : > { %11148 = vrot.lane.b32.xlu0 %v10689_v54, %s12507_s30  ;;  %v19275_v35 = vsel %vm6819_vm13, %v11242_v4, %v12193_v62  ;;  %v19278_v36 = vsel %vm6819_vm13, %v11243_v20, %v12194_v26  ;;  %v11208_v54 = vsel %vm6744_vm8, %v11199_v44, %v12178_v50  ;;  %v11209_v29 = vsel %vm6744_vm8, %v11200_v14, %v12179_v13  ;;  %v20918_v14 = vld [vmem:[#allocation19_spill] sm:$0xff] }
 0x78b   : > { %v11586_v17 = vpack.c.bf16 %v19278_v36, %v19275_v35  ;;  %v12197_v5 = vpop.permute.xlu1 %12196  ;;  %v11217_v0 = vsel %vm6759_vm9, %v11208_v54, %v12188_v41  ;;  %v11218_v10 = vsel %vm6759_vm9, %v11209_v29, %v12189_v11  ;;  %v12219_v41 = vunpack.i.h.bf16 %v19233_v48  ;;  %v20921_v54 = vld [vmem:[#allocation28_spill] sm:$0xff] }
 0x78c   : > { %v12199_v47 = vunpack.i.h.bf16 %v12197_v5  ;;  %v12198_v33 = vunpack.i.l.bf16 %v12197_v5  ;;  %v12234_v44 = vunpack.i.h.bf16 %v19280_v40  ;;  %v12233_v9 = vunpack.i.l.bf16 %v19280_v40 }
 0x78e   : > { %11184 = vrot.lane.b32.xlu0 %v10690_v7, %s12510_s11  ;;  %v19288_v61 = vpop.permute.xlu0 %12236  ;;  %v11227_v42 = vsel %vm6774_vm10, %v11218_v10, %v12199_v47  ;;  %v11226_v26 = vsel %vm6774_vm10, %v11217_v0, %v12198_v33  ;;  %v12218_v47 = vunpack.i.l.bf16 %v19233_v48  ;;  %v12224_v33 = vunpack.i.h.bf16 %v19247_v19  ;;  %v20920_v48 = vld [vmem:[#allocation83_spill] sm:$0xff] }
 0x78f   : > { %v12202_v21 = vpop.permute.xlu1 %12201  ;;  %v20922_v29 = vcombine.low %v20920_v48, %v20921_v54 }
 0x790   : > { %v12204_v55 = vunpack.i.h.bf16 %v12202_v21  ;;  %v12203_v52 = vunpack.i.l.bf16 %v12202_v21 }
 0x792   : > { %11324 = vperm.xlu0 %12109, %v11321_v39   ;;  %v11235_v4 = vsel %vm6789_vm11, %v11226_v26, %v12203_v52  ;;  %v11236_v20 = vsel %vm6789_vm11, %v11227_v42, %v12204_v55  ;;  %v20919_v55 = vcombine.low %v20917_v6, %v20918_v14 }
 0x793   : > { %v19296_v15 = vpop.permute.xlu0 %12246  ;;  %v12207_v63 = vpop.permute.xlu1 %12206 }
 0x794   : > { %v12209_v34 = vunpack.i.h.bf16 %v12207_v63  ;;  %v12208_v12 = vunpack.i.l.bf16 %v12207_v63  ;;  %v12223_v63 = vunpack.i.l.bf16 %v19247_v19  ;;  %v11258_v52 = vsel %vm1064_vm7, %v20919_v55, %v12218_v47 }
 0x795   : > { %v11259_v19 = vsel %vm1064_vm7, %v20922_v29, %v12219_v41  ;;  %v12249_v6 = vunpack.i.h.bf16 %v19296_v15  ;;  %v12248_v14 = vunpack.i.l.bf16 %v19296_v15 }
 0x796   : > { %v11244_v21 = vsel %vm6804_vm12, %v11235_v4, %v12208_v12  ;;  %v11245_v16 = vsel %vm6804_vm12, %v11236_v20, %v12209_v34  ;;  %v11267_v31 = vsel %vm6744_vm8, %v11258_v52, %v12223_v63  ;;  %v11268_v0 = vsel %vm6744_vm8, %v11259_v19, %v12224_v33  ;;  %v20923_v19 = vld [vmem:[#allocation50_spill] sm:$0xff] }
 0x797   : > { %v12212_v62 = vpop.permute.xlu1 %12211  ;;  %v19314_v7 = vpop.permute.xlu0 %12256  ;;  %v11276_v40 = vsel %vm6759_vm9, %v11267_v31, %v12228_v37  ;;  %v11277_v26 = vsel %vm6759_vm9, %v11268_v0, %v12229_v56  ;;  %v20926_v31 = vld [vmem:[#allocation119_spill] sm:$0xff]  ;;  %v20927_v0 = vld [vmem:[#allocation121_spill] sm:$0xff] }
 0x798   : > { %v12214_v5 = vunpack.i.h.bf16 %v12212_v62  ;;  %v12213_v39 = vunpack.i.l.bf16 %v12212_v62  ;;  %v11285_v4 = vsel %vm6774_vm10, %v11276_v40, %v12233_v9  ;;  %v11286_v20 = vsel %vm6774_vm10, %v11277_v26, %v12234_v44 }
 0x799   : > { %v12239_v9 = vunpack.i.h.bf16 %v19288_v61  ;;  %v12238_v44 = vunpack.i.l.bf16 %v19288_v61  ;;  %v12259_v55 = vunpack.i.h.bf16 %v19314_v7  ;;  %v12258_v52 = vunpack.i.l.bf16 %v19314_v7 }
 0x79a   : > { %v19319_v8 = vsel %vm6819_vm13, %v11244_v21, %v12213_v39  ;;  %v19322_v13 = vsel %vm6819_vm13, %v11245_v16, %v12214_v5  ;;  %v20928_v15 = vcombine.low %v20926_v31, %v20927_v0 }
 0x79b   : > { %v11590_v50 = vpack.c.bf16 %v19322_v13, %v19319_v8  ;;  %v12242_v11 = vpop.permute.xlu1 %12241  ;;  %v12267_v30 = vpop.permute.xlu0 %12266  ;;  %v20932_v8 = vcombine.low %v18913_v28, %v18916_v51 }
 0x79c   : > { %v12244_v34 = vunpack.i.h.bf16 %v12242_v11  ;;  %v12243_v12 = vunpack.i.l.bf16 %v12242_v11  ;;  %v12269_v48 = vunpack.i.h.bf16 %v12267_v30  ;;  %v12268_v54 = vunpack.i.l.bf16 %v12267_v30 }
 0x79e   : > { %v11295_v39 = vsel %vm6789_vm11, %v11286_v20, %v12244_v34  ;;  %v11294_v21 = vsel %vm6789_vm11, %v11285_v4, %v12243_v12  ;;  %v20924_v34 = vld [vmem:[#allocation123_spill] sm:$0xff] }
 0x79f   : > { %v12252_v59 = vpop.permute.xlu1 %12251  ;;  %v20925_v61 = vcombine.low %v20923_v19, %v20924_v34 }
 0x7a0   : > { %v12254_v10 = vunpack.i.h.bf16 %v12252_v59  ;;  %v12253_v42 = vunpack.i.l.bf16 %v12252_v59 }
 0x7a1   : > { %v11261_v12 = vsel %vm1064_vm7, %v20925_v61, %v12239_v9  ;;  %v20929_v61 = vcombine.low %v18528_v27, %v18491_v2 }
 0x7a2   : > { %v19346_v62 = vpop.permute.xlu0 %12271  ;;  %v11303_v41 = vsel %vm6804_vm12, %v11294_v21, %v12253_v42  ;;  %v11304_v47 = vsel %vm6804_vm12, %v11295_v39, %v12254_v10  ;;  %v11260_v10 = vsel %vm1064_vm7, %v20928_v15, %v12238_v44  ;;  %v11270_v32 = vsel %vm6744_vm8, %v11261_v12, %v12249_v6 }
 0x7a3   : > { %v12262_v5 = vpop.permute.xlu1 %12261  ;;  %v11269_v7 = vsel %vm6744_vm8, %v11260_v10, %v12248_v14  ;;  %v11279_v26 = vsel %vm6759_vm9, %v11270_v32, %v12259_v55  ;;  %v12274_v44 = vunpack.i.h.bf16 %v19346_v62  ;;  %v12273_v6 = vunpack.i.l.bf16 %v19346_v62 }
 0x7a4   : > { %v12264_v16 = vunpack.i.h.bf16 %v12262_v5  ;;  %v12263_v11 = vunpack.i.l.bf16 %v12262_v5  ;;  %v11278_v30 = vsel %vm6759_vm9, %v11269_v7, %v12258_v52  ;;  %v11288_v5 = vsel %vm6774_vm10, %v11279_v26, %v12269_v48 }
 0x7a5   : > { %v11287_v20 = vsel %vm6774_vm10, %v11278_v30, %v12268_v54  ;;  %v11262_v12 = vsel %vm1064_vm7, %v20929_v61, %v12273_v6  ;;  %v20930_v62 = vcombine.low %v18624_v22, %v18627_v18  ;;  %v20931_v6 = vcombine.low %v20895_v23, %v20894_v57 }
 0x7a6   : > { %v11312_v33 = vsel %vm6819_vm13, %v11303_v41, %v12263_v11  ;;  %v11313_v63 = vsel %vm6819_vm13, %v11304_v47, %v12264_v16  ;;  %v12282_v59 = vpop.permute.xlu0 %12281 }
 0x7a7   : > { %v11580_v37 = vpack.c.bf16 %v11313_v63, %v11312_v33  ;;  %v12284_v55 = vunpack.i.h.bf16 %v12282_v59  ;;  %v12283_v52 = vunpack.i.l.bf16 %v12282_v59  ;;  %v11263_v59 = vsel %vm1064_vm7, %v20930_v62, %v12274_v44 }
 0x7a9   : > { %v12277_v56 = vpop.permute.xlu1 %12276  ;;  %11581 = vmatprep.subr.bf16.mxu1 %v11580_v37  ;;  %v11271_v15 = vsel %vm6744_vm8, %v11262_v12, %v12283_v52  ;;  %v11272_v35 = vsel %vm6744_vm8, %v11263_v59, %v12284_v55 }
 0x7aa   : > { %11583 = vmatpush1.bf16.msra.mxu1 %v11582_v46  ;;  %v12279_v42 = vunpack.i.h.bf16 %v12277_v56  ;;  %v12278_v40 = vunpack.i.l.bf16 %v12277_v56  ;;  %v12292_v4 = vpop.permute.xlu0 %12291 }
 0x7ab   : > { %v12294_v48 = vunpack.i.h.bf16 %v12292_v4  ;;  %v12293_v54 = vunpack.i.l.bf16 %v12292_v4 }
 0x7ac   : > { %v11297_v21 = vsel %vm6789_vm11, %v11288_v5, %v12279_v42  ;;  %v11296_v16 = vsel %vm6789_vm11, %v11287_v20, %v12278_v40 }
 0x7ad   : > { %v12287_v29 = vpop.permute.xlu1 %12286  ;;  %v11280_v10 = vsel %vm6759_vm9, %v11271_v15, %v12293_v54  ;;  %v11281_v42 = vsel %vm6759_vm9, %v11272_v35, %v12294_v48 }
 0x7ae   : > { %v12289_v24 = vunpack.i.h.bf16 %v12287_v29  ;;  %v12288_v46 = vunpack.i.l.bf16 %v12287_v29  ;;  %v12302_v14 = vpop.permute.xlu0 %12301 }
 0x7af   : > { %v12304_v29 = vunpack.i.h.bf16 %v12302_v14  ;;  %v12303_v19 = vunpack.i.l.bf16 %v12302_v14 }
 0x7b0   : > { %v11305_v47 = vsel %vm6804_vm12, %v11296_v16, %v12288_v46  ;;  %v11306_v33 = vsel %vm6804_vm12, %v11297_v21, %v12289_v24 }
 0x7b1   : > { %v12297_v39 = vpop.permute.xlu1 %12296  ;;  %v11289_v2 = vsel %vm6774_vm10, %v11280_v10, %v12303_v19  ;;  %v11290_v27 = vsel %vm6774_vm10, %v11281_v42, %v12304_v29 }
 0x7b2   : > { %v12299_v11 = vunpack.i.h.bf16 %v12297_v39  ;;  %v12298_v41 = vunpack.i.l.bf16 %v12297_v39 }
 0x7b4   : > { %v11314_v63 = vsel %vm6819_vm13, %v11305_v47, %v12298_v41  ;;  %v11315_v56 = vsel %vm6819_vm13, %v11306_v33, %v12299_v11 }
 0x7b5   : > { %v12312_v37 = vpop.permute.xlu1 %12311  ;;  %v11584_v9 = vpack.c.bf16 %v11315_v56, %v11314_v63  ;;  %v12307_v30 = vpop.permute.xlu0 %12306 }
 0x7b6   : > { %v12314_v31 = vunpack.i.h.bf16 %v12312_v37  ;;  %v12313_v0 = vunpack.i.l.bf16 %v12312_v37 }
 0x7b7   : > { %11585 = vmatprep.subr.bf16.mxu1 %v11584_v9 }
 0x7b8   : > { %11587 = vmatpush1.bf16.msra.mxu1 %v11586_v17  ;;  %v11299_v22 = vsel %vm6789_vm11, %v11290_v27, %v12314_v31  ;;  %v11298_v18 = vsel %vm6789_vm11, %v11289_v2, %v12313_v0 }
 0x7b9   : > { %v12327_v34 = vpop.permute.xlu1 %12326 }
 0x7ba   : > { %v12329_v36 = vunpack.i.h.bf16 %v12327_v34  ;;  %v12328_v17 = vunpack.i.l.bf16 %v12327_v34 }
 0x7bc   : > { %v11307_v24 = vsel %vm6804_vm12, %v11298_v18, %v12328_v17  ;;  %v11308_v46 = vsel %vm6804_vm12, %v11299_v22, %v12329_v36  ;;  %v12309_v36 = vunpack.i.h.bf16 %v12307_v30  ;;  %v12308_v17 = vunpack.i.l.bf16 %v12307_v30 }
 0x7bd   : > { %v12342_v40 = vpop.permute.xlu1 %12341 }
 0x7be   : > { %v12344_v7 = vunpack.i.h.bf16 %v12342_v40  ;;  %v12343_v32 = vunpack.i.l.bf16 %v12342_v40 }
 0x7c0   : > { %v11316_v26 = vsel %vm6819_vm13, %v11307_v24, %v12343_v32  ;;  %v11317_v4 = vsel %vm6819_vm13, %v11308_v46, %v12344_v7 }
 0x7c1   : > { %v11588_v20 = vpack.c.bf16 %v11317_v4, %v11316_v26  ;;  %v20933_v4 = vcombine.low %v20877_v45, %v20876_v3 }
 0x7c3   : > { %11589 = vmatprep.subr.bf16.mxu1 %v11588_v20  ;;  %v12357_v39 = vpop.permute.xlu1 %12356  ;;  %v11264_v30 = vsel %vm1064_vm7, %v20933_v4, %v12308_v17  ;;  %v20934_v20 = vcombine.low %v18800_v60, %v18803_v49  ;;  %v8098_v17 = vld [vmem:[%s19493_s6] sm:$0xff] }
 0x7c4   : > { %v12317_v5 = vpop.permute.xlu0 %12316  ;;  %11591 = vmatpush1.bf16.msra.mxu1 %v11590_v50  ;;  %v12359_v52 = vunpack.i.h.bf16 %v12357_v39  ;;  %v12358_v48 = vunpack.i.l.bf16 %v12357_v39 }
 0x7c5   : > { %v12319_v63 = vunpack.i.h.bf16 %v12317_v5  ;;  %v12318_v56 = vunpack.i.l.bf16 %v12317_v5  ;;  %v11265_v5 = vsel %vm1064_vm7, %v20934_v20, %v12309_v36 }
 0x7c7   : > { %v11201_v14 = vsel %vm1064_vm7, %v20931_v6, %v12318_v56  ;;  %v11202_v13 = vsel %vm1064_vm7, %v20932_v8, %v12319_v63 }
 0x7c8   : > { %v12322_v21 = vpop.permute.xlu0 %12321 }
 0x7c9   : > { %v12367_v16 = vpop.permute.xlu1 %12366  ;;  %v12324_v2 = vunpack.i.h.bf16 %v12322_v21  ;;  %v12323_v27 = vunpack.i.l.bf16 %v12322_v21 }
 0x7ca   : > { %v12369_v34 = vunpack.i.h.bf16 %v12367_v16  ;;  %v12368_v61 = vunpack.i.l.bf16 %v12367_v16 }
 0x7cb   : > { %v11274_v16 = vsel %vm6744_vm8, %v11265_v5, %v12324_v2 }
 0x7cc   : > { %v12332_v11 = vpop.permute.xlu0 %12331 }
 0x7cd   : > { %v12377_v41 = vpop.permute.xlu1 %12376  ;;  %v12334_v37 = vunpack.i.h.bf16 %v12332_v11  ;;  %v12333_v9 = vunpack.i.l.bf16 %v12332_v11  ;;  %v11273_v11 = vsel %vm6744_vm8, %v11264_v30, %v12323_v27 }
 0x7ce   : > { %v12379_v12 = vunpack.i.h.bf16 %v12377_v41  ;;  %v12378_v62 = vunpack.i.l.bf16 %v12377_v41 }
 0x7cf   : > { %v11210_v54 = vsel %vm6744_vm8, %v11201_v14, %v12333_v9  ;;  %v11211_v29 = vsel %vm6744_vm8, %v11202_v13, %v12334_v37 }
 0x7d0   : > { %v12337_v47 = vpop.permute.xlu0 %12336 }
 0x7d1   : > { %v19413_v33 = vpop.permute.xlu1 %12381  ;;  %v12339_v18 = vunpack.i.h.bf16 %v12337_v47  ;;  %v12338_v7 = vunpack.i.l.bf16 %v12337_v47 }
 0x7d2   : > { %v12384_v60 = vunpack.i.h.bf16 %v19413_v33  ;;  %v12383_v49 = vunpack.i.l.bf16 %v19413_v33 }
 0x7d3   : > { %v11282_v41 = vsel %vm6759_vm9, %v11273_v11, %v12338_v7  ;;  %v11283_v47 = vsel %vm6759_vm9, %v11274_v16, %v12339_v18 }
 0x7d4   : > { %v12347_v44 = vpop.permute.xlu0 %12346 }
 0x7d5   : > { %v12349_v50 = vunpack.i.h.bf16 %v12347_v44  ;;  %v12348_v55 = vunpack.i.l.bf16 %v12347_v44  ;;  %v12387_v19 = vpop.permute.xlu1 %12386 }
 0x7d6   : > { %v12389_v31 = vunpack.i.h.bf16 %v12387_v19  ;;  %v12388_v0 = vunpack.i.l.bf16 %v12387_v19 }
 0x7d7   : > { %v11219_v57 = vsel %vm6759_vm9, %v11210_v54, %v12348_v55  ;;  %v11220_v23 = vsel %vm6759_vm9, %v11211_v29, %v12349_v50 }
 0x7d8   : > { %v11228_v28 = vsel %vm6774_vm10, %v11219_v57, %v12358_v48  ;;  %v11229_v51 = vsel %vm6774_vm10, %v11220_v23, %v12359_v52  ;;  %v12352_v59 = vpop.permute.xlu0 %12351 }
 0x7d9   : > { %v11237_v15 = vsel %vm6789_vm11, %v11228_v28, %v12368_v61  ;;  %v11238_v35 = vsel %vm6789_vm11, %v11229_v51, %v12369_v34  ;;  %v12354_v46 = vunpack.i.h.bf16 %v12352_v59  ;;  %v12353_v26 = vunpack.i.l.bf16 %v12352_v59 }
 0x7da   : > { %v11246_v10 = vsel %vm6804_vm12, %v11237_v15, %v12378_v62  ;;  %v11247_v42 = vsel %vm6804_vm12, %v11238_v35, %v12379_v12 }
 0x7db   : > { %v11255_v40 = vsel %vm6819_vm13, %v11246_v10, %v12388_v0  ;;  %v11256_v22 = vsel %vm6819_vm13, %v11247_v42, %v12389_v31  ;;  %v11291_v3 = vsel %vm6774_vm10, %v11282_v41, %v12353_v26  ;;  %v11292_v45 = vsel %vm6774_vm10, %v11283_v47, %v12354_v46 }
 0x7dc   : > { %v11594_v32 = vpack.c.bf16 %v11256_v22, %v11255_v40  ;;  %v12362_v24 = vpop.permute.xlu0 %12361 }
 0x7dd   : > { %v12364_v39 = vunpack.i.h.bf16 %v12362_v24  ;;  %v12363_v21 = vunpack.i.l.bf16 %v12362_v24 }
 0x7df   : > { %v11300_v9 = vsel %vm6789_vm11, %v11291_v3, %v12363_v21  ;;  %v11301_v44 = vsel %vm6789_vm11, %v11292_v45, %v12364_v39 }
 0x7e0   : > { %v12372_v63 = vpop.permute.xlu0 %12371  ;;  %v10753_v6 = vpop.permute.xlu1 %10752 }
 0x7e1   : > { %v12374_v56 = vunpack.i.h.bf16 %v12372_v63  ;;  %v12373_v37 = vunpack.i.l.bf16 %v12372_v63 }
 0x7e3   : > { %v11309_v14 = vsel %vm6804_vm12, %v11300_v9, %v12373_v37  ;;  %v11310_v8 = vsel %vm6804_vm12, %v11301_v44, %v12374_v56 }
 0x7e4   : > { %v10969_v13 = vpop.permute.xlu0 %10968  ;;  %v11318_v50 = vsel %vm6819_vm13, %v11309_v14, %v12383_v49  ;;  %v11319_v55 = vsel %vm6819_vm13, %v11310_v8, %v12384_v60  ;;  %v10789_v48 = vpop.permute.xlu1 %10788 }
 0x7e5   : > { %v11592_v52 = vpack.c.bf16 %v11319_v55, %v11318_v50  ;;  %v11266_v28 = vsel %vm1064_vm7, %v10683_v38, %v10969_v13 }
 0x7e7   : > { %11593 = vmatprep.subr.bf16.mxu1 %v11592_v52 }
 0x7e8   : > { %v10717_v54 = vpop.permute.xlu0 %10716  ;;  %11595 = vmatpush1.bf16.msra.mxu1 %v11594_v32  ;;  %v10825_v29 = vpop.permute.xlu1 %10824 }
 0x7e9   : > { %v11203_v57 = vsel %vm1064_vm7, %v9459_v43, %v10717_v54 }
 0x7ea   : > { %v11212_v12 = vsel %vm6744_vm8, %v11203_v57, %v10753_v6 }
 0x7eb   : > { %v11221_v51 = vsel %vm6759_vm9, %v11212_v12, %v10789_v48 }
 0x7ec   : > { %v11005_v33 = vpop.permute.xlu0 %11004  ;;  %v10861_v34 = vpop.permute.xlu1 %10860  ;;  %v11230_v58 = vsel %vm6774_vm10, %v11221_v51, %v10825_v29 }
 0x7ed   : > { %v11275_v59 = vsel %vm6744_vm8, %v11266_v28, %v11005_v33  ;;  %v11239_v35 = vsel %vm6789_vm11, %v11230_v58, %v10861_v34 }
 0x7f0   : > { %v11041_v19 = vpop.permute.xlu0 %11040  ;;  %v10897_v62 = vpop.permute.xlu1 %10896 }
 0x7f1   : > { %v11284_v0 = vsel %vm6759_vm9, %v11275_v59, %v11041_v19  ;;  %v11248_v38 = vsel %vm6804_vm12, %v11239_v35, %v10897_v62 }
 0x7f4   : > { %v11077_v61 = vpop.permute.xlu0 %11076  ;;  %v10933_v43 = vpop.permute.xlu1 %10932 }
 0x7f5   : > { %v11293_v53 = vsel %vm6774_vm10, %v11284_v0, %v11077_v61  ;;  %v11257_v10 = vsel %vm6819_vm13, %v11248_v38, %v10933_v43 }
 0x7f8   : > { %v11113_v23 = vpop.permute.xlu0 %11112 }
 0x7f9   : > { %v11302_v15 = vsel %vm6789_vm11, %v11293_v53, %v11113_v23 }
 0x7fc   : > { %v11149_v31 = vpop.permute.xlu0 %11148 }
 0x7fd   : > { %v11311_v25 = vsel %vm6804_vm12, %v11302_v15, %v11149_v31 }
 0x800   : > { %v11185_v1 = vpop.permute.xlu0 %11184 }
 0x801   : > { %v11320_v36 = vsel %vm6819_vm13, %v11311_v25, %v11185_v1 }
 0x802   : > { %11347 = vmatprep.subr.mxu1 %v11320_v36 }
 0x803   : > { %11348 = vmatpush1.msra.mxu1 %v11257_v10 }
 0x804   : > { %11499 = vmatmul.mubr.msk.f32.vlgmr.msra.gmra.mrb[8].mxu1 %vm11327_vm2, %v8098_v17 }
 0x811   : > { %v11325_v42 = vpop.permute.xlu0 %11324 }
 0x8d7   : > { %v11397_v2 = vpop.f32.mrb[8].mxu1 }
 0x8d8   : > { %v11398_v27 = vadd.f32 %v11397_v2, %v11325_v42  ;;  %v11399_v40 = vpop.f32.mrb[9].mxu1 }
 0x8d9   : > { %v11400_v22 = vadd.f32 %v11399_v40, %v11325_v42 }
 0x8da   : > { %v11402_v18 = vmax.f32 %v11398_v27, 0.0 }
 0x8db   : > { %v11403_v7 = vmax.f32 %v11400_v22, 0.0 }
 0x8dc   : > { %11404 = vst [vmem:[%s325_s23] sm:$0xff] %v11402_v18 }
 0x8dd   : > { %11405 = vst [vmem:[%s325_s23 + $0x8] sm:$0xff] %v11403_v7 }
 0x8de PF: > { %s18_s27 = sadd.s32 1, %s12496_s27  }
 0x8df   : > { %p15_p4 = scmp.ge.s32.totalorder %s18_s27, 4  }
 0x8e1   :  { %17 = sbr.rel (!%p15_p4) target bundleno = 1 (0x1), region = 102 }

</bundles_post_ra>
